<compile_context>
chip_gen: v7x
topology: tpu7x:2x2x1
jax: 0.10.0
libtpu: 0.0.40
codegen_flags: <defaults>
</compile_context>

<pallas_src>
import functools

import jax
import jax.numpy as jnp
from jax.experimental import pallas as pl
from jax.experimental.pallas import tpu as pltpu

# Full-precision f32 matmul passes on the MXU for both the kernel and the
# pure-JAX reference, so the correctness check can be tight.
jax.config.update("jax_default_matmul_precision", "highest")

EPS = 1e-5  # PyTorch GroupNorm default eps


def _linear_attention_kernel(x_ref, wqkv_ref, wout_ref, bout_ref,
                             gnw_ref, gnb_ref, o_ref, *, heads, dim_head):
    hidden = heads * dim_head
    scale = dim_head ** (-0.5)

    x = x_ref[0].astype(jnp.float32)              # (C, HW)   one sample
    w_qkv = wqkv_ref[...].astype(jnp.float32)     # (3*hidden, C)
    C = wout_ref.shape[0]
    HW = x_ref.shape[2]

    # to_qkv: 1x1 conv (no bias) == channel matmul.
    qkv = jnp.dot(w_qkv, x, preferred_element_type=jnp.float32)   # (3*hidden, HW)

    w_out = wout_ref[...].astype(jnp.float32)     # (C, hidden)
    b_out = bout_ref[...].astype(jnp.float32)     # (C, 1)

    # Accumulate the output 1x1 conv per head: y = sum_h W_out[:, h] @ out_h.
    # (avoids materializing the (hidden, HW) attention output / a concat)
    y = jnp.zeros((C, HW), jnp.float32)
    for h in range(heads):
        r0 = h * dim_head
        q_h = qkv[r0:r0 + dim_head, :]                                # (d, n)
        k_h = qkv[hidden + r0:hidden + r0 + dim_head, :]              # (d, n)
        v_h = qkv[2 * hidden + r0:2 * hidden + r0 + dim_head, :]      # (e, n)

        # q.softmax(dim=-2): over the head-feature axis d (sublane reduce).
        q_m = jnp.max(q_h, axis=0, keepdims=True)
        q_e = jnp.exp(q_h - q_m)
        q_s = (q_e / jnp.sum(q_e, axis=0, keepdims=True)) * scale

        # k.softmax(dim=-1): over the spatial axis n (lane reduce).
        k_m = jnp.max(k_h, axis=1, keepdims=True)
        k_e = jnp.exp(k_h - k_m)
        k_s = k_e / jnp.sum(k_e, axis=1, keepdims=True)

        # context^T[e, d] = sum_n v[e, n] * k[d, n]   (A @ B^T form on the MXU)
        ctx_t = jnp.einsum('en,dn->ed', v_h, k_s,
                           preferred_element_type=jnp.float32)        # (e, d)
        # out_h[e, n] = sum_d context[d, e] * q[d, n]
        out_h = jnp.dot(ctx_t, q_s, preferred_element_type=jnp.float32)  # (e, n)

        y = y + jnp.dot(w_out[:, r0:r0 + dim_head], out_h,
                        preferred_element_type=jnp.float32)           # (C, HW)

    y = y + b_out                                                     # conv bias

    # GroupNorm(1, C): per-sample normalization over all C*HW elements,
    # folded with the per-channel affine into a single scale/shift.
    mean = jnp.mean(y)
    var = jnp.mean((y - mean) * (y - mean))       # biased variance (PyTorch)
    inv = jax.lax.rsqrt(var + EPS)
    gn_w = gnw_ref[...].astype(jnp.float32)       # (C, 1)
    gn_b = gnb_ref[...].astype(jnp.float32)       # (C, 1)
    ch_scale = gn_w * inv
    ch_shift = gn_b - mean * ch_scale
    o_ref[0] = (y * ch_scale + ch_shift).astype(o_ref.dtype)


def linear_attention_pallas(x_nchw, w_qkv, w_out, b_out, gn_w, gn_b,
                            *, heads, dim_head):
    """LinearAttention.forward for NCHW input, one fused Pallas kernel."""
    N, C, H, W = x_nchw.shape
    HW = H * W
    hidden = heads * dim_head
    assert w_qkv.shape == (3 * hidden, C)
    assert w_out.shape == (C, hidden)

    x = x_nchw.reshape(N, C, HW)
    bout = b_out.reshape(C, 1)
    gnw = gn_w.reshape(C, 1)
    gnb = gn_b.reshape(C, 1)

    kernel = functools.partial(_linear_attention_kernel,
                               heads=heads, dim_head=dim_head)

    out = pl.pallas_call(
        kernel,
        out_shape=jax.ShapeDtypeStruct((N, C, HW), x_nchw.dtype),
        grid_spec=pltpu.PrefetchScalarGridSpec(
            num_scalar_prefetch=0,
            grid=(N,),
            in_specs=[
                pl.BlockSpec((1, C, HW), lambda n: (n, 0, 0)),       # x: one sample
                pl.BlockSpec((3 * hidden, C), lambda n: (0, 0)),     # qkv conv weight
                pl.BlockSpec((C, hidden), lambda n: (0, 0)),         # out conv weight
                pl.BlockSpec((C, 1), lambda n: (0, 0)),              # out conv bias
                pl.BlockSpec((C, 1), lambda n: (0, 0)),              # GroupNorm weight
                pl.BlockSpec((C, 1), lambda n: (0, 0)),              # GroupNorm bias
            ],
            out_specs=pl.BlockSpec((1, C, HW), lambda n: (n, 0, 0)),
        ),
        compiler_params=pltpu.CompilerParams(
            dimension_semantics=("parallel",),
            vmem_limit_bytes=32 * 1024 * 1024,
        ),
    )(x, w_qkv, w_out, bout, gnw, gnb)
    return out.reshape(N, C, H, W)


def _linear_attention_ref(x, w_qkv, w_out, b_out, gn_w, gn_b, heads, dim_head):
    """Pure-JAX reference (matches the PyTorch module math)."""
    N, C, H, W = x.shape
    HW = H * W
    hidden = heads * dim_head
    scale = dim_head ** (-0.5)

    xf = x.reshape(N, C, HW).astype(jnp.float32)
    qkv = jnp.einsum('kc,ncs->nks', w_qkv.astype(jnp.float32), xf)
    q, k, v = jnp.split(qkv, 3, axis=1)
    q = q.reshape(N, heads, dim_head, HW)
    k = k.reshape(N, heads, dim_head, HW)
    v = v.reshape(N, heads, dim_head, HW)

    q = jax.nn.softmax(q, axis=2) * scale      # softmax(dim=-2) then * scale
    k = jax.nn.softmax(k, axis=3)              # softmax(dim=-1)

    context = jnp.einsum('nhds,nhes->nhde', k, v)
    out = jnp.einsum('nhde,nhds->nhes', context, q)
    out = out.reshape(N, hidden, HW)

    y = jnp.einsum('oc,ncs->nos', w_out.astype(jnp.float32), out)
    y = y + b_out.astype(jnp.float32)[None, :, None]

    yf = y.reshape(N, -1)
    mean = yf.mean(axis=1, keepdims=True)
    var = ((yf - mean) ** 2).mean(axis=1, keepdims=True)
    yn = ((yf - mean) / jnp.sqrt(var + EPS)).reshape(N, C, HW)
    res = yn * gn_w.astype(jnp.float32)[None, :, None] \
        + gn_b.astype(jnp.float32)[None, :, None]
    return res.reshape(N, C, H, W).astype(x.dtype)


if __name__ == "__main__":
    key = jax.random.PRNGKey(0)
    k1, k2, k3, k4, k5, k6 = jax.random.split(key, 6)

    # Small shapes consistent with the module defaults: dim=4, heads=4, dim_head=32.
    N, C, H, W = 2, 4, 16, 16
    heads, dim_head = 4, 32
    hidden = heads * dim_head

    x = jax.random.normal(k1, (N, C, H, W), dtype=jnp.float32)
    w_qkv = 0.2 * jax.random.normal(k2, (3 * hidden, C), dtype=jnp.float32)   # to_qkv conv
    w_out = 0.2 * jax.random.normal(k3, (C, hidden), dtype=jnp.float32)       # to_out conv
    b_out = 0.1 * jax.random.normal(k4, (C,), dtype=jnp.float32)
    gn_w = 1.0 + 0.1 * jax.random.normal(k5, (C,), dtype=jnp.float32)         # GroupNorm affine
    gn_b = 0.1 * jax.random.normal(k6, (C,), dtype=jnp.float32)

    out = linear_attention_pallas(x, w_qkv, w_out, b_out, gn_w, gn_b,
                                  heads=heads, dim_head=dim_head)
    out = jax.block_until_ready(out)

    ref = _linear_attention_ref(x, w_qkv, w_out, b_out, gn_w, gn_b, heads, dim_head)
    assert out.shape == (N, C, H, W)
    max_err = float(jnp.max(jnp.abs(out - ref)))
    assert jnp.allclose(out, ref, atol=2e-3, rtol=2e-3), f"max abs err {max_err}"

    print("KERNEL_OK")
</pallas_src>

<mosaic_0001>
module attributes {stable_mosaic.version = 11 : i64} {
  func.func @_linear_attention_kernel(%arg0: i32, %arg1: memref<1x4x256xf32, #tpu.memory_space<vmem>>, %arg2: memref<384x4xf32, #tpu.memory_space<vmem>>, %arg3: memref<4x128xf32, #tpu.memory_space<vmem>>, %arg4: memref<4x1xf32, #tpu.memory_space<vmem>>, %arg5: memref<4x1xf32, #tpu.memory_space<vmem>>, %arg6: memref<4x1xf32, #tpu.memory_space<vmem>>, %arg7: memref<1x4x256xf32, #tpu.memory_space<vmem>>) attributes {dimension_semantics = [#tpu.dimension_semantics<parallel>], iteration_bounds = array<i64: 2>, scalar_prefetch = 0 : i64, scratch_operands = 0 : i64, tpu.core_type = #tpu.core_type<tc>, window_params = [{transform_indices = @transform_0, window_bounds = array<i64: 1, 4, 256>}, {pipeline_mode = #tpu.pipeline_mode<synchronous>, transform_indices = @transform_1, window_bounds = array<i64: 384, 4>}, {pipeline_mode = #tpu.pipeline_mode<synchronous>, transform_indices = @transform_2, window_bounds = array<i64: 4, 128>}, {pipeline_mode = #tpu.pipeline_mode<synchronous>, transform_indices = @transform_3, window_bounds = array<i64: 4, 1>}, {pipeline_mode = #tpu.pipeline_mode<synchronous>, transform_indices = @transform_4, window_bounds = array<i64: 4, 1>}, {pipeline_mode = #tpu.pipeline_mode<synchronous>, transform_indices = @transform_5, window_bounds = array<i64: 4, 1>}, {transform_indices = @transform_6, window_bounds = array<i64: 1, 4, 256>}]} {
    %c0 = arith.constant 0 : index
    %c0_0 = arith.constant 0 : index
    %c0_1 = arith.constant 0 : index
    %0 = vector.load %arg1[%c0, %c0_0, %c0_1] : memref<1x4x256xf32, #tpu.memory_space<vmem>>, vector<1x4x256xf32>
    %1 = vector.shape_cast %0 : vector<1x4x256xf32> to vector<4x256xf32>
    %c0_2 = arith.constant 0 : index
    %c0_3 = arith.constant 0 : index
    %2 = vector.load %arg2[%c0_2, %c0_3] : memref<384x4xf32, #tpu.memory_space<vmem>>, vector<384x4xf32>
    %cst = arith.constant dense<0.000000e+00> : vector<384x256xf32>
    %3 = tpu.matmul %2, %1, %cst {dimension_numbers = #tpu.dot_dimension_numbers<[1], [0], [0], [1], [0, 0, 1, 1], [], []>, precision = #tpu.contract_precision<fp32>} : vector<384x4xf32>, vector<4x256xf32>, vector<384x256xf32> -> vector<384x256xf32>
    %c0_4 = arith.constant 0 : index
    %c0_5 = arith.constant 0 : index
    %4 = vector.load %arg3[%c0_4, %c0_5] : memref<4x128xf32, #tpu.memory_space<vmem>>, vector<4x128xf32>
    %c0_6 = arith.constant 0 : index
    %c0_7 = arith.constant 0 : index
    %5 = vector.load %arg4[%c0_6, %c0_7] : memref<4x1xf32, #tpu.memory_space<vmem>>, vector<4x1xf32>
    %cst_8 = arith.constant 0.000000e+00 : f32
    %6 = vector.broadcast %cst_8 : f32 to vector<4x256xf32>
    %7 = vector.extract_strided_slice %3 {offsets = [0, 0], sizes = [32, 256], strides = [1, 1]} : vector<384x256xf32> to vector<32x256xf32>
    %8 = vector.extract_strided_slice %3 {offsets = [128, 0], sizes = [32, 256], strides = [1, 1]} : vector<384x256xf32> to vector<32x256xf32>
    %9 = vector.extract_strided_slice %3 {offsets = [256, 0], sizes = [32, 256], strides = [1, 1]} : vector<384x256xf32> to vector<32x256xf32>
    %cst_9 = arith.constant dense<0xFF800000> : vector<256xf32>
    %10 = vector.multi_reduction <maximumf>, %7, %cst_9 [0] : vector<32x256xf32> to vector<256xf32>
    %11 = vector.shape_cast %10 : vector<256xf32> to vector<1x256xf32>
    %12 = vector.broadcast %11 : vector<1x256xf32> to vector<32x256xf32>
    %13 = arith.subf %7, %12 : vector<32x256xf32>
    %14 = math.exp %13 : vector<32x256xf32>
    %cst_10 = arith.constant dense<0.000000e+00> : vector<256xf32>
    %15 = vector.multi_reduction <add>, %14, %cst_10 [0] : vector<32x256xf32> to vector<256xf32>
    %16 = vector.shape_cast %15 : vector<256xf32> to vector<1x256xf32>
    %17 = vector.broadcast %16 : vector<1x256xf32> to vector<32x256xf32>
    %18 = arith.divf %14, %17 : vector<32x256xf32>
    %cst_11 = arith.constant 0.176776692 : f32
    %19 = vector.broadcast %cst_11 : f32 to vector<32x256xf32>
    %20 = arith.mulf %18, %19 : vector<32x256xf32>
    %cst_12 = arith.constant dense<0xFF800000> : vector<32xf32>
    %21 = vector.multi_reduction <maximumf>, %8, %cst_12 [1] : vector<32x256xf32> to vector<32xf32>
    %22 = vector.shape_cast %21 : vector<32xf32> to vector<32x1xf32>
    %23 = vector.broadcast %22 : vector<32x1xf32> to vector<32x256xf32>
    %24 = arith.subf %8, %23 : vector<32x256xf32>
    %25 = math.exp %24 : vector<32x256xf32>
    %cst_13 = arith.constant dense<0.000000e+00> : vector<32xf32>
    %26 = vector.multi_reduction <add>, %25, %cst_13 [1] : vector<32x256xf32> to vector<32xf32>
    %27 = vector.shape_cast %26 : vector<32xf32> to vector<32x1xf32>
    %28 = vector.broadcast %27 : vector<32x1xf32> to vector<32x256xf32>
    %29 = arith.divf %25, %28 : vector<32x256xf32>
    "tpu.trace_start"() <{level = 10 : i32, message = "en,dn->ed"}> : () -> ()
    %cst_14 = arith.constant dense<0.000000e+00> : vector<32x32xf32>
    %30 = tpu.matmul %9, %29, %cst_14 {dimension_numbers = #tpu.dot_dimension_numbers<[1], [1], [0], [0], [0, 0, 1, 0], [], []>, precision = #tpu.contract_precision<fp32>} : vector<32x256xf32>, vector<32x256xf32>, vector<32x32xf32> -> vector<32x32xf32>
    "tpu.trace_stop"() : () -> ()
    %cst_15 = arith.constant dense<0.000000e+00> : vector<32x256xf32>
    %31 = tpu.matmul %30, %20, %cst_15 {dimension_numbers = #tpu.dot_dimension_numbers<[1], [0], [0], [1], [0, 0, 1, 1], [], []>, precision = #tpu.contract_precision<fp32>} : vector<32x32xf32>, vector<32x256xf32>, vector<32x256xf32> -> vector<32x256xf32>
    %32 = vector.extract_strided_slice %4 {offsets = [0, 0], sizes = [4, 32], strides = [1, 1]} : vector<4x128xf32> to vector<4x32xf32>
    %cst_16 = arith.constant dense<0.000000e+00> : vector<4x256xf32>
    %33 = tpu.matmul %32, %31, %cst_16 {dimension_numbers = #tpu.dot_dimension_numbers<[1], [0], [0], [1], [0, 0, 1, 1], [], []>, precision = #tpu.contract_precision<fp32>} : vector<4x32xf32>, vector<32x256xf32>, vector<4x256xf32> -> vector<4x256xf32>
    %34 = arith.addf %6, %33 : vector<4x256xf32>
    %35 = vector.extract_strided_slice %3 {offsets = [32, 0], sizes = [32, 256], strides = [1, 1]} : vector<384x256xf32> to vector<32x256xf32>
    %36 = vector.extract_strided_slice %3 {offsets = [160, 0], sizes = [32, 256], strides = [1, 1]} : vector<384x256xf32> to vector<32x256xf32>
    %37 = vector.extract_strided_slice %3 {offsets = [288, 0], sizes = [32, 256], strides = [1, 1]} : vector<384x256xf32> to vector<32x256xf32>
    %cst_17 = arith.constant dense<0xFF800000> : vector<256xf32>
    %38 = vector.multi_reduction <maximumf>, %35, %cst_17 [0] : vector<32x256xf32> to vector<256xf32>
    %39 = vector.shape_cast %38 : vector<256xf32> to vector<1x256xf32>
    %40 = vector.broadcast %39 : vector<1x256xf32> to vector<32x256xf32>
    %41 = arith.subf %35, %40 : vector<32x256xf32>
    %42 = math.exp %41 : vector<32x256xf32>
    %cst_18 = arith.constant dense<0.000000e+00> : vector<256xf32>
    %43 = vector.multi_reduction <add>, %42, %cst_18 [0] : vector<32x256xf32> to vector<256xf32>
    %44 = vector.shape_cast %43 : vector<256xf32> to vector<1x256xf32>
    %45 = vector.broadcast %44 : vector<1x256xf32> to vector<32x256xf32>
    %46 = arith.divf %42, %45 : vector<32x256xf32>
    %cst_19 = arith.constant 0.176776692 : f32
    %47 = vector.broadcast %cst_19 : f32 to vector<32x256xf32>
    %48 = arith.mulf %46, %47 : vector<32x256xf32>
    %cst_20 = arith.constant dense<0xFF800000> : vector<32xf32>
    %49 = vector.multi_reduction <maximumf>, %36, %cst_20 [1] : vector<32x256xf32> to vector<32xf32>
    %50 = vector.shape_cast %49 : vector<32xf32> to vector<32x1xf32>
    %51 = vector.broadcast %50 : vector<32x1xf32> to vector<32x256xf32>
    %52 = arith.subf %36, %51 : vector<32x256xf32>
    %53 = math.exp %52 : vector<32x256xf32>
    %cst_21 = arith.constant dense<0.000000e+00> : vector<32xf32>
    %54 = vector.multi_reduction <add>, %53, %cst_21 [1] : vector<32x256xf32> to vector<32xf32>
    %55 = vector.shape_cast %54 : vector<32xf32> to vector<32x1xf32>
    %56 = vector.broadcast %55 : vector<32x1xf32> to vector<32x256xf32>
    %57 = arith.divf %53, %56 : vector<32x256xf32>
    "tpu.trace_start"() <{level = 10 : i32, message = "en,dn->ed"}> : () -> ()
    %cst_22 = arith.constant dense<0.000000e+00> : vector<32x32xf32>
    %58 = tpu.matmul %37, %57, %cst_22 {dimension_numbers = #tpu.dot_dimension_numbers<[1], [1], [0], [0], [0, 0, 1, 0], [], []>, precision = #tpu.contract_precision<fp32>} : vector<32x256xf32>, vector<32x256xf32>, vector<32x32xf32> -> vector<32x32xf32>
    "tpu.trace_stop"() : () -> ()
    %cst_23 = arith.constant dense<0.000000e+00> : vector<32x256xf32>
    %59 = tpu.matmul %58, %48, %cst_23 {dimension_numbers = #tpu.dot_dimension_numbers<[1], [0], [0], [1], [0, 0, 1, 1], [], []>, precision = #tpu.contract_precision<fp32>} : vector<32x32xf32>, vector<32x256xf32>, vector<32x256xf32> -> vector<32x256xf32>
    %60 = vector.extract_strided_slice %4 {offsets = [0, 32], sizes = [4, 32], strides = [1, 1]} : vector<4x128xf32> to vector<4x32xf32>
    %cst_24 = arith.constant dense<0.000000e+00> : vector<4x256xf32>
    %61 = tpu.matmul %60, %59, %cst_24 {dimension_numbers = #tpu.dot_dimension_numbers<[1], [0], [0], [1], [0, 0, 1, 1], [], []>, precision = #tpu.contract_precision<fp32>} : vector<4x32xf32>, vector<32x256xf32>, vector<4x256xf32> -> vector<4x256xf32>
    %62 = arith.addf %34, %61 : vector<4x256xf32>
    %63 = vector.extract_strided_slice %3 {offsets = [64, 0], sizes = [32, 256], strides = [1, 1]} : vector<384x256xf32> to vector<32x256xf32>
    %64 = vector.extract_strided_slice %3 {offsets = [192, 0], sizes = [32, 256], strides = [1, 1]} : vector<384x256xf32> to vector<32x256xf32>
    %65 = vector.extract_strided_slice %3 {offsets = [320, 0], sizes = [32, 256], strides = [1, 1]} : vector<384x256xf32> to vector<32x256xf32>
    %cst_25 = arith.constant dense<0xFF800000> : vector<256xf32>
    %66 = vector.multi_reduction <maximumf>, %63, %cst_25 [0] : vector<32x256xf32> to vector<256xf32>
    %67 = vector.shape_cast %66 : vector<256xf32> to vector<1x256xf32>
    %68 = vector.broadcast %67 : vector<1x256xf32> to vector<32x256xf32>
    %69 = arith.subf %63, %68 : vector<32x256xf32>
    %70 = math.exp %69 : vector<32x256xf32>
    %cst_26 = arith.constant dense<0.000000e+00> : vector<256xf32>
    %71 = vector.multi_reduction <add>, %70, %cst_26 [0] : vector<32x256xf32> to vector<256xf32>
    %72 = vector.shape_cast %71 : vector<256xf32> to vector<1x256xf32>
    %73 = vector.broadcast %72 : vector<1x256xf32> to vector<32x256xf32>
    %74 = arith.divf %70, %73 : vector<32x256xf32>
    %cst_27 = arith.constant 0.176776692 : f32
    %75 = vector.broadcast %cst_27 : f32 to vector<32x256xf32>
    %76 = arith.mulf %74, %75 : vector<32x256xf32>
    %cst_28 = arith.constant dense<0xFF800000> : vector<32xf32>
    %77 = vector.multi_reduction <maximumf>, %64, %cst_28 [1] : vector<32x256xf32> to vector<32xf32>
    %78 = vector.shape_cast %77 : vector<32xf32> to vector<32x1xf32>
    %79 = vector.broadcast %78 : vector<32x1xf32> to vector<32x256xf32>
    %80 = arith.subf %64, %79 : vector<32x256xf32>
    %81 = math.exp %80 : vector<32x256xf32>
    %cst_29 = arith.constant dense<0.000000e+00> : vector<32xf32>
    %82 = vector.multi_reduction <add>, %81, %cst_29 [1] : vector<32x256xf32> to vector<32xf32>
    %83 = vector.shape_cast %82 : vector<32xf32> to vector<32x1xf32>
    %84 = vector.broadcast %83 : vector<32x1xf32> to vector<32x256xf32>
    %85 = arith.divf %81, %84 : vector<32x256xf32>
    "tpu.trace_start"() <{level = 10 : i32, message = "en,dn->ed"}> : () -> ()
    %cst_30 = arith.constant dense<0.000000e+00> : vector<32x32xf32>
    %86 = tpu.matmul %65, %85, %cst_30 {dimension_numbers = #tpu.dot_dimension_numbers<[1], [1], [0], [0], [0, 0, 1, 0], [], []>, precision = #tpu.contract_precision<fp32>} : vector<32x256xf32>, vector<32x256xf32>, vector<32x32xf32> -> vector<32x32xf32>
    "tpu.trace_stop"() : () -> ()
    %cst_31 = arith.constant dense<0.000000e+00> : vector<32x256xf32>
    %87 = tpu.matmul %86, %76, %cst_31 {dimension_numbers = #tpu.dot_dimension_numbers<[1], [0], [0], [1], [0, 0, 1, 1], [], []>, precision = #tpu.contract_precision<fp32>} : vector<32x32xf32>, vector<32x256xf32>, vector<32x256xf32> -> vector<32x256xf32>
    %88 = vector.extract_strided_slice %4 {offsets = [0, 64], sizes = [4, 32], strides = [1, 1]} : vector<4x128xf32> to vector<4x32xf32>
    %cst_32 = arith.constant dense<0.000000e+00> : vector<4x256xf32>
    %89 = tpu.matmul %88, %87, %cst_32 {dimension_numbers = #tpu.dot_dimension_numbers<[1], [0], [0], [1], [0, 0, 1, 1], [], []>, precision = #tpu.contract_precision<fp32>} : vector<4x32xf32>, vector<32x256xf32>, vector<4x256xf32> -> vector<4x256xf32>
    %90 = arith.addf %62, %89 : vector<4x256xf32>
    %91 = vector.extract_strided_slice %3 {offsets = [96, 0], sizes = [32, 256], strides = [1, 1]} : vector<384x256xf32> to vector<32x256xf32>
    %92 = vector.extract_strided_slice %3 {offsets = [224, 0], sizes = [32, 256], strides = [1, 1]} : vector<384x256xf32> to vector<32x256xf32>
    %93 = vector.extract_strided_slice %3 {offsets = [352, 0], sizes = [32, 256], strides = [1, 1]} : vector<384x256xf32> to vector<32x256xf32>
    %cst_33 = arith.constant dense<0xFF800000> : vector<256xf32>
    %94 = vector.multi_reduction <maximumf>, %91, %cst_33 [0] : vector<32x256xf32> to vector<256xf32>
    %95 = vector.shape_cast %94 : vector<256xf32> to vector<1x256xf32>
    %96 = vector.broadcast %95 : vector<1x256xf32> to vector<32x256xf32>
    %97 = arith.subf %91, %96 : vector<32x256xf32>
    %98 = math.exp %97 : vector<32x256xf32>
    %cst_34 = arith.constant dense<0.000000e+00> : vector<256xf32>
    %99 = vector.multi_reduction <add>, %98, %cst_34 [0] : vector<32x256xf32> to vector<256xf32>
    %100 = vector.shape_cast %99 : vector<256xf32> to vector<1x256xf32>
    %101 = vector.broadcast %100 : vector<1x256xf32> to vector<32x256xf32>
    %102 = arith.divf %98, %101 : vector<32x256xf32>
    %cst_35 = arith.constant 0.176776692 : f32
    %103 = vector.broadcast %cst_35 : f32 to vector<32x256xf32>
    %104 = arith.mulf %102, %103 : vector<32x256xf32>
    %cst_36 = arith.constant dense<0xFF800000> : vector<32xf32>
    %105 = vector.multi_reduction <maximumf>, %92, %cst_36 [1] : vector<32x256xf32> to vector<32xf32>
    %106 = vector.shape_cast %105 : vector<32xf32> to vector<32x1xf32>
    %107 = vector.broadcast %106 : vector<32x1xf32> to vector<32x256xf32>
    %108 = arith.subf %92, %107 : vector<32x256xf32>
    %109 = math.exp %108 : vector<32x256xf32>
    %cst_37 = arith.constant dense<0.000000e+00> : vector<32xf32>
    %110 = vector.multi_reduction <add>, %109, %cst_37 [1] : vector<32x256xf32> to vector<32xf32>
    %111 = vector.shape_cast %110 : vector<32xf32> to vector<32x1xf32>
    %112 = vector.broadcast %111 : vector<32x1xf32> to vector<32x256xf32>
    %113 = arith.divf %109, %112 : vector<32x256xf32>
    "tpu.trace_start"() <{level = 10 : i32, message = "en,dn->ed"}> : () -> ()
    %cst_38 = arith.constant dense<0.000000e+00> : vector<32x32xf32>
    %114 = tpu.matmul %93, %113, %cst_38 {dimension_numbers = #tpu.dot_dimension_numbers<[1], [1], [0], [0], [0, 0, 1, 0], [], []>, precision = #tpu.contract_precision<fp32>} : vector<32x256xf32>, vector<32x256xf32>, vector<32x32xf32> -> vector<32x32xf32>
    "tpu.trace_stop"() : () -> ()
    %cst_39 = arith.constant dense<0.000000e+00> : vector<32x256xf32>
    %115 = tpu.matmul %114, %104, %cst_39 {dimension_numbers = #tpu.dot_dimension_numbers<[1], [0], [0], [1], [0, 0, 1, 1], [], []>, precision = #tpu.contract_precision<fp32>} : vector<32x32xf32>, vector<32x256xf32>, vector<32x256xf32> -> vector<32x256xf32>
    %116 = vector.extract_strided_slice %4 {offsets = [0, 96], sizes = [4, 32], strides = [1, 1]} : vector<4x128xf32> to vector<4x32xf32>
    %cst_40 = arith.constant dense<0.000000e+00> : vector<4x256xf32>
    %117 = tpu.matmul %116, %115, %cst_40 {dimension_numbers = #tpu.dot_dimension_numbers<[1], [0], [0], [1], [0, 0, 1, 1], [], []>, precision = #tpu.contract_precision<fp32>} : vector<4x32xf32>, vector<32x256xf32>, vector<4x256xf32> -> vector<4x256xf32>
    %118 = arith.addf %90, %117 : vector<4x256xf32>
    %119 = vector.broadcast %5 : vector<4x1xf32> to vector<4x256xf32>
    %120 = arith.addf %118, %119 : vector<4x256xf32>
    %121 = vector.shape_cast %120 : vector<4x256xf32> to vector<1x4x256xf32>
    %cst_41 = arith.constant dense<0.000000e+00> : vector<1xf32>
    %122 = vector.multi_reduction <add>, %121, %cst_41 [1, 2] : vector<1x4x256xf32> to vector<1xf32>
    %123 = vector.shape_cast %122 : vector<1xf32> to vector<1x1x1xf32>
    %124 = vector.extract %123[0, 0, 0] : f32 from vector<1x1x1xf32>
    %cst_42 = arith.constant 1.024000e+03 : f32
    %125 = arith.divf %124, %cst_42 : f32
    %126 = vector.broadcast %125 : f32 to vector<4x256xf32>
    %127 = arith.subf %120, %126 : vector<4x256xf32>
    %128 = vector.broadcast %125 : f32 to vector<4x256xf32>
    %129 = arith.subf %120, %128 : vector<4x256xf32>
    %130 = arith.mulf %127, %129 : vector<4x256xf32>
    %131 = vector.shape_cast %130 : vector<4x256xf32> to vector<1x4x256xf32>
    %cst_43 = arith.constant dense<0.000000e+00> : vector<1xf32>
    %132 = vector.multi_reduction <add>, %131, %cst_43 [1, 2] : vector<1x4x256xf32> to vector<1xf32>
    %133 = vector.shape_cast %132 : vector<1xf32> to vector<1x1x1xf32>
    %134 = vector.extract %133[0, 0, 0] : f32 from vector<1x1x1xf32>
    %cst_44 = arith.constant 1.024000e+03 : f32
    %135 = arith.divf %134, %cst_44 : f32
    %cst_45 = arith.constant 9.99999974E-6 : f32
    %136 = arith.addf %135, %cst_45 : f32
    %137 = math.rsqrt %136 : f32
    %c0_46 = arith.constant 0 : index
    %c0_47 = arith.constant 0 : index
    %138 = vector.load %arg5[%c0_46, %c0_47] : memref<4x1xf32, #tpu.memory_space<vmem>>, vector<4x1xf32>
    %c0_48 = arith.constant 0 : index
    %c0_49 = arith.constant 0 : index
    %139 = vector.load %arg6[%c0_48, %c0_49] : memref<4x1xf32, #tpu.memory_space<vmem>>, vector<4x1xf32>
    %140 = vector.broadcast %137 : f32 to vector<4x1xf32>
    %141 = arith.mulf %138, %140 : vector<4x1xf32>
    %142 = vector.broadcast %125 : f32 to vector<4x1xf32>
    %143 = arith.mulf %142, %141 : vector<4x1xf32>
    %144 = arith.subf %139, %143 : vector<4x1xf32>
    %145 = vector.broadcast %141 : vector<4x1xf32> to vector<4x256xf32>
    %146 = arith.mulf %120, %145 : vector<4x256xf32>
    %147 = vector.broadcast %144 : vector<4x1xf32> to vector<4x256xf32>
    %148 = arith.addf %146, %147 : vector<4x256xf32>
    %c0_50 = arith.constant 0 : index
    %c0_51 = arith.constant 0 : index
    %c0_52 = arith.constant 0 : index
    %149 = vector.load %arg7[%c0_50, %c0_51, %c0_52] : memref<1x4x256xf32, #tpu.memory_space<vmem>>, vector<1x4x256xf32>
    %150 = vector.shape_cast %149 : vector<1x4x256xf32> to vector<4x256xf32>
    %151 = vector.shape_cast %148 : vector<4x256xf32> to vector<1x4x256xf32>
    tpu.vector_store %arg7[%c0_50, %c0_51, %c0_52], %151 {strides = array<i32>} : memref<1x4x256xf32, #tpu.memory_space<vmem>>, vector<1x4x256xf32>,
    return
  }
  func.func @transform_0(%arg0: i32) -> (i32, i32, i32) {
    %c0_i32 = arith.constant 0 : i32
    %c0_i32_0 = arith.constant 0 : i32
    %c0_i32_1 = arith.constant 0 : i32
    return %arg0, %c0_i32, %c0_i32_0 : i32, i32, i32
  }
  func.func @transform_1(%arg0: i32) -> (i32, i32) {
    %c0_i32 = arith.constant 0 : i32
    %c0_i32_0 = arith.constant 0 : i32
    %c0_i32_1 = arith.constant 0 : i32
    return %c0_i32, %c0_i32_0 : i32, i32
  }
  func.func @transform_2(%arg0: i32) -> (i32, i32) {
    %c0_i32 = arith.constant 0 : i32
    %c0_i32_0 = arith.constant 0 : i32
    %c0_i32_1 = arith.constant 0 : i32
    return %c0_i32, %c0_i32_0 : i32, i32
  }
  func.func @transform_3(%arg0: i32) -> (i32, i32) {
    %c0_i32 = arith.constant 0 : i32
    %c0_i32_0 = arith.constant 0 : i32
    %c0_i32_1 = arith.constant 0 : i32
    return %c0_i32, %c0_i32_0 : i32, i32
  }
  func.func @transform_4(%arg0: i32) -> (i32, i32) {
    %c0_i32 = arith.constant 0 : i32
    %c0_i32_0 = arith.constant 0 : i32
    %c0_i32_1 = arith.constant 0 : i32
    return %c0_i32, %c0_i32_0 : i32, i32
  }
  func.func @transform_5(%arg0: i32) -> (i32, i32) {
    %c0_i32 = arith.constant 0 : i32
    %c0_i32_0 = arith.constant 0 : i32
    %c0_i32_1 = arith.constant 0 : i32
    return %c0_i32, %c0_i32_0 : i32, i32
  }
  func.func @transform_6(%arg0: i32) -> (i32, i32, i32) {
    %c0_i32 = arith.constant 0 : i32
    %c0_i32_0 = arith.constant 0 : i32
    %c0_i32_1 = arith.constant 0 : i32
    return %arg0, %c0_i32, %c0_i32_0 : i32, i32, i32
  }
}

</mosaic_0001>

<bundles_post_ra>
// kernel: tpu_custom_call.1
= control target key start
LH: loop header
LB: loop body
LE: loop exit
PB: predicated region body
PF: predicated region fallthrough
CT: control target
= control target key end

     0   :  { %11 = vsyncpa [#allocation3], 0  ;;  %s17531_s0 = inlined_call_operand.vmem [shape: f32[2,4,256], index: 0, kind: input, shape index: {}]   ;;  %s17532_s1 = inlined_call_operand.vmem [shape: f32[384,4], index: 1, kind: input, shape index: {}]   ;;  %s17533_s2 = inlined_call_operand.vmem [shape: f32[4,128], index: 2, kind: input, shape index: {}]   ;;  %s17534_s3 = inlined_call_operand.vmem [shape: f32[4,1], index: 3, kind: input, shape index: {}]   ;;  %s17535_s4 = inlined_call_operand.vmem [shape: f32[4,1], index: 4, kind: input, shape index: {}]   ;;  %s17536_s5 = inlined_call_operand.vmem [shape: f32[4,1], index: 5, kind: input, shape index: {}]   ;;  %s17537_s6 = inlined_call_operand.hbm [shape: f32[2,4,256], index: 6, kind: output, shape index: {}]  }
   0x1   :  { %13 = vsyncpa [#allocation3 + $0x1], 0  ;;  %s13566_s21 = smov 0   ;;  %s13568_s22 = smov 0  }
   0x2   :  { %s13570_s23 = smov 0   ;;  %s13572_s24 = smov 0  }
   0x3 LB: > { %s13587_s25 = sadd.s32 4294967295, %s13523_s24   ;;  %s11790_s26 = sadd.s32 4294967294, %s13523_s24   ;;  %s13523_s24 = sphi %s13572_s24, %s18468_s24   ;;  %s13519_s23 = sphi %s13570_s23, %s18467_s23   ;;  %s13515_s22 = sphi %s13568_s22, %s18466_s22   ;;  %s13511_s21 = sphi %s13566_s21, %s18465_s21  }
   0x4   : > { %s13591_s27 = sadd.s32 1, %s13523_s24   ;;  %s157_s28 = sadd.s32 1, %s13519_s23 }
   0x5   : > { %s154_s29 = ssub.s32 %s13523_s24, %s13591_s27  ;;  %p167_p0 = scmp.ne.s32.totalorder %s13519_s23, %s13515_s22 }
   0x6   : > { %p155_p1 = scmp.eq.s32.totalorder %s154_s29, 0  ;;  %p168_p2 = scmp.eq.s32.totalorder %s13587_s25, 1 }
   0x7   : > { %p173_p3 = scmp.ne.s32.totalorder %s13515_s22, %s13511_s21  ;;  %p174_p4 = scmp.eq.s32.totalorder %s11790_s26, 1 }
   0x8   : > { %s13602_s30 = scalar_select %p155_p1, %s13519_s23, %s157_s28  }
   0x9   : > { %p13604_p5 = por %p168_p2, %p167_p0  ;;  %p13608_p6 = por %p174_p4, %p173_p3 }
   0xa   : > { %p11793_p7 = scmp.ge.s32.totalorder %s13523_s24, 1  ;;  %p215_p8 = scmp.lt.s32.totalorder %s13523_s24, 3 }
   0xc   : > { %p216_p9 = pnand %p11793_p7, %p215_p8 }
   0xe   : > { %219 = sbr.rel (%p216_p9) target bundleno = 4843 (0x12eb), region = 44 }
  0x15   : > { %p245_p10 = scmp.lt.s32.totalorder %s13587_s25, 1  ;;  %v251_v0 = vld [vmem:[%s17532_s1] sm:$0xff]  ;;  %vm301_vm0 = vcmask 31744   ;;  %v252_v1 = vld [vmem:[%s17532_s1 + $0x8] sm:$0xff]  ;;  %v17682_v2 = vmov 0.0   ;;  %v253_v5 = vld [vmem:[%s17532_s1 + $0x10] sm:$0xff] }
  0x16   : > { %517 = vmatprep.mubr.f32.mxu0 %v17682_v2  ;;  %v303_v3 = vsel %vm301_vm0, %v251_v0, 0  ;;  %v306_v4 = vsel %vm301_vm0, %v252_v1, 0  ;;  %v254_v6 = vld [vmem:[%s17532_s1 + $0x18] sm:$0xff]  ;;  %803 = vmatprep.mubr.f32.mxu1 %v17682_v2  ;;  %v309_v9 = vsel %vm301_vm0, %v253_v5, 0  ;;  %v255_v12 = vld [vmem:[%s17532_s1 + $0x20] sm:$0xff]  ;;  %vm446_vm1 = vcmask 1043456  }
  0x17   : > { %s246_s17 = scalar_select %p245_p10, %s13587_s25, 1  ;;  %v13632_v7 = vand.u32 4294901760, %v303_v3  ;;  %v13634_v8 = vand.u32 4294901760, %v306_v4  ;;  %v312_v10 = vsel %vm301_vm0, %v254_v6, 0  ;;  %v13638_v11 = vand.u32 4294901760, %v309_v9  ;;  %v256_v16 = vld [vmem:[%s17532_s1 + $0x28] sm:$0xff] }
  0x18   : > { %v13652_v15 = vand.u32 4294901760, %v312_v10  ;;  %v315_v21 = vsel %vm301_vm0, %v255_v12, 0  ;;  %v318_v25 = vsel %vm301_vm0, %v256_v16, 0  ;;  %v257_v34 = vld [vmem:[%s17532_s1 + $0x30] sm:$0xff]  ;;  %v258_v41 = vld [vmem:[%s17532_s1 + $0x38] sm:$0xff]  ;;  %v259_v48 = vld [vmem:[%s17532_s1 + $0x40] sm:$0xff] }
  0x19   : > { %17834 = vst [vmem:[#allocation5_spill] sm:$0xff] %v13632_v7  ;;  %17835 = vst [vmem:[#allocation6_spill] sm:$0xff] %v13634_v8  ;;  %s11802_s20 = sshll.u32 %s246_s17, 3  ;;  %v13644_v13 = vsub.f32 %v303_v3, %v13632_v7  ;;  %v13647_v14 = vsub.f32 %v306_v4, %v13634_v8  ;;  %v13660_v20 = vsub.f32 %v309_v9, %v13638_v11  ;;  %v13674_v29 = vand.u32 4294901760, %v315_v21  ;;  %v260_v54 = vld [vmem:[%s17532_s1 + $0x48] sm:$0xff]  ;;  %v261_v0 = vld [vmem:[%s17532_s1 + $0x50] sm:$0xff] }
  0x1a   : > { %17836 = vst [vmem:[#allocation7_spill] sm:$0xff] %v13638_v11  ;;  %s249_s29 = scalar_lea.vmem %s17531_s0, %s11802_s20  ;;  %17837 = vst [vmem:[#allocation8_spill] sm:$0xff] %v13652_v15  ;;  %v13672_v28 = vsub.f32 %v312_v10, %v13652_v15  ;;  %v13691_v36 = vand.u32 4294901760, %v318_v25  ;;  %v321_v40 = vsel %vm301_vm0, %v257_v34, 0  ;;  %v324_v47 = vsel %vm301_vm0, %v258_v41, 0  ;;  %v262_v12 = vld [vmem:[%s17532_s1 + $0x58] sm:$0xff] }
  0x1b   : > { %v250_v17 = vld [vmem:[%s249_s29] sm:$0xff]  ;;  %v17558_v18 = vand.u32 4294901760, %v13644_v13  ;;  %v17555_v19 = vand.u32 4294901760, %v13647_v14  ;;  %17839 = vst [vmem:[#allocation10_spill] sm:$0xff] %v13674_v29  ;;  %v17553_v33 = vand.u32 4294901760, %v13660_v20  ;;  %v13689_v35 = vsub.f32 %v315_v21, %v13674_v29  ;;  %s13526_s28 = smov 96  }
  0x1c   : > { %v300_v22 = vcombine.high %v250_v17, %v250_v17  ;;  %v447_v23 = vsel %vm446_vm1, %v250_v17, 0  ;;  %17841 = vst [vmem:[#allocation12_spill] sm:$0xff] %v13691_v36  ;;  %v17552_v39 = vand.u32 4294901760, %v13672_v28  ;;  %v13705_v43 = vsub.f32 %v318_v25, %v13691_v36  ;;  %s13527_s29 = smov 64   ;;  %s13528_s13 = smov 32  }
  0x1d   : > { %v521_v24 = vsub.f32 %v13644_v13, %v17558_v18  ;;  %v13669_v27 = vand.u32 4294901760, %v447_v23  ;;  %v532_v32 = vsub.f32 %v13647_v14, %v17555_v19  ;;  %v543_v38 = vsub.f32 %v13660_v20, %v17553_v33  ;;  %v276_v18 = vld [vmem:[%s17532_s1 + $0xc8] sm:$0xff]  ;;  %s242_s11 = sand.u32 1, %s13515_s22  }
  0x1e   : > { %v449_v26 = vsel %vm446_vm1, %v300_v22, 0  ;;  %v17551_v42 = vand.u32 4294901760, %v13689_v35  ;;  %v554_v45 = vsub.f32 %v13672_v28, %v17552_v39  ;;  %v13710_v46 = vand.u32 4294901760, %v321_v40  ;;  %s11794_s12 = sshll.u32 %s242_s11, 3 }
  0x1f   : > { %17838 = vst [vmem:[#allocation9_spill] sm:$0xff] %v13669_v27  ;;  %v13676_v30 = vand.u32 4294901760, %v449_v26  ;;  %v522_v31 = vand.u32 4294901760, %v521_v24  ;;  %v533_v37 = vand.u32 4294901760, %v532_v32  ;;  %v544_v44 = vand.u32 4294901760, %v543_v38  ;;  %s244_s14 = scalar_lea.vmem [#allocation2], %s11794_s12 }
  0x20   : > { %17842 = vst [vmem:[#allocation13_spill] sm:$0xff] %v13710_v46  ;;  %v565_v49 = vsub.f32 %v13689_v35, %v17551_v42  ;;  %v17549_v50 = vand.u32 4294901760, %v13705_v43  ;;  %v555_v51 = vand.u32 4294901760, %v554_v45  ;;  %v13722_v52 = vsub.f32 %v321_v40, %v13710_v46  ;;  %s11731_s15 = sshll.u32 %s244_s14, 4  ;;  %s17491_s15 = int_to_ptr.vmem [resolvable:$true] %s11731_s15 }
  0x21   : > { %17840 = vst [vmem:[#allocation11_spill] sm:$0xff] %v13676_v30  ;;  %452 = vmatprep.subr.mxu0 %v13676_v30  ;;  %12380 = vmatprep.subr.mxu1 %v13676_v30  ;;  %v13724_v53 = vand.u32 4294901760, %v324_v47  ;;  %v327_v55 = vsel %vm301_vm0, %v259_v48, 0  ;;  %v330_v58 = vsel %vm301_vm0, %v260_v54, 0  ;;  %v13742_v62 = vsub.f32 %v449_v26, %v13676_v30  ;;  %v264_v48 = vld [vmem:[%s17532_s1 + $0x68] sm:$0xff] }
  0x22   : > { %454 = vmatpush1.msra.mxu0 %v13669_v27  ;;  %12381 = vmatpush1.msra.mxu1 %v13669_v27  ;;  %v566_v56 = vand.u32 4294901760, %v565_v49  ;;  %v576_v57 = vsub.f32 %v13705_v43, %v17549_v50  ;;  %v17548_v59 = vand.u32 4294901760, %v13722_v52  ;;  %v13739_v61 = vand.u32 4294901760, %v327_v55  ;;  %v273_v50 = vld [vmem:[%s17532_s1 + $0xb0] sm:$0xff] }
  0x23   : > { %523 = vmatmul.mubr.f32.vlgmr.msra.gmra.mrb[0].mxu0 %v522_v31  ;;  %17843 = vst [vmem:[#allocation14_spill] sm:$0xff] %v13724_v53  ;;  %v13737_v60 = vsub.f32 %v324_v47, %v13724_v53  ;;  %v13746_v63 = vsub.f32 %v447_v23, %v13669_v27  ;;  %v17559_v1 = vand.u32 4294901760, %v13742_v62  ;;  %v13752_v4 = vand.u32 4294901760, %v330_v58 }
  0x24   : > { %528 = vmatprep.mubr.f32.mxu0 %v17682_v2  ;;  %17844 = vst [vmem:[#allocation15_spill] sm:$0xff] %v13739_v61  ;;  %v577_v3 = vand.u32 4294901760, %v576_v57  ;;  %v587_v6 = vsub.f32 %v13722_v52, %v17548_v59  ;;  %v13760_v10 = vsub.f32 %v327_v55, %v13739_v61  ;;  %v333_v17 = vsel %vm301_vm0, %v261_v0, 0 }
  0x25   : > { %17845 = vst [vmem:[#allocation16_spill] sm:$0xff] %v13746_v63  ;;  %17846 = vst [vmem:[#allocation17_spill] sm:$0xff] %v13752_v4  ;;  %v17556_v5 = vand.u32 4294901760, %v13746_v63  ;;  %v17546_v9 = vand.u32 4294901760, %v13737_v60  ;;  %v1049_v16 = vsub.f32 %v13742_v62, %v17559_v1  ;;  %v13774_v23 = vsub.f32 %v330_v58, %v13752_v4  ;;  %v265_v58 = vld [vmem:[%s17532_s1 + $0x70] sm:$0xff] }
  0x26   : > { %v336_v24 = vsel %vm301_vm0, %v262_v12, 0  ;;  %v588_v26 = vand.u32 4294901760, %v587_v6  ;;  %v17545_v32 = vand.u32 4294901760, %v13760_v10  ;;  %v13781_v34 = vand.u32 4294901760, %v333_v17 }
  0x27   : > { %534 = vmatmul.mubr.f32.gmra.mrb[2].mxu0 %v533_v37  ;;  %v1055_v21 = vsub.f32 %v13746_v63, %v17556_v5  ;;  %v1050_v22 = vand.u32 4294901760, %v1049_v16  ;;  %v598_v31 = vsub.f32 %v13737_v60, %v17546_v9  ;;  %v263_v37 = vld [vmem:[%s17532_s1 + $0x60] sm:$0xff]  ;;  %v13788_v38 = vand.u32 4294901760, %v336_v24  ;;  %v272_v9 = vld [vmem:[%s17532_s1 + $0xa8] sm:$0xff] }
  0x28   : > { %539 = vmatprep.mubr.f32.mxu0 %v17682_v2  ;;  %17847 = vst [vmem:[#allocation18_spill] sm:$0xff] %v13781_v34  ;;  %v339_v40 = vsel %vm301_vm0, %v263_v37, 0  ;;  %v17543_v45 = vand.u32 4294901760, %v13774_v23  ;;  %v13796_v47 = vsub.f32 %v333_v17, %v13781_v34  ;;  %v342_v57 = vsel %vm301_vm0, %v264_v48, 0  ;;  %v275_v5 = vld [vmem:[%s17532_s1 + $0xc0] sm:$0xff] }
  0x29   : > { %v1056_v25 = vand.u32 4294901760, %v1055_v21  ;;  %1051 = vmatprep.subr.mxu0 %v1050_v22  ;;  %17848 = vst [vmem:[#allocation19_spill] sm:$0xff] %v13788_v38  ;;  %v599_v41 = vand.u32 4294901760, %v598_v31  ;;  %v13802_v49 = vand.u32 4294901760, %v339_v40  ;;  %v13823_v16 = vand.u32 4294901760, %v342_v57  ;;  %v266_v21 = vld [vmem:[%s17532_s1 + $0x78] sm:$0xff] }
  0x2a   : > { %v620_v54 = vsub.f32 %v13774_v23, %v17543_v45  ;;  %v17541_v55 = vand.u32 4294901760, %v13796_v47  ;;  %v345_v17 = vsel %vm301_vm0, %v265_v58, 0  ;;  %v348_v37 = vsel %vm301_vm0, %v266_v21, 0  ;;  %v271_v45 = vld [vmem:[%s17532_s1 + $0xa0] sm:$0xff] }
  0x2b   : > { %545 = vmatmul.mubr.f32.gmra.mrb[4].mxu0 %v544_v44  ;;  %v609_v44 = vsub.f32 %v13760_v10, %v17545_v32  ;;  %17849 = vst [vmem:[#allocation20_spill] sm:$0xff] %v13802_v49  ;;  %v13817_v0 = vsub.f32 %v339_v40, %v13802_v49  ;;  %17850 = vst [vmem:[#allocation21_spill] sm:$0xff] %v13823_v16  ;;  %v13837_v31 = vand.u32 4294901760, %v345_v17  ;;  %v267_v40 = vld [vmem:[%s17532_s1 + $0x80] sm:$0xff]  ;;  %v369_v39 = vsel %vm301_vm0, %v273_v50, 0 }
  0x2c   : > { %550 = vmatprep.mubr.f32.mxu0 %v17682_v2  ;;  %1057 = vmatpush1.msra.mxu0 %v1056_v25  ;;  %v631_v6 = vsub.f32 %v13796_v47, %v17541_v55  ;;  %v351_v58 = vsel %vm301_vm0, %v267_v40, 0  ;;  %v13950_v19 = vand.u32 4294901760, %v369_v39  ;;  %vm4077_vm2 = vcmask 261120  }
  0x2d   : > { %1459 = vmatprep.subr.mxu0 %v13742_v62  ;;  %v17538_v22 = vand.u32 4294901760, %v13817_v0  ;;  %17851 = vst [vmem:[#allocation22_spill] sm:$0xff] %v13837_v31 }
  0x2e   : > { %17861 = vst [vmem:[#allocation32_spill] sm:$0xff] %v13950_v19 }
  0x2f   : > { %556 = vmatmul.mubr.f32.gmra.mrb[6].mxu0 %v555_v51  ;;  %v610_v51 = vand.u32 4294901760, %v609_v44 }
  0x30   : > { %561 = vmatprep.mubr.f32.mxu0 %v17682_v2 }
  0x33   : > { %567 = vmatmul.mubr.f32.gmra.mrb[8].mxu0 %v566_v56  ;;  %v13809_v56 = vsub.f32 %v336_v24, %v13788_v38  ;;  %v632_v24 = vand.u32 4294901760, %v631_v6 }
  0x34   : > { %572 = vmatprep.mubr.f32.mxu0 %v17682_v2 }
  0x35   : > { %v17540_v12 = vand.u32 4294901760, %v13809_v56 }
  0x37   : > { %578 = vmatmul.mubr.f32.gmra.mrb[10].mxu0 %v577_v3  ;;  %v621_v3 = vand.u32 4294901760, %v620_v54  ;;  %v642_v25 = vsub.f32 %v13809_v56, %v17540_v12  ;;  %v13851_v54 = vand.u32 4294901760, %v348_v37  ;;  %v270_v12 = vld [vmem:[%s17532_s1 + $0x98] sm:$0xff] }
  0x38   : > { %583 = vmatprep.mubr.f32.mxu0 %v17682_v2 }
  0x39   : > { %v643_v44 = vand.u32 4294901760, %v642_v25  ;;  %17852 = vst [vmem:[#allocation23_spill] sm:$0xff] %v13851_v54  ;;  %v13866_v25 = vand.u32 4294901760, %v351_v58 }
  0x3b   : > { %589 = vmatmul.mubr.f32.gmra.mrb[12].mxu0 %v588_v26  ;;  %v13835_v26 = vsub.f32 %v342_v57, %v13823_v16  ;;  %v268_v57 = vld [vmem:[%s17532_s1 + $0x88] sm:$0xff]  ;;  %17853 = vst [vmem:[#allocation24_spill] sm:$0xff] %v13866_v25 }
  0x3c   : > { %594 = vmatprep.mubr.f32.mxu0 %v17682_v2  ;;  %v354_v6 = vsel %vm301_vm0, %v268_v57, 0 }
  0x3d   : > { %v17539_v48 = vand.u32 4294901760, %v13835_v26  ;;  %v13872_v40 = vand.u32 4294901760, %v354_v6 }
  0x3f   : > { %600 = vmatmul.mubr.f32.gmra.mrb[14].mxu0 %v599_v41  ;;  %v653_v41 = vsub.f32 %v13817_v0, %v17538_v22  ;;  %v664_v21 = vsub.f32 %v13835_v26, %v17539_v48  ;;  %v269_v22 = vld [vmem:[%s17532_s1 + $0x90] sm:$0xff]  ;;  %17854 = vst [vmem:[#allocation25_spill] sm:$0xff] %v13872_v40  ;;  %v13880_v48 = vsub.f32 %v351_v58, %v13866_v25  ;;  %v360_v58 = vsel %vm301_vm0, %v270_v12, 0 }
  0x40   : > { %605 = vmatprep.mubr.f32.mxu0 %v17682_v2  ;;  %v13907_v32 = vand.u32 4294901760, %v360_v58  ;;  %v363_v12 = vsel %vm301_vm0, %v271_v45, 0  ;;  %v366_v45 = vsel %vm301_vm0, %v272_v9, 0  ;;  %v274_v9 = vld [vmem:[%s17532_s1 + $0xb8] sm:$0xff] }
  0x41   : > { %v13921_v59 = vand.u32 4294901760, %v363_v12  ;;  %v13935_v42 = vand.u32 4294901760, %v366_v45 }
  0x42   : > { %17856 = vst [vmem:[#allocation27_spill] sm:$0xff] %v13907_v32 }
  0x43   : > { %611 = vmatmul.mubr.f32.gmra.mrb[16].mxu0 %v610_v51  ;;  %v13849_v51 = vsub.f32 %v345_v17, %v13837_v31  ;;  %17858 = vst [vmem:[#allocation29_spill] sm:$0xff] %v13921_v59  ;;  %17860 = vst [vmem:[#allocation31_spill] sm:$0xff] %v13935_v42 }
  0x44   : > { %616 = vmatprep.mubr.f32.mxu0 %v17682_v2 }
  0x45   : > { %v17542_v17 = vand.u32 4294901760, %v13849_v51 }
  0x47   : > { %622 = vmatmul.mubr.f32.gmra.mrb[18].mxu0 %v621_v3  ;;  %v654_v3 = vand.u32 4294901760, %v653_v41  ;;  %v357_v41 = vsel %vm301_vm0, %v269_v22, 0  ;;  %v675_v57 = vsub.f32 %v13849_v51, %v17542_v17  ;;  %v13893_v17 = vsub.f32 %v354_v6, %v13872_v40 }
  0x48   : > { %627 = vmatprep.mubr.f32.mxu0 %v17682_v2  ;;  %v13886_v55 = vand.u32 4294901760, %v357_v41 }
  0x49   : > { %v676_v22 = vand.u32 4294901760, %v675_v57  ;;  %v17550_v6 = vand.u32 4294901760, %v13893_v17 }
  0x4a   : > { %17855 = vst [vmem:[#allocation26_spill] sm:$0xff] %v13886_v55 }
  0x4b   : > { %633 = vmatmul.mubr.f32.gmra.mrb[20].mxu0 %v632_v24  ;;  %v13864_v24 = vsub.f32 %v348_v37, %v13851_v54 }
  0x4c   : > { %638 = vmatprep.mubr.f32.mxu0 %v17682_v2 }
  0x4d   : > { %v17544_v37 = vand.u32 4294901760, %v13864_v24 }
  0x4f   : > { %644 = vmatmul.mubr.f32.gmra.mrb[22].mxu0 %v643_v44  ;;  %v665_v44 = vand.u32 4294901760, %v664_v21  ;;  %v17547_v21 = vand.u32 4294901760, %v13880_v48 }
  0x50   : > { %649 = vmatprep.mubr.f32.mxu0 %v17682_v2 }
  0x53   : > { %655 = vmatmul.mubr.f32.gmra.mrb[24].mxu0 %v654_v3  ;;  %v686_v3 = vsub.f32 %v13864_v24, %v17544_v37  ;;  %v697_v37 = vsub.f32 %v13880_v48, %v17547_v21  ;;  %v13919_v21 = vsub.f32 %v360_v58, %v13907_v32  ;;  %v13933_v58 = vsub.f32 %v363_v12, %v13921_v59 }
  0x54   : > { %660 = vmatprep.mubr.f32.mxu0 %v17682_v2 }
  0x55   : > { %v687_v57 = vand.u32 4294901760, %v686_v3  ;;  %v708_v3 = vsub.f32 %v13893_v17, %v17550_v6  ;;  %17857 = vst [vmem:[#allocation28_spill] sm:$0xff] %v13919_v21  ;;  %v17557_v6 = vand.u32 4294901760, %v13919_v21  ;;  %17859 = vst [vmem:[#allocation30_spill] sm:$0xff] %v13933_v58  ;;  %v17560_v12 = vand.u32 4294901760, %v13933_v58 }
  0x57   : > { %666 = vmatmul.mubr.f32.gmra.mrb[26].mxu0 %v665_v44  ;;  %v13901_v44 = vsub.f32 %v357_v41, %v13886_v55 }
  0x58   : > { %671 = vmatprep.mubr.f32.mxu0 %v17682_v2 }
  0x59   : > { %v17554_v41 = vand.u32 4294901760, %v13901_v44 }
  0x5b   : > { %677 = vmatmul.mubr.f32.gmra.mrb[28].mxu0 %v676_v22  ;;  %v698_v22 = vand.u32 4294901760, %v697_v37  ;;  %v719_v37 = vsub.f32 %v13901_v44, %v17554_v41  ;;  %v372_v41 = vsel %vm301_vm0, %v274_v9, 0  ;;  %v741_v9 = vsub.f32 %v13933_v58, %v17560_v12 }
  0x5c   : > { %682 = vmatprep.mubr.f32.mxu0 %v17682_v2  ;;  %v13956_v50 = vand.u32 4294901760, %v372_v41 }
  0x5d   : > { %v720_v33 = vand.u32 4294901760, %v719_v37  ;;  %v375_v37 = vsel %vm301_vm0, %v275_v5, 0 }
  0x5e   : > { %17862 = vst [vmem:[#allocation33_spill] sm:$0xff] %v13956_v50  ;;  %v13970_v1 = vand.u32 4294901760, %v375_v37  ;;  %v13977_v12 = vsub.f32 %v372_v41, %v13956_v50 }
  0x5f   : > { %688 = vmatmul.mubr.f32.gmra.mrb[30].mxu0 %v687_v57  ;;  %v709_v57 = vand.u32 4294901760, %v708_v3  ;;  %v13948_v3 = vsub.f32 %v366_v45, %v13935_v42 }
  0x60   : > { %693 = vmatprep.mubr.f32.mxu0 %v17682_v2  ;;  %17863 = vst [vmem:[#allocation34_spill] sm:$0xff] %v13970_v1  ;;  %v13982_v58 = vsub.f32 %v375_v37, %v13970_v1 }
  0x61   : > { %v17565_v45 = vand.u32 4294901760, %v13948_v3 }
  0x62   : > { %17864 = vst [vmem:[#allocation35_spill] sm:$0xff] %v13982_v58  ;;  %v17569_v37 = vand.u32 4294901760, %v13982_v58 }
  0x63   : > { %699 = vmatmul.mubr.f32.gmra.mrb[32].mxu0 %v698_v22  ;;  %v730_v22 = vsub.f32 %v13919_v21, %v17557_v6  ;;  %v13964_v6 = vsub.f32 %v369_v39, %v13950_v19  ;;  %v752_v5 = vsub.f32 %v13948_v3, %v17565_v45  ;;  %v378_v39 = vsel %vm301_vm0, %v276_v18, 0 }
  0x64   : > { %704 = vmatprep.mubr.f32.mxu0 %v17682_v2  ;;  %v13988_v45 = vand.u32 4294901760, %v378_v39 }
  0x65   : > { %v753_v21 = vand.u32 4294901760, %v752_v5 }
  0x66   : > { %17865 = vst [vmem:[#allocation36_spill] sm:$0xff] %v13988_v45 }
  0x67   : > { %710 = vmatmul.mubr.f32.gmra.mrb[34].mxu0 %v709_v57  ;;  %v731_v57 = vand.u32 4294901760, %v730_v22  ;;  %v17566_v22 = vand.u32 4294901760, %v13964_v6 }
  0x68   : > { %715 = vmatprep.mubr.f32.mxu0 %v17682_v2 }
  0x6b   : > { %721 = vmatmul.mubr.f32.gmra.mrb[36].mxu0 %v720_v33  ;;  %v742_v33 = vand.u32 4294901760, %v741_v9  ;;  %v17567_v9 = vand.u32 4294901760, %v13977_v12 }
  0x6c   : > { %726 = vmatprep.mubr.f32.mxu0 %v17682_v2 }
  0x6d   : > { %v774_v18 = vsub.f32 %v13977_v12, %v17567_v9 }
  0x6f   : > { %732 = vmatmul.mubr.f32.gmra.mrb[38].mxu0 %v731_v57  ;;  %v763_v57 = vsub.f32 %v13964_v6, %v17566_v22  ;;  %v775_v5 = vand.u32 4294901760, %v774_v18  ;;  %v785_v22 = vsub.f32 %v13982_v58, %v17569_v37 }
  0x70   : > { %737 = vmatprep.mubr.f32.mxu0 %v17682_v2 }
  0x71   : > { %v764_v41 = vand.u32 4294901760, %v763_v57  ;;  %v786_v57 = vand.u32 4294901760, %v785_v22  ;;  %v277_v22 = vld [vmem:[%s17532_s1 + $0xd0] sm:$0xff] }
  0x73   : > { %743 = vmatmul.mubr.f32.gmra.mrb[40].mxu0 %v742_v33  ;;  %v13996_v33 = vsub.f32 %v378_v39, %v13988_v45 }
  0x74   : > { %748 = vmatprep.mubr.f32.mxu0 %v17682_v2 }
  0x77   : > { %754 = vmatmul.mubr.f32.gmra.mrb[42].mxu0 %v753_v21  ;;  %v17568_v21 = vand.u32 4294901760, %v13996_v33 }
  0x78   : > { %759 = vmatprep.mubr.f32.mxu0 %v17682_v2 }
  0x79   : > { %v796_v9 = vsub.f32 %v13996_v33, %v17568_v21  ;;  %v280_v21 = vld [vmem:[%s17532_s1 + $0xe8] sm:$0xff] }
  0x7a   : > { %v14099_v37 = vsel %vm301_vm0, %v280_v21, 0 }
  0x7b   : > { %765 = vmatmul.mubr.f32.gmra.mrb[44].mxu0 %v764_v41  ;;  %v797_v39 = vand.u32 4294901760, %v796_v9  ;;  %v14066_v9 = vsel %vm301_vm0, %v277_v22, 0  ;;  %v278_v41 = vld [vmem:[%s17532_s1 + $0xd8] sm:$0xff] }
  0x7c   : > { %770 = vmatprep.mubr.f32.mxu0 %v17682_v2  ;;  %v14073_v18 = vand.u32 4294901760, %v14066_v9 }
  0x7f   : > { %776 = vmatmul.mubr.f32.gmra.mrb[46].mxu0 %v775_v5  ;;  %v14077_v5 = vsel %vm301_vm0, %v278_v41, 0 }
  0x80   : > { %781 = vmatprep.mubr.f32.mxu0 %v17682_v2 }
  0x83   : > { %787 = vmatmul.mubr.f32.gmra.mrb[48].mxu0 %v786_v57  ;;  %v279_v57 = vld [vmem:[%s17532_s1 + $0xe0] sm:$0xff] }
  0x84   : > { %792 = vmatprep.mubr.f32.mxu0 %v17682_v2  ;;  %v14088_v22 = vsel %vm301_vm0, %v279_v57, 0  ;;  %v14106_v57 = vand.u32 4294901760, %v14099_v37 }
  0x85   : > { %v14095_v41 = vand.u32 4294901760, %v14088_v22 }
  0x87   : > { %798 = vmatmul.mubr.f32.gmra.mrb[50].mxu0 %v797_v39  ;;  %v14084_v39 = vand.u32 4294901760, %v14077_v5 }
  0x88   : > { %1120 = vmatprep.mubr.f32.mxu0 %v17682_v2 }
  0x8b   : > { %1122 = vmatmul.mubr.f32.vlgmr.msra.gmra.mrb[0].mxu0 %v13632_v7 }
  0x8c   : > { %1127 = vmatprep.mubr.f32.mxu0 %v17682_v2  ;;  %1462 = vmatpush1.msra.mxu0 %v13746_v63 }
  0x8d   : > { %1911 = vmatprep.subr.mxu0 %v13676_v30  ;;  %v294_v30 = vld [vmem:[%s17532_s1 + $0x158] sm:$0xff] }
  0x8e   : > { %v14253_v63 = vsel %vm301_vm0, %v294_v30, 0 }
  0x8f   : > { %1129 = vmatmul.mubr.f32.gmra.mrb[2].mxu0 %v13634_v8  ;;  %v293_v8 = vld [vmem:[%s17532_s1 + $0x150] sm:$0xff]  ;;  %17880 = vst [vmem:[#allocation51_spill] sm:$0xff] %v14253_v63 }
  0x90   : > { %1134 = vmatprep.mubr.f32.mxu0 %v17682_v2  ;;  %v14242_v7 = vsel %vm301_vm0, %v293_v8, 0  ;;  %v14260_v8 = vand.u32 4294901760, %v14253_v63  ;;  %v297_v63 = vld [vmem:[%s17532_s1 + $0x170] sm:$0xff] }
  0x91   : > { %17878 = vst [vmem:[#allocation49_spill] sm:$0xff] %v14242_v7 }
  0x92   : > { %17881 = vst [vmem:[#allocation52_spill] sm:$0xff] %v14260_v8 }
  0x93   : > { %1136 = vmatmul.mubr.f32.gmra.mrb[4].mxu0 %v13638_v11 }
  0x94   : > { %1141 = vmatprep.mubr.f32.mxu0 %v17682_v2 }
  0x97   : > { %1143 = vmatmul.mubr.f32.gmra.mrb[6].mxu0 %v13652_v15  ;;  %v292_v15 = vld [vmem:[%s17532_s1 + $0x148] sm:$0xff] }
  0x98   : > { %1148 = vmatprep.mubr.f32.mxu0 %v17682_v2  ;;  %v14231_v11 = vsel %vm301_vm0, %v292_v15, 0  ;;  %v14249_v15 = vand.u32 4294901760, %v14242_v7  ;;  %v296_v7 = vld [vmem:[%s17532_s1 + $0x168] sm:$0xff] }
  0x99   : > { %17876 = vst [vmem:[#allocation47_spill] sm:$0xff] %v14231_v11 }
  0x9a   : > { %17879 = vst [vmem:[#allocation50_spill] sm:$0xff] %v14249_v15 }
  0x9b   : > { %1150 = vmatmul.mubr.f32.gmra.mrb[8].mxu0 %v13674_v29 }
  0x9c   : > { %1155 = vmatprep.mubr.f32.mxu0 %v17682_v2 }
  0x9f   : > { %1157 = vmatmul.mubr.f32.gmra.mrb[10].mxu0 %v13691_v36  ;;  %v291_v36 = vld [vmem:[%s17532_s1 + $0x140] sm:$0xff] }
  0xa0   : > { %1162 = vmatprep.mubr.f32.mxu0 %v17682_v2  ;;  %v14220_v29 = vsel %vm301_vm0, %v291_v36, 0  ;;  %v14238_v36 = vand.u32 4294901760, %v14231_v11  ;;  %v295_v11 = vld [vmem:[%s17532_s1 + $0x160] sm:$0xff] }
  0xa2   : > { %17877 = vst [vmem:[#allocation48_spill] sm:$0xff] %v14238_v36 }
  0xa3   : > { %1164 = vmatmul.mubr.f32.gmra.mrb[12].mxu0 %v13710_v46 }
  0xa4   : > { %1169 = vmatprep.mubr.f32.mxu0 %v17682_v2 }
  0xa7   : > { %1171 = vmatmul.mubr.f32.gmra.mrb[14].mxu0 %v13724_v53  ;;  %v290_v53 = vld [vmem:[%s17532_s1 + $0x138] sm:$0xff] }
  0xa8   : > { %1176 = vmatprep.mubr.f32.mxu0 %v17682_v2  ;;  %v14209_v46 = vsel %vm301_vm0, %v290_v53, 0  ;;  %v14227_v53 = vand.u32 4294901760, %v14220_v29 }
  0xaa   : > { %17875 = vst [vmem:[#allocation46_spill] sm:$0xff] %v14227_v53 }
  0xab   : > { %1178 = vmatmul.mubr.f32.gmra.mrb[16].mxu0 %v13739_v61 }
  0xac   : > { %1183 = vmatprep.mubr.f32.mxu0 %v17682_v2 }
  0xaf   : > { %1185 = vmatmul.mubr.f32.gmra.mrb[18].mxu0 %v13752_v4  ;;  %v289_v4 = vld [vmem:[%s17532_s1 + $0x130] sm:$0xff] }
  0xb0   : > { %1190 = vmatprep.mubr.f32.mxu0 %v17682_v2  ;;  %v14198_v61 = vsel %vm301_vm0, %v289_v4, 0  ;;  %v14216_v4 = vand.u32 4294901760, %v14209_v46 }
  0xb2   : > { %17874 = vst [vmem:[#allocation45_spill] sm:$0xff] %v14216_v4 }
  0xb3   : > { %1192 = vmatmul.mubr.f32.gmra.mrb[20].mxu0 %v13781_v34 }
  0xb4   : > { %1197 = vmatprep.mubr.f32.mxu0 %v17682_v2 }
  0xb7   : > { %1199 = vmatmul.mubr.f32.gmra.mrb[22].mxu0 %v13788_v38  ;;  %v288_v38 = vld [vmem:[%s17532_s1 + $0x128] sm:$0xff] }
  0xb8   : > { %1204 = vmatprep.mubr.f32.mxu0 %v17682_v2  ;;  %v14187_v34 = vsel %vm301_vm0, %v288_v38, 0  ;;  %v14205_v38 = vand.u32 4294901760, %v14198_v61 }
  0xba   : > { %17873 = vst [vmem:[#allocation44_spill] sm:$0xff] %v14205_v38 }
  0xbb   : > { %1206 = vmatmul.mubr.f32.gmra.mrb[24].mxu0 %v13802_v49 }
  0xbc   : > { %1211 = vmatprep.mubr.f32.mxu0 %v17682_v2 }
  0xbf   : > { %1213 = vmatmul.mubr.f32.gmra.mrb[26].mxu0 %v13823_v16  ;;  %v287_v16 = vld [vmem:[%s17532_s1 + $0x120] sm:$0xff] }
  0xc0   : > { %1218 = vmatprep.mubr.f32.mxu0 %v17682_v2  ;;  %v14176_v49 = vsel %vm301_vm0, %v287_v16, 0  ;;  %v14194_v16 = vand.u32 4294901760, %v14187_v34 }
  0xc2   : > { %17872 = vst [vmem:[#allocation43_spill] sm:$0xff] %v14194_v16 }
  0xc3   : > { %1220 = vmatmul.mubr.f32.gmra.mrb[28].mxu0 %v13837_v31 }
  0xc4   : > { %1225 = vmatprep.mubr.f32.mxu0 %v17682_v2 }
  0xc7   : > { %1227 = vmatmul.mubr.f32.gmra.mrb[30].mxu0 %v13851_v54  ;;  %v286_v54 = vld [vmem:[%s17532_s1 + $0x118] sm:$0xff] }
  0xc8   : > { %1232 = vmatprep.mubr.f32.mxu0 %v17682_v2  ;;  %v14165_v31 = vsel %vm301_vm0, %v286_v54, 0  ;;  %v14183_v54 = vand.u32 4294901760, %v14176_v49 }
  0xca   : > { %17871 = vst [vmem:[#allocation42_spill] sm:$0xff] %v14183_v54 }
  0xcb   : > { %1234 = vmatmul.mubr.f32.gmra.mrb[32].mxu0 %v13866_v25 }
  0xcc   : > { %1239 = vmatprep.mubr.f32.mxu0 %v17682_v2 }
  0xcf   : > { %1241 = vmatmul.mubr.f32.gmra.mrb[34].mxu0 %v13872_v40  ;;  %v285_v40 = vld [vmem:[%s17532_s1 + $0x110] sm:$0xff] }
  0xd0   : > { %1246 = vmatprep.mubr.f32.mxu0 %v17682_v2  ;;  %v14154_v25 = vsel %vm301_vm0, %v285_v40, 0  ;;  %v14172_v40 = vand.u32 4294901760, %v14165_v31 }
  0xd2   : > { %17870 = vst [vmem:[#allocation41_spill] sm:$0xff] %v14172_v40 }
  0xd3   : > { %1248 = vmatmul.mubr.f32.gmra.mrb[36].mxu0 %v13886_v55 }
  0xd4   : > { %1253 = vmatprep.mubr.f32.mxu0 %v17682_v2 }
  0xd7   : > { %1255 = vmatmul.mubr.f32.gmra.mrb[38].mxu0 %v13907_v32  ;;  %v284_v32 = vld [vmem:[%s17532_s1 + $0x108] sm:$0xff] }
  0xd8   : > { %1260 = vmatprep.mubr.f32.mxu0 %v17682_v2  ;;  %v14143_v55 = vsel %vm301_vm0, %v284_v32, 0  ;;  %v14161_v32 = vand.u32 4294901760, %v14154_v25 }
  0xda   : > { %17869 = vst [vmem:[#allocation40_spill] sm:$0xff] %v14161_v32 }
  0xdb   : > { %1262 = vmatmul.mubr.f32.gmra.mrb[40].mxu0 %v13921_v59 }
  0xdc   : > { %1267 = vmatprep.mubr.f32.mxu0 %v17682_v2 }
  0xdf   : > { %1269 = vmatmul.mubr.f32.gmra.mrb[42].mxu0 %v13935_v42  ;;  %v283_v42 = vld [vmem:[%s17532_s1 + $0x100] sm:$0xff] }
  0xe0   : > { %1274 = vmatprep.mubr.f32.mxu0 %v17682_v2  ;;  %v14132_v59 = vsel %vm301_vm0, %v283_v42, 0  ;;  %v14150_v42 = vand.u32 4294901760, %v14143_v55 }
  0xe2   : > { %17868 = vst [vmem:[#allocation39_spill] sm:$0xff] %v14150_v42 }
  0xe3   : > { %1276 = vmatmul.mubr.f32.gmra.mrb[44].mxu0 %v13950_v19 }
  0xe4   : > { %1281 = vmatprep.mubr.f32.mxu0 %v17682_v2 }
  0xe7   : > { %1283 = vmatmul.mubr.f32.gmra.mrb[46].mxu0 %v13956_v50  ;;  %v282_v50 = vld [vmem:[%s17532_s1 + $0xf8] sm:$0xff] }
  0xe8   : > { %1288 = vmatprep.mubr.f32.mxu0 %v17682_v2  ;;  %v14121_v19 = vsel %vm301_vm0, %v282_v50, 0  ;;  %v14139_v50 = vand.u32 4294901760, %v14132_v59 }
  0xea   : > { %17867 = vst [vmem:[#allocation38_spill] sm:$0xff] %v14139_v50 }
  0xeb   : > { %1290 = vmatmul.mubr.f32.gmra.mrb[48].mxu0 %v13970_v1 }
  0xec   : > { %1295 = vmatprep.mubr.f32.mxu0 %v17682_v2 }
  0xef   : > { %1297 = vmatmul.mubr.f32.gmra.mrb[50].mxu0 %v13988_v45  ;;  %v281_v45 = vld [vmem:[%s17532_s1 + $0xf0] sm:$0xff] }
  0xf0   : > { %1302 = vmatprep.mubr.f32.mxu0 %v17682_v2  ;;  %v14110_v1 = vsel %vm301_vm0, %v281_v45, 0  ;;  %v14128_v45 = vand.u32 4294901760, %v14121_v19 }
  0xf1   : > { %v14117_v21 = vand.u32 4294901760, %v14110_v1 }
  0xf2   : > { %17866 = vst [vmem:[#allocation37_spill] sm:$0xff] %v14128_v45 }
  0xf3   : > { %1304 = vmatmul.mubr.f32.gmra.mrb[52].mxu0 %v14073_v18 }
  0xf4   : > { %1309 = vmatprep.mubr.f32.mxu0 %v17682_v2 }
  0xf7   : > { %1311 = vmatmul.mubr.f32.gmra.mrb[54].mxu0 %v14084_v39 }
  0xf8   : > { %1316 = vmatprep.mubr.f32.mxu0 %v17682_v2 }
  0xfb   : > { %1318 = vmatmul.mubr.f32.gmra.mrb[56].mxu0 %v14095_v41 }
  0xfc   : > { %1323 = vmatprep.mubr.f32.mxu0 %v17682_v2 }
  0xff   : > { %1325 = vmatmul.mubr.f32.gmra.mrb[58].mxu0 %v14106_v57 }
 0x100   : > { %1330 = vmatprep.mubr.f32.mxu0 %v17682_v2 }
 0x103   : > { %1332 = vmatmul.mubr.f32.gmra.mrb[60].mxu0 %v14117_v21 }
 0x104   : > { %1337 = vmatprep.mubr.f32.mxu0 %v17682_v2 }
 0x107   : > { %1339 = vmatmul.mubr.f32.gmra.mrb[62].mxu0 %v14128_v45 }
 0x108   : > { %1344 = vmatprep.mubr.f32.mxu0 %v17682_v2 }
 0x10b   : > { %1346 = vmatmul.mubr.f32.gmra.mrb[64].mxu0 %v14139_v50 }
 0x10c   : > { %1351 = vmatprep.mubr.f32.mxu0 %v17682_v2 }
 0x10f   : > { %1353 = vmatmul.mubr.f32.gmra.mrb[66].mxu0 %v14150_v42 }
 0x110   : > { %1358 = vmatprep.mubr.f32.mxu0 %v17682_v2 }
 0x113   : > { %1360 = vmatmul.mubr.f32.gmra.mrb[68].mxu0 %v14161_v32 }
 0x114   : > { %1365 = vmatprep.mubr.f32.mxu0 %v17682_v2 }
 0x117   : > { %1367 = vmatmul.mubr.f32.gmra.mrb[70].mxu0 %v14172_v40 }
 0x118   : > { %1372 = vmatprep.mubr.f32.mxu0 %v17682_v2 }
 0x11b   : > { %1374 = vmatmul.mubr.f32.gmra.mrb[72].mxu0 %v14183_v54 }
 0x11c   : > { %1379 = vmatprep.mubr.f32.mxu0 %v17682_v2 }
 0x11f   : > { %1381 = vmatmul.mubr.f32.gmra.mrb[74].mxu0 %v14194_v16 }
 0x120   : > { %1386 = vmatprep.mubr.f32.mxu0 %v17682_v2 }
 0x123   : > { %1388 = vmatmul.mubr.f32.gmra.mrb[76].mxu0 %v14205_v38 }
 0x124   : > { %1393 = vmatprep.mubr.f32.mxu0 %v17682_v2 }
 0x127   : > { %1395 = vmatmul.mubr.f32.gmra.mrb[78].mxu0 %v14216_v4 }
 0x128   : > { %1400 = vmatprep.mubr.f32.mxu0 %v17682_v2 }
 0x12b   : > { %1402 = vmatmul.mubr.f32.gmra.mrb[80].mxu0 %v14227_v53 }
 0x12c   : > { %1407 = vmatprep.mubr.f32.mxu0 %v17682_v2 }
 0x12f   : > { %1409 = vmatmul.mubr.f32.gmra.mrb[82].mxu0 %v14238_v36  ;;  %v14264_v36 = vsel %vm301_vm0, %v295_v11, 0 }
 0x130   : > { %1414 = vmatprep.mubr.f32.mxu0 %v17682_v2  ;;  %17882 = vst [vmem:[#allocation53_spill] sm:$0xff] %v14264_v36  ;;  %v14271_v30 = vand.u32 4294901760, %v14264_v36  ;;  %v298_v36 = vld [vmem:[%s17532_s1 + $0x178] sm:$0xff] }
 0x132   : > { %17883 = vst [vmem:[#allocation54_spill] sm:$0xff] %v14271_v30 }
 0x133   : > { %1416 = vmatmul.mubr.f32.gmra.mrb[84].mxu0 %v14249_v15  ;;  %v14275_v15 = vsel %vm301_vm0, %v296_v7, 0 }
 0x134   : > { %1421 = vmatprep.mubr.f32.mxu0 %v17682_v2  ;;  %17884 = vst [vmem:[#allocation55_spill] sm:$0xff] %v14275_v15  ;;  %v14282_v11 = vand.u32 4294901760, %v14275_v15 }
 0x136   : > { %17885 = vst [vmem:[#allocation56_spill] sm:$0xff] %v14282_v11 }
 0x137   : > { %1423 = vmatmul.mubr.f32.gmra.mrb[86].mxu0 %v14260_v8  ;;  %v14286_v8 = vsel %vm301_vm0, %v297_v63, 0  ;;  %v17887_v63 = vand.u32 4294901760, %v13742_v62  ;;  %v17888_v62 = vld [vmem:[#allocation28_spill] sm:$0xff] }
 0x138   : > { %1428 = vmatprep.mubr.f32.mxu0 %v17682_v2  ;;  %v14293_v7 = vand.u32 4294901760, %v14286_v8 }
 0x13a   : > { %17886 = vst [vmem:[#allocation57_spill] sm:$0xff] %v14293_v7 }
 0x13b   : > { %1430 = vmatmul.mubr.f32.gmra.mrb[88].mxu0 %v14271_v30  ;;  %v14297_v30 = vsel %vm301_vm0, %v298_v36, 0  ;;  %v17889_v36 = vld [vmem:[#allocation30_spill] sm:$0xff] }
 0x13c   : > { %1435 = vmatprep.mubr.f32.mxu0 %v17682_v2  ;;  %v14301_v15 = vand.u32 4294901760, %v14297_v30 }
 0x13f   : > { %1437 = vmatmul.mubr.f32.gmra.mrb[90].mxu0 %v14282_v11 }
 0x140   : > { %1442 = vmatprep.mubr.f32.mxu0 %v17682_v2 }
 0x143   : > { %1444 = vmatmul.mubr.f32.gmra.mrb[92].mxu0 %v14293_v7 }
 0x144   : > { %1449 = vmatprep.mubr.f32.mxu0 %v17682_v2 }
 0x147   : > { %1451 = vmatmul.mubr.f32.gmra.mrb[94].mxu0 %v14301_v15 }
 0x148   : > { %1525 = vmatprep.mubr.f32.mxu0 %v17682_v2 }
 0x14b   : > { %1528 = vmatmul.mubr.f32.vlgmr.msra.gmra.mrb[0].mxu0 %v13644_v13 }
 0x14c   : > { %1533 = vmatprep.mubr.f32.mxu0 %v17682_v2  ;;  %1913 = vmatpush1.msra.mxu0 %v13669_v27  ;;  %v14368_v27 = vsub.f32 %v14077_v5, %v14084_v39  ;;  %v14386_v5 = vsub.f32 %v14110_v1, %v14117_v21  ;;  %v14404_v1 = vsub.f32 %v14143_v55, %v14150_v42 }
 0x14d   : > { %2412 = vmatprep.subr.mxu0 %v17887_v63  ;;  %v14362_v63 = vsub.f32 %v14066_v9, %v14073_v18  ;;  %v14380_v9 = vsub.f32 %v14099_v37, %v14106_v57  ;;  %v14398_v37 = vsub.f32 %v14132_v59, %v14139_v50  ;;  %v14416_v59 = vsub.f32 %v14165_v31, %v14172_v40 }
 0x14e   : > { %v14422_v55 = vsub.f32 %v14176_v49, %v14183_v54  ;;  %v14434_v31 = vsub.f32 %v14198_v61, %v14205_v38  ;;  %v14440_v49 = vsub.f32 %v14209_v46, %v14216_v4  ;;  %v17890_v61 = vld [vmem:[#allocation48_spill] sm:$0xff]  ;;  %v17891_v38 = vld [vmem:[#allocation47_spill] sm:$0xff]  ;;  %v17892_v46 = vld [vmem:[#allocation50_spill] sm:$0xff] }
 0x14f   : > { %1536 = vmatmul.mubr.f32.gmra.mrb[2].mxu0 %v13647_v14  ;;  %v17893_v4 = vld [vmem:[#allocation49_spill] sm:$0xff] }
 0x150   : > { %1541 = vmatprep.mubr.f32.mxu0 %v17682_v2  ;;  %v14458_v54 = vsub.f32 %v17893_v4, %v17892_v46  ;;  %v17898_v4 = vld [vmem:[#allocation55_spill] sm:$0xff] }
 0x151   : > { %v14476_v46 = vsub.f32 %v17898_v4, %v14282_v11  ;;  %v17899_v4 = vand.u32 4294901760, %v13644_v13  ;;  %v17902_v11 = vld [vmem:[#allocation11_spill] sm:$0xff]  ;;  %v17905_v13 = vand.u32 4294901760, %v13672_v28 }
 0x153   : > { %1544 = vmatmul.mubr.f32.gmra.mrb[4].mxu0 %v13660_v20 }
 0x154   : > { %1549 = vmatprep.mubr.f32.mxu0 %v17682_v2 }
 0x157   : > { %1552 = vmatmul.mubr.f32.gmra.mrb[6].mxu0 %v13672_v28  ;;  %v17909_v28 = vand.u32 4294901760, %v13737_v60 }
 0x158   : > { %1557 = vmatprep.mubr.f32.mxu0 %v17682_v2 }
 0x15b   : > { %1560 = vmatmul.mubr.f32.gmra.mrb[8].mxu0 %v13689_v35 }
 0x15c   : > { %1565 = vmatprep.mubr.f32.mxu0 %v17682_v2 }
 0x15f   : > { %1568 = vmatmul.mubr.f32.gmra.mrb[10].mxu0 %v13705_v43 }
 0x160   : > { %1573 = vmatprep.mubr.f32.mxu0 %v17682_v2 }
 0x163   : > { %1576 = vmatmul.mubr.f32.gmra.mrb[12].mxu0 %v13722_v52 }
 0x164   : > { %1581 = vmatprep.mubr.f32.mxu0 %v17682_v2 }
 0x167   : > { %1584 = vmatmul.mubr.f32.gmra.mrb[14].mxu0 %v13737_v60  ;;  %v17913_v60 = vand.u32 4294901760, %v13809_v56 }
 0x168   : > { %1589 = vmatprep.mubr.f32.mxu0 %v17682_v2 }
 0x16b   : > { %1592 = vmatmul.mubr.f32.gmra.mrb[16].mxu0 %v13760_v10 }
 0x16c   : > { %1597 = vmatprep.mubr.f32.mxu0 %v17682_v2 }
 0x16f   : > { %1600 = vmatmul.mubr.f32.gmra.mrb[18].mxu0 %v13774_v23 }
 0x170   : > { %1605 = vmatprep.mubr.f32.mxu0 %v17682_v2 }
 0x173   : > { %1608 = vmatmul.mubr.f32.gmra.mrb[20].mxu0 %v13796_v47 }
 0x174   : > { %1613 = vmatprep.mubr.f32.mxu0 %v17682_v2 }
 0x177   : > { %1616 = vmatmul.mubr.f32.gmra.mrb[22].mxu0 %v13809_v56  ;;  %v17917_v56 = vand.u32 4294901760, %v13864_v24 }
 0x178   : > { %1621 = vmatprep.mubr.f32.mxu0 %v17682_v2 }
 0x17b   : > { %1624 = vmatmul.mubr.f32.gmra.mrb[24].mxu0 %v13817_v0 }
 0x17c   : > { %1629 = vmatprep.mubr.f32.mxu0 %v17682_v2 }
 0x17f   : > { %1632 = vmatmul.mubr.f32.gmra.mrb[26].mxu0 %v13835_v26 }
 0x180   : > { %1637 = vmatprep.mubr.f32.mxu0 %v17682_v2 }
 0x183   : > { %1640 = vmatmul.mubr.f32.gmra.mrb[28].mxu0 %v13849_v51 }
 0x184   : > { %1645 = vmatprep.mubr.f32.mxu0 %v17682_v2 }
 0x187   : > { %1648 = vmatmul.mubr.f32.gmra.mrb[30].mxu0 %v13864_v24  ;;  %v17921_v24 = vand.u32 4294901760, %v17888_v62 }
 0x188   : > { %1653 = vmatprep.mubr.f32.mxu0 %v17682_v2 }
 0x18b   : > { %1656 = vmatmul.mubr.f32.gmra.mrb[32].mxu0 %v13880_v48 }
 0x18c   : > { %1661 = vmatprep.mubr.f32.mxu0 %v17682_v2 }
 0x18f   : > { %1664 = vmatmul.mubr.f32.gmra.mrb[34].mxu0 %v13893_v17 }
 0x190   : > { %1669 = vmatprep.mubr.f32.mxu0 %v17682_v2 }
 0x193   : > { %1672 = vmatmul.mubr.f32.gmra.mrb[36].mxu0 %v13901_v44 }
 0x194   : > { %1677 = vmatprep.mubr.f32.mxu0 %v17682_v2 }
 0x197   : > { %1680 = vmatmul.mubr.f32.gmra.mrb[38].mxu0 %v17888_v62 }
 0x198   : > { %1685 = vmatprep.mubr.f32.mxu0 %v17682_v2 }
 0x19b   : > { %1688 = vmatmul.mubr.f32.gmra.mrb[40].mxu0 %v17889_v36 }
 0x19c   : > { %1693 = vmatprep.mubr.f32.mxu0 %v17682_v2 }
 0x19f   : > { %1696 = vmatmul.mubr.f32.gmra.mrb[42].mxu0 %v13948_v3 }
 0x1a0   : > { %1701 = vmatprep.mubr.f32.mxu0 %v17682_v2 }
 0x1a3   : > { %1704 = vmatmul.mubr.f32.gmra.mrb[44].mxu0 %v13964_v6 }
 0x1a4   : > { %1709 = vmatprep.mubr.f32.mxu0 %v17682_v2 }
 0x1a7   : > { %1712 = vmatmul.mubr.f32.gmra.mrb[46].mxu0 %v13977_v12 }
 0x1a8   : > { %1717 = vmatprep.mubr.f32.mxu0 %v17682_v2 }
 0x1ab   : > { %1720 = vmatmul.mubr.f32.gmra.mrb[48].mxu0 %v13982_v58  ;;  %v14374_v58 = vsub.f32 %v14088_v22, %v14095_v41  ;;  %v14392_v22 = vsub.f32 %v14121_v19, %v14128_v45  ;;  %v14410_v19 = vsub.f32 %v14154_v25, %v14161_v32  ;;  %v14428_v25 = vsub.f32 %v14187_v34, %v14194_v16 }
 0x1ac   : > { %1725 = vmatprep.mubr.f32.mxu0 %v17682_v2  ;;  %v14446_v34 = vsub.f32 %v14220_v29, %v14227_v53  ;;  %v14452_v16 = vsub.f32 %v17891_v38, %v17890_v61  ;;  %v17894_v29 = vld [vmem:[#allocation52_spill] sm:$0xff]  ;;  %v17895_v53 = vld [vmem:[#allocation51_spill] sm:$0xff]  ;;  %v17896_v38 = vld [vmem:[#allocation54_spill] sm:$0xff] }
 0x1ad   : > { %v14464_v40 = vsub.f32 %v17895_v53, %v17894_v29  ;;  %v17897_v61 = vld [vmem:[#allocation53_spill] sm:$0xff]  ;;  %v14482_v53 = vsub.f32 %v14286_v8, %v14293_v7  ;;  %v17900_v8 = vld [vmem:[#allocation16_spill] sm:$0xff] }
 0x1ae   : > { %v14470_v32 = vsub.f32 %v17897_v61, %v17896_v38  ;;  %v14488_v61 = vsub.f32 %v14297_v30, %v14301_v15  ;;  %v17901_v7 = vand.u32 4294901760, %v17900_v8  ;;  %v17903_v38 = vand.u32 4294901760, %v13647_v14 }
 0x1af   : > { %1728 = vmatmul.mubr.f32.gmra.mrb[50].mxu0 %v13996_v33  ;;  %v17904_v30 = vand.u32 4294901760, %v13660_v20  ;;  %v17907_v14 = vand.u32 4294901760, %v13705_v43  ;;  %v17908_v20 = vand.u32 4294901760, %v13722_v52  ;;  %v17911_v43 = vand.u32 4294901760, %v13774_v23 }
 0x1b0   : > { %1733 = vmatprep.mubr.f32.mxu0 %v17682_v2  ;;  %v17912_v52 = vand.u32 4294901760, %v13796_v47  ;;  %v17915_v23 = vand.u32 4294901760, %v13835_v26  ;;  %v17916_v47 = vand.u32 4294901760, %v13849_v51  ;;  %v17919_v26 = vand.u32 4294901760, %v13893_v17 }
 0x1b1   : > { %v17920_v51 = vand.u32 4294901760, %v13901_v44  ;;  %v17923_v17 = vand.u32 4294901760, %v13948_v3  ;;  %v17924_v44 = vand.u32 4294901760, %v13964_v6  ;;  %v17928_v3 = vand.u32 4294901760, %v13996_v33 }
 0x1b2   : > { %v17677_v6 = vand.u32 4294901760, %v14368_v27  ;;  %v17675_v33 = vand.u32 4294901760, %v14380_v9  ;;  %v17673_v8 = vand.u32 4294901760, %v14392_v22 }
 0x1b3   : > { %1736 = vmatmul.mubr.f32.gmra.mrb[52].mxu0 %v14362_v63 }
 0x1b4   : > { %1741 = vmatprep.mubr.f32.mxu0 %v17682_v2 }
 0x1b7   : > { %1744 = vmatmul.mubr.f32.gmra.mrb[54].mxu0 %v14368_v27 }
 0x1b8   : > { %1749 = vmatprep.mubr.f32.mxu0 %v17682_v2 }
 0x1bb   : > { %1752 = vmatmul.mubr.f32.gmra.mrb[56].mxu0 %v14374_v58 }
 0x1bc   : > { %1757 = vmatprep.mubr.f32.mxu0 %v17682_v2 }
 0x1bf   : > { %1760 = vmatmul.mubr.f32.gmra.mrb[58].mxu0 %v14380_v9 }
 0x1c0   : > { %1765 = vmatprep.mubr.f32.mxu0 %v17682_v2 }
 0x1c3   : > { %1768 = vmatmul.mubr.f32.gmra.mrb[60].mxu0 %v14386_v5 }
 0x1c4   : > { %1773 = vmatprep.mubr.f32.mxu0 %v17682_v2 }
 0x1c7   : > { %1776 = vmatmul.mubr.f32.gmra.mrb[62].mxu0 %v14392_v22 }
 0x1c8   : > { %1781 = vmatprep.mubr.f32.mxu0 %v17682_v2 }
 0x1cb   : > { %1784 = vmatmul.mubr.f32.gmra.mrb[64].mxu0 %v14398_v37 }
 0x1cc   : > { %1789 = vmatprep.mubr.f32.mxu0 %v17682_v2 }
 0x1cf   : > { %1792 = vmatmul.mubr.f32.gmra.mrb[66].mxu0 %v14404_v1 }
 0x1d0   : > { %1797 = vmatprep.mubr.f32.mxu0 %v17682_v2 }
 0x1d3   : > { %1800 = vmatmul.mubr.f32.gmra.mrb[68].mxu0 %v14410_v19 }
 0x1d4   : > { %1805 = vmatprep.mubr.f32.mxu0 %v17682_v2 }
 0x1d7   : > { %1808 = vmatmul.mubr.f32.gmra.mrb[70].mxu0 %v14416_v59 }
 0x1d8   : > { %1813 = vmatprep.mubr.f32.mxu0 %v17682_v2 }
 0x1db   : > { %1816 = vmatmul.mubr.f32.gmra.mrb[72].mxu0 %v14422_v55 }
 0x1dc   : > { %1821 = vmatprep.mubr.f32.mxu0 %v17682_v2 }
 0x1df   : > { %1824 = vmatmul.mubr.f32.gmra.mrb[74].mxu0 %v14428_v25 }
 0x1e0   : > { %1829 = vmatprep.mubr.f32.mxu0 %v17682_v2 }
 0x1e3   : > { %1832 = vmatmul.mubr.f32.gmra.mrb[76].mxu0 %v14434_v31 }
 0x1e4   : > { %1837 = vmatprep.mubr.f32.mxu0 %v17682_v2 }
 0x1e7   : > { %1840 = vmatmul.mubr.f32.gmra.mrb[78].mxu0 %v14440_v49 }
 0x1e8   : > { %1845 = vmatprep.mubr.f32.mxu0 %v17682_v2 }
 0x1eb   : > { %1848 = vmatmul.mubr.f32.gmra.mrb[80].mxu0 %v14446_v34 }
 0x1ec   : > { %1853 = vmatprep.mubr.f32.mxu0 %v17682_v2 }
 0x1ef   : > { %1856 = vmatmul.mubr.f32.gmra.mrb[82].mxu0 %v14452_v16 }
 0x1f0   : > { %1861 = vmatprep.mubr.f32.mxu0 %v17682_v2 }
 0x1f3   : > { %1864 = vmatmul.mubr.f32.gmra.mrb[84].mxu0 %v14458_v54 }
 0x1f4   : > { %1869 = vmatprep.mubr.f32.mxu0 %v17682_v2 }
 0x1f7   : > { %1872 = vmatmul.mubr.f32.gmra.mrb[86].mxu0 %v14464_v40 }
 0x1f8   : > { %1877 = vmatprep.mubr.f32.mxu0 %v17682_v2 }
 0x1fb   : > { %1880 = vmatmul.mubr.f32.gmra.mrb[88].mxu0 %v14470_v32 }
 0x1fc   : > { %1885 = vmatprep.mubr.f32.mxu0 %v17682_v2 }
 0x1ff   : > { %1888 = vmatmul.mubr.f32.gmra.mrb[90].mxu0 %v14476_v46 }
 0x200   : > { %1893 = vmatprep.mubr.f32.mxu0 %v17682_v2 }
 0x203   : > { %1896 = vmatmul.mubr.f32.gmra.mrb[92].mxu0 %v14482_v53 }
 0x204   : > { %1901 = vmatprep.mubr.f32.mxu0 %v17682_v2 }
 0x207   : > { %1904 = vmatmul.mubr.f32.gmra.mrb[94].mxu0 %v14488_v61 }
 0x208   : > { %1976 = vmatprep.mubr.f32.mxu0 %v17682_v2 }
 0x20b   : > { %1980 = vmatmul.mubr.f32.vlgmr.msra.gmra.mrb[0].mxu0 %v17899_v4  ;;  %v17906_v4 = vand.u32 4294901760, %v13689_v35  ;;  %v17910_v35 = vand.u32 4294901760, %v13760_v10  ;;  %v17914_v10 = vand.u32 4294901760, %v13817_v0  ;;  %v17918_v0 = vand.u32 4294901760, %v13880_v48 }
 0x20c   : > { %1985 = vmatprep.mubr.f32.mxu0 %v17682_v2  ;;  %2416 = vmatpush1.msra.mxu0 %v17901_v7  ;;  %v17922_v48 = vand.u32 4294901760, %v17889_v36  ;;  %v17926_v7 = vld [vmem:[#allocation35_spill] sm:$0xff]  ;;  %v17678_v36 = vand.u32 4294901760, %v14362_v63 }
 0x20d   : > { %2817 = vmatprep.subr.mxu0 %v17902_v11  ;;  %v17925_v11 = vand.u32 4294901760, %v13977_v12  ;;  %v17927_v62 = vand.u32 4294901760, %v17926_v7  ;;  %v17676_v12 = vand.u32 4294901760, %v14374_v58  ;;  %v17935_v7 = vld [vmem:[#allocation12_spill] sm:$0xff] }
 0x20f   : > { %1989 = vmatmul.mubr.f32.gmra.mrb[2].mxu0 %v17903_v38  ;;  %v17674_v38 = vand.u32 4294901760, %v14386_v5 }
 0x210   : > { %1994 = vmatprep.mubr.f32.mxu0 %v17682_v2 }
 0x213   : > { %1998 = vmatmul.mubr.f32.gmra.mrb[4].mxu0 %v17904_v30  ;;  %v17672_v30 = vand.u32 4294901760, %v14398_v37 }
 0x214   : > { %2003 = vmatprep.mubr.f32.mxu0 %v17682_v2 }
 0x217   : > { %2007 = vmatmul.mubr.f32.gmra.mrb[6].mxu0 %v17905_v13  ;;  %v17671_v13 = vand.u32 4294901760, %v14404_v1 }
 0x218   : > { %2012 = vmatprep.mubr.f32.mxu0 %v17682_v2 }
 0x21b   : > { %2016 = vmatmul.mubr.f32.gmra.mrb[8].mxu0 %v17906_v4  ;;  %v17670_v4 = vand.u32 4294901760, %v14410_v19 }
 0x21c   : > { %2021 = vmatprep.mubr.f32.mxu0 %v17682_v2 }
 0x21f   : > { %2025 = vmatmul.mubr.f32.gmra.mrb[10].mxu0 %v17907_v14  ;;  %v17669_v14 = vand.u32 4294901760, %v14416_v59 }
 0x220   : > { %2030 = vmatprep.mubr.f32.mxu0 %v17682_v2 }
 0x223   : > { %2034 = vmatmul.mubr.f32.gmra.mrb[12].mxu0 %v17908_v20  ;;  %v17668_v20 = vand.u32 4294901760, %v14422_v55 }
 0x224   : > { %2039 = vmatprep.mubr.f32.mxu0 %v17682_v2 }
 0x227   : > { %2043 = vmatmul.mubr.f32.gmra.mrb[14].mxu0 %v17909_v28  ;;  %v17667_v28 = vand.u32 4294901760, %v14428_v25 }
 0x228   : > { %2048 = vmatprep.mubr.f32.mxu0 %v17682_v2 }
 0x22b   : > { %2052 = vmatmul.mubr.f32.gmra.mrb[16].mxu0 %v17910_v35  ;;  %v17666_v35 = vand.u32 4294901760, %v14434_v31 }
 0x22c   : > { %2057 = vmatprep.mubr.f32.mxu0 %v17682_v2 }
 0x22f   : > { %2061 = vmatmul.mubr.f32.gmra.mrb[18].mxu0 %v17911_v43  ;;  %v17665_v43 = vand.u32 4294901760, %v14440_v49 }
 0x230   : > { %2066 = vmatprep.mubr.f32.mxu0 %v17682_v2 }
 0x233   : > { %2070 = vmatmul.mubr.f32.gmra.mrb[20].mxu0 %v17912_v52  ;;  %v17664_v52 = vand.u32 4294901760, %v14446_v34 }
 0x234   : > { %2075 = vmatprep.mubr.f32.mxu0 %v17682_v2 }
 0x237   : > { %2079 = vmatmul.mubr.f32.gmra.mrb[22].mxu0 %v17913_v60  ;;  %v17663_v60 = vand.u32 4294901760, %v14452_v16 }
 0x238   : > { %2084 = vmatprep.mubr.f32.mxu0 %v17682_v2 }
 0x23b   : > { %2088 = vmatmul.mubr.f32.gmra.mrb[24].mxu0 %v17914_v10  ;;  %v17662_v10 = vand.u32 4294901760, %v14458_v54 }
 0x23c   : > { %2093 = vmatprep.mubr.f32.mxu0 %v17682_v2 }
 0x23f   : > { %2097 = vmatmul.mubr.f32.gmra.mrb[26].mxu0 %v17915_v23  ;;  %v17661_v23 = vand.u32 4294901760, %v14464_v40 }
 0x240   : > { %2102 = vmatprep.mubr.f32.mxu0 %v17682_v2 }
 0x243   : > { %2106 = vmatmul.mubr.f32.gmra.mrb[28].mxu0 %v17916_v47  ;;  %v17660_v47 = vand.u32 4294901760, %v14470_v32 }
 0x244   : > { %2111 = vmatprep.mubr.f32.mxu0 %v17682_v2 }
 0x247   : > { %2115 = vmatmul.mubr.f32.gmra.mrb[30].mxu0 %v17917_v56  ;;  %v17659_v56 = vand.u32 4294901760, %v14476_v46 }
 0x248   : > { %2120 = vmatprep.mubr.f32.mxu0 %v17682_v2 }
 0x24b   : > { %2124 = vmatmul.mubr.f32.gmra.mrb[32].mxu0 %v17918_v0  ;;  %v17658_v0 = vand.u32 4294901760, %v14482_v53 }
 0x24c   : > { %2129 = vmatprep.mubr.f32.mxu0 %v17682_v2 }
 0x24f   : > { %2133 = vmatmul.mubr.f32.gmra.mrb[34].mxu0 %v17919_v26  ;;  %v17657_v26 = vand.u32 4294901760, %v14488_v61 }
 0x250   : > { %2138 = vmatprep.mubr.f32.mxu0 %v17682_v2 }
 0x253   : > { %2142 = vmatmul.mubr.f32.gmra.mrb[36].mxu0 %v17920_v51  ;;  %v17929_v51 = vld [vmem:[#allocation5_spill] sm:$0xff] }
 0x254   : > { %2147 = vmatprep.mubr.f32.mxu0 %v17682_v2 }
 0x257   : > { %2151 = vmatmul.mubr.f32.gmra.mrb[38].mxu0 %v17921_v24  ;;  %v17930_v24 = vld [vmem:[#allocation9_spill] sm:$0xff] }
 0x258   : > { %2156 = vmatprep.mubr.f32.mxu0 %v17682_v2 }
 0x25b   : > { %2160 = vmatmul.mubr.f32.gmra.mrb[40].mxu0 %v17922_v48  ;;  %v17931_v48 = vld [vmem:[#allocation6_spill] sm:$0xff] }
 0x25c   : > { %2165 = vmatprep.mubr.f32.mxu0 %v17682_v2 }
 0x25f   : > { %2169 = vmatmul.mubr.f32.gmra.mrb[42].mxu0 %v17923_v17  ;;  %v17932_v17 = vld [vmem:[#allocation7_spill] sm:$0xff] }
 0x260   : > { %2174 = vmatprep.mubr.f32.mxu0 %v17682_v2 }
 0x263   : > { %2178 = vmatmul.mubr.f32.gmra.mrb[44].mxu0 %v17924_v44  ;;  %v17933_v44 = vld [vmem:[#allocation8_spill] sm:$0xff] }
 0x264   : > { %2183 = vmatprep.mubr.f32.mxu0 %v17682_v2 }
 0x267   : > { %2187 = vmatmul.mubr.f32.gmra.mrb[46].mxu0 %v17925_v11  ;;  %v17934_v11 = vld [vmem:[#allocation10_spill] sm:$0xff] }
 0x268   : > { %2192 = vmatprep.mubr.f32.mxu0 %v17682_v2 }
 0x26b   : > { %2196 = vmatmul.mubr.f32.gmra.mrb[48].mxu0 %v17927_v62  ;;  %v17936_v62 = vld [vmem:[#allocation13_spill] sm:$0xff] }
 0x26c   : > { %2201 = vmatprep.mubr.f32.mxu0 %v17682_v2 }
 0x26f   : > { %2205 = vmatmul.mubr.f32.gmra.mrb[50].mxu0 %v17928_v3  ;;  %v17937_v3 = vld [vmem:[#allocation14_spill] sm:$0xff] }
 0x270   : > { %2210 = vmatprep.mubr.f32.mxu0 %v17682_v2 }
 0x273   : > { %2214 = vmatmul.mubr.f32.gmra.mrb[52].mxu0 %v17678_v36  ;;  %v17960_v36 = vld [vmem:[#allocation44_spill] sm:$0xff] }
 0x274   : > { %2219 = vmatprep.mubr.f32.mxu0 %v17682_v2 }
 0x277   : > { %2223 = vmatmul.mubr.f32.gmra.mrb[54].mxu0 %v17677_v6  ;;  %v17959_v6 = vld [vmem:[#allocation43_spill] sm:$0xff] }
 0x278   : > { %2228 = vmatprep.mubr.f32.mxu0 %v17682_v2 }
 0x27b   : > { %2232 = vmatmul.mubr.f32.gmra.mrb[56].mxu0 %v17676_v12  ;;  %v17958_v12 = vld [vmem:[#allocation42_spill] sm:$0xff] }
 0x27c   : > { %2237 = vmatprep.mubr.f32.mxu0 %v17682_v2 }
 0x27f   : > { %2241 = vmatmul.mubr.f32.gmra.mrb[58].mxu0 %v17675_v33  ;;  %v17957_v33 = vld [vmem:[#allocation41_spill] sm:$0xff] }
 0x280   : > { %2246 = vmatprep.mubr.f32.mxu0 %v17682_v2 }
 0x283   : > { %2250 = vmatmul.mubr.f32.gmra.mrb[60].mxu0 %v17674_v38  ;;  %v17956_v38 = vld [vmem:[#allocation40_spill] sm:$0xff] }
 0x284   : > { %2255 = vmatprep.mubr.f32.mxu0 %v17682_v2 }
 0x287   : > { %2259 = vmatmul.mubr.f32.gmra.mrb[62].mxu0 %v17673_v8  ;;  %v17955_v8 = vld [vmem:[#allocation36_spill] sm:$0xff] }
 0x288   : > { %2264 = vmatprep.mubr.f32.mxu0 %v17682_v2 }
 0x28b   : > { %2268 = vmatmul.mubr.f32.gmra.mrb[64].mxu0 %v17672_v30  ;;  %v17954_v30 = vld [vmem:[#allocation34_spill] sm:$0xff] }
 0x28c   : > { %2273 = vmatprep.mubr.f32.mxu0 %v17682_v2 }
 0x28f   : > { %2277 = vmatmul.mubr.f32.gmra.mrb[66].mxu0 %v17671_v13  ;;  %v17953_v13 = vld [vmem:[#allocation33_spill] sm:$0xff] }
 0x290   : > { %2282 = vmatprep.mubr.f32.mxu0 %v17682_v2 }
 0x293   : > { %2286 = vmatmul.mubr.f32.gmra.mrb[68].mxu0 %v17670_v4  ;;  %v17952_v4 = vld [vmem:[#allocation32_spill] sm:$0xff] }
 0x294   : > { %2291 = vmatprep.mubr.f32.mxu0 %v17682_v2 }
 0x297   : > { %2295 = vmatmul.mubr.f32.gmra.mrb[70].mxu0 %v17669_v14  ;;  %v17951_v14 = vld [vmem:[#allocation31_spill] sm:$0xff] }
 0x298   : > { %2300 = vmatprep.mubr.f32.mxu0 %v17682_v2 }
 0x29b   : > { %2304 = vmatmul.mubr.f32.gmra.mrb[72].mxu0 %v17668_v20  ;;  %v17950_v20 = vld [vmem:[#allocation29_spill] sm:$0xff] }
 0x29c   : > { %2309 = vmatprep.mubr.f32.mxu0 %v17682_v2 }
 0x29f   : > { %2313 = vmatmul.mubr.f32.gmra.mrb[74].mxu0 %v17667_v28  ;;  %v17949_v28 = vld [vmem:[#allocation27_spill] sm:$0xff] }
 0x2a0   : > { %2318 = vmatprep.mubr.f32.mxu0 %v17682_v2 }
 0x2a3   : > { %2322 = vmatmul.mubr.f32.gmra.mrb[76].mxu0 %v17666_v35  ;;  %v17948_v35 = vld [vmem:[#allocation26_spill] sm:$0xff] }
 0x2a4   : > { %2327 = vmatprep.mubr.f32.mxu0 %v17682_v2 }
 0x2a7   : > { %2331 = vmatmul.mubr.f32.gmra.mrb[78].mxu0 %v17665_v43  ;;  %v17947_v43 = vld [vmem:[#allocation25_spill] sm:$0xff] }
 0x2a8   : > { %2336 = vmatprep.mubr.f32.mxu0 %v17682_v2 }
 0x2ab   : > { %2340 = vmatmul.mubr.f32.gmra.mrb[80].mxu0 %v17664_v52  ;;  %v17946_v52 = vld [vmem:[#allocation24_spill] sm:$0xff] }
 0x2ac   : > { %2345 = vmatprep.mubr.f32.mxu0 %v17682_v2 }
 0x2af   : > { %2349 = vmatmul.mubr.f32.gmra.mrb[82].mxu0 %v17663_v60  ;;  %v17945_v60 = vld [vmem:[#allocation23_spill] sm:$0xff] }
 0x2b0   : > { %2354 = vmatprep.mubr.f32.mxu0 %v17682_v2 }
 0x2b3   : > { %2358 = vmatmul.mubr.f32.gmra.mrb[84].mxu0 %v17662_v10  ;;  %v17944_v10 = vld [vmem:[#allocation22_spill] sm:$0xff] }
 0x2b4   : > { %2363 = vmatprep.mubr.f32.mxu0 %v17682_v2 }
 0x2b7   : > { %2367 = vmatmul.mubr.f32.gmra.mrb[86].mxu0 %v17661_v23  ;;  %v17943_v23 = vld [vmem:[#allocation21_spill] sm:$0xff] }
 0x2b8   : > { %2372 = vmatprep.mubr.f32.mxu0 %v17682_v2 }
 0x2bb   : > { %2376 = vmatmul.mubr.f32.gmra.mrb[88].mxu0 %v17660_v47  ;;  %v17942_v47 = vld [vmem:[#allocation20_spill] sm:$0xff] }
 0x2bc   : > { %2381 = vmatprep.mubr.f32.mxu0 %v17682_v2 }
 0x2bf   : > { %2385 = vmatmul.mubr.f32.gmra.mrb[90].mxu0 %v17659_v56  ;;  %v17941_v56 = vld [vmem:[#allocation19_spill] sm:$0xff] }
 0x2c0   : > { %2390 = vmatprep.mubr.f32.mxu0 %v17682_v2 }
 0x2c3   : > { %2394 = vmatmul.mubr.f32.gmra.mrb[92].mxu0 %v17658_v0  ;;  %v17940_v0 = vld [vmem:[#allocation18_spill] sm:$0xff] }
 0x2c4   : > { %2399 = vmatprep.mubr.f32.mxu0 %v17682_v2 }
 0x2c7   : > { %2403 = vmatmul.mubr.f32.gmra.mrb[94].mxu0 %v17657_v26  ;;  %v17939_v26 = vld [vmem:[#allocation17_spill] sm:$0xff] }
 0x2c8   : > { %2479 = vmatprep.mubr.f32.mxu0 %v17682_v2 }
 0x2cb   : > { %2481 = vmatmul.mubr.f32.vlgmr.msra.gmra.mrb[0].mxu0 %v17929_v51 }
 0x2cc   : > { %2486 = vmatprep.mubr.f32.mxu0 %v17682_v2  ;;  %2819 = vmatpush1.msra.mxu0 %v17930_v24  ;;  %v17938_v24 = vld [vmem:[#allocation15_spill] sm:$0xff] }
 0x2cf   : > { %2488 = vmatmul.mubr.f32.gmra.mrb[2].mxu0 %v17931_v48 }
 0x2d0   : > { %2493 = vmatprep.mubr.f32.mxu0 %v17682_v2 }
 0x2d3   : > { %2495 = vmatmul.mubr.f32.gmra.mrb[4].mxu0 %v17932_v17 }
 0x2d4   : > { %2500 = vmatprep.mubr.f32.mxu0 %v17682_v2 }
 0x2d7   : > { %2502 = vmatmul.mubr.f32.gmra.mrb[6].mxu0 %v17933_v44 }
 0x2d8   : > { %2507 = vmatprep.mubr.f32.mxu0 %v17682_v2 }
 0x2db   : > { %2509 = vmatmul.mubr.f32.gmra.mrb[8].mxu0 %v17934_v11 }
 0x2dc   : > { %2514 = vmatprep.mubr.f32.mxu0 %v17682_v2 }
 0x2df   : > { %2516 = vmatmul.mubr.f32.gmra.mrb[10].mxu0 %v17935_v7 }
 0x2e0   : > { %2521 = vmatprep.mubr.f32.mxu0 %v17682_v2 }
 0x2e3   : > { %2523 = vmatmul.mubr.f32.gmra.mrb[12].mxu0 %v17936_v62 }
 0x2e4   : > { %2528 = vmatprep.mubr.f32.mxu0 %v17682_v2 }
 0x2e7   : > { %2530 = vmatmul.mubr.f32.gmra.mrb[14].mxu0 %v17937_v3 }
 0x2e8   : > { %2535 = vmatprep.mubr.f32.mxu0 %v17682_v2 }
 0x2eb   : > { %2537 = vmatmul.mubr.f32.gmra.mrb[16].mxu0 %v17938_v24 }
 0x2ec   : > { %2542 = vmatprep.mubr.f32.mxu0 %v17682_v2 }
 0x2ef   : > { %2544 = vmatmul.mubr.f32.gmra.mrb[18].mxu0 %v17939_v26 }
 0x2f0   : > { %2549 = vmatprep.mubr.f32.mxu0 %v17682_v2 }
 0x2f3   : > { %2551 = vmatmul.mubr.f32.gmra.mrb[20].mxu0 %v17940_v0 }
 0x2f4   : > { %2556 = vmatprep.mubr.f32.mxu0 %v17682_v2 }
 0x2f7   : > { %2558 = vmatmul.mubr.f32.gmra.mrb[22].mxu0 %v17941_v56 }
 0x2f8   : > { %2563 = vmatprep.mubr.f32.mxu0 %v17682_v2 }
 0x2fb   : > { %2565 = vmatmul.mubr.f32.gmra.mrb[24].mxu0 %v17942_v47 }
 0x2fc   : > { %2570 = vmatprep.mubr.f32.mxu0 %v17682_v2 }
 0x2ff   : > { %2572 = vmatmul.mubr.f32.gmra.mrb[26].mxu0 %v17943_v23 }
 0x300   : > { %2577 = vmatprep.mubr.f32.mxu0 %v17682_v2 }
 0x303   : > { %2579 = vmatmul.mubr.f32.gmra.mrb[28].mxu0 %v17944_v10 }
 0x304   : > { %2584 = vmatprep.mubr.f32.mxu0 %v17682_v2 }
 0x307   : > { %2586 = vmatmul.mubr.f32.gmra.mrb[30].mxu0 %v17945_v60 }
 0x308   : > { %2591 = vmatprep.mubr.f32.mxu0 %v17682_v2 }
 0x30b   : > { %2593 = vmatmul.mubr.f32.gmra.mrb[32].mxu0 %v17946_v52 }
 0x30c   : > { %2598 = vmatprep.mubr.f32.mxu0 %v17682_v2 }
 0x30f   : > { %2600 = vmatmul.mubr.f32.gmra.mrb[34].mxu0 %v17947_v43 }
 0x310   : > { %2605 = vmatprep.mubr.f32.mxu0 %v17682_v2 }
 0x313   : > { %2607 = vmatmul.mubr.f32.gmra.mrb[36].mxu0 %v17948_v35 }
 0x314   : > { %2612 = vmatprep.mubr.f32.mxu0 %v17682_v2 }
 0x317   : > { %2614 = vmatmul.mubr.f32.gmra.mrb[38].mxu0 %v17949_v28 }
 0x318   : > { %2619 = vmatprep.mubr.f32.mxu0 %v17682_v2 }
 0x31b   : > { %2621 = vmatmul.mubr.f32.gmra.mrb[40].mxu0 %v17950_v20 }
 0x31c   : > { %2626 = vmatprep.mubr.f32.mxu0 %v17682_v2 }
 0x31f   : > { %2628 = vmatmul.mubr.f32.gmra.mrb[42].mxu0 %v17951_v14 }
 0x320   : > { %2633 = vmatprep.mubr.f32.mxu0 %v17682_v2 }
 0x323   : > { %2635 = vmatmul.mubr.f32.gmra.mrb[44].mxu0 %v17952_v4 }
 0x324   : > { %2640 = vmatprep.mubr.f32.mxu0 %v17682_v2 }
 0x327   : > { %2642 = vmatmul.mubr.f32.gmra.mrb[46].mxu0 %v17953_v13 }
 0x328   : > { %2647 = vmatprep.mubr.f32.mxu0 %v17682_v2 }
 0x32b   : > { %2649 = vmatmul.mubr.f32.gmra.mrb[48].mxu0 %v17954_v30 }
 0x32c   : > { %2654 = vmatprep.mubr.f32.mxu0 %v17682_v2 }
 0x32f   : > { %2656 = vmatmul.mubr.f32.gmra.mrb[50].mxu0 %v17955_v8 }
 0x330   : > { %2661 = vmatprep.mubr.f32.mxu0 %v17682_v2 }
 0x333   : > { %2663 = vmatmul.mubr.f32.gmra.mrb[52].mxu0 %v14073_v18 }
 0x334   : > { %2668 = vmatprep.mubr.f32.mxu0 %v17682_v2 }
 0x337   : > { %2670 = vmatmul.mubr.f32.gmra.mrb[54].mxu0 %v14084_v39 }
 0x338   : > { %2675 = vmatprep.mubr.f32.mxu0 %v17682_v2 }
 0x33b   : > { %2677 = vmatmul.mubr.f32.gmra.mrb[56].mxu0 %v14095_v41 }
 0x33c   : > { %2682 = vmatprep.mubr.f32.mxu0 %v17682_v2 }
 0x33f   : > { %2684 = vmatmul.mubr.f32.gmra.mrb[58].mxu0 %v14106_v57 }
 0x340   : > { %2689 = vmatprep.mubr.f32.mxu0 %v17682_v2 }
 0x343   : > { %2691 = vmatmul.mubr.f32.gmra.mrb[60].mxu0 %v14117_v21 }
 0x344   : > { %2696 = vmatprep.mubr.f32.mxu0 %v17682_v2 }
 0x347   : > { %2698 = vmatmul.mubr.f32.gmra.mrb[62].mxu0 %v14128_v45 }
 0x348   : > { %2703 = vmatprep.mubr.f32.mxu0 %v17682_v2 }
 0x34b   : > { %2705 = vmatmul.mubr.f32.gmra.mrb[64].mxu0 %v14139_v50 }
 0x34c   : > { %2710 = vmatprep.mubr.f32.mxu0 %v17682_v2 }
 0x34f   : > { %2712 = vmatmul.mubr.f32.gmra.mrb[66].mxu0 %v14150_v42  ;;  %v17961_v42 = vld [vmem:[#allocation45_spill] sm:$0xff] }
 0x350   : > { %2717 = vmatprep.mubr.f32.mxu0 %v17682_v2 }
 0x353   : > { %2719 = vmatmul.mubr.f32.gmra.mrb[68].mxu0 %v17956_v38  ;;  %v17962_v38 = vld [vmem:[#allocation46_spill] sm:$0xff] }
 0x354   : > { %2724 = vmatprep.mubr.f32.mxu0 %v17682_v2 }
 0x357   : > { %2726 = vmatmul.mubr.f32.gmra.mrb[70].mxu0 %v17957_v33  ;;  %v17963_v33 = vld [vmem:[#allocation48_spill] sm:$0xff] }
 0x358   : > { %2731 = vmatprep.mubr.f32.mxu0 %v17682_v2 }
 0x35b   : > { %2733 = vmatmul.mubr.f32.gmra.mrb[72].mxu0 %v17958_v12  ;;  %v17964_v12 = vand.u32 4294901760, %v14362_v63 }
 0x35c   : > { %2738 = vmatprep.mubr.f32.mxu0 %v17682_v2 }
 0x35f   : > { %2740 = vmatmul.mubr.f32.gmra.mrb[74].mxu0 %v17959_v6  ;;  %v807_v6 = vsub.f32 %v14362_v63, %v17964_v12  ;;  %v17967_v63 = vand.u32 4294901760, %v14374_v58 }
 0x360   : > { %2745 = vmatprep.mubr.f32.mxu0 %v17682_v2 }
 0x361   : > { %v808_v50 = vand.u32 4294901760, %v807_v6  ;;  %v829_v12 = vsub.f32 %v14374_v58, %v17967_v63  ;;  %v17968_v6 = vld [vmem:[#allocation54_spill] sm:$0xff]  ;;  %v17971_v58 = vand.u32 4294901760, %v14386_v5 }
 0x363   : > { %2747 = vmatmul.mubr.f32.gmra.mrb[76].mxu0 %v17960_v36  ;;  %v17965_v36 = vld [vmem:[#allocation50_spill] sm:$0xff]  ;;  %809 = vmatmul.mubr.f32.vlgmr.msra.gmra.mrb[0].mxu1 %v808_v50  ;;  %v830_v50 = vand.u32 4294901760, %v829_v12  ;;  %v851_v63 = vsub.f32 %v14386_v5, %v17971_v58  ;;  %v17974_v5 = vand.u32 4294901760, %v14398_v37 }
 0x364   : > { %2752 = vmatprep.mubr.f32.mxu0 %v17682_v2  ;;  %814 = vmatprep.mubr.f32.mxu1 %v17682_v2 }
 0x365   : > { %v852_v12 = vand.u32 4294901760, %v851_v63 }
 0x367   : > { %2754 = vmatmul.mubr.f32.gmra.mrb[78].mxu0 %v17961_v42  ;;  %v17966_v42 = vand.u32 4294901760, %v14368_v27 }
 0x368   : > { %2759 = vmatprep.mubr.f32.mxu0 %v17682_v2 }
 0x369   : > { %v818_v45 = vsub.f32 %v14368_v27, %v17966_v42  ;;  %v17969_v27 = vand.u32 4294901760, %v14380_v9 }
 0x36b   : > { %2761 = vmatmul.mubr.f32.gmra.mrb[80].mxu0 %v17962_v38  ;;  %v819_v38 = vand.u32 4294901760, %v818_v45  ;;  %v840_v42 = vsub.f32 %v14380_v9, %v17969_v27  ;;  %v17973_v9 = vand.u32 4294901760, %v14392_v22 }
 0x36c   : > { %2766 = vmatprep.mubr.f32.mxu0 %v17682_v2 }
 0x36d   : > { %820 = vmatmul.mubr.f32.gmra.mrb[2].mxu1 %v819_v38  ;;  %v841_v45 = vand.u32 4294901760, %v840_v42  ;;  %v17970_v38 = vld [vmem:[#allocation56_spill] sm:$0xff]  ;;  %v862_v27 = vsub.f32 %v14392_v22, %v17973_v9  ;;  %v17975_v22 = vand.u32 4294901760, %v14404_v1 }
 0x36e   : > { %825 = vmatprep.mubr.f32.mxu1 %v17682_v2 }
 0x36f   : > { %2768 = vmatmul.mubr.f32.gmra.mrb[82].mxu0 %v17963_v33  ;;  %v863_v42 = vand.u32 4294901760, %v862_v27  ;;  %v884_v63 = vsub.f32 %v14404_v1, %v17975_v22  ;;  %v17977_v1 = vand.u32 4294901760, %v14416_v59 }
 0x370   : > { %2773 = vmatprep.mubr.f32.mxu0 %v17682_v2 }
 0x371   : > { %831 = vmatmul.mubr.f32.gmra.mrb[4].mxu1 %v830_v50  ;;  %v17972_v50 = vld [vmem:[#allocation57_spill] sm:$0xff]  ;;  %v906_v27 = vsub.f32 %v14416_v59, %v17977_v1  ;;  %v17979_v59 = vand.u32 4294901760, %v14428_v25 }
 0x372   : > { %836 = vmatprep.mubr.f32.mxu1 %v17682_v2 }
 0x373   : > { %2775 = vmatmul.mubr.f32.gmra.mrb[84].mxu0 %v17965_v36 }
 0x374   : > { %2780 = vmatprep.mubr.f32.mxu0 %v17682_v2 }
 0x375   : > { %842 = vmatmul.mubr.f32.gmra.mrb[6].mxu1 %v841_v45  ;;  %v873_v45 = vsub.f32 %v14398_v37, %v17974_v5  ;;  %v17976_v37 = vand.u32 4294901760, %v14410_v19  ;;  %v928_v5 = vsub.f32 %v14428_v25, %v17979_v59  ;;  %v17981_v25 = vand.u32 4294901760, %v14440_v49 }
 0x376   : > { %847 = vmatprep.mubr.f32.mxu1 %v17682_v2 }
 0x377   : > { %2782 = vmatmul.mubr.f32.gmra.mrb[86].mxu0 %v17894_v29  ;;  %v874_v58 = vand.u32 4294901760, %v873_v45  ;;  %v895_v9 = vsub.f32 %v14410_v19, %v17976_v37  ;;  %v17978_v19 = vand.u32 4294901760, %v14422_v55 }
 0x378   : > { %2787 = vmatprep.mubr.f32.mxu0 %v17682_v2 }
 0x379   : > { %853 = vmatmul.mubr.f32.gmra.mrb[8].mxu1 %v852_v12  ;;  %v885_v12 = vand.u32 4294901760, %v884_v63 }
 0x37a   : > { %858 = vmatprep.mubr.f32.mxu1 %v17682_v2 }
 0x37b   : > { %2789 = vmatmul.mubr.f32.gmra.mrb[88].mxu0 %v17968_v6 }
 0x37c   : > { %2794 = vmatprep.mubr.f32.mxu0 %v17682_v2 }
 0x37d   : > { %864 = vmatmul.mubr.f32.gmra.mrb[10].mxu1 %v863_v42  ;;  %v917_v42 = vsub.f32 %v14422_v55, %v17978_v19  ;;  %v17980_v55 = vand.u32 4294901760, %v14434_v31 }
 0x37e   : > { %869 = vmatprep.mubr.f32.mxu1 %v17682_v2 }
 0x37f   : > { %2796 = vmatmul.mubr.f32.gmra.mrb[90].mxu0 %v17970_v38  ;;  %v939_v45 = vsub.f32 %v14434_v31, %v17980_v55  ;;  %v17982_v31 = vand.u32 4294901760, %v14446_v34 }
 0x380   : > { %2801 = vmatprep.mubr.f32.mxu0 %v17682_v2 }
 0x381   : > { %875 = vmatmul.mubr.f32.gmra.mrb[12].mxu1 %v874_v58  ;;  %v950_v58 = vsub.f32 %v14440_v49, %v17981_v25  ;;  %v961_v22 = vsub.f32 %v14446_v34, %v17982_v31  ;;  %v17983_v49 = vand.u32 4294901760, %v14452_v16  ;;  %v17984_v34 = vand.u32 4294901760, %v14458_v54 }
 0x382   : > { %880 = vmatprep.mubr.f32.mxu1 %v17682_v2 }
 0x383   : > { %2803 = vmatmul.mubr.f32.gmra.mrb[92].mxu0 %v17972_v50  ;;  %v972_v63 = vsub.f32 %v14452_v16, %v17983_v49  ;;  %v17985_v16 = vand.u32 4294901760, %v14464_v40 }
 0x384   : > { %2808 = vmatprep.mubr.f32.mxu0 %v17682_v2 }
 0x385   : > { %886 = vmatmul.mubr.f32.gmra.mrb[14].mxu1 %v885_v12  ;;  %v983_v12 = vsub.f32 %v14458_v54, %v17984_v34  ;;  %v994_v37 = vsub.f32 %v14464_v40, %v17985_v16  ;;  %v17986_v54 = vand.u32 4294901760, %v14470_v32  ;;  %v17987_v40 = vand.u32 4294901760, %v14476_v46 }
 0x386   : > { %891 = vmatprep.mubr.f32.mxu1 %v17682_v2 }
 0x387   : > { %2810 = vmatmul.mubr.f32.gmra.mrb[94].mxu0 %v14301_v15 }
 0x388   : > { %2882 = vmatprep.mubr.f32.mxu0 %v17682_v2 }
 0x38b   : > { %2884 = vmatmul.mubr.f32.vlgmr.msra.gmra.mrb[0].mxu0 %v17929_v51  ;;  %v896_v51 = vand.u32 4294901760, %v895_v9  ;;  %v1005_v9 = vsub.f32 %v14470_v32, %v17986_v54  ;;  %v17988_v32 = vand.u32 4294901760, %v14482_v53 }
 0x38c   : > { %2889 = vmatprep.mubr.f32.mxu0 %v17682_v2 }
 0x38d   : > { %897 = vmatmul.mubr.f32.gmra.mrb[16].mxu1 %v896_v51  ;;  %v1016_v51 = vsub.f32 %v14476_v46, %v17987_v40  ;;  %v1027_v1 = vsub.f32 %v14482_v53, %v17988_v32  ;;  %v17989_v46 = vand.u32 4294901760, %v14488_v61  ;;  %v17990_v53 = vld [vmem:[#allocation37_spill] sm:$0xff] }
 0x38e   : > { %902 = vmatprep.mubr.f32.mxu1 %v17682_v2 }
 0x38f   : > { %2891 = vmatmul.mubr.f32.gmra.mrb[2].mxu0 %v17931_v48  ;;  %v907_v48 = vand.u32 4294901760, %v906_v27  ;;  %v1038_v27 = vsub.f32 %v14488_v61, %v17989_v46  ;;  %v17996_v61 = vld [vmem:[#allocation43_spill] sm:$0xff] }
 0x390   : > { %2896 = vmatprep.mubr.f32.mxu0 %v17682_v2 }
 0x391   : > { %908 = vmatmul.mubr.f32.gmra.mrb[18].mxu1 %v907_v48 }
 0x392   : > { %913 = vmatprep.mubr.f32.mxu1 %v17682_v2 }
 0x393   : > { %2898 = vmatmul.mubr.f32.gmra.mrb[4].mxu0 %v17932_v17  ;;  %v918_v17 = vand.u32 4294901760, %v917_v42 }
 0x394   : > { %2903 = vmatprep.mubr.f32.mxu0 %v17682_v2 }
 0x395   : > { %919 = vmatmul.mubr.f32.gmra.mrb[20].mxu1 %v918_v17 }
 0x396   : > { %924 = vmatprep.mubr.f32.mxu1 %v17682_v2 }
 0x397   : > { %2905 = vmatmul.mubr.f32.gmra.mrb[6].mxu0 %v17933_v44  ;;  %v929_v44 = vand.u32 4294901760, %v928_v5 }
 0x398   : > { %2910 = vmatprep.mubr.f32.mxu0 %v17682_v2 }
 0x399   : > { %930 = vmatmul.mubr.f32.gmra.mrb[22].mxu1 %v929_v44 }
 0x39a   : > { %935 = vmatprep.mubr.f32.mxu1 %v17682_v2 }
 0x39b   : > { %2912 = vmatmul.mubr.f32.gmra.mrb[8].mxu0 %v17934_v11  ;;  %v940_v11 = vand.u32 4294901760, %v939_v45 }
 0x39c   : > { %2917 = vmatprep.mubr.f32.mxu0 %v17682_v2 }
 0x39d   : > { %941 = vmatmul.mubr.f32.gmra.mrb[24].mxu1 %v940_v11 }
 0x39e   : > { %946 = vmatprep.mubr.f32.mxu1 %v17682_v2 }
 0x39f   : > { %2919 = vmatmul.mubr.f32.gmra.mrb[10].mxu0 %v17935_v7  ;;  %v951_v7 = vand.u32 4294901760, %v950_v58 }
 0x3a0   : > { %2924 = vmatprep.mubr.f32.mxu0 %v17682_v2 }
 0x3a1   : > { %952 = vmatmul.mubr.f32.gmra.mrb[26].mxu1 %v951_v7 }
 0x3a2   : > { %957 = vmatprep.mubr.f32.mxu1 %v17682_v2 }
 0x3a3   : > { %2926 = vmatmul.mubr.f32.gmra.mrb[12].mxu0 %v17936_v62  ;;  %v962_v62 = vand.u32 4294901760, %v961_v22 }
 0x3a4   : > { %2931 = vmatprep.mubr.f32.mxu0 %v17682_v2 }
 0x3a5   : > { %963 = vmatmul.mubr.f32.gmra.mrb[28].mxu1 %v962_v62 }
 0x3a6   : > { %968 = vmatprep.mubr.f32.mxu1 %v17682_v2 }
 0x3a7   : > { %2933 = vmatmul.mubr.f32.gmra.mrb[14].mxu0 %v17937_v3  ;;  %v973_v3 = vand.u32 4294901760, %v972_v63 }
 0x3a8   : > { %2938 = vmatprep.mubr.f32.mxu0 %v17682_v2 }
 0x3a9   : > { %974 = vmatmul.mubr.f32.gmra.mrb[30].mxu1 %v973_v3 }
 0x3aa   : > { %979 = vmatprep.mubr.f32.mxu1 %v17682_v2 }
 0x3ab   : > { %2940 = vmatmul.mubr.f32.gmra.mrb[16].mxu0 %v17938_v24  ;;  %v984_v24 = vand.u32 4294901760, %v983_v12 }
 0x3ac   : > { %2945 = vmatprep.mubr.f32.mxu0 %v17682_v2 }
 0x3ad   : > { %985 = vmatmul.mubr.f32.gmra.mrb[32].mxu1 %v984_v24 }
 0x3ae   : > { %990 = vmatprep.mubr.f32.mxu1 %v17682_v2 }
 0x3af   : > { %2947 = vmatmul.mubr.f32.gmra.mrb[18].mxu0 %v17939_v26  ;;  %v995_v26 = vand.u32 4294901760, %v994_v37 }
 0x3b0   : > { %2952 = vmatprep.mubr.f32.mxu0 %v17682_v2 }
 0x3b1   : > { %996 = vmatmul.mubr.f32.gmra.mrb[34].mxu1 %v995_v26 }
 0x3b2   : > { %1001 = vmatprep.mubr.f32.mxu1 %v17682_v2 }
 0x3b3   : > { %2954 = vmatmul.mubr.f32.gmra.mrb[20].mxu0 %v17940_v0  ;;  %v1006_v0 = vand.u32 4294901760, %v1005_v9 }
 0x3b4   : > { %2959 = vmatprep.mubr.f32.mxu0 %v17682_v2 }
 0x3b5   : > { %1007 = vmatmul.mubr.f32.gmra.mrb[36].mxu1 %v1006_v0 }
 0x3b6   : > { %1012 = vmatprep.mubr.f32.mxu1 %v17682_v2 }
 0x3b7   : > { %2961 = vmatmul.mubr.f32.gmra.mrb[22].mxu0 %v17941_v56  ;;  %v1017_v56 = vand.u32 4294901760, %v1016_v51 }
 0x3b8   : > { %2966 = vmatprep.mubr.f32.mxu0 %v17682_v2 }
 0x3b9   : > { %1018 = vmatmul.mubr.f32.gmra.mrb[38].mxu1 %v1017_v56 }
 0x3ba   : > { %1023 = vmatprep.mubr.f32.mxu1 %v17682_v2 }
 0x3bb   : > { %2968 = vmatmul.mubr.f32.gmra.mrb[24].mxu0 %v17942_v47  ;;  %v1028_v47 = vand.u32 4294901760, %v1027_v1 }
 0x3bc   : > { %2973 = vmatprep.mubr.f32.mxu0 %v17682_v2 }
 0x3bd   : > { %1029 = vmatmul.mubr.f32.gmra.mrb[40].mxu1 %v1028_v47 }
 0x3be   : > { %1034 = vmatprep.mubr.f32.mxu1 %v17682_v2 }
 0x3bf   : > { %2975 = vmatmul.mubr.f32.gmra.mrb[26].mxu0 %v17943_v23  ;;  %v1039_v23 = vand.u32 4294901760, %v1038_v27 }
 0x3c0   : > { %2980 = vmatprep.mubr.f32.mxu0 %v17682_v2 }
 0x3c1   : > { %1040 = vmatmul.mubr.f32.gmra.mrb[42].mxu1 %v1039_v23 }
 0x3c3   : > { %2982 = vmatmul.mubr.f32.gmra.mrb[28].mxu0 %v17944_v10 }
 0x3c4   : > { %2987 = vmatprep.mubr.f32.mxu0 %v17682_v2 }
 0x3c7   : > { %2989 = vmatmul.mubr.f32.gmra.mrb[30].mxu0 %v17945_v60 }
 0x3c8   : > { %2994 = vmatprep.mubr.f32.mxu0 %v17682_v2 }
 0x3cb   : > { %2996 = vmatmul.mubr.f32.gmra.mrb[32].mxu0 %v17946_v52 }
 0x3cc   : > { %3001 = vmatprep.mubr.f32.mxu0 %v17682_v2 }
 0x3cf   : > { %3003 = vmatmul.mubr.f32.gmra.mrb[34].mxu0 %v17947_v43 }
 0x3d0   : > { %3008 = vmatprep.mubr.f32.mxu0 %v17682_v2 }
 0x3d3   : > { %3010 = vmatmul.mubr.f32.gmra.mrb[36].mxu0 %v17948_v35 }
 0x3d4   : > { %3015 = vmatprep.mubr.f32.mxu0 %v17682_v2 }
 0x3d7   : > { %3017 = vmatmul.mubr.f32.gmra.mrb[38].mxu0 %v17949_v28 }
 0x3d8   : > { %3022 = vmatprep.mubr.f32.mxu0 %v17682_v2 }
 0x3db   : > { %3024 = vmatmul.mubr.f32.gmra.mrb[40].mxu0 %v17950_v20 }
 0x3dc   : > { %3029 = vmatprep.mubr.f32.mxu0 %v17682_v2 }
 0x3df   : > { %3031 = vmatmul.mubr.f32.gmra.mrb[42].mxu0 %v17951_v14 }
 0x3e0   : > { %3036 = vmatprep.mubr.f32.mxu0 %v17682_v2 }
 0x3e3   : > { %3038 = vmatmul.mubr.f32.gmra.mrb[44].mxu0 %v17952_v4 }
 0x3e4   : > { %3043 = vmatprep.mubr.f32.mxu0 %v17682_v2 }
 0x3e7   : > { %3045 = vmatmul.mubr.f32.gmra.mrb[46].mxu0 %v17953_v13  ;;  %v17999_v13 = vld [vmem:[#allocation46_spill] sm:$0xff] }
 0x3e8   : > { %3050 = vmatprep.mubr.f32.mxu0 %v17682_v2 }
 0x3eb   : > { %3052 = vmatmul.mubr.f32.gmra.mrb[48].mxu0 %v17954_v30  ;;  %v17998_v30 = vld [vmem:[#allocation45_spill] sm:$0xff] }
 0x3ec   : > { %3057 = vmatprep.mubr.f32.mxu0 %v17682_v2 }
 0x3ef   : > { %3059 = vmatmul.mubr.f32.gmra.mrb[50].mxu0 %v17955_v8  ;;  %v17997_v8 = vld [vmem:[#allocation44_spill] sm:$0xff] }
 0x3f0   : > { %3064 = vmatprep.mubr.f32.mxu0 %v17682_v2 }
 0x3f3   : > { %3066 = vmatmul.mubr.f32.gmra.mrb[52].mxu0 %v14073_v18  ;;  %v17991_v18 = vld [vmem:[#allocation38_spill] sm:$0xff] }
 0x3f4   : > { %3071 = vmatprep.mubr.f32.mxu0 %v17682_v2 }
 0x3f7   : > { %3073 = vmatmul.mubr.f32.gmra.mrb[54].mxu0 %v14084_v39  ;;  %v17992_v39 = vld [vmem:[#allocation39_spill] sm:$0xff] }
 0x3f8   : > { %3078 = vmatprep.mubr.f32.mxu0 %v17682_v2 }
 0x3fb   : > { %3080 = vmatmul.mubr.f32.gmra.mrb[56].mxu0 %v14095_v41  ;;  %v17993_v41 = vld [vmem:[#allocation40_spill] sm:$0xff] }
 0x3fc   : > { %3085 = vmatprep.mubr.f32.mxu0 %v17682_v2 }
 0x3ff   : > { %3087 = vmatmul.mubr.f32.gmra.mrb[58].mxu0 %v14106_v57  ;;  %v17994_v57 = vld [vmem:[#allocation41_spill] sm:$0xff] }
 0x400   : > { %3092 = vmatprep.mubr.f32.mxu0 %v17682_v2 }
 0x403   : > { %3094 = vmatmul.mubr.f32.gmra.mrb[60].mxu0 %v14117_v21  ;;  %v17995_v21 = vld [vmem:[#allocation42_spill] sm:$0xff] }
 0x404   : > { %3099 = vmatprep.mubr.f32.mxu0 %v17682_v2 }
 0x407   : > { %3101 = vmatmul.mubr.f32.gmra.mrb[62].mxu0 %v17990_v53 }
 0x408   : > { %3106 = vmatprep.mubr.f32.mxu0 %v17682_v2 }
 0x40b   : > { %3108 = vmatmul.mubr.f32.gmra.mrb[64].mxu0 %v17991_v18 }
 0x40c   : > { %3113 = vmatprep.mubr.f32.mxu0 %v17682_v2 }
 0x40f   : > { %3115 = vmatmul.mubr.f32.gmra.mrb[66].mxu0 %v17992_v39 }
 0x410   : > { %3120 = vmatprep.mubr.f32.mxu0 %v17682_v2 }
 0x413   : > { %3122 = vmatmul.mubr.f32.gmra.mrb[68].mxu0 %v17993_v41 }
 0x414   : > { %3127 = vmatprep.mubr.f32.mxu0 %v17682_v2 }
 0x417   : > { %3129 = vmatmul.mubr.f32.gmra.mrb[70].mxu0 %v17994_v57 }
 0x418   : > { %3134 = vmatprep.mubr.f32.mxu0 %v17682_v2 }
 0x41b   : > { %3136 = vmatmul.mubr.f32.gmra.mrb[72].mxu0 %v17995_v21 }
 0x41c   : > { %3141 = vmatprep.mubr.f32.mxu0 %v17682_v2 }
 0x41f   : > { %3143 = vmatmul.mubr.f32.gmra.mrb[74].mxu0 %v17996_v61 }
 0x420   : > { %3148 = vmatprep.mubr.f32.mxu0 %v17682_v2 }
 0x423   : > { %3150 = vmatmul.mubr.f32.gmra.mrb[76].mxu0 %v17997_v8 }
 0x424   : > { %3155 = vmatprep.mubr.f32.mxu0 %v17682_v2 }
 0x427   : > { %3157 = vmatmul.mubr.f32.gmra.mrb[78].mxu0 %v17998_v30 }
 0x428   : > { %3162 = vmatprep.mubr.f32.mxu0 %v17682_v2 }
 0x42b   : > { %3164 = vmatmul.mubr.f32.gmra.mrb[80].mxu0 %v17999_v13 }
 0x42c   : > { %3169 = vmatprep.mubr.f32.mxu0 %v17682_v2 }
 0x42f   : > { %3171 = vmatmul.mubr.f32.gmra.mrb[82].mxu0 %v17963_v33 }
 0x430   : > { %3176 = vmatprep.mubr.f32.mxu0 %v17682_v2 }
 0x433   : > { %3178 = vmatmul.mubr.f32.gmra.mrb[84].mxu0 %v17965_v36 }
 0x434   : > { %3183 = vmatprep.mubr.f32.mxu0 %v17682_v2 }
 0x436   : > { %v14941_v36 = vpop.f32.mrb[0].mxu1 }
 0x437   : > { %3185 = vmatmul.mubr.f32.gmra.mrb[86].mxu0 %v17894_v29  ;;  %v14943_v33 = vpop.f32.mrb[1].mxu1 }
 0x438   : > { %3190 = vmatprep.mubr.f32.mxu0 %v17682_v2 }
 0x43b   : > { %3192 = vmatmul.mubr.f32.gmra.mrb[88].mxu0 %v17968_v6 }
 0x43c   : > { %3197 = vmatprep.mubr.f32.mxu0 %v17682_v2 }
 0x43f   : > { %3199 = vmatmul.mubr.f32.gmra.mrb[90].mxu0 %v17970_v38 }
 0x440   : > { %3204 = vmatprep.mubr.f32.mxu0 %v17682_v2  ;;  %v14945_v29 = vpop.f32.mrb[2].mxu1 }
 0x441   : > { %v14947_v4 = vpop.f32.mrb[3].mxu1 }
 0x443   : > { %3206 = vmatmul.mubr.f32.gmra.mrb[92].mxu0 %v17972_v50 }
 0x444   : > { %3211 = vmatprep.mubr.f32.mxu0 %v17682_v2  ;;  %v14949_v14 = vpop.f32.mrb[4].mxu1 }
 0x445   : > { %v14951_v20 = vpop.f32.mrb[5].mxu1 }
 0x447   : > { %3213 = vmatmul.mubr.f32.gmra.mrb[94].mxu0 %v14301_v15 }
 0x448   : > { %v14953_v28 = vpop.f32.mrb[6].mxu1 }
 0x449   : > { %v14955_v35 = vpop.f32.mrb[7].mxu1 }
 0x44c   : > { %v14957_v43 = vpop.f32.mrb[8].mxu1 }
 0x44d   : > { %v14959_v15 = vpop.f32.mrb[9].mxu1 }
 0x450   : > { %v14963_v10 = vpop.f32.mrb[10].mxu1 }
 0x451   : > { %v14965_v6 = vpop.f32.mrb[11].mxu1 }
 0x454   : > { %v14967_v38 = vpop.f32.mrb[12].mxu1 }
 0x455   : > { %v14975_v5 = vpop.f32.mrb[13].mxu1 }
 0x456   : > { %18000 = vst [vmem:[#allocation28_spill] sm:$0xff] %v14975_v5 }
 0x458   : > { %v14977_v55 = vpop.f32.mrb[14].mxu1 }
 0x459   : > { %18001 = vst [vmem:[#allocation30_spill] sm:$0xff] %v14977_v55  ;;  %v14981_v25 = vpop.f32.mrb[15].mxu1 }
 0x45a   : > { %18002 = vst [vmem:[#allocation47_spill] sm:$0xff] %v14981_v25 }
 0x45e   : > { %v2885_v52 = vpop.f32.mrb[0].mxu0 }
 0x45f   : > { %v14961_v60 = vpop.f32.mrb[1].mxu0 }
 0x460   : > { %v14985_v7 = vpop.f32.mrb[16].mxu1 }
 0x461   : > { %18003 = vst [vmem:[#allocation49_spill] sm:$0xff] %v14985_v7  ;;  %v14987_v22 = vpop.f32.mrb[17].mxu1 }
 0x462   : > { %v2892_v50 = vpop.f32.mrb[2].mxu0  ;;  %18004 = vst [vmem:[#allocation52_spill] sm:$0xff] %v14987_v22 }
 0x463   : > { %v14969_v48 = vpop.f32.mrb[3].mxu0 }
 0x464   : > { %v14991_v63 = vpop.f32.mrb[18].mxu1 }
 0x465   : > { %18005 = vst [vmem:[#allocation51_spill] sm:$0xff] %v14991_v63  ;;  %v14995_v12 = vpop.f32.mrb[19].mxu1 }
 0x466   : > { %v2899_v19 = vpop.f32.mrb[4].mxu0  ;;  %18006 = vst [vmem:[#allocation53_spill] sm:$0xff] %v14995_v12 }
 0x467   : > { %v3221_v42 = vmax.f32 %v2885_v52, %v2899_v19  ;;  %v14971_v17 = vpop.f32.mrb[5].mxu0 }
 0x468   : > { %v3230_v59 = vmax.f32 %v14961_v60, %v14971_v17  ;;  %v14997_v16 = vpop.f32.mrb[20].mxu1 }
 0x469   : > { %18007 = vst [vmem:[#allocation55_spill] sm:$0xff] %v14997_v16  ;;  %v15011_v18 = vpop.f32.mrb[21].mxu1 }
 0x46a   : > { %v2906_v44 = vpop.f32.mrb[6].mxu0  ;;  %18008 = vst [vmem:[#allocation16_spill] sm:$0xff] %v15011_v18 }
 0x46b   : > { %v3222_v45 = vmax.f32 %v2892_v50, %v2906_v44  ;;  %v14979_v11 = vpop.f32.mrb[7].mxu0 }
 0x46c   : > { %v3231_v58 = vmax.f32 %v14969_v48, %v14979_v11  ;;  %v15015_v57 = vpop.f32.mrb[22].mxu1 }
 0x46d   : > { %v3223_v31 = vmax.f32 %v3221_v42, %v3222_v45  ;;  %18009 = vst [vmem:[#allocation11_spill] sm:$0xff] %v15015_v57  ;;  %v15019_v42 = vpop.f32.mrb[23].mxu1 }
 0x46e   : > { %v3232_v62 = vmax.f32 %v3230_v59, %v3231_v58  ;;  %v14989_v49 = vpop.f32.mrb[8].mxu0  ;;  %18010 = vst [vmem:[#allocation35_spill] sm:$0xff] %v15019_v42 }
 0x46f   : > { %v3224_v3 = vrot.slane %v3223_v31, 4  ;;  %v14993_v34 = vpop.f32.mrb[9].mxu0 }
 0x470   : > { %v3233_v24 = vrot.slane %v3232_v62, 4 }
 0x471   : > { %v3225_v37 = vmax.f32 %v3223_v31, %v3224_v3 }
 0x472   : > { %v3234_v26 = vmax.f32 %v3232_v62, %v3233_v24  ;;  %v14999_v54 = vpop.f32.mrb[10].mxu0  ;;  %v15025_v62 = vpop.f32.mrb[24].mxu1 }
 0x473   : > { %v3226_v9 = vrot.slane %v3225_v37, 2  ;;  %v15001_v0 = vpop.f32.mrb[11].mxu0  ;;  %18011 = vst [vmem:[#allocation5_spill] sm:$0xff] %v15025_v62 }
 0x474   : > { %v3235_v40 = vrot.slane %v3234_v26, 2 }
 0x475   : > { %v3227_v51 = vmax.f32 %v3225_v37, %v3226_v9 }
 0x476   : > { %v3236_v56 = vmax.f32 %v3234_v26, %v3235_v40  ;;  %v15003_v32 = vpop.f32.mrb[12].mxu0 }
 0x477   : > { %v3228_v1 = vrot.slane %v3227_v51, 1  ;;  %v4780_v47 = vmax.f32 %v14989_v49, %v15003_v32  ;;  %v15007_v46 = vpop.f32.mrb[13].mxu0 }
 0x478   : > { %v3237_v27 = vrot.slane %v3236_v56, 1  ;;  %v4789_v23 = vmax.f32 %v14993_v34, %v15007_v46 }
 0x479   : > { %v3229_v53 = vmax.f32 %v3227_v51, %v3228_v1 }
 0x47a   : > { %v3238_v39 = vmax.f32 %v3236_v56, %v3237_v27  ;;  %v15013_v41 = vpop.f32.mrb[14].mxu0 }
 0x47b   : > { %v3239_v21 = vsub.f32 %v2885_v52, %v3229_v53  ;;  %v3241_v61 = vsub.f32 %v2892_v50, %v3229_v53  ;;  %v3243_v8 = vsub.f32 %v2899_v19, %v3229_v53  ;;  %v3245_v30 = vsub.f32 %v2906_v44, %v3229_v53  ;;  %v15017_v13 = vpop.f32.mrb[15].mxu0 }
 0x47c   : > { %v3240_v59 = vsub.f32 %v14961_v60, %v3238_v39  ;;  %v3242_v45 = vsub.f32 %v14969_v48, %v3238_v39  ;;  %v3244_v58 = vsub.f32 %v14971_v17, %v3238_v39  ;;  %v3246_v31 = vsub.f32 %v14979_v11, %v3238_v39  ;;  %v15033_v17 = vpop.f32.mrb[25].mxu1 }
 0x47d   : > { %v3247_v3 = vmul.f32 1.442695, %v3239_v21  ;;  %v3251_v24 = vmul.f32 1.442695, %v3241_v61  ;;  %v3255_v52 = vmul.f32 1.442695, %v3243_v8  ;;  %v4781_v50 = vmax.f32 %v14999_v54, %v15013_v41 }
 0x47e   : > { %v3259_v19 = vmul.f32 1.442695, %v3245_v30  ;;  %v4790_v44 = vmax.f32 %v15001_v0, %v15017_v13  ;;  %v3249_v60 = vmul.f32 1.442695, %v3240_v59  ;;  %v15031_v48 = vpop.f32.mrb[16].mxu0  ;;  %18012 = vst [vmem:[#allocation9_spill] sm:$0xff] %v15033_v17 }
 0x47f   : > { %13281 = vpow2.f32 %v3247_v3  ;;  %v4782_v37 = vmax.f32 %v4780_v47, %v4781_v50  ;;  %v3253_v11 = vmul.f32 1.442695, %v3242_v45  ;;  %v15035_v9 = vpop.f32.mrb[17].mxu0  ;;  %v15037_v40 = vpop.f32.mrb[26].mxu1  ;;  %v3257_v1 = vmul.f32 1.442695, %v3244_v58 }
 0x480   : > { %13283 = vpow2.f32 %v3251_v24  ;;  %v4791_v26 = vmax.f32 %v4789_v23, %v4790_v44  ;;  %18013 = vst [vmem:[#allocation6_spill] sm:$0xff] %v15037_v40  ;;  %v15039_v56 = vpop.f32.mrb[27].mxu1  ;;  %v3261_v23 = vmul.f32 1.442695, %v3246_v31 }
 0x481   : > { %13285 = vpow2.f32 %v3255_v52  ;;  %v4783_v51 = vrot.slane %v4782_v37, 4  ;;  %18014 = vst [vmem:[#allocation7_spill] sm:$0xff] %v15039_v56  ;;  %v15043_v47 = vpop.f32.mrb[28].mxu1 }
 0x482   : > { %13287 = vpow2.f32 %v3259_v19  ;;  %v4792_v27 = vrot.slane %v4791_v26, 4  ;;  %v15041_v53 = vpop.f32.mrb[18].mxu0  ;;  %18015 = vst [vmem:[#allocation8_spill] sm:$0xff] %v15043_v47  ;;  %v15053_v24 = vpop.f32.mrb[29].mxu1 }
 0x483   : > { %13289 = vpow2.f32 %v3249_v60  ;;  %v4784_v39 = vmax.f32 %v4782_v37, %v4783_v51  ;;  %v15045_v21 = vpop.f32.mrb[19].mxu0  ;;  %18016 = vst [vmem:[#allocation10_spill] sm:$0xff] %v15053_v24  ;;  %v15057_v31 = vpop.f32.mrb[30].mxu1 }
 0x484   : > { %13291 = vpow2.f32 %v3253_v11  ;;  %v4793_v61 = vmax.f32 %v4791_v26, %v4792_v27  ;;  %18017 = vst [vmem:[#allocation12_spill] sm:$0xff] %v15057_v31  ;;  %v15061_v60 = vpop.f32.mrb[31].mxu1 }
 0x485   : > { %v4785_v8 = vrot.slane %v4784_v39, 2  ;;  %13293 = vpow2.f32 %v3257_v1  ;;  %18018 = vst [vmem:[#allocation13_spill] sm:$0xff] %v15061_v60  ;;  %v15067_v51 = vpop.f32.mrb[32].mxu1 }
 0x486   : > { %v4794_v30 = vrot.slane %v4793_v61, 2  ;;  %v15047_v59 = vpop.f32.mrb[20].mxu0  ;;  %13295 = vpow2.f32 %v3261_v23  ;;  %18019 = vst [vmem:[#allocation14_spill] sm:$0xff] %v15067_v51 }
 0x487   : > { %v4786_v45 = vmax.f32 %v4784_v39, %v4785_v8  ;;  %v7431_v58 = vmax.f32 %v15031_v48, %v15047_v59  ;;  %v15051_v3 = vpop.f32.mrb[21].mxu0  ;;  %v15077_v8 = vpop.f32.mrb[33].mxu1 }
 0x488   : > { %v4795_v52 = vmax.f32 %v4793_v61, %v4794_v30  ;;  %v7440_v50 = vmax.f32 %v15035_v9, %v15051_v3  ;;  %18020 = vst [vmem:[#allocation15_spill] sm:$0xff] %v15077_v8  ;;  %v15083_v51 = vpop.f32.mrb[34].mxu1 }
 0x489   : > { %v15059_v19 = vpop.eup %13281  ;;  %v4787_v44 = vrot.slane %v4786_v45, 1  ;;  %18021 = vst [vmem:[#allocation17_spill] sm:$0xff] %v15083_v51  ;;  %v15104_v62 = vpop.f32.mrb[35].mxu1 }
 0x48a   : > { %v15063_v37 = vpop.eup %13283  ;;  %v4796_v11 = vrot.slane %v4795_v52, 1  ;;  %v15065_v26 = vpop.f32.mrb[22].mxu0  ;;  %18022 = vst [vmem:[#allocation18_spill] sm:$0xff] %v15104_v62 }
 0x48b   : > { %v15069_v1 = vpop.eup %13285  ;;  %v3263_v27 = vadd.f32 %v15063_v37, %v15059_v19  ;;  %v4788_v39 = vmax.f32 %v4786_v45, %v4787_v44  ;;  %v7432_v23 = vmax.f32 %v15041_v53, %v15065_v26  ;;  %v15075_v61 = vpop.f32.mrb[23].mxu0 }
 0x48c   : > { %v15079_v30 = vpop.eup %13287  ;;  %v4797_v2 = vmax.f32 %v4795_v52, %v4796_v11  ;;  %v7441_v60 = vmax.f32 %v15045_v21, %v15075_v61  ;;  %v15110_v57 = vpop.f32.mrb[36].mxu1 }
 0x48d   : > { %v15085_v31 = vpop.eup %13289  ;;  %v3264_v24 = vadd.f32 %v15069_v1, %v3263_v27  ;;  %v4798_v45 = vsub.f32 %v14989_v49, %v4788_v39  ;;  %v4800_v44 = vsub.f32 %v14999_v54, %v4788_v39  ;;  %v4802_v47 = vsub.f32 %v15003_v32, %v4788_v39  ;;  %18023 = vst [vmem:[#allocation19_spill] sm:$0xff] %v15110_v57 }
 0x48e   : > { %v15091_v56 = vpop.eup %13291  ;;  %v4804_v8 = vsub.f32 %v15013_v41, %v4788_v39  ;;  %v4799_v52 = vsub.f32 %v14993_v34, %v4797_v2  ;;  %v4801_v11 = vsub.f32 %v15001_v0, %v4797_v2  ;;  %v4803_v51 = vsub.f32 %v15007_v46, %v4797_v2  ;;  %v15097_v40 = vpop.f32.mrb[24].mxu0 }
 0x48f   : > { %v3265_v27 = vadd.f32 %v15079_v30, %v3264_v24  ;;  %v3272_v49 = vadd.f32 %v15091_v56, %v15085_v31  ;;  %v4806_v54 = vmul.f32 1.442695, %v4798_v45  ;;  %v4810_v17 = vmul.f32 1.442695, %v4800_v44  ;;  %v15102_v32 = vpop.f32.mrb[25].mxu0  ;;  %v15106_v41 = vpop.eup %13293 }
 0x490   : > { %v4814_v34 = vmul.f32 1.442695, %v4802_v47  ;;  %v4818_v39 = vmul.f32 1.442695, %v4804_v8  ;;  %v4805_v0 = vsub.f32 %v15017_v13, %v4797_v2  ;;  %v4808_v24 = vmul.f32 1.442695, %v4799_v52  ;;  %v15112_v18 = vpop.eup %13295 }
 0x491   : > { %v3266_v46 = vrot.slane %v3265_v27, 4  ;;  %v3273_v42 = vadd.f32 %v15106_v41, %v3272_v49  ;;  %13297 = vpow2.f32 %v4806_v54  ;;  %v4812_v45 = vmul.f32 1.442695, %v4801_v11 }
 0x492   : > { %13299 = vpow2.f32 %v4810_v17  ;;  %v7433_v44 = vmax.f32 %v7431_v58, %v7432_v23  ;;  %v15114_v16 = vpop.f32.mrb[26].mxu0  ;;  %v7442_v8 = vmax.f32 %v7440_v50, %v7441_v60  ;;  %v4816_v13 = vmul.f32 1.442695, %v4803_v51  ;;  %v15123_v50 = vpop.f32.mrb[37].mxu1 }
 0x493   : > { %v3267_v62 = vadd.f32 %v3266_v46, %v3265_v27  ;;  %v3274_v47 = vadd.f32 %v15112_v18, %v3273_v42  ;;  %13301 = vpow2.f32 %v4814_v34  ;;  %v15117_v2 = vpop.f32.mrb[27].mxu0  ;;  %v4820_v17 = vmul.f32 1.442695, %v4805_v0  ;;  %18024 = vst [vmem:[#allocation20_spill] sm:$0xff] %v15123_v50 }
 0x494   : > { %13303 = vpow2.f32 %v4818_v39  ;;  %v7434_v49 = vrot.slane %v7433_v44, 4  ;;  %v7443_v57 = vrot.slane %v7442_v8, 4  ;;  %v15129_v39 = vpop.f32.mrb[38].mxu1 }
 0x495   : > { %v3268_v52 = vrot.slane %v3267_v62, 2  ;;  %v3275_v54 = vrot.slane %v3274_v47, 4  ;;  %13305 = vpow2.f32 %v4808_v24  ;;  %18025 = vst [vmem:[#allocation21_spill] sm:$0xff] %v15129_v39 }
 0x496   : > { %13307 = vpow2.f32 %v4812_v45  ;;  %v7435_v11 = vmax.f32 %v7433_v44, %v7434_v49  ;;  %v15119_v58 = vpop.f32.mrb[28].mxu0  ;;  %v7444_v46 = vmax.f32 %v7442_v8, %v7443_v57 }
 0x497   : > { %v3269_v23 = vadd.f32 %v3268_v52, %v3267_v62  ;;  %v3276_v27 = vadd.f32 %v3275_v54, %v3274_v47  ;;  %v15121_v42 = vpop.f32.mrb[29].mxu0  ;;  %13309 = vpow2.f32 %v4816_v13  ;;  %v9538_v51 = vmax.f32 %v15097_v40, %v15119_v58  ;;  %v15131_v62 = vpop.f32.mrb[39].mxu1 }
 0x498   : > { %v7436_v60 = vrot.slane %v7435_v11, 2  ;;  %v9547_v34 = vmax.f32 %v15102_v32, %v15121_v42  ;;  %v7445_v45 = vrot.slane %v7444_v46, 2  ;;  %18026 = vst [vmem:[#allocation22_spill] sm:$0xff] %v15131_v62  ;;  %13311 = vpow2.f32 %v4820_v17  ;;  %v15135_v47 = vpop.f32.mrb[40].mxu1 }
 0x499   : > { %v3270_v0 = vrot.slane %v3269_v23, 1  ;;  %v3277_v24 = vrot.slane %v3276_v27, 2  ;;  %18027 = vst [vmem:[#allocation23_spill] sm:$0xff] %v15135_v47  ;;  %v15143_v50 = vpop.f32.mrb[41].mxu1 }
 0x49a   : > { %v7437_v57 = vmax.f32 %v7435_v11, %v7436_v60  ;;  %v15133_v44 = vpop.f32.mrb[30].mxu0  ;;  %v7446_v52 = vmax.f32 %v7444_v46, %v7445_v45  ;;  %18028 = vst [vmem:[#allocation24_spill] sm:$0xff] %v15143_v50  ;;  %v15149_v60 = vpop.f32.mrb[42].mxu1 }
 0x49b   : > { %v15137_v8 = vpop.eup %13297  ;;  %v3271_v13 = vadd.f32 %v3270_v0, %v3269_v23  ;;  %v3278_v49 = vadd.f32 %v3277_v24, %v3276_v27  ;;  %v9539_v54 = vmax.f32 %v15114_v16, %v15133_v44  ;;  %v15141_v39 = vpop.f32.mrb[31].mxu0  ;;  %18029 = vst [vmem:[#allocation25_spill] sm:$0xff] %v15149_v60 }
 0x49c   : > { %v15145_v12 = vpop.eup %13299  ;;  %v7438_v17 = vrot.slane %v7437_v57, 1  ;;  %v9548_v11 = vmax.f32 %v15117_v2, %v15141_v39  ;;  %v7447_v46 = vrot.slane %v7446_v52, 1 }
 0x49d   : > { %v15151_v47 = vpop.eup %13301  ;;  %13313 = vrcp.f32 %v3271_v13  ;;  %v3279_v23 = vrot.slane %v3278_v49, 1  ;;  %v4822_v27 = vadd.f32 %v15145_v12, %v15137_v8  ;;  %v9540_v45 = vmax.f32 %v9538_v51, %v9539_v54  ;;  %v15164_v13 = vpop.f32.mrb[43].mxu1 }
 0x49e   : > { %v15155_v0 = vpop.eup %13303  ;;  %v7439_v24 = vmax.f32 %v7437_v57, %v7438_v17  ;;  %v9549_v50 = vmax.f32 %v9547_v34, %v9548_v11  ;;  %v15157_v62 = vpop.f32.mrb[32].mxu0  ;;  %v7448_v7 = vmax.f32 %v7446_v52, %v7447_v46  ;;  %18032 = vst [vmem:[#allocation29_spill] sm:$0xff] %v15164_v13 }
 0x49f   : > { %18030 = vst [vmem:[#allocation26_spill] sm:$0xff] %v15157_v62  ;;  %v15159_v63 = vpop.eup %13305  ;;  %v3280_v22 = vadd.f32 %v3279_v23, %v3278_v49  ;;  %v4823_v60 = vadd.f32 %v15151_v47, %v4822_v27  ;;  %v15162_v25 = vpop.f32.mrb[33].mxu0 }
 0x4a0   : > { %18031 = vst [vmem:[#allocation27_spill] sm:$0xff] %v15162_v25  ;;  %v15166_v55 = vpop.eup %13307  ;;  %v7449_v5 = vsub.f32 %v15031_v48, %v7439_v24  ;;  %v7451_v57 = vsub.f32 %v15041_v53, %v7439_v24  ;;  %v7453_v51 = vsub.f32 %v15047_v59, %v7439_v24  ;;  %v7455_v34 = vsub.f32 %v15065_v26, %v7439_v24 }
 0x4a1   : > { %13315 = vrcp.f32 %v3280_v22  ;;  %v4824_v49 = vadd.f32 %v15155_v0, %v4823_v60  ;;  %v4831_v52 = vadd.f32 %v15166_v55, %v15159_v63  ;;  %v7450_v54 = vsub.f32 %v15035_v9, %v7448_v7  ;;  %v15176_v17 = vpop.eup %13309 }
 0x4a2   : > { %v7457_v11 = vmul.f32 1.442695, %v7449_v5  ;;  %v7461_v23 = vmul.f32 1.442695, %v7451_v57  ;;  %v7465_v27 = vmul.f32 1.442695, %v7453_v51  ;;  %v7452_v48 = vsub.f32 %v15045_v21, %v7448_v7  ;;  %v15183_v60 = vpop.eup %13311 }
 0x4a3   : > { %v4832_v53 = vadd.f32 %v15176_v17, %v4831_v52  ;;  %v7469_v59 = vmul.f32 1.442695, %v7455_v34  ;;  %v7454_v26 = vsub.f32 %v15051_v3, %v7448_v7  ;;  %v15181_v22 = vpop.f32.mrb[34].mxu0  ;;  %v7456_v46 = vsub.f32 %v15075_v61, %v7448_v7 }
 0x4a4   : > { %18033 = vst [vmem:[#allocation31_spill] sm:$0xff] %v15181_v22  ;;  %13317 = vpow2.f32 %v7457_v11  ;;  %v7459_v9 = vmul.f32 1.442695, %v7450_v54  ;;  %v15186_v24 = vpop.f32.mrb[35].mxu0  ;;  %v7463_v57 = vmul.f32 1.442695, %v7452_v48  ;;  %v3299_v11 = vmax.f32 %v15157_v62, %v15162_v25 }
 0x4a5   : > { %18034 = vst [vmem:[#allocation32_spill] sm:$0xff] %v15186_v24  ;;  %v4833_v5 = vadd.f32 %v15183_v60, %v4832_v53  ;;  %13319 = vpow2.f32 %v7461_v23  ;;  %v9541_v21 = vrot.slane %v9540_v45, 4  ;;  %v9550_v51 = vrot.slane %v9549_v50, 4 }
 0x4a6   : > { %13321 = vpow2.f32 %v7465_v27  ;;  %v15189_v34 = vpop.f32.mrb[36].mxu0  ;;  %v7467_v52 = vmul.f32 1.442695, %v7454_v26  ;;  %v3302_v23 = vmax.f32 %v15181_v22, %v15186_v24  ;;  %v4825_v27 = vrot.slane %v4824_v49, 4  ;;  %3300 = vmax.xlane.f32.xlu0 %v3299_v11 }
 0x4a7   : > { %18035 = vst [vmem:[#allocation33_spill] sm:$0xff] %v15189_v34  ;;  %v15191_v3 = vpop.eup %13313  ;;  %13323 = vpow2.f32 %v7469_v59  ;;  %v15195_v7 = vpop.f32.mrb[37].mxu0  ;;  %v9542_v61 = vmax.f32 %v9540_v45, %v9541_v21  ;;  %v9551_v54 = vmax.f32 %v9549_v50, %v9550_v51  ;;  %v7471_v48 = vmul.f32 1.442695, %v7456_v46 }
 0x4a8   : > { %18036 = vst [vmem:[#allocation34_spill] sm:$0xff] %v15195_v7  ;;  %13325 = vpow2.f32 %v7459_v9  ;;  %v3305_v53 = vmax.f32 %v15189_v34, %v15195_v7  ;;  %v3282_v25 = vmul.f32 %v15191_v3, %v15059_v19  ;;  %v3285_v45 = vmul.f32 %v15191_v3, %v15063_v37 }
 0x4a9   : > { %13327 = vpow2.f32 %v7463_v57  ;;  %v9543_v59 = vrot.slane %v9542_v61, 2  ;;  %v9552_v26 = vrot.slane %v9551_v54, 2  ;;  %v4826_v11 = vadd.f32 %v4825_v27, %v4824_v49 }
 0x4aa   : > { %v15201_v13 = vpop.f32.mrb[38].mxu0  ;;  %13329 = vpow2.f32 %v7467_v52  ;;  %3306 = vmax.xlane.f32.xlu1 %v3305_v53  ;;  %v4834_v24 = vrot.slane %v4833_v5, 4  ;;  %3303 = vmax.xlane.f32.xlu0 %v3302_v23  ;;  %v3291_v7 = vmul.f32 0.17677669, %v3282_v25 }
 0x4ab   : > { %18037 = vst [vmem:[#allocation36_spill] sm:$0xff] %v15201_v13  ;;  %v15205_v9 = vpop.eup %13315  ;;  %v15207_v50 = vpop.f32.mrb[39].mxu0  ;;  %v9544_v46 = vmax.f32 %v9542_v61, %v9543_v59  ;;  %v9553_v57 = vmax.f32 %v9551_v54, %v9552_v26  ;;  %13331 = vpow2.f32 %v7471_v48 }
 0x4ac   : > { %18038 = vst [vmem:[#allocation48_spill] sm:$0xff] %v15207_v50  ;;  %v3308_v21 = vmax.f32 %v15201_v13, %v15207_v50  ;;  %v3284_v51 = vmul.f32 %v15205_v9, %v15085_v31  ;;  %v3286_v19 = vmul.f32 %v15205_v9, %v15091_v56  ;;  %v15223_v54 = vmul.f32 %v15205_v9, %v15106_v41 }
 0x4ad   : > { %v9545_v53 = vrot.slane %v9544_v46, 1  ;;  %v9554_v22 = vrot.slane %v9553_v57, 1  ;;  %v4827_v41 = vrot.slane %v4826_v11, 2  ;;  %v4835_v50 = vadd.f32 %v4834_v24, %v4833_v5 }
 0x4ae   : > { %v15217_v52 = vpop.eup %13317  ;;  %v15219_v37 = vpop.f32.mrb[40].mxu0  ;;  %v3292_v61 = vmul.f32 0.17677669, %v3284_v51  ;;  %3309 = vmax.xlane.f32.xlu1 %v3308_v21  ;;  %v3294_v49 = vmul.f32 0.17677669, %v3286_v19 }
 0x4af   : > { %18039 = vst [vmem:[#allocation50_spill] sm:$0xff] %v15217_v52  ;;  %18040 = vst [vmem:[#allocation54_spill] sm:$0xff] %v15219_v37  ;;  %v15225_v59 = vpop.eup %13319  ;;  %v15227_v31 = vpop.f32.mrb[41].mxu0  ;;  %v9546_v27 = vmax.f32 %v9544_v46, %v9545_v53  ;;  %v9555_v48 = vmax.f32 %v9553_v57, %v9554_v22 }
 0x4b0   : > { %18041 = vst [vmem:[#allocation56_spill] sm:$0xff] %v15225_v59  ;;  %18042 = vst [vmem:[#allocation57_spill] sm:$0xff] %v15227_v31  ;;  %v15229_v23 = vpop.eup %13321  ;;  %v7473_v56 = vadd.f32 %v15225_v59, %v15217_v52  ;;  %v4090_v13 = vand.u32 4294901760, %v3292_v61  ;;  %v4094_v26 = vand.u32 4294901760, %v3294_v49  ;;  %v4092_v52 = vand.u32 4294901760, %v3291_v7 }
 0x4b1   : > { %18043 = vst [vmem:[#allocation37_spill] sm:$0xff] %v15229_v23  ;;  %v15235_v51 = vpop.eup %13323  ;;  %v9556_v34 = vsub.f32 %v15097_v40, %v9546_v27  ;;  %v9558_v62 = vsub.f32 %v15114_v16, %v9546_v27  ;;  %v9560_v46 = vsub.f32 %v15119_v58, %v9546_v27  ;;  %v9562_v53 = vsub.f32 %v15133_v44, %v9546_v27 }
 0x4b2   : > { %18044 = vst [vmem:[#allocation38_spill] sm:$0xff] %v15235_v51  ;;  %v15237_v21 = vpop.eup %13325  ;;  %v7474_v19 = vadd.f32 %v15229_v23, %v7473_v56  ;;  %v15243_v22 = vpop.f32.mrb[42].mxu0  ;;  %v9557_v24 = vsub.f32 %v15102_v32, %v9555_v48  ;;  %v9559_v25 = vsub.f32 %v15117_v2, %v9555_v48  ;;  %v9561_v44 = vsub.f32 %v15121_v42, %v9555_v48 }
 0x4b3   : > { %v15245_v57 = vpop.eup %13327  ;;  %v15250_v5 = vpop.f32.mrb[43].mxu0  ;;  %v9564_v40 = vmul.f32 1.442695, %v9556_v34  ;;  %v9568_v58 = vmul.f32 1.442695, %v9558_v62  ;;  %v9563_v32 = vsub.f32 %v15141_v39, %v9555_v48  ;;  %v4836_v2 = vrot.slane %v4835_v50, 2 }
 0x4b4   : > { %18045 = vst [vmem:[#allocation39_spill] sm:$0xff] %v15245_v57  ;;  %v15253_v56 = vadd.f32 %v15235_v51, %v7474_v19  ;;  %v7482_v16 = vadd.f32 %v15245_v57, %v15237_v21  ;;  %v15257_v31 = vpop.eup %13329  ;;  %v9572_v37 = vmul.f32 1.442695, %v9560_v46  ;;  %v9576_v23 = vmul.f32 1.442695, %v9562_v53 }
 0x4b5   : > { %13333 = vpow2.f32 %v9564_v40  ;;  %v9566_v59 = vmul.f32 1.442695, %v9557_v24  ;;  %v15264_v51 = vpop.eup %13331  ;;  %v9570_v34 = vmul.f32 1.442695, %v9559_v25  ;;  %v3293_v62 = vmul.f32 0.17677669, %v3285_v45 }
 0x4b6   : > { %v7483_v27 = vadd.f32 %v15257_v31, %v7482_v16  ;;  %v15262_v19 = vpop.f32.mrb[44].mxu0  ;;  %13335 = vpow2.f32 %v9568_v58  ;;  %v4828_v57 = vadd.f32 %v4827_v41, %v4826_v11  ;;  %v9574_v48 = vmul.f32 1.442695, %v9561_v44 }
 0x4b7   : > { %18046 = vst [vmem:[#allocation40_spill] sm:$0xff] %v15262_v19  ;;  %13337 = vpow2.f32 %v9572_v37  ;;  %v15269_v42 = vpop.f32.mrb[45].mxu0  ;;  %v15275_v24 = vpack.c.bf16 %v4094_v26, %v4090_v13  ;;  %v4837_v25 = vadd.f32 %v4836_v2, %v4835_v50  ;;  %v9578_v45 = vmul.f32 1.442695, %v9563_v32 }
 0x4b8   : > { %v15267_v46 = vadd.f32 %v15264_v51, %v7483_v27  ;;  %18047 = vst [vmem:[#allocation41_spill] sm:$0xff] %v15269_v42  ;;  %13339 = vpow2.f32 %v9576_v23  ;;  %v15279_v41 = vsub.f32 %v3292_v61, %v4090_v13  ;;  %v4096_v16 = vand.u32 4294901760, %v3293_v62 }
 0x4b9   : > { %18048 = vst [vmem:[#allocation42_spill] sm:$0xff] %v15275_v24  ;;  %13341 = vpow2.f32 %v9566_v59  ;;  %v15283_v40 = vsub.f32 %v3291_v7, %v4092_v52  ;;  %v3290_v23 = vmul.f32 %v15205_v9, %v15112_v18  ;;  %v15289_v44 = vsub.f32 %v3294_v49, %v4094_v26 }
 0x4ba   : > { %v15277_v11 = vpop.f32.mrb[46].mxu0  ;;  %18050 = vst [vmem:[#allocation44_spill] sm:$0xff] %v15279_v41  ;;  %13343 = vpow2.f32 %v9570_v34  ;;  %v15291_v50 = vpack.c.bf16 %v4096_v16, %v4092_v52  ;;  %v15293_v59 = vsub.f32 %v3293_v62, %v4096_v16  ;;  %v3296_v13 = vmul.f32 0.17677669, %v15223_v54 }
 0x4bb   : > { %18049 = vst [vmem:[#allocation43_spill] sm:$0xff] %v15277_v11  ;;  %v15281_v37 = vpop.f32.mrb[47].mxu0  ;;  %18052 = vst [vmem:[#allocation46_spill] sm:$0xff] %v15283_v40  ;;  %13345 = vpow2.f32 %v9574_v48  ;;  %v4829_v61 = vrot.slane %v4828_v57, 1  ;;  %v4838_v32 = vrot.slane %v4837_v25, 1  ;;  %v3287_v18 = vmul.f32 %v15191_v3, %v15069_v1 }
 0x4bc   : > { %18051 = vst [vmem:[#allocation45_spill] sm:$0xff] %v15281_v37  ;;  %18053 = vst [vmem:[#allocation58_spill] sm:$0xff] %v15289_v44  ;;  %v3298_v7 = vmul.f32 0.17677669, %v3290_v23  ;;  %13347 = vpow2.f32 %v9578_v45  ;;  %v4098_v49 = vand.u32 4294901760, %v3296_v13  ;;  %v3289_v52 = vmul.f32 %v15191_v3, %v15079_v30 }
 0x4bd   : > { %18054 = vst [vmem:[#allocation59_spill] sm:$0xff] %v15291_v50  ;;  %18055 = vst [vmem:[#allocation60_spill] sm:$0xff] %v15293_v59  ;;  %v17702_v26 = vand.u32 4294901760, %v15279_v41  ;;  %v3295_v45 = vmul.f32 0.17677669, %v3287_v18  ;;  %v4839_v23 = vadd.f32 %v4838_v32, %v4837_v25 }
 0x4be   : > { %v15296_v2 = vpop.f32.mrb[48].mxu0  ;;  %v4102_v34 = vand.u32 4294901760, %v3298_v7  ;;  %v15312_v1 = vsub.f32 %v3296_v13, %v4098_v49  ;;  %v3297_v16 = vmul.f32 0.17677669, %v3289_v52  ;;  %v4830_v13 = vadd.f32 %v4829_v61, %v4828_v57 }
 0x4bf   : > { %18056 = vst [vmem:[#allocation61_spill] sm:$0xff] %v15296_v2  ;;  %v15300_v9 = vpop.f32.mrb[49].mxu0  ;;  %v15305_v27 = vpop.eup %13333  ;;  %v4210_v30 = vsub.f32 %v15279_v41, %v17702_v26  ;;  %v4100_v52 = vand.u32 4294901760, %v3295_v45  ;;  %13349 = vrcp.f32 %v4839_v23 }
 0x4c0   : > { %18057 = vst [vmem:[#allocation62_spill] sm:$0xff] %v15300_v9  ;;  %v15310_v48 = vpop.eup %13335  ;;  %18058 = vst [vmem:[#allocation63_spill] sm:$0xff] %v15312_v1  ;;  %v15323_v53 = vpack.c.bf16 %v4102_v34, %v4098_v49  ;;  %v15329_v18 = vsub.f32 %v3298_v7, %v4102_v34  ;;  %v4104_v50 = vand.u32 4294901760, %v3297_v16  ;;  %v18063_v49 = vand.u32 4294901760, %v15289_v44 }
 0x4c1   : > { %v15317_v3 = vpop.eup %13337  ;;  %v9580_v58 = vadd.f32 %v15310_v48, %v15305_v27  ;;  %v4211_v24 = vand.u32 4294901760, %v4210_v30  ;;  %v15343_v61 = vsub.f32 %v3295_v45, %v4100_v52  ;;  %v4215_v34 = vand.u32 4294901760, %v15283_v40 }
 0x4c2   : > { %v15321_v54 = vpop.f32.mrb[50].mxu0  ;;  %18060 = vst [vmem:[#allocation65_spill] sm:$0xff] %v15323_v53  ;;  %v15325_v39 = vpop.eup %13339  ;;  %18062 = vst [vmem:[#allocation67_spill] sm:$0xff] %v15329_v18  ;;  %v4222_v53 = vsub.f32 %v15289_v44, %v18063_v49  ;;  %v15341_v57 = vpack.c.bf16 %v4104_v50, %v4100_v52  ;;  %v15345_v7 = vsub.f32 %v3297_v16, %v4104_v50  ;;  %v4227_v16 = vand.u32 4294901760, %v15293_v59 }
 0x4c3   : > { %18059 = vst [vmem:[#allocation64_spill] sm:$0xff] %v15321_v54  ;;  %v15327_v62 = vpop.f32.mrb[51].mxu0  ;;  %v15331_v26 = vpop.eup %13341  ;;  %v9581_v25 = vadd.f32 %v15317_v3, %v9580_v58  ;;  %18065 = vst [vmem:[#allocation69_spill] sm:$0xff] %v15343_v61  ;;  %v4216_v50 = vsub.f32 %v15283_v40, %v4215_v34  ;;  %v4233_v23 = vand.u32 4294901760, %v15312_v1  ;;  %13351 = vrcp.f32 %v4830_v13 }
 0x4c4   : > { %18061 = vst [vmem:[#allocation66_spill] sm:$0xff] %v15327_v62  ;;  %v15339_v9 = vpop.eup %13343  ;;  %18064 = vst [vmem:[#allocation68_spill] sm:$0xff] %v15341_v57  ;;  %v4223_v62 = vand.u32 4294901760, %v4222_v53  ;;  %v4251_v42 = vand.u32 4294901760, %v15345_v7  ;;  %v7485_v40 = vrot.slane %v15267_v46, 4 }
 0x4c5   : > { %18066 = vst [vmem:[#allocation70_spill] sm:$0xff] %v15345_v7  ;;  %v15349_v58 = vadd.f32 %v15325_v39, %v9581_v25  ;;  %v9589_v30 = vadd.f32 %v15339_v9, %v15331_v26  ;;  %v15353_v49 = vpop.eup %13345  ;;  %v4217_v2 = vand.u32 4294901760, %v4216_v50 }
 0x4c6   : > { %v3067_v32 = vpop.f32.mrb[52].mxu0  ;;  %v15365_v57 = vpack.c.bf16 %v4223_v62, %v4211_v24  ;;  %v15367_v53 = vpop.eup %13347 }
 0x4c7   : > { %v15356_v54 = vadd.f32 %v3067_v32, %v14941_v36  ;;  %v3069_v45 = vpop.f32.mrb[53].mxu0  ;;  %v9590_v52 = vadd.f32 %v15353_v49, %v9589_v30  ;;  %v4228_v36 = vsub.f32 %v15293_v59, %v4227_v16  ;;  %v4234_v32 = vsub.f32 %v15312_v1, %v4233_v23  ;;  %v18103_v59 = vld [vmem:[#allocation51_spill] sm:$0xff] }
 0x4c8   : > { %v15363_v25 = vadd.f32 %v3069_v45, %v14943_v33  ;;  %18069 = vst [vmem:[#allocation73_spill] sm:$0xff] %v15365_v57  ;;  %v4239_v30 = vand.u32 4294901760, %v15343_v61 }
 0x4c9   : > { %18067 = vst [vmem:[#allocation71_spill] sm:$0xff] %v15356_v54  ;;  %v4245_v54 = vand.u32 4294901760, %v15329_v18  ;;  %v15373_v37 = vadd.f32 %v15367_v53, %v9590_v52  ;;  %v4229_v62 = vand.u32 4294901760, %v4228_v36  ;;  %v4235_v45 = vand.u32 4294901760, %v4234_v32 }
 0x4ca   : > { %18068 = vst [vmem:[#allocation72_spill] sm:$0xff] %v15363_v25  ;;  %v3074_v13 = vpop.f32.mrb[54].mxu0  ;;  %v4240_v25 = vsub.f32 %v15343_v61, %v4239_v30 }
 0x4cb   : > { %v15377_v33 = vadd.f32 %v3074_v13, %v14945_v29  ;;  %v3076_v24 = vpop.f32.mrb[55].mxu0  ;;  %v4246_v50 = vsub.f32 %v15329_v18, %v4245_v54  ;;  %v15384_v11 = vpack.c.bf16 %v4229_v62, %v4217_v2 }
 0x4cc   : > { %v15381_v57 = vadd.f32 %v3076_v24, %v14947_v4  ;;  %v4241_v13 = vand.u32 4294901760, %v4240_v25  ;;  %v4252_v4 = vsub.f32 %v15345_v7, %v4251_v42  ;;  %v13350_v24 = vpop.eup %13349  ;;  %v18073_v25 = vand.u32 4294901760, %v15279_v41 }
 0x4cd   : > { %18070 = vst [vmem:[#allocation74_spill] sm:$0xff] %v15377_v33  ;;  %18071 = vst [vmem:[#allocation75_spill] sm:$0xff] %v15384_v11  ;;  %v4247_v52 = vand.u32 4294901760, %v4246_v50  ;;  %v13352_v2 = vpop.eup %13351  ;;  %v4843_v61 = vmul.f32 %v13350_v24, %v15159_v63  ;;  %v18233_v11 = vld [vmem:[#allocation61_spill] sm:$0xff] }
 0x4ce   : > { %v3081_v29 = vpop.f32.mrb[56].mxu0  ;;  %v4253_v19 = vand.u32 4294901760, %v4252_v4 }
 0x4cf   : > { %v15390_v36 = vadd.f32 %v3081_v29, %v14949_v14  ;;  %v3083_v32 = vpop.f32.mrb[57].mxu0  ;;  %v15392_v33 = vpack.c.bf16 %v4247_v52, %v4235_v45  ;;  %v18074_v45 = vand.u32 4294901760, %v15289_v44  ;;  %v15410_v29 = vpack.c.bf16 %v4227_v16, %v4215_v34 }
 0x4d0   : > { %v15398_v62 = vadd.f32 %v3083_v32, %v14951_v20  ;;  %v15413_v32 = vpack.c.bf16 %v4245_v54, %v4233_v23  ;;  %v15418_v1 = vpack.c.bf16 %v4253_v19, %v4241_v13  ;;  %v15420_v14 = vpack.c.bf16 %v4251_v42, %v4239_v30 }
 0x4d1   : > { %18072 = vst [vmem:[#allocation76_spill] sm:$0xff] %v15392_v33  ;;  %v15408_v52 = vpack.c.bf16 %v18074_v45, %v18073_v25  ;;  %18076 = vst [vmem:[#allocation78_spill] sm:$0xff] %v15410_v29  ;;  %v4845_v34 = vmul.f32 %v13350_v24, %v15166_v55  ;;  %v4851_v16 = vmul.f32 0.17677669, %v4843_v61  ;;  %v4841_v45 = vmul.f32 %v13352_v2, %v15137_v8 }
 0x4d2   : > { %v3088_v20 = vpop.f32.mrb[58].mxu0  ;;  %18077 = vst [vmem:[#allocation79_spill] sm:$0xff] %v15413_v32  ;;  %18079 = vst [vmem:[#allocation81_spill] sm:$0xff] %v15418_v1  ;;  %v4844_v54 = vmul.f32 %v13352_v2, %v15145_v12  ;;  %v7486_v23 = vadd.f32 %v7485_v40, %v15267_v46  ;;  %v4849_v42 = vmul.f32 %v13350_v24, %v15183_v60  ;;  %v7476_v61 = vrot.slane %v15253_v56, 4 }
 0x4d3   : > { %18075 = vst [vmem:[#allocation77_spill] sm:$0xff] %v15408_v52  ;;  %v15416_v50 = vadd.f32 %v3088_v20, %v14953_v28  ;;  %v3090_v4 = vpop.f32.mrb[59].mxu0  ;;  %18080 = vst [vmem:[#allocation82_spill] sm:$0xff] %v15420_v14  ;;  %v4847_v28 = vmul.f32 %v13350_v24, %v15176_v17  ;;  %v4853_v13 = vmul.f32 0.17677669, %v4845_v34  ;;  %v5648_v30 = vand.u32 4294901760, %v4851_v16 }
 0x4d4   : > { %v15424_v25 = vadd.f32 %v3090_v4, %v14955_v35  ;;  %v4850_v20 = vmul.f32 0.17677669, %v4841_v45  ;;  %v4852_v55 = vmul.f32 0.17677669, %v4844_v54  ;;  %v4857_v34 = vmul.f32 0.17677669, %v4849_v42 }
 0x4d5   : > { %18078 = vst [vmem:[#allocation80_spill] sm:$0xff] %v15416_v50  ;;  %v5652_v12 = vand.u32 4294901760, %v4853_v13  ;;  %v4855_v17 = vmul.f32 0.17677669, %v4847_v28  ;;  %v15439_v4 = vsub.f32 %v4851_v16, %v5648_v30  ;;  %v7487_v60 = vrot.slane %v7486_v23, 2 }
 0x4d6   : > { %18081 = vst [vmem:[#allocation83_spill] sm:$0xff] %v15424_v25  ;;  %v3095_v19 = vpop.f32.mrb[60].mxu0  ;;  %v5650_v46 = vand.u32 4294901760, %v4850_v20  ;;  %v5654_v40 = vand.u32 4294901760, %v4852_v55  ;;  %v5660_v42 = vand.u32 4294901760, %v4857_v34 }
 0x4d7   : > { %v15433_v63 = vadd.f32 %v3095_v19, %v14957_v43  ;;  %v3097_v35 = vpop.f32.mrb[61].mxu0  ;;  %18082 = vst [vmem:[#allocation84_spill] sm:$0xff] %v15439_v4  ;;  %v15441_v43 = vpack.c.bf16 %v5652_v12, %v5648_v30  ;;  %v15443_v19 = vsub.f32 %v4853_v13, %v5652_v12  ;;  %v5656_v45 = vand.u32 4294901760, %v4855_v17 }
 0x4d8   : > { %v15437_v8 = vadd.f32 %v3097_v35, %v14959_v15  ;;  %v15448_v15 = vpack.c.bf16 %v5654_v40, %v5650_v46  ;;  %v15450_v35 = vsub.f32 %v4850_v20, %v5650_v46  ;;  %v15452_v16 = vsub.f32 %v4852_v55, %v5654_v40 }
 0x4d9   : > { %18083 = vst [vmem:[#allocation85_spill] sm:$0xff] %v15441_v43  ;;  %18084 = vst [vmem:[#allocation86_spill] sm:$0xff] %v15443_v19  ;;  %v15457_v32 = vsub.f32 %v4855_v17, %v5656_v45  ;;  %v4846_v13 = vmul.f32 %v13352_v2, %v15151_v47  ;;  %v4848_v30 = vmul.f32 %v13352_v2, %v15155_v0  ;;  %v17732_v12 = vand.u32 4294901760, %v15443_v19 }
 0x4da   : > { %v3102_v24 = vpop.f32.mrb[62].mxu0  ;;  %18086 = vst [vmem:[#allocation88_spill] sm:$0xff] %v15448_v15  ;;  %18087 = vst [vmem:[#allocation89_spill] sm:$0xff] %v15450_v35  ;;  %v7477_v20 = vadd.f32 %v7476_v61, %v15253_v56  ;;  %v15465_v46 = vpack.c.bf16 %v5660_v42, %v5656_v45  ;;  %v18093_v56 = vld [vmem:[#allocation28_spill] sm:$0xff] }
 0x4db   : > { %v15446_v54 = vadd.f32 %v3102_v24, %v14963_v10  ;;  %v3104_v14 = vpop.f32.mrb[63].mxu0  ;;  %18088 = vst [vmem:[#allocation90_spill] sm:$0xff] %v15452_v16  ;;  %18090 = vst [vmem:[#allocation92_spill] sm:$0xff] %v15457_v32  ;;  %v17729_v10 = vand.u32 4294901760, %v15439_v4  ;;  %v17733_v24 = vand.u32 4294901760, %v15450_v35  ;;  %v5780_v2 = vsub.f32 %v15443_v19, %v17732_v12 }
 0x4dc   : > { %v15455_v28 = vadd.f32 %v3104_v14, %v14965_v6  ;;  %18091 = vst [vmem:[#allocation93_spill] sm:$0xff] %v15465_v46  ;;  %v15467_v6 = vsub.f32 %v4857_v34, %v5660_v42  ;;  %v4854_v14 = vmul.f32 0.17677669, %v4846_v13  ;;  %v4856_v40 = vmul.f32 0.17677669, %v4848_v30 }
 0x4dd   : > { %18085 = vst [vmem:[#allocation87_spill] sm:$0xff] %v15446_v54  ;;  %v5768_v0 = vsub.f32 %v15439_v4, %v17729_v10  ;;  %v5774_v34 = vsub.f32 %v15450_v35, %v17733_v24  ;;  %v7488_v42 = vadd.f32 %v7487_v60, %v7486_v23 }
 0x4de   : > { %18089 = vst [vmem:[#allocation91_spill] sm:$0xff] %v15455_v28  ;;  %v3109_v55 = vpop.f32.mrb[64].mxu0  ;;  %18092 = vst [vmem:[#allocation94_spill] sm:$0xff] %v15467_v6  ;;  %v5658_v45 = vand.u32 4294901760, %v4854_v14  ;;  %v5662_v13 = vand.u32 4294901760, %v4856_v40 }
 0x4df   : > { %v15470_v17 = vadd.f32 %v3109_v55, %v14967_v38  ;;  %v3111_v47 = vpop.f32.mrb[65].mxu0  ;;  %v17734_v38 = vand.u32 4294901760, %v15452_v16  ;;  %v5769_v30 = vand.u32 4294901760, %v5768_v0  ;;  %v5781_v55 = vand.u32 4294901760, %v5780_v2  ;;  %v18098_v0 = vld [vmem:[#allocation47_spill] sm:$0xff] }
 0x4e0   : > { %v12395_v61 = vadd.f32 %v3111_v47, %v18093_v56  ;;  %v15485_v15 = vsub.f32 %v4854_v14, %v5658_v45  ;;  %v5775_v43 = vand.u32 4294901760, %v5774_v34  ;;  %v18095_v56 = vld [vmem:[#allocation30_spill] sm:$0xff]  ;;  %v15493_v29 = vpack.c.bf16 %v5662_v13, %v5658_v45 }
 0x4e1   : > { %v5786_v47 = vsub.f32 %v15452_v16, %v17734_v38  ;;  %v15495_v23 = vsub.f32 %v4856_v40, %v5662_v13  ;;  %v15503_v14 = vpack.c.bf16 %v5781_v55, %v5769_v30  ;;  %v7489_v52 = vrot.slane %v7488_v42, 1  ;;  %v18101_v13 = vld [vmem:[#allocation49_spill] sm:$0xff]  ;;  %v18102_v30 = vld [vmem:[#allocation52_spill] sm:$0xff] }
 0x4e2   : > { %v15483_v46 = vand.u32 4294901760, %v12395_v61  ;;  %v3116_v10 = vpop.f32.mrb[66].mxu0  ;;  %18094 = vst [vmem:[#allocation28_spill] sm:$0xff] %v15485_v15  ;;  %18096 = vst [vmem:[#allocation30_spill] sm:$0xff] %v15493_v29  ;;  %v5791_v38 = vand.u32 4294901760, %v15457_v32 }
 0x4e3   : > { %v15491_v12 = vadd.f32 %v3116_v10, %v18095_v56  ;;  %v3118_v24 = vpop.f32.mrb[67].mxu0  ;;  %18097 = vst [vmem:[#allocation95_spill] sm:$0xff] %v15495_v23  ;;  %18099 = vst [vmem:[#allocation47_spill] sm:$0xff] %v15503_v14  ;;  %v5787_v34 = vand.u32 4294901760, %v5786_v47  ;;  %v5803_v10 = vand.u32 4294901760, %v15467_v6  ;;  %v7478_v56 = vrot.slane %v7477_v20, 2 }
 0x4e4   : > { %v15498_v60 = vsub.f32 %v12395_v61, %v15483_v46  ;;  %v15501_v2 = vadd.f32 %v3118_v24, %v18098_v0  ;;  %v5792_v24 = vsub.f32 %v15457_v32, %v5791_v38  ;;  %v5797_v14 = vand.u32 4294901760, %v15485_v15 }
 0x4e5   : > { %v15508_v40 = vpack.c.bf16 %v5787_v34, %v5775_v43  ;;  %v5804_v0 = vsub.f32 %v15467_v6, %v5803_v10  ;;  %v7490_v18 = vadd.f32 %v7489_v52, %v7488_v42  ;;  %v7479_v34 = vadd.f32 %v7478_v56, %v7477_v20  ;;  %v18106_v42 = vld [vmem:[#allocation55_spill] sm:$0xff] }
 0x4e6   : > { %v3123_v7 = vpop.f32.mrb[68].mxu0  ;;  %v17741_v45 = vand.u32 4294901760, %v15498_v60  ;;  %v5793_v43 = vand.u32 4294901760, %v5792_v24  ;;  %v5809_v20 = vand.u32 4294901760, %v15495_v23  ;;  %v18130_v6 = vld [vmem:[#allocation7_spill] sm:$0xff] }
 0x4e7   : > { %18100 = vst [vmem:[#allocation96_spill] sm:$0xff] %v15508_v40  ;;  %v15511_v61 = vadd.f32 %v3123_v7, %v18101_v13  ;;  %v3125_v29 = vpop.f32.mrb[69].mxu0  ;;  %v5805_v13 = vand.u32 4294901760, %v5804_v0  ;;  %13353 = vrcp.f32 %v7490_v18  ;;  %v7480_v33 = vrot.slane %v7479_v34, 1 }
 0x4e8   : > { %v15515_v55 = vadd.f32 %v3125_v29, %v18102_v30  ;;  %v3434_v47 = vsub.f32 %v15498_v60, %v17741_v45  ;;  %v18104_v29 = vld [vmem:[#allocation53_spill] sm:$0xff]  ;;  %v5798_v45 = vsub.f32 %v15485_v15, %v5797_v14  ;;  %v5810_v0 = vsub.f32 %v15495_v23, %v5809_v20  ;;  %v18129_v23 = vld [vmem:[#allocation39_spill] sm:$0xff] }
 0x4e9   : > { %v15528_v1 = vpack.c.bf16 %v5805_v13, %v5793_v43  ;;  %v7481_v43 = vadd.f32 %v7480_v33, %v7479_v34  ;;  %v18115_v33 = vand.u32 4294901760, %v15439_v4  ;;  %v18116_v34 = vand.u32 4294901760, %v15443_v19 }
 0x4ea   : > { %v3130_v40 = vpop.f32.mrb[70].mxu0  ;;  %v3435_v7 = vand.u32 4294901760, %v3434_v47  ;;  %v5799_v47 = vand.u32 4294901760, %v5798_v45  ;;  %v5811_v13 = vand.u32 4294901760, %v5810_v0  ;;  %v15573_v45 = vpack.c.bf16 %v5803_v10, %v5791_v38  ;;  %v18132_v38 = vld [vmem:[#allocation8_spill] sm:$0xff] }
 0x4eb   : > { %v15523_v41 = vadd.f32 %v3130_v40, %v18103_v59  ;;  %v3132_v44 = vpop.f32.mrb[71].mxu0  ;;  %18105 = vst [vmem:[#allocation49_spill] sm:$0xff] %v15528_v1  ;;  %v18108_v40 = vld [vmem:[#allocation16_spill] sm:$0xff]  ;;  %v18112_v59 = vld [vmem:[#allocation35_spill] sm:$0xff]  ;;  %13355 = vrcp.f32 %v7481_v43  ;;  %v15559_v0 = vpack.c.bf16 %v18116_v34, %v18115_v33  ;;  %v15575_v15 = vpack.c.bf16 %v5809_v20, %v5797_v14 }
 0x4ec   : > { %v15526_v30 = vadd.f32 %v3132_v44, %v18104_v29  ;;  %3436 = vmatprep.mubr.f32.mxu1 %v3435_v7  ;;  %v18110_v29 = vld [vmem:[#allocation11_spill] sm:$0xff]  ;;  %18125 = vst [vmem:[#allocation97_spill] sm:$0xff] %v15573_v45 }
 0x4ed   : > { %18117 = vst [vmem:[#allocation11_spill] sm:$0xff] %v15559_v0  ;;  %18126 = vst [vmem:[#allocation98_spill] sm:$0xff] %v15575_v15  ;;  %v18127_v0 = vld [vmem:[#allocation6_spill] sm:$0xff] }
 0x4ee   : > { %v3137_v52 = vpop.f32.mrb[72].mxu0 }
 0x4ef   : > { %v15533_v56 = vadd.f32 %v3137_v52, %v18106_v42  ;;  %v3139_v24 = vpop.f32.mrb[73].mxu0 }
 0x4f0   : > { %v15538_v44 = vadd.f32 %v3139_v24, %v18108_v40  ;;  %v15551_v24 = vpack.c.bf16 %v5811_v13, %v5799_v47  ;;  %v18121_v47 = vand.u32 4294901760, %v15452_v16  ;;  %v18140_v16 = vld [vmem:[#allocation13_spill] sm:$0xff] }
 0x4f1   : > { %18107 = vst [vmem:[#allocation52_spill] sm:$0xff] %v15533_v56 }
 0x4f2   : > { %18109 = vst [vmem:[#allocation51_spill] sm:$0xff] %v15538_v44  ;;  %v3144_v7 = vpop.f32.mrb[74].mxu0  ;;  %18114 = vst [vmem:[#allocation16_spill] sm:$0xff] %v15551_v24 }
 0x4f3   : > { %v15544_v1 = vadd.f32 %v3144_v7, %v18110_v29  ;;  %v3146_v52 = vpop.f32.mrb[75].mxu0  ;;  %v13354_v7 = vpop.eup %13353  ;;  %v18118_v29 = vld [vmem:[#allocation5_spill] sm:$0xff] }
 0x4f4   : > { %v15549_v56 = vadd.f32 %v3146_v52, %v18112_v59  ;;  %v18120_v59 = vand.u32 4294901760, %v15450_v35  ;;  %v18123_v52 = vld [vmem:[#allocation9_spill] sm:$0xff]  ;;  %v7494_v34 = vmul.f32 %v13354_v7, %v15237_v21  ;;  %v7496_v32 = vmul.f32 %v13354_v7, %v18129_v23  ;;  %v18134_v21 = vld [vmem:[#allocation10_spill] sm:$0xff]  ;;  %v18137_v23 = vld [vmem:[#allocation12_spill] sm:$0xff] }
 0x4f5   : > { %18111 = vst [vmem:[#allocation53_spill] sm:$0xff] %v15544_v1  ;;  %v13356_v15 = vpop.eup %13355 }
 0x4f6   : > { %18113 = vst [vmem:[#allocation55_spill] sm:$0xff] %v15549_v56  ;;  %v3151_v40 = vpop.f32.mrb[76].mxu0  ;;  %v15568_v13 = vpack.c.bf16 %v18121_v47, %v18120_v59  ;;  %v7502_v59 = vmul.f32 0.17677669, %v7494_v34  ;;  %v7504_v47 = vmul.f32 0.17677669, %v7496_v32 }
 0x4f7   : > { %v15562_v18 = vadd.f32 %v3151_v40, %v18118_v29  ;;  %v3153_v42 = vpop.f32.mrb[77].mxu0  ;;  %v18139_v34 = vld [vmem:[#allocation50_spill] sm:$0xff] }
 0x4f8   : > { %18122 = vst [vmem:[#allocation5_spill] sm:$0xff] %v15568_v13  ;;  %v15571_v43 = vadd.f32 %v3153_v42, %v18123_v52  ;;  %v8299_v52 = vand.u32 4294901760, %v7502_v59  ;;  %v8303_v20 = vand.u32 4294901760, %v7504_v47  ;;  %v7492_v32 = vmul.f32 %v13356_v15, %v18139_v34  ;;  %v18145_v34 = vld [vmem:[#allocation15_spill] sm:$0xff] }
 0x4f9   : > { %18119 = vst [vmem:[#allocation35_spill] sm:$0xff] %v15562_v18 }
 0x4fa   : > { %18124 = vst [vmem:[#allocation9_spill] sm:$0xff] %v15571_v43  ;;  %v3158_v33 = vpop.f32.mrb[78].mxu0  ;;  %v7501_v4 = vmul.f32 0.17677669, %v7492_v32 }
 0x4fb   : > { %v15579_v40 = vadd.f32 %v3158_v33, %v18127_v0  ;;  %v3160_v29 = vpop.f32.mrb[79].mxu0  ;;  %v15591_v0 = vpack.c.bf16 %v8303_v20, %v8299_v52 }
 0x4fc   : > { %v15583_v35 = vadd.f32 %v3160_v29, %v18130_v6  ;;  %v9592_v29 = vrot.slane %v15373_v37, 4 }
 0x4fd   : > { %18128 = vst [vmem:[#allocation6_spill] sm:$0xff] %v15579_v40  ;;  %18136 = vst [vmem:[#allocation10_spill] sm:$0xff] %v15591_v0  ;;  %v18143_v0 = vld [vmem:[#allocation14_spill] sm:$0xff] }
 0x4fe   : > { %18131 = vst [vmem:[#allocation39_spill] sm:$0xff] %v15583_v35  ;;  %v3165_v42 = vpop.f32.mrb[80].mxu0  ;;  %v18152_v35 = vld [vmem:[#allocation18_spill] sm:$0xff] }
 0x4ff   : > { %v15586_v10 = vadd.f32 %v3165_v42, %v18132_v38  ;;  %v3167_v14 = vpop.f32.mrb[81].mxu0  ;;  %v18142_v38 = vld [vmem:[#allocation56_spill] sm:$0xff] }
 0x500   : > { %v15589_v45 = vadd.f32 %v3167_v14, %v18134_v21  ;;  %v9583_v14 = vrot.slane %v15349_v58, 4 }
 0x501   : > { %18133 = vst [vmem:[#allocation7_spill] sm:$0xff] %v15586_v10  ;;  %v7495_v10 = vmul.f32 %v13356_v15, %v18142_v38 }
 0x502   : > { %18135 = vst [vmem:[#allocation8_spill] sm:$0xff] %v15589_v45  ;;  %v3172_v33 = vpop.f32.mrb[82].mxu0 }
 0x503   : > { %v15594_v13 = vadd.f32 %v3172_v33, %v18137_v23  ;;  %v3174_v6 = vpop.f32.mrb[83].mxu0  ;;  %v7503_v45 = vmul.f32 0.17677669, %v7495_v10  ;;  %v8301_v23 = vand.u32 4294901760, %v7501_v4 }
 0x504   : > { %v15599_v42 = vadd.f32 %v3174_v6, %v18140_v16  ;;  %v9584_v6 = vadd.f32 %v9583_v14, %v15349_v58  ;;  %v18154_v14 = vld [vmem:[#allocation19_spill] sm:$0xff] }
 0x505   : > { %18138 = vst [vmem:[#allocation12_spill] sm:$0xff] %v15594_v13  ;;  %v9593_v13 = vadd.f32 %v9592_v29, %v15373_v37  ;;  %v8305_v40 = vand.u32 4294901760, %v7503_v45  ;;  %v15610_v16 = vsub.f32 %v7501_v4, %v8301_v23  ;;  %v7498_v29 = vmul.f32 %v13354_v7, %v15257_v31 }
 0x506   : > { %18141 = vst [vmem:[#allocation50_spill] sm:$0xff] %v15599_v42  ;;  %v3179_v21 = vpop.f32.mrb[84].mxu0  ;;  %v18149_v42 = vld [vmem:[#allocation17_spill] sm:$0xff]  ;;  %v7500_v4 = vmul.f32 %v13354_v7, %v15264_v51 }
 0x507   : > { %v15604_v19 = vadd.f32 %v3179_v21, %v18143_v0  ;;  %v3181_v33 = vpop.f32.mrb[85].mxu0  ;;  %18147 = vst [vmem:[#allocation14_spill] sm:$0xff] %v15610_v16  ;;  %v15613_v38 = vpack.c.bf16 %v8305_v40, %v8301_v23  ;;  %v15618_v21 = vsub.f32 %v7503_v45, %v8305_v40  ;;  %v7506_v58 = vmul.f32 0.17677669, %v7498_v29  ;;  %v18160_v51 = vld [vmem:[#allocation21_spill] sm:$0xff] }
 0x508   : > { %v15608_v24 = vadd.f32 %v3181_v33, %v18145_v34  ;;  %v9585_v33 = vrot.slane %v9584_v6, 2 }
 0x509   : > { %18144 = vst [vmem:[#allocation13_spill] sm:$0xff] %v15604_v19  ;;  %18148 = vst [vmem:[#allocation15_spill] sm:$0xff] %v15613_v38  ;;  %v9594_v19 = vrot.slane %v9593_v13, 2  ;;  %v8307_v40 = vand.u32 4294901760, %v7506_v58 }
 0x50a   : > { %18146 = vst [vmem:[#allocation56_spill] sm:$0xff] %v15608_v24  ;;  %v3186_v32 = vpop.f32.mrb[86].mxu0  ;;  %18151 = vst [vmem:[#allocation99_spill] sm:$0xff] %v15618_v21 }
 0x50b   : > { %v15616_v10 = vadd.f32 %v3186_v32, %v18149_v42  ;;  %v3188_v0 = vpop.f32.mrb[87].mxu0  ;;  %v7508_v42 = vmul.f32 0.17677669, %v7500_v4  ;;  %v9595_v32 = vadd.f32 %v9594_v19, %v9593_v13  ;;  %v15633_v31 = vsub.f32 %v7506_v58, %v8307_v40  ;;  %v18163_v4 = vld [vmem:[#allocation22_spill] sm:$0xff] }
 0x50c   : > { %v15621_v37 = vadd.f32 %v3188_v0, %v18152_v35  ;;  %v9586_v35 = vadd.f32 %v9585_v33, %v9584_v6  ;;  %v18167_v6 = vld [vmem:[#allocation37_spill] sm:$0xff]  ;;  %v18168_v33 = vld [vmem:[#allocation38_spill] sm:$0xff] }
 0x50d   : > { %18150 = vst [vmem:[#allocation17_spill] sm:$0xff] %v15616_v10  ;;  %v18156_v10 = vld [vmem:[#allocation20_spill] sm:$0xff]  ;;  %v8311_v24 = vand.u32 4294901760, %v7508_v42  ;;  %18159 = vst [vmem:[#allocation101_spill] sm:$0xff] %v15633_v31  ;;  %v7499_v58 = vmul.f32 %v13356_v15, %v18168_v33 }
 0x50e   : > { %18153 = vst [vmem:[#allocation18_spill] sm:$0xff] %v15621_v37  ;;  %v3193_v34 = vpop.f32.mrb[88].mxu0  ;;  %v15631_v37 = vsub.f32 %v7502_v59, %v8299_v52  ;;  %v9587_v59 = vrot.slane %v9586_v35, 1 }
 0x50f   : > { %v15626_v23 = vadd.f32 %v3193_v34, %v18154_v14  ;;  %v3195_v38 = vpop.f32.mrb[89].mxu0  ;;  %v15638_v34 = vpack.c.bf16 %v8311_v24, %v8307_v40  ;;  %v9596_v14 = vrot.slane %v9595_v32, 1  ;;  %v15643_v13 = vsub.f32 %v7508_v42, %v8311_v24 }
 0x510   : > { %v15629_v45 = vadd.f32 %v3195_v38, %v18156_v10  ;;  %18158 = vst [vmem:[#allocation100_spill] sm:$0xff] %v15631_v37  ;;  %v15645_v38 = vsub.f32 %v7504_v47, %v8303_v20  ;;  %v7497_v10 = vmul.f32 %v13356_v15, %v18167_v6  ;;  %v7507_v24 = vmul.f32 0.17677669, %v7499_v58 }
 0x511   : > { %18155 = vst [vmem:[#allocation19_spill] sm:$0xff] %v15626_v23  ;;  %18162 = vst [vmem:[#allocation102_spill] sm:$0xff] %v15638_v34  ;;  %v8424_v6 = vand.u32 4294901760, %v15610_v16  ;;  %v9588_v15 = vadd.f32 %v9587_v59, %v9586_v35 }
 0x512   : > { %18157 = vst [vmem:[#allocation20_spill] sm:$0xff] %v15629_v45  ;;  %v3200_v0 = vpop.f32.mrb[90].mxu0  ;;  %18165 = vst [vmem:[#allocation103_spill] sm:$0xff] %v15643_v13  ;;  %v7505_v23 = vmul.f32 0.17677669, %v7497_v10  ;;  %v9597_v45 = vadd.f32 %v9596_v14, %v9595_v32  ;;  %v8430_v42 = vand.u32 4294901760, %v15645_v38 }
 0x513   : > { %v15636_v7 = vadd.f32 %v3200_v0, %v18160_v51  ;;  %v3202_v29 = vpop.f32.mrb[91].mxu0  ;;  %18166 = vst [vmem:[#allocation104_spill] sm:$0xff] %v15645_v38  ;;  %v8418_v0 = vand.u32 4294901760, %v15631_v37  ;;  %v18169_v51 = vld [vmem:[#allocation23_spill] sm:$0xff]  ;;  %v8425_v34 = vsub.f32 %v15610_v16, %v8424_v6 }
 0x514   : > { %v15641_v19 = vadd.f32 %v3202_v29, %v18163_v4  ;;  %v18171_v29 = vld [vmem:[#allocation24_spill] sm:$0xff]  ;;  %v8309_v20 = vand.u32 4294901760, %v7505_v23  ;;  %v8431_v58 = vsub.f32 %v15645_v38, %v8430_v42  ;;  %13357 = vrcp.f32 %v9597_v45 }
 0x515   : > { %18161 = vst [vmem:[#allocation21_spill] sm:$0xff] %v15636_v7  ;;  %v8419_v47 = vsub.f32 %v15631_v37, %v8418_v0  ;;  %13359 = vrcp.f32 %v9588_v15  ;;  %v18202_v37 = vld [vmem:[#allocation33_spill] sm:$0xff] }
 0x516   : > { %18164 = vst [vmem:[#allocation22_spill] sm:$0xff] %v15641_v19  ;;  %v3207_v52 = vpop.f32.mrb[92].mxu0  ;;  %v8313_v19 = vand.u32 4294901760, %v7507_v24  ;;  %v15663_v14 = vsub.f32 %v7505_v23, %v8309_v20  ;;  %v8432_v59 = vand.u32 4294901760, %v8431_v58  ;;  %v8442_v23 = vand.u32 4294901760, %v15633_v31 }
 0x517   : > { %v15651_v7 = vadd.f32 %v3207_v52, %v18169_v51  ;;  %v3209_v40 = vpop.f32.mrb[93].mxu0  ;;  %v8436_v52 = vand.u32 4294901760, %v15618_v21  ;;  %v18173_v51 = vld [vmem:[#allocation25_spill] sm:$0xff]  ;;  %v8420_v10 = vand.u32 4294901760, %v8419_v47  ;;  %v8454_v47 = vand.u32 4294901760, %v15643_v13 }
 0x518   : > { %v15654_v4 = vadd.f32 %v3209_v40, %v18171_v29  ;;  %18175 = vst [vmem:[#allocation24_spill] sm:$0xff] %v15663_v14  ;;  %v18176_v40 = vld [vmem:[#allocation29_spill] sm:$0xff]  ;;  %v15671_v35 = vsub.f32 %v7507_v24, %v8313_v19 }
 0x519   : > { %18170 = vst [vmem:[#allocation37_spill] sm:$0xff] %v15651_v7  ;;  %v15678_v45 = vpack.c.bf16 %v8432_v59, %v8420_v10 }
 0x51a   : > { %18172 = vst [vmem:[#allocation38_spill] sm:$0xff] %v15654_v4  ;;  %v3214_v33 = vpop.f32.mrb[94].mxu0  ;;  %v15669_v4 = vpack.c.bf16 %v8313_v19, %v8309_v20  ;;  %18179 = vst [vmem:[#allocation105_spill] sm:$0xff] %v15671_v35  ;;  %v8443_v20 = vsub.f32 %v15633_v31, %v8442_v23  ;;  %v8455_v19 = vsub.f32 %v15643_v13, %v8454_v47  ;;  %v8460_v15 = vand.u32 4294901760, %v15671_v35 }
 0x51b   : > { %v15661_v7 = vadd.f32 %v3214_v33, %v18173_v51  ;;  %v3216_v32 = vpop.f32.mrb[95].mxu0  ;;  %v8437_v33 = vsub.f32 %v15618_v21, %v8436_v52  ;;  %v8448_v51 = vand.u32 4294901760, %v15663_v14  ;;  %18180 = vst [vmem:[#allocation106_spill] sm:$0xff] %v15678_v45 }
 0x51c   : > { %v15667_v29 = vadd.f32 %v3216_v32, %v18176_v40  ;;  %18178 = vst [vmem:[#allocation29_spill] sm:$0xff] %v15669_v4  ;;  %v8426_v32 = vand.u32 4294901760, %v8425_v34  ;;  %v8444_v10 = vand.u32 4294901760, %v8443_v20  ;;  %v8456_v59 = vand.u32 4294901760, %v8455_v19 }
 0x51d   : > { %18174 = vst [vmem:[#allocation23_spill] sm:$0xff] %v15661_v7  ;;  %v8438_v40 = vand.u32 4294901760, %v8437_v33  ;;  %v8449_v24 = vsub.f32 %v15663_v14, %v8448_v51  ;;  %v8461_v45 = vsub.f32 %v15671_v35, %v8460_v15  ;;  %v15701_v7 = vpack.c.bf16 %v8454_v47, %v8442_v23 }
 0x51e   : > { %18177 = vst [vmem:[#allocation25_spill] sm:$0xff] %v15667_v29  ;;  %v15699_v4 = vpack.c.bf16 %v8456_v59, %v8444_v10  ;;  %v15703_v29 = vpack.c.bf16 %v8460_v15, %v8448_v51  ;;  %v13358_v19 = vpop.eup %13357 }
 0x51f   : > { %v15683_v58 = vpack.c.bf16 %v8438_v40, %v8426_v32  ;;  %v8450_v34 = vand.u32 4294901760, %v8449_v24  ;;  %v15695_v40 = vpack.c.bf16 %v8430_v42, %v8418_v0  ;;  %18185 = vst [vmem:[#allocation111_spill] sm:$0xff] %v15701_v7  ;;  %v8462_v20 = vand.u32 4294901760, %v8461_v45  ;;  %v13360_v33 = vpop.eup %13359  ;;  %v18201_v7 = vld [vmem:[#allocation27_spill] sm:$0xff] }
 0x520   : > { %18184 = vst [vmem:[#allocation110_spill] sm:$0xff] %v15699_v4  ;;  %18186 = vst [vmem:[#allocation112_spill] sm:$0xff] %v15703_v29  ;;  %v9601_v31 = vmul.f32 %v13358_v19, %v15331_v26  ;;  %v9603_v13 = vmul.f32 %v13358_v19, %v15339_v9  ;;  %v9599_v0 = vmul.f32 %v13360_v33, %v15305_v27 }
 0x521   : > { %18181 = vst [vmem:[#allocation107_spill] sm:$0xff] %v15683_v58  ;;  %18182 = vst [vmem:[#allocation108_spill] sm:$0xff] %v15695_v40  ;;  %v15697_v58 = vpack.c.bf16 %v8436_v52, %v8424_v6  ;;  %v15705_v24 = vpack.c.bf16 %v8462_v20, %v8450_v34  ;;  %v9602_v42 = vmul.f32 %v13360_v33, %v15310_v48 }
 0x522   : > { %v9609_v32 = vmul.f32 0.17677669, %v9601_v31  ;;  %v9611_v6 = vmul.f32 0.17677669, %v9603_v13  ;;  %v9605_v52 = vmul.f32 %v13358_v19, %v15353_v49  ;;  %v9607_v23 = vmul.f32 %v13358_v19, %v15367_v53 }
 0x523   : > { %18183 = vst [vmem:[#allocation109_spill] sm:$0xff] %v15697_v58  ;;  %18187 = vst [vmem:[#allocation113_spill] sm:$0xff] %v15705_v24  ;;  %v9604_v47 = vmul.f32 %v13360_v33, %v15317_v3  ;;  %v9608_v45 = vmul.f32 0.17677669, %v9599_v0  ;;  %v9610_v15 = vmul.f32 0.17677669, %v9602_v42  ;;  %v9606_v10 = vmul.f32 %v13360_v33, %v15325_v39 }
 0x524   : > { %v10406_v51 = vand.u32 4294901760, %v9609_v32  ;;  %v10410_v26 = vand.u32 4294901760, %v9611_v6  ;;  %v9613_v59 = vmul.f32 0.17677669, %v9605_v52  ;;  %v9615_v9 = vmul.f32 0.17677669, %v9607_v23 }
 0x525   : > { %v10408_v27 = vand.u32 4294901760, %v9608_v45  ;;  %v10412_v34 = vand.u32 4294901760, %v9610_v15  ;;  %v9612_v48 = vmul.f32 0.17677669, %v9604_v47  ;;  %v9614_v39 = vmul.f32 0.17677669, %v9606_v10 }
 0x526   : > { %v15715_v31 = vsub.f32 %v9609_v32, %v10406_v51  ;;  %v15717_v13 = vpack.c.bf16 %v10410_v26, %v10406_v51  ;;  %v15719_v49 = vsub.f32 %v9611_v6, %v10410_v26  ;;  %v10414_v53 = vand.u32 4294901760, %v9613_v59  ;;  %v18203_v24 = vld [vmem:[#allocation34_spill] sm:$0xff] }
 0x527   : > { %v10418_v20 = vand.u32 4294901760, %v9615_v9  ;;  %v15721_v3 = vpack.c.bf16 %v10412_v34, %v10408_v27  ;;  %v15723_v19 = vsub.f32 %v9608_v45, %v10408_v27  ;;  %v15725_v0 = vsub.f32 %v9610_v15, %v10412_v34 }
 0x528   : > { %18188 = vst [vmem:[#allocation114_spill] sm:$0xff] %v15715_v31  ;;  %18189 = vst [vmem:[#allocation115_spill] sm:$0xff] %v15717_v13  ;;  %v15729_v32 = vsub.f32 %v9613_v59, %v10414_v53  ;;  %v10416_v52 = vand.u32 4294901760, %v9612_v48  ;;  %v10420_v23 = vand.u32 4294901760, %v9614_v39  ;;  %v10525_v6 = vand.u32 4294901760, %v15715_v31  ;;  %v18200_v13 = vld [vmem:[#allocation26_spill] sm:$0xff] }
 0x529   : > { %18190 = vst [vmem:[#allocation116_spill] sm:$0xff] %v15719_v49  ;;  %18191 = vst [vmem:[#allocation117_spill] sm:$0xff] %v15721_v3  ;;  %v15727_v33 = vpack.c.bf16 %v10418_v20, %v10414_v53  ;;  %v15731_v42 = vsub.f32 %v9615_v9, %v10418_v20  ;;  %v10537_v47 = vand.u32 4294901760, %v15719_v49  ;;  %v10531_v51 = vand.u32 4294901760, %v15723_v19 }
 0x52a   : > { %18192 = vst [vmem:[#allocation118_spill] sm:$0xff] %v15723_v19  ;;  %18193 = vst [vmem:[#allocation119_spill] sm:$0xff] %v15725_v0  ;;  %v15736_v26 = vsub.f32 %v9612_v48, %v10416_v52  ;;  %v10543_v45 = vand.u32 4294901760, %v15725_v0  ;;  %v10549_v15 = vand.u32 4294901760, %v15729_v32  ;;  %v15741_v59 = vpack.c.bf16 %v10420_v23, %v10416_v52 }
 0x52b   : > { %18194 = vst [vmem:[#allocation120_spill] sm:$0xff] %v15727_v33  ;;  %18195 = vst [vmem:[#allocation121_spill] sm:$0xff] %v15729_v32  ;;  %v10561_v10 = vand.u32 4294901760, %v15731_v42  ;;  %v15743_v9 = vsub.f32 %v9614_v39, %v10420_v23  ;;  %v10526_v27 = vsub.f32 %v15715_v31, %v10525_v6  ;;  %v10538_v34 = vsub.f32 %v15719_v49, %v10537_v47 }
 0x52c   : > { %18196 = vst [vmem:[#allocation122_spill] sm:$0xff] %v15731_v42  ;;  %18197 = vst [vmem:[#allocation123_spill] sm:$0xff] %v15736_v26  ;;  %v10532_v20 = vsub.f32 %v15723_v19, %v10531_v51  ;;  %v10544_v48 = vsub.f32 %v15725_v0, %v10543_v45  ;;  %v10550_v33 = vsub.f32 %v15729_v32, %v10549_v15 }
 0x52d   : > { %18198 = vst [vmem:[#allocation124_spill] sm:$0xff] %v15741_v59  ;;  %18199 = vst [vmem:[#allocation125_spill] sm:$0xff] %v15743_v9  ;;  %v10562_v3 = vsub.f32 %v15731_v42, %v10561_v10  ;;  %v10527_v59 = vand.u32 4294901760, %v10526_v27  ;;  %v10539_v39 = vand.u32 4294901760, %v10538_v34  ;;  %v18207_v27 = vld [vmem:[#allocation31_spill] sm:$0xff] }
 0x52e   : > { %v10533_v58 = vand.u32 4294901760, %v10532_v20  ;;  %v10545_v40 = vand.u32 4294901760, %v10544_v48  ;;  %v10551_v14 = vand.u32 4294901760, %v10550_v33  ;;  %v18208_v33 = vld [vmem:[#allocation32_spill] sm:$0xff] }
 0x52f   : > { %v10563_v35 = vand.u32 4294901760, %v10562_v3  ;;  %v15755_v43 = vpack.c.bf16 %v10539_v39, %v10527_v59  ;;  %v10567_v59 = vand.u32 4294901760, %v15743_v9 }
 0x530   : > { %v15757_v1 = vpack.c.bf16 %v10545_v40, %v10533_v58  ;;  %v18210_v40 = vld [vmem:[#allocation48_spill] sm:$0xff] }
 0x531   : > { %18204 = vst [vmem:[#allocation26_spill] sm:$0xff] %v15755_v43 }
 0x532   : > { %18205 = vst [vmem:[#allocation27_spill] sm:$0xff] %v15757_v1 }
 0x533   : > { %v3301_v53 = vpop.xlane.xlu0 %3300 }
 0x534   : > { %v3311_v29 = vsub.f32 %v18200_v13, %v3301_v53  ;;  %v3312_v52 = vsub.f32 %v18201_v7, %v3301_v53  ;;  %v15759_v13 = vpack.c.bf16 %v10563_v35, %v10551_v14  ;;  %v10555_v7 = vand.u32 4294901760, %v15736_v26  ;;  %v18209_v14 = vld [vmem:[#allocation36_spill] sm:$0xff] }
 0x536   : > { %v3319_v16 = vmul.f32 1.442695, %v3311_v29  ;;  %v3321_v21 = vmul.f32 1.442695, %v3312_v52  ;;  %18206 = vst [vmem:[#allocation33_spill] sm:$0xff] %v15759_v13  ;;  %v10568_v52 = vsub.f32 %v15743_v9, %v10567_v59 }
 0x537   : > { %v3307_v23 = vpop.xlane.xlu1 %3306  ;;  %v3304_v18 = vpop.xlane.xlu0 %3303 }
 0x538   : > { %v3315_v38 = vsub.f32 %v18202_v37, %v3307_v23  ;;  %v3316_v4 = vsub.f32 %v18203_v24, %v3307_v23  ;;  %13361 = vpow2.f32 %v3319_v16  ;;  %v3313_v34 = vsub.f32 %v18207_v27, %v3304_v18 }
 0x539   : > { %v3314_v3 = vsub.f32 %v18208_v33, %v3304_v18  ;;  %13363 = vpow2.f32 %v3321_v21  ;;  %v10556_v24 = vsub.f32 %v15736_v26, %v10555_v7  ;;  %v10569_v39 = vand.u32 4294901760, %v10568_v52  ;;  %v18221_v52 = vld [vmem:[#allocation41_spill] sm:$0xff] }
 0x53a   : > { %v3327_v29 = vmul.f32 1.442695, %v3315_v38  ;;  %v3329_v53 = vmul.f32 1.442695, %v3316_v4  ;;  %v3323_v20 = vmul.f32 1.442695, %v3313_v34  ;;  %v15777_v34 = vpack.c.bf16 %v10537_v47, %v10525_v6 }
 0x53b   : > { %v3310_v37 = vpop.xlane.xlu1 %3309  ;;  %v3325_v58 = vmul.f32 1.442695, %v3314_v3  ;;  %v10557_v48 = vand.u32 4294901760, %v10556_v24  ;;  %v15779_v33 = vpack.c.bf16 %v10543_v45, %v10531_v51  ;;  %v15817_v21 = vand.u32 4294901760, %v15501_v2 }
 0x53c   : > { %13365 = vpow2.f32 %v3327_v29  ;;  %v3317_v35 = vsub.f32 %v18209_v14, %v3310_v37  ;;  %v3318_v16 = vsub.f32 %v18210_v40, %v3310_v37  ;;  %18211 = vst [vmem:[#allocation34_spill] sm:$0xff] %v15777_v34  ;;  %v15783_v29 = vpack.c.bf16 %v10561_v10, %v10549_v15 }
 0x53d   : > { %13367 = vpow2.f32 %v3329_v53  ;;  %18212 = vst [vmem:[#allocation31_spill] sm:$0xff] %v15779_v33  ;;  %v15781_v3 = vpack.c.bf16 %v10569_v39, %v10557_v48  ;;  %v15785_v53 = vpack.c.bf16 %v10567_v59, %v10555_v7  ;;  %v18216_v7 = vld [vmem:[#allocation54_spill] sm:$0xff]  ;;  %v18217_v59 = vld [vmem:[#allocation57_spill] sm:$0xff]  ;;  %v18220_v48 = vld [vmem:[#allocation40_spill] sm:$0xff]  ;;  %v15832_v34 = vsub.f32 %v15501_v2, %v15817_v21 }
 0x53e   : > { %13369 = vpow2.f32 %v3323_v20  ;;  %v3331_v18 = vmul.f32 1.442695, %v3317_v35  ;;  %v3333_v4 = vmul.f32 1.442695, %v3318_v16  ;;  %18214 = vst [vmem:[#allocation36_spill] sm:$0xff] %v15783_v29  ;;  %v18218_v40 = vmax.f32 %v18216_v7, %v18217_v59  ;;  %v18224_v39 = vld [vmem:[#allocation45_spill] sm:$0xff] }
 0x53f   : > { %13371 = vpow2.f32 %v3325_v58  ;;  %18213 = vst [vmem:[#allocation32_spill] sm:$0xff] %v15781_v3  ;;  %18215 = vst [vmem:[#allocation48_spill] sm:$0xff] %v15785_v53  ;;  %v18219_v16 = vmax.f32 %v15243_v22, %v15250_v5  ;;  %v18230_v49 = vand.u32 4294901760, %v15832_v34 }
 0x540   : > { %13373 = vpow2.f32 %v3331_v18  ;;  %v18222_v18 = vmax.f32 %v18220_v48, %v18221_v52 }
 0x541   : > { %13375 = vpow2.f32 %v3333_v4  ;;  %v18223_v4 = vld [vmem:[#allocation43_spill] sm:$0xff] }
 0x542   : > { %v13362_v37 = vpop.eup %13361 }
 0x543   : > { %v13364_v24 = vpop.eup %13363 }
 0x544   : > { %v3335_v58 = vadd.f32 %v13364_v24, %v13362_v37 }
 0x546   : > { %v15787_v20 = vpop.eup %13365  ;;  %3336 = vadd.xlane.f32.xlu0 %v3335_v58  ;;  %v18225_v58 = vmax.f32 %v18223_v4, %v18224_v39 }
 0x547   : > { %v15789_v14 = vpop.eup %13367 }
 0x548   : > { %v13370_v35 = vpop.eup %13369  ;;  %v3341_v6 = vadd.f32 %v15789_v14, %v15787_v20 }
 0x549   : > { %v13372_v47 = vpop.eup %13371 }
 0x54a   : > { %v15793_v51 = vpop.eup %13373  ;;  %v3338_v45 = vadd.f32 %v13372_v47, %v13370_v35  ;;  %3342 = vadd.xlane.f32.xlu0 %v3341_v6 }
 0x54b   : > { %v15795_v15 = vpop.eup %13375 }
 0x54c   : > { %3339 = vadd.xlane.f32.xlu1 %v3338_v45  ;;  %v3344_v10 = vadd.f32 %v15795_v15, %v15793_v51 }
 0x54e   : > { %4859 = vmax.xlane.f32.xlu0 %v18218_v40  ;;  %v15812_v40 = vand.u32 4294901760, %v15470_v17 }
 0x550   : > { %3345 = vadd.xlane.f32.xlu1 %v3344_v10 }
 0x552   : > { %4865 = vmax.xlane.f32.xlu0 %v18222_v18 }
 0x554   : > { %4862 = vmax.xlane.f32.xlu1 %v18219_v16 }
 0x558   : > { %4868 = vmax.xlane.f32.xlu1 %v18225_v58 }
 0x5d3   : > { %v3337_v6 = vpop.xlane.xlu0 %3336 }
 0x5d4   : > { %13377 = vrcp.f32 %v3337_v6 }
 0x5d7   : > { %v3343_v10 = vpop.xlane.xlu0 %3342 }
 0x5d9   : > { %v3340_v45 = vpop.xlane.xlu1 %3339 }
 0x5da   : > { %13379 = vrcp.f32 %v3340_v45  ;;  %v15821_v45 = vsub.f32 %v15470_v17, %v15812_v40 }
 0x5db   : > { %13381 = vrcp.f32 %v3343_v10  ;;  %v4860_v23 = vpop.xlane.xlu0 %4859 }
 0x5dc   : > { %v4870_v16 = vsub.f32 %v18216_v7, %v4860_v23  ;;  %v4871_v18 = vsub.f32 %v18217_v59, %v4860_v23  ;;  %v15827_v59 = vand.u32 4294901760, %v15491_v12 }
 0x5dd   : > { %v3346_v27 = vpop.xlane.xlu1 %3345 }
 0x5de   : > { %13383 = vrcp.f32 %v3346_v27  ;;  %v13378_v38 = vpop.eup %13377  ;;  %v4878_v58 = vmul.f32 1.442695, %v4870_v16  ;;  %v4880_v6 = vmul.f32 1.442695, %v4871_v18 }
 0x5df   : > { %v4866_v53 = vpop.xlane.xlu0 %4865  ;;  %v3349_v29 = vmul.f32 %v13378_v38, %v13364_v24  ;;  %v3348_v33 = vmul.f32 %v13378_v38, %v13362_v37 }
 0x5e0   : > { %13385 = vpow2.f32 %v4878_v58  ;;  %v4874_v23 = vsub.f32 %v18220_v48, %v4866_v53  ;;  %v4875_v16 = vsub.f32 %v18221_v52, %v4866_v53 }
 0x5e1   : > { %v4863_v10 = vpop.xlane.xlu1 %4862  ;;  %13387 = vpow2.f32 %v4880_v6  ;;  %v3359_v18 = vand.u32 4294901760, %v3349_v29  ;;  %v3361_v26 = vand.u32 4294901760, %v3348_v33 }
 0x5e2   : > { %v4872_v27 = vsub.f32 %v15243_v22, %v4863_v10  ;;  %v4873_v7 = vsub.f32 %v15250_v5, %v4863_v10  ;;  %v4886_v24 = vmul.f32 1.442695, %v4874_v23  ;;  %v4888_v58 = vmul.f32 1.442695, %v4875_v16 }
 0x5e3   : > { %v15836_v52 = vsub.f32 %v3349_v29, %v3359_v18 }
 0x5e4   : > { %v13380_v17 = vpop.eup %13379  ;;  %v4882_v38 = vmul.f32 1.442695, %v4872_v27  ;;  %v4884_v37 = vmul.f32 1.442695, %v4873_v7 }
 0x5e5   : > { %v13382_v22 = vpop.eup %13381  ;;  %v4869_v5 = vpop.xlane.xlu1 %4868  ;;  %v3352_v10 = vmul.f32 %v13380_v17, %v13372_v47  ;;  %v3351_v48 = vmul.f32 %v13380_v17, %v13370_v35 }
 0x5e6   : > { %13389 = vpow2.f32 %v4882_v38  ;;  %v4876_v6 = vsub.f32 %v18223_v4, %v4869_v5  ;;  %v4877_v53 = vsub.f32 %v18224_v39, %v4869_v5  ;;  %v3355_v27 = vmul.f32 %v13382_v22, %v15789_v14 }
 0x5e7   : > { %13391 = vpow2.f32 %v4884_v37  ;;  %v3363_v9 = vand.u32 4294901760, %v3352_v10  ;;  %v3365_v2 = vand.u32 4294901760, %v3351_v48  ;;  %v3354_v47 = vmul.f32 %v13382_v22, %v15787_v20 }
 0x5e8   : > { %v13384_v7 = vpop.eup %13383  ;;  %13393 = vpow2.f32 %v4886_v24  ;;  %v4890_v23 = vmul.f32 1.442695, %v4876_v6  ;;  %v4892_v16 = vmul.f32 1.442695, %v4877_v53  ;;  %v3367_v38 = vand.u32 4294901760, %v3355_v27 }
 0x5e9   : > { %13395 = vpow2.f32 %v4888_v58  ;;  %v15840_v35 = vpack.c.bf16 %v3363_v9, %v3359_v18  ;;  %v15842_v17 = vsub.f32 %v3352_v10, %v3363_v9  ;;  %v15844_v4 = vpack.c.bf16 %v3365_v2, %v3361_v26 }
 0x5ea   : > { %13397 = vpow2.f32 %v4890_v23  ;;  %v15846_v29 = vsub.f32 %v3351_v48, %v3365_v2  ;;  %v3358_v39 = vmul.f32 %v13384_v7, %v15795_v15  ;;  %v15850_v14 = vand.u32 4294901760, %v15515_v55  ;;  %v15855_v9 = vpop.eup %13385 }
 0x5eb   : > { %13399 = vpow2.f32 %v4892_v16  ;;  %11805 = vmatprep.subr.bf16.mxu1 %v15840_v35  ;;  %v3357_v20 = vmul.f32 %v13384_v7, %v15793_v51  ;;  %v17791_v18 = vand.u32 4294901760, %v15836_v52  ;;  %v15858_v37 = vsub.f32 %v3348_v33, %v3361_v26  ;;  %v15861_v58 = vpop.eup %13387 }
 0x5ec   : > { %11807 = vmatpush1.bf16.xpose.msra.mxu1 %v15844_v4  ;;  %v3371_v24 = vand.u32 4294901760, %v3358_v39  ;;  %v3369_v22 = vand.u32 4294901760, %v3354_v47  ;;  %v17790_v15 = vand.u32 4294901760, %v15842_v17  ;;  %v15863_v5 = vsub.f32 %v3355_v27, %v3367_v38 }
 0x5ed   : > { %v3373_v10 = vand.u32 4294901760, %v3357_v20  ;;  %v3495_v51 = vsub.f32 %v15836_v52, %v17791_v18  ;;  %v4894_v26 = vadd.f32 %v15861_v58, %v15855_v9  ;;  %v15881_v27 = vsub.f32 %v15491_v12, %v15827_v59 }
 0x5ee   : > { %v15869_v6 = vpack.c.bf16 %v3371_v24, %v3367_v38  ;;  %v15871_v53 = vsub.f32 %v3358_v39, %v3371_v24  ;;  %v3507_v33 = vsub.f32 %v15842_v17, %v17790_v15  ;;  %v15884_v7 = vand.u32 4294901760, %v15511_v61 }
 0x5ef   : > { %4895 = vadd.xlane.f32.xlu0 %v4894_v26  ;;  %v15889_v16 = vpack.c.bf16 %v3373_v10, %v3369_v22  ;;  %v15897_v12 = vsub.f32 %v15515_v55, %v15850_v14  ;;  %v3496_v18 = vand.u32 4294901760, %v3495_v51  ;;  %v15904_v26 = vand.u32 4294901760, %v15526_v30 }
 0x5f0   : > { %v15886_v23 = vpop.eup %13389  ;;  %11809 = vmatprep.subr.bf16.mxu1 %v15869_v6  ;;  %v3508_v39 = vand.u32 4294901760, %v3507_v33  ;;  %v15906_v33 = vsub.f32 %v3357_v20, %v3373_v10  ;;  %v18226_v24 = vand.u32 4294901760, %v15846_v29  ;;  %v18227_v51 = vand.u32 4294901760, %v15821_v45 }
 0x5f1   : > { %v15893_v15 = vpop.eup %13391  ;;  %v15920_v2 = vsub.f32 %v15511_v61, %v15884_v7  ;;  %v18228_v20 = vand.u32 4294901760, %v15871_v53  ;;  %v18232_v56 = vand.u32 4294901760, %v15881_v27 }
 0x5f2   : > { %v15901_v32 = vpop.eup %13393  ;;  %v4897_v38 = vadd.f32 %v15893_v15, %v15886_v23  ;;  %v3513_v55 = vsub.f32 %v15846_v29, %v18226_v24  ;;  %v3440_v48 = vsub.f32 %v15821_v45, %v18227_v51  ;;  %v11812_v19 = vpack.c.bf16 %v3508_v39, %v3496_v18 }
 0x5f3   : > { %v15913_v42 = vpop.eup %13395  ;;  %v3531_v10 = vsub.f32 %v15871_v53, %v18228_v20  ;;  %v15928_v24 = vsub.f32 %v3354_v47, %v3369_v22  ;;  %v18229_v51 = vand.u32 4294901760, %v15858_v37  ;;  %v15939_v20 = vand.u32 4294901760, %v15523_v41 }
 0x5f4   : > { %v15925_v0 = vpop.eup %13397  ;;  %11811 = vmatpush1.bf16.xpose.msra.mxu1 %v15889_v16  ;;  %v4900_v31 = vadd.f32 %v15913_v42, %v15901_v32  ;;  %4898 = vadd.xlane.f32.xlu1 %v4897_v38  ;;  %v3449_v47 = vsub.f32 %v15832_v34, %v18230_v49  ;;  %v18231_v22 = vand.u32 4294901760, %v15863_v5  ;;  %v3514_v13 = vand.u32 4294901760, %v3513_v55  ;;  %v18239_v55 = vld [vmem:[#allocation71_spill] sm:$0xff] }
 0x5f5   : > { %v3501_v61 = vsub.f32 %v15858_v37, %v18229_v51  ;;  %v15936_v39 = vpop.eup %13399  ;;  %11813 = vmatprep.subr.bf16.mxu1 %v11812_v19  ;;  %v15950_v51 = vsub.f32 %v15526_v30, %v15904_v26  ;;  %v3532_v1 = vand.u32 4294901760, %v3531_v10  ;;  %v3441_v43 = vand.u32 4294901760, %v3440_v48  ;;  %v18234_v19 = vld [vmem:[#allocation62_spill] sm:$0xff] }
 0x5f6   : > { %v3519_v38 = vsub.f32 %v15863_v5, %v18231_v22  ;;  %4901 = vadd.xlane.f32.xlu0 %v4900_v31  ;;  %v4903_v18 = vadd.f32 %v15936_v39, %v15925_v0  ;;  %v3455_v22 = vsub.f32 %v15881_v27, %v18232_v56  ;;  %v15961_v30 = vsub.f32 %v15523_v41, %v15939_v20 }
 0x5f7   : > { %v3502_v49 = vand.u32 4294901760, %v3501_v61  ;;  %v3450_v31 = vand.u32 4294901760, %v3449_v47  ;;  %v18235_v10 = vmax.f32 %v18233_v11, %v18234_v19  ;;  %v18236_v61 = vand.u32 4294901760, %v15897_v12 }
 0x5f8   : > { %4904 = vadd.xlane.f32.xlu1 %v4903_v18  ;;  %v3520_v44 = vand.u32 4294901760, %v3519_v38  ;;  %v18237_v3 = vand.u32 4294901760, %v15906_v33  ;;  %v18238_v38 = vld [vmem:[#allocation72_spill] sm:$0xff]  ;;  %v3456_v56 = vand.u32 4294901760, %v3455_v22  ;;  %v18244_v50 = vand.u32 4294901760, %v15920_v2 }
 0x5f9   : > { %v11814_v48 = vpack.c.bf16 %v3514_v13, %v3502_v49  ;;  %v3464_v18 = vsub.f32 %v15897_v12, %v18236_v61  ;;  %v7515_v54 = vmax.f32 %v18239_v55, %v18238_v38  ;;  %v18241_v49 = vld [vmem:[#allocation64_spill] sm:$0xff]  ;;  %v18242_v61 = vld [vmem:[#allocation66_spill] sm:$0xff] }
 0x5fa   : > { %7510 = vmax.xlane.f32.xlu0 %v18235_v10  ;;  %v3537_v41 = vsub.f32 %v15906_v33, %v18237_v3  ;;  %v11816_v47 = vpack.c.bf16 %v3532_v1, %v3520_v44  ;;  %v18240_v10 = vand.u32 4294901760, %v15928_v24  ;;  %v18243_v28 = vmax.f32 %v18241_v49, %v18242_v61 }
 0x5fb   : > { %3442 = vmatmul.mubr.f32.vlgmr.msra.gmra.mrb[44].mxu1 %v3441_v43  ;;  %v3470_v43 = vsub.f32 %v15920_v2, %v18244_v50  ;;  %v3484_v1 = vand.u32 4294901760, %v15961_v30  ;;  %v3465_v44 = vand.u32 4294901760, %v3464_v18  ;;  %v18245_v3 = vand.u32 4294901760, %v15950_v51 }
 0x5fc   : > { %3451 = vmatprep.mubr.f32.mxu1 %v3450_v31  ;;  %11815 = vmatpush1.bf16.xpose.msra.mxu1 %v11814_v48  ;;  %v3525_v13 = vsub.f32 %v15928_v24, %v18240_v10  ;;  %v3538_v48 = vand.u32 4294901760, %v3537_v41  ;;  %v11820_v18 = vpack.c.bf16 %v15842_v17, %v15836_v52  ;;  %v11822_v41 = vpack.c.bf16 %v15846_v29, %v15858_v37 }
 0x5fd   : > { %11817 = vmatprep.subr.bf16.mxu1 %v11816_v47  ;;  %7513 = vmax.xlane.f32.xlu1 %v18243_v28  ;;  %v3479_v31 = vsub.f32 %v15950_v51, %v18245_v3  ;;  %v18246_v47 = vld [vmem:[#allocation74_spill] sm:$0xff]  ;;  %v3471_v22 = vand.u32 4294901760, %v3470_v43  ;;  %v3485_v50 = vsub.f32 %v15961_v30, %v3484_v1  ;;  %v16010_v43 = vld [vmem:[%s17533_s2] sm:$0xf]  ;;  %v18248_v3 = vand.u32 4294901760, %v15842_v17 }
 0x5fe   : > { %7516 = vmax.xlane.f32.xlu0 %v7515_v54  ;;  %v7518_v10 = vmax.f32 %v18246_v47, %v15381_v57  ;;  %v3526_v28 = vand.u32 4294901760, %v3525_v13  ;;  %v11824_v13 = vpack.c.bf16 %v15871_v53, %v15863_v5  ;;  %v18253_v17 = vand.u32 4294901760, %v15863_v5 }
 0x5ff   : > { %3457 = vmatmul.mubr.f32.gmra.mrb[46].mxu1 %v3456_v56  ;;  %v3480_v25 = vand.u32 4294901760, %v3479_v31  ;;  %v3486_v56 = vand.u32 4294901760, %v3485_v50  ;;  %v18254_v50 = vand.u32 4294901760, %v15871_v53  ;;  %v18260_v5 = vand.u32 4294901760, %v15920_v2 }
 0x600   : > { %3466 = vmatprep.mubr.f32.mxu1 %v3465_v44  ;;  %v11818_v54 = vpack.c.bf16 %v3538_v48, %v3526_v28  ;;  %v18247_v44 = vand.u32 4294901760, %v15836_v52  ;;  %v18249_v48 = vand.u32 4294901760, %v15498_v60  ;;  %v18251_v28 = vand.u32 4294901760, %v15846_v29 }
 0x601   : > { %7519 = vmax.xlane.f32.xlu1 %v7518_v10  ;;  %v18250_v10 = vand.u32 4294901760, %v15858_v37  ;;  %v18252_v52 = vand.u32 4294901760, %v15821_v45  ;;  %v18257_v37 = vand.u32 4294901760, %v15897_v12  ;;  %v18258_v29 = vand.u32 4294901760, %v15928_v24 }
 0x602   : > { %v11836_v31 = vpack.c.bf16 %v18248_v3, %v18247_v44  ;;  %v18261_v53 = vand.u32 4294901760, %v15950_v51 }
 0x603   : > { %3472 = vmatmul.mubr.f32.gmra.mrb[48].mxu1 %v3471_v22  ;;  %v11838_v22 = vpack.c.bf16 %v18251_v28, %v18250_v10 }
 0x604   : > { %3481 = vmatprep.mubr.f32.mxu1 %v3480_v25  ;;  %11819 = vmatpush1.bf16.xpose.msra.mxu1 %v11818_v54  ;;  %v11826_v25 = vpack.c.bf16 %v15906_v33, %v15928_v24  ;;  %v11840_v54 = vpack.c.bf16 %v18254_v50, %v18253_v17 }
 0x605   : > { %11821 = vmatprep.subr.bf16.mxu1 %v11820_v18  ;;  %v18255_v18 = vand.u32 4294901760, %v15832_v34 }
 0x607   : > { %3487 = vmatmul.mubr.f32.gmra.mrb[50].mxu1 %v3486_v56 }
 0x608   : > { %3597 = vmatprep.mubr.f32.mxu1 %v15483_v46 }
 0x60b   : > { %3599 = vmatmul.mubr.f32.vlgmr.msra.gmra.mrb[44].mxu1 %v15812_v40 }
 0x60c   : > { %3604 = vmatprep.mubr.f32.mxu1 %v15817_v21  ;;  %11823 = vmatpush1.bf16.xpose.msra.mxu1 %v11822_v41 }
 0x60d   : > { %11825 = vmatprep.subr.bf16.mxu1 %v11824_v13 }
 0x60f   : > { %3606 = vmatmul.mubr.f32.gmra.mrb[46].mxu1 %v15827_v59 }
 0x610   : > { %3611 = vmatprep.mubr.f32.mxu1 %v15850_v14 }
 0x613   : > { %3613 = vmatmul.mubr.f32.gmra.mrb[48].mxu1 %v15884_v7 }
 0x614   : > { %3618 = vmatprep.mubr.f32.mxu1 %v15904_v26  ;;  %11827 = vmatpush1.bf16.xpose.msra.mxu1 %v11826_v25 }
 0x615   : > { %11829 = vmatprep.subr.bf16.mxu1 %v15840_v35  ;;  %6339 = vrot.lane.b32.xlu0 %v16010_v43, %s13526_s28 }
 0x617   : > { %3620 = vmatmul.mubr.f32.gmra.mrb[50].mxu1 %v15939_v20 }
 0x618   : > { %3707 = vmatprep.mubr.f32.mxu1 %v15498_v60  ;;  %v18256_v60 = vand.u32 4294901760, %v15881_v27 }
 0x61b   : > { %3710 = vmatmul.mubr.f32.vlgmr.msra.gmra.mrb[44].mxu1 %v15821_v45  ;;  %v18259_v45 = vand.u32 4294901760, %v15906_v33 }
 0x61c   : > { %3716 = vmatprep.mubr.f32.mxu1 %v15832_v34  ;;  %11831 = vmatpush1.bf16.xpose.msra.mxu1 %v15844_v4  ;;  %v9622_v34 = vmax.f32 %v15433_v63, %v15437_v8 }
 0x61d   : > { %11833 = vmatprep.subr.bf16.mxu1 %v15869_v6  ;;  %v11842_v56 = vpack.c.bf16 %v18259_v45, %v18258_v29 }
 0x61f   : > { %3719 = vmatmul.mubr.f32.gmra.mrb[46].mxu1 %v15881_v27  ;;  %v18266_v27 = vld [vmem:[#allocation73_spill] sm:$0xff] }
 0x620   : > { %3725 = vmatprep.mubr.f32.mxu1 %v15897_v12 }
 0x623   : > { %3728 = vmatmul.mubr.f32.gmra.mrb[48].mxu1 %v15920_v2  ;;  %v18265_v2 = vld [vmem:[#allocation68_spill] sm:$0xff] }
 0x624   : > { %3734 = vmatprep.mubr.f32.mxu1 %v15950_v51  ;;  %11835 = vmatpush1.bf16.xpose.msra.mxu1 %v15889_v16 }
 0x625   : > { %11837 = vmatprep.subr.bf16.mxu1 %v11836_v31 }
 0x627   : > { %3737 = vmatmul.mubr.f32.gmra.mrb[50].mxu1 %v15961_v30 }
 0x628   : > { %3817 = vmatprep.mubr.f32.mxu1 %v18249_v48 }
 0x62b   : > { %3821 = vmatmul.mubr.f32.vlgmr.msra.gmra.mrb[44].mxu1 %v18252_v52 }
 0x62c   : > { %3828 = vmatprep.mubr.f32.mxu1 %v18255_v18  ;;  %11839 = vmatpush1.bf16.xpose.msra.mxu1 %v11838_v22 }
 0x62d   : > { %11841 = vmatprep.subr.bf16.mxu1 %v11840_v54 }
 0x62f   : > { %3832 = vmatmul.mubr.f32.gmra.mrb[46].mxu1 %v18256_v60 }
 0x630   : > { %3839 = vmatprep.mubr.f32.mxu1 %v18257_v37 }
 0x633   : > { %3843 = vmatmul.mubr.f32.gmra.mrb[48].mxu1 %v18260_v5 }
 0x634   : > { %3850 = vmatprep.mubr.f32.mxu1 %v18261_v53  ;;  %11843 = vmatpush1.bf16.xpose.msra.mxu1 %v11842_v56 }
 0x635   : > { %9623 = vmax.xlane.f32.xlu0 %v9622_v34  ;;  %11845 = vmatprep.subr.bf16.mxu1 %v15840_v35  ;;  %v18262_v35 = vld [vmem:[#allocation42_spill] sm:$0xff] }
 0x637   : > { %3854 = vmatmul.mubr.f32.gmra.mrb[50].mxu1 %v3484_v1 }
 0x638   : > { %3948 = vmatprep.mubr.f32.mxu1 %v15483_v46 }
 0x63b   : > { %3950 = vmatmul.mubr.f32.vlgmr.msra.gmra.mrb[44].mxu1 %v15812_v40 }
 0x63c   : > { %3955 = vmatprep.mubr.f32.mxu1 %v15817_v21  ;;  %11847 = vmatpush1.bf16.xpose.msra.mxu1 %v15844_v4  ;;  %v18263_v4 = vld [vmem:[#allocation59_spill] sm:$0xff] }
 0x63d   : > { %11849 = vmatprep.subr.bf16.mxu1 %v15869_v6  ;;  %v18264_v6 = vld [vmem:[#allocation65_spill] sm:$0xff] }
 0x63f   : > { %3957 = vmatmul.mubr.f32.gmra.mrb[46].mxu1 %v15827_v59 }
 0x640   : > { %3962 = vmatprep.mubr.f32.mxu1 %v15850_v14 }
 0x643   : > { %3964 = vmatmul.mubr.f32.gmra.mrb[48].mxu1 %v15884_v7 }
 0x644   : > { %3969 = vmatprep.mubr.f32.mxu1 %v15904_v26  ;;  %11851 = vmatpush1.bf16.xpose.msra.mxu1 %v15889_v16 }
 0x645   : > { %11853 = vmatprep.subr.bf16.mxu1 %v18262_v35 }
 0x647   : > { %3971 = vmatmul.mubr.f32.gmra.mrb[50].mxu1 %v15939_v20 }
 0x648   : > { %4049 = vmatprep.mubr.f32.mxu1 %v15483_v46  ;;  %v18267_v46 = vmov 0.0  }
 0x64b   : > { %4051 = vmatmul.mubr.f32.vlgmr.msra.gmra.mrb[44].mxu1 %v15812_v40 }
 0x64c   : > { %4056 = vmatprep.mubr.f32.mxu1 %v15817_v21  ;;  %11855 = vmatpush1.bf16.msra.mxu1 %v18263_v4 }
 0x64d   : > { %11857 = vmatprep.subr.bf16.mxu1 %v18264_v6 }
 0x64f   : > { %4058 = vmatmul.mubr.f32.gmra.mrb[46].mxu1 %v15827_v59 }
 0x650   : > { %4063 = vmatprep.mubr.f32.mxu1 %v15850_v14  ;;  %11859 = vmatpush1.bf16.msra.mxu1 %v18265_v2 }
 0x651   : > { %11861 = vmatprep.subr.bf16.mxu1 %v18266_v27 }
 0x653   : > { %4065 = vmatmul.mubr.f32.gmra.mrb[48].mxu1 %v15884_v7 }
 0x654   : > { %4070 = vmatprep.mubr.f32.mxu1 %v15904_v26 }
 0x657   : > { %4072 = vmatmul.mubr.f32.gmra.mrb[50].mxu1 %v15939_v20 }
 0x658   : > { %4162 = vmatprep.mubr.f32.mxu1 %v18267_v46 }
 0x67c   : > { %v4896_v21 = vpop.xlane.xlu0 %4895 }
 0x67d   : > { %13401 = vrcp.f32 %v4896_v21 }
 0x681   : > { %v4899_v40 = vpop.xlane.xlu1 %4898 }
 0x682   : > { %13403 = vrcp.f32 %v4899_v40 }
 0x683   : > { %v4902_v16 = vpop.xlane.xlu0 %4901 }
 0x684   : > { %13405 = vrcp.f32 %v4902_v16 }
 0x685   : > { %v4905_v59 = vpop.xlane.xlu1 %4904 }
 0x686   : > { %13407 = vrcp.f32 %v4905_v59 }
 0x687   : > { %v7511_v14 = vpop.xlane.xlu0 %7510  ;;  %v13402_v12 = vpop.eup %13401 }
 0x688   : > { %v7521_v33 = vsub.f32 %v18233_v11, %v7511_v14  ;;  %v7522_v7 = vsub.f32 %v18234_v19, %v7511_v14  ;;  %v4908_v26 = vmul.f32 %v13402_v12, %v15861_v58  ;;  %v4907_v24 = vmul.f32 %v13402_v12, %v15855_v9 }
 0x68a   : > { %v7529_v20 = vmul.f32 1.442695, %v7521_v33  ;;  %v7531_v51 = vmul.f32 1.442695, %v7522_v7  ;;  %v7514_v30 = vpop.xlane.xlu1 %7513  ;;  %v4918_v25 = vand.u32 4294901760, %v4908_v26  ;;  %v4920_v19 = vand.u32 4294901760, %v4907_v24 }
 0x68b   : > { %v7523_v1 = vsub.f32 %v18241_v49, %v7514_v30  ;;  %v7524_v41 = vsub.f32 %v18242_v61, %v7514_v30  ;;  %v7517_v13 = vpop.xlane.xlu0 %7516 }
 0x68c   : > { %v13404_v44 = vpop.eup %13403  ;;  %13409 = vpow2.f32 %v7529_v20  ;;  %v7525_v3 = vsub.f32 %v18239_v55, %v7517_v13  ;;  %v7526_v11 = vsub.f32 %v18238_v38, %v7517_v13  ;;  %v16100_v54 = vsub.f32 %v4908_v26, %v4918_v25 }
 0x68d   : > { %13411 = vpow2.f32 %v7531_v51  ;;  %v7533_v58 = vmul.f32 1.442695, %v7523_v1  ;;  %v7535_v31 = vmul.f32 1.442695, %v7524_v41  ;;  %v4911_v9 = vmul.f32 %v13404_v44, %v15893_v15 }
 0x68e   : > { %v7537_v48 = vmul.f32 1.442695, %v7525_v3  ;;  %v7539_v10 = vmul.f32 1.442695, %v7526_v11  ;;  %v7520_v28 = vpop.xlane.xlu1 %7519  ;;  %v4910_v49 = vmul.f32 %v13404_v44, %v15886_v23  ;;  %v13406_v55 = vpop.eup %13405  ;;  %v16102_v15 = vsub.f32 %v4907_v24, %v4920_v19 }
 0x68f   : > { %13413 = vpow2.f32 %v7533_v58  ;;  %v7527_v61 = vsub.f32 %v18246_v47, %v7520_v28  ;;  %v7528_v22 = vsub.f32 %v15381_v57, %v7520_v28  ;;  %v4922_v52 = vand.u32 4294901760, %v4911_v9 }
 0x690   : > { %13415 = vpow2.f32 %v7535_v31  ;;  %v4924_v38 = vand.u32 4294901760, %v4910_v49  ;;  %v13408_v17 = vpop.eup %13407  ;;  %v4914_v57 = vmul.f32 %v13406_v55, %v15913_v42  ;;  %v4913_v29 = vmul.f32 %v13406_v55, %v15901_v32 }
 0x691   : > { %13417 = vpow2.f32 %v7537_v48  ;;  %v7541_v50 = vmul.f32 1.442695, %v7527_v61  ;;  %v16104_v18 = vpack.c.bf16 %v4922_v52, %v4918_v25  ;;  %v16106_v23 = vsub.f32 %v4911_v9, %v4922_v52 }
 0x692   : > { %13419 = vpow2.f32 %v7539_v10  ;;  %v16108_v60 = vpack.c.bf16 %v4924_v38, %v4920_v19  ;;  %v7543_v47 = vmul.f32 1.442695, %v7528_v22  ;;  %v4917_v37 = vmul.f32 %v13408_v17, %v15936_v39 }
 0x693   : > { %13421 = vpow2.f32 %v7541_v50  ;;  %v4916_v45 = vmul.f32 %v13408_v17, %v15925_v0  ;;  %v16114_v56 = vsub.f32 %v4910_v49, %v4924_v38  ;;  %v4926_v5 = vand.u32 4294901760, %v4914_v57  ;;  %v18277_v17 = vld [vmem:[#allocation58_spill] sm:$0xff] }
 0x694   : > { %v5053_v34 = vand.u32 4294901760, %v16100_v54  ;;  %v5065_v53 = vand.u32 4294901760, %v16106_v23  ;;  %v4930_v21 = vand.u32 4294901760, %v4917_v37  ;;  %v4928_v40 = vand.u32 4294901760, %v4913_v29 }
 0x695   : > { %v4932_v16 = vand.u32 4294901760, %v4916_v45  ;;  %v5059_v42 = vand.u32 4294901760, %v16102_v15  ;;  %13423 = vpow2.f32 %v7543_v47  ;;  %v16123_v32 = vsub.f32 %v4914_v57, %v4926_v5 }
 0x696   : > { %v16118_v27 = vpop.eup %13409  ;;  %v5054_v0 = vsub.f32 %v16100_v54, %v5053_v34  ;;  %v5066_v39 = vsub.f32 %v16106_v23, %v5065_v53  ;;  %v16129_v12 = vpack.c.bf16 %v4930_v21, %v4926_v5  ;;  %v16131_v33 = vsub.f32 %v4917_v37, %v4930_v21 }
 0x697   : > { %v16121_v59 = vpop.eup %13411  ;;  %v16133_v7 = vpack.c.bf16 %v4932_v16, %v4928_v40  ;;  %v16137_v24 = vsub.f32 %v4913_v29, %v4928_v40  ;;  %v16139_v20 = vsub.f32 %v4916_v45, %v4932_v16  ;;  %v5060_v41 = vsub.f32 %v16102_v15, %v5059_v42 }
 0x698   : > { %v7545_v14 = vadd.f32 %v16121_v59, %v16118_v27  ;;  %v5055_v51 = vand.u32 4294901760, %v5054_v0  ;;  %v5067_v1 = vand.u32 4294901760, %v5066_v39  ;;  %v5071_v13 = vand.u32 4294901760, %v16114_v56 }
 0x699   : > { %v16135_v26 = vpop.eup %13413  ;;  %v5077_v25 = vand.u32 4294901760, %v16123_v32  ;;  %v5089_v11 = vand.u32 4294901760, %v16131_v33  ;;  %v5083_v19 = vand.u32 4294901760, %v16137_v24  ;;  %v5095_v58 = vand.u32 4294901760, %v16139_v20 }
 0x69a   : > { %v16141_v30 = vpop.eup %13415  ;;  %7546 = vadd.xlane.f32.xlu1 %v7545_v14  ;;  %v16155_v9 = vpack.c.bf16 %v5067_v1, %v5055_v51  ;;  %v5072_v48 = vsub.f32 %v16114_v56, %v5071_v13  ;;  %v5061_v28 = vand.u32 4294901760, %v5060_v41  ;;  %v16176_v40 = vpack.c.bf16 %v5065_v53, %v5053_v34  ;;  %v18269_v53 = vld [vmem:[#allocation83_spill] sm:$0xff] }
 0x69b   : > { %v16146_v44 = vpop.eup %13417  ;;  %v7548_v3 = vadd.f32 %v16141_v30, %v16135_v26  ;;  %v5078_v10 = vsub.f32 %v16123_v32, %v5077_v25  ;;  %v5090_v49 = vsub.f32 %v16131_v33, %v5089_v11  ;;  %v5084_v61 = vsub.f32 %v16137_v24, %v5083_v19 }
 0x69c   : > { %v16153_v31 = vpop.eup %13419  ;;  %v5096_v22 = vsub.f32 %v16139_v20, %v5095_v58  ;;  %v5073_v38 = vand.u32 4294901760, %v5072_v48  ;;  %v16184_v14 = vpack.c.bf16 %v5071_v13, %v5059_v42  ;;  %v16186_v51 = vpack.c.bf16 %v5089_v11, %v5077_v25  ;;  %v18272_v42 = vld [vmem:[#allocation87_spill] sm:$0xff] }
 0x69d   : > { %v16162_v52 = vpop.eup %13421  ;;  %v7551_v55 = vadd.f32 %v16153_v31, %v16146_v44  ;;  %v5079_v47 = vand.u32 4294901760, %v5078_v10  ;;  %v5091_v57 = vand.u32 4294901760, %v5090_v49  ;;  %v5085_v37 = vand.u32 4294901760, %v5084_v61  ;;  %v18271_v10 = vld [vmem:[#allocation91_spill] sm:$0xff] }
 0x69e   : > { %7549 = vadd.xlane.f32.xlu1 %v7548_v3  ;;  %v5097_v29 = vand.u32 4294901760, %v5096_v22  ;;  %v16170_v45 = vpack.c.bf16 %v5073_v38, %v5061_v28  ;;  %v16188_v1 = vpack.c.bf16 %v5095_v58, %v5083_v19  ;;  %v9616_v34 = vmax.f32 %v15390_v36, %v15398_v62  ;;  %v18270_v3 = vld [vmem:[#allocation80_spill] sm:$0xff] }
 0x69f   : > { %v16178_v16 = vpop.eup %13423  ;;  %v16180_v0 = vpack.c.bf16 %v5091_v57, %v5079_v47  ;;  %v9619_v48 = vmax.f32 %v18270_v3, %v18269_v53  ;;  %v9625_v13 = vmax.f32 %v18272_v42, %v18271_v10 }
 0x6a0   : > { %v16182_v39 = vpack.c.bf16 %v5097_v29, %v5085_v37  ;;  %18268 = vst [vmem:[#allocation54_spill] sm:$0xff] %v16188_v1  ;;  %v7554_v41 = vadd.f32 %v16178_v16, %v16162_v52 }
 0x6a2   : > { %7552 = vadd.xlane.f32.xlu1 %v7551_v55 }
 0x6a6   : > { %7555 = vadd.xlane.f32.xlu1 %v7554_v41 }
 0x6aa   : > { %9617 = vmax.xlane.f32.xlu1 %v9616_v34 }
 0x6ae   : > { %9620 = vmax.xlane.f32.xlu1 %v9619_v48 }
 0x6b2   : > { %9626 = vmax.xlane.f32.xlu1 %v9625_v13 }
 0x6c3   : > { %8989 = vrot.lane.b32.xlu1 %v16010_v43, %s13527_s29 }
 0x71e   : > { %v4052_v25 = vpop.f32.mrb[44].mxu1 }
 0x71f   : > { %v4079_v11 = vsel %vm4077_vm2, %v4052_v25, 0  ;;  %v4054_v19 = vpop.f32.mrb[45].mxu1  ;;  %v16219_v25 = vpop.permute.xlu0 %6339 }
 0x720   : > { %v16200_v58 = vand.u32 4294901760, %v4079_v11  ;;  %18273 = vst [vmem:[#allocation57_spill] sm:$0xff] %v16219_v25 }
 0x722   : > { %v16203_v28 = vsub.f32 %v4079_v11, %v16200_v58  ;;  %v4059_v49 = vpop.f32.mrb[46].mxu1 }
 0x723   : > { %v4082_v61 = vsel %vm4077_vm2, %v4059_v49, 0  ;;  %v4061_v22 = vpop.f32.mrb[47].mxu1 }
 0x724   : > { %v17806_v55 = vand.u32 4294901760, %v16203_v28  ;;  %v16207_v38 = vand.u32 4294901760, %v4082_v61  ;;  %v18274_v22 = vld [vmem:[#allocation75_spill] sm:$0xff] }
 0x726   : > { %v4166_v43 = vsub.f32 %v16203_v28, %v17806_v55  ;;  %v16213_v47 = vsub.f32 %v4082_v61, %v16207_v38  ;;  %v4066_v57 = vpop.f32.mrb[48].mxu1 }
 0x727   : > { %v4085_v37 = vsel %vm4077_vm2, %v4066_v57, 0  ;;  %v4068_v29 = vpop.f32.mrb[49].mxu1  ;;  %v7547_v41 = vpop.xlane.xlu1 %7546 }
 0x728   : > { %v4167_v34 = vand.u32 4294901760, %v4166_v43  ;;  %v17804_v48 = vand.u32 4294901760, %v16213_v47  ;;  %v16217_v13 = vand.u32 4294901760, %v4085_v37  ;;  %13425 = vrcp.f32 %v7547_v41 }
 0x72a   : > { %v16222_v11 = vsub.f32 %v4085_v37, %v16217_v13  ;;  %v4073_v19 = vpop.f32.mrb[50].mxu1  ;;  %4168 = vmatmul.mubr.f32.vlgmr.msra.gmra.mrb[52].mxu1 %v4167_v34  ;;  %v4177_v49 = vsub.f32 %v16213_v47, %v17804_v48  ;;  %v18275_v37 = vld [vmem:[#allocation76_spill] sm:$0xff] }
 0x72b   : > { %v4088_v61 = vsel %vm4077_vm2, %v4073_v19, 0  ;;  %11863 = vmatpush1.bf16.msra.mxu1 %v18274_v22  ;;  %v4075_v43 = vpop.f32.mrb[51].mxu1  ;;  %v7550_v57 = vpop.xlane.xlu1 %7549  ;;  %4173 = vmatprep.mubr.f32.mxu1 %v18267_v46 }
 0x72c   : > { %v17805_v29 = vand.u32 4294901760, %v16222_v11  ;;  %v16231_v41 = vand.u32 4294901760, %v4088_v61  ;;  %11865 = vmatprep.subr.bf16.mxu1 %v18275_v37  ;;  %13427 = vrcp.f32 %v7550_v57  ;;  %v4178_v34 = vand.u32 4294901760, %v4177_v49  ;;  %v9624_v22 = vpop.xlane.xlu0 %9623  ;;  %v18276_v43 = vld [vmem:[#allocation81_spill] sm:$0xff]  ;;  %v18278_v37 = vld [vmem:[#allocation44_spill] sm:$0xff] }
 0x72d   : > { %v18279_v57 = vpack.c.bf16 %v18277_v17, %v18278_v37  ;;  %v9633_v48 = vsub.f32 %v15437_v8, %v9624_v22 }
 0x72e   : > { %v16235_v21 = vsub.f32 %v4088_v61, %v16231_v41  ;;  %4179 = vmatmul.mubr.f32.gmra.mrb[54].mxu1 %v4178_v34  ;;  %v4188_v19 = vsub.f32 %v16222_v11, %v17805_v29  ;;  %v9632_v34 = vsub.f32 %v15433_v63, %v9624_v22 }
 0x72f   : > { %11867 = vmatpush1.bf16.msra.mxu1 %v18276_v43  ;;  %v7553_v5 = vpop.xlane.xlu1 %7552  ;;  %4184 = vmatprep.mubr.f32.mxu1 %v18267_v46  ;;  %v9646_v25 = vmul.f32 1.442695, %v9633_v48 }
 0x730   : > { %v17807_v50 = vand.u32 4294901760, %v16235_v21  ;;  %11869 = vmatprep.subr.bf16.mxu1 %v18279_v57  ;;  %13429 = vrcp.f32 %v7553_v5  ;;  %v4189_v49 = vand.u32 4294901760, %v4188_v19  ;;  %v9644_v63 = vmul.f32 1.442695, %v9632_v34 }
 0x732   : > { %v13426_v61 = vpop.eup %13425  ;;  %4190 = vmatmul.mubr.f32.gmra.mrb[56].mxu1 %v4189_v49  ;;  %v4199_v43 = vsub.f32 %v16235_v21, %v17807_v50 }
 0x733   : > { %v7556_v29 = vpop.xlane.xlu1 %7555  ;;  %4195 = vmatprep.mubr.f32.mxu1 %v18267_v46  ;;  %v7559_v55 = vmul.f32 %v13426_v61, %v16121_v59  ;;  %v7558_v17 = vmul.f32 %v13426_v61, %v16118_v27 }
 0x734   : > { %13431 = vrcp.f32 %v7556_v29  ;;  %v4200_v5 = vand.u32 4294901760, %v4199_v43 }
 0x735   : > { %v7569_v19 = vand.u32 4294901760, %v7559_v55  ;;  %v7571_v37 = vand.u32 4294901760, %v7558_v17  ;;  %13433 = vpow2.f32 %v9644_v63  ;;  %v18288_v63 = vld [vmem:[#allocation67_spill] sm:$0xff] }
 0x736   : > { %v13428_v57 = vpop.eup %13427  ;;  %4201 = vmatmul.mubr.f32.gmra.mrb[58].mxu1 %v4200_v5  ;;  %13435 = vpow2.f32 %v9646_v25 }
 0x737   : > { %v9618_v8 = vpop.xlane.xlu1 %9617  ;;  %4311 = vmatprep.mubr.f32.mxu1 %v18267_v46  ;;  %v7562_v22 = vmul.f32 %v13428_v57, %v16141_v30  ;;  %v16256_v49 = vsub.f32 %v7559_v55, %v7569_v19  ;;  %v7561_v50 = vmul.f32 %v13428_v57, %v16135_v26  ;;  %v16259_v59 = vsub.f32 %v7558_v17, %v7571_v37  ;;  %v18282_v26 = vld [vmem:[#allocation60_spill] sm:$0xff]  ;;  %v18283_v55 = vld [vmem:[#allocation46_spill] sm:$0xff] }
 0x738   : > { %v9628_v27 = vsub.f32 %v15390_v36, %v9618_v8  ;;  %v9629_v29 = vsub.f32 %v15398_v62, %v9618_v8  ;;  %v18284_v17 = vpack.c.bf16 %v18282_v26, %v18283_v55 }
 0x739   : > { %18280 = vst [vmem:[#allocation40_spill] sm:$0xff] %v16256_v49  ;;  %18281 = vst [vmem:[#allocation41_spill] sm:$0xff] %v16259_v59  ;;  %v7573_v61 = vand.u32 4294901760, %v7562_v22  ;;  %v7575_v43 = vand.u32 4294901760, %v7561_v50  ;;  %v17809_v48 = vand.u32 4294901760, %v16256_v49 }
 0x73a   : > { %v13430_v34 = vpop.eup %13429  ;;  %v9636_v5 = vmul.f32 1.442695, %v9628_v27  ;;  %v9638_v1 = vmul.f32 1.442695, %v9629_v29  ;;  %4313 = vmatmul.mubr.f32.vlgmr.msra.gmra.mrb[52].mxu1 %v16200_v58  ;;  %v18289_v27 = vld [vmem:[#allocation63_spill] sm:$0xff] }
 0x73b   : > { %11871 = vmatpush1.bf16.msra.mxu1 %v18284_v17  ;;  %v9621_v36 = vpop.xlane.xlu1 %9620  ;;  %4318 = vmatprep.mubr.f32.mxu1 %v18267_v46  ;;  %v16270_v62 = vpack.c.bf16 %v7573_v61, %v7569_v19  ;;  %v16272_v57 = vsub.f32 %v7562_v22, %v7573_v61  ;;  %v16274_v8 = vpack.c.bf16 %v7575_v43, %v7571_v37 }
 0x73c   : > { %13437 = vpow2.f32 %v9636_v5  ;;  %v18290_v29 = vpack.c.bf16 %v18288_v63, %v18289_v27  ;;  %v9630_v25 = vsub.f32 %v18270_v3, %v9621_v36  ;;  %v9631_v30 = vsub.f32 %v18269_v53, %v9621_v36 }
 0x73d   : > { %18285 = vst [vmem:[#allocation43_spill] sm:$0xff] %v16270_v62  ;;  %18286 = vst [vmem:[#allocation45_spill] sm:$0xff] %v16272_v57  ;;  %v16281_v26 = vsub.f32 %v7561_v50, %v7575_v43  ;;  %13439 = vpow2.f32 %v9638_v1  ;;  %v7565_v55 = vmul.f32 %v13430_v34, %v16153_v31  ;;  %v7564_v19 = vmul.f32 %v13430_v34, %v16146_v44  ;;  %v18293_v1 = vld [vmem:[#allocation70_spill] sm:$0xff]  ;;  %v18294_v43 = vld [vmem:[#allocation69_spill] sm:$0xff] }
 0x73e   : > { %18287 = vst [vmem:[#allocation61_spill] sm:$0xff] %v16274_v8  ;;  %11873 = vmatprep.subr.bf16.mxu1 %v18290_v29  ;;  %v7705_v37 = vsub.f32 %v16256_v49, %v17809_v48  ;;  %v13432_v22 = vpop.eup %13431  ;;  %v9640_v61 = vmul.f32 1.442695, %v9630_v25  ;;  %v9642_v5 = vmul.f32 1.442695, %v9631_v30  ;;  %4320 = vmatmul.mubr.f32.gmra.mrb[54].mxu1 %v16207_v38  ;;  %v17808_v3 = vand.u32 4294901760, %v16272_v57 }
 0x73f   : > { %18291 = vst [vmem:[#allocation62_spill] sm:$0xff] %v16281_v26  ;;  %v18292_v53 = vand.u32 4294901760, %v16259_v59  ;;  %v18295_v31 = vpack.c.bf16 %v18293_v1, %v18294_v43  ;;  %v9627_v44 = vpop.xlane.xlu1 %9626  ;;  %4325 = vmatprep.mubr.f32.mxu1 %v18267_v46  ;;  %v7568_v34 = vmul.f32 %v13432_v22, %v16178_v16  ;;  %v7577_v17 = vand.u32 4294901760, %v7565_v55  ;;  %v18333_v8 = vld [vmem:[#allocation6_spill] sm:$0xff] }
 0x740   : > { %v7567_v30 = vmul.f32 %v13432_v22, %v16162_v52  ;;  %v7579_v36 = vand.u32 4294901760, %v7564_v19  ;;  %13441 = vpow2.f32 %v9640_v61  ;;  %v9634_v63 = vsub.f32 %v18272_v42, %v9627_v44  ;;  %v16319_v22 = vpop.eup %13433 }
 0x741   : > { %v7711_v50 = vsub.f32 %v16259_v59, %v18292_v53  ;;  %11875 = vmatpush1.bf16.msra.mxu1 %v18295_v31  ;;  %v9635_v27 = vsub.f32 %v18271_v10, %v9627_v44  ;;  %v7706_v29 = vand.u32 4294901760, %v7705_v37  ;;  %13443 = vpow2.f32 %v9642_v5  ;;  %18302 = vst [vmem:[#allocation59_spill] sm:$0xff] %v16319_v22  ;;  %v16322_v44 = vpop.eup %13435 }
 0x742   : > { %11877 = vmatprep.subr.bf16.mxu1 %v18262_v35  ;;  %v7581_v25 = vand.u32 4294901760, %v7568_v34  ;;  %v16302_v53 = vsub.f32 %v7565_v55, %v7577_v17  ;;  %v7583_v1 = vand.u32 4294901760, %v7567_v30  ;;  %v9648_v43 = vmul.f32 1.442695, %v9634_v63  ;;  %4327 = vmatmul.mubr.f32.gmra.mrb[56].mxu1 %v16217_v13  ;;  %18303 = vst [vmem:[#allocation65_spill] sm:$0xff] %v16322_v44 }
 0x743   : > { %v9650_v31 = vmul.f32 1.442695, %v9635_v27  ;;  %v16305_v16 = vsub.f32 %v7564_v19, %v7579_v36  ;;  %v7717_v52 = vsub.f32 %v16272_v57, %v17808_v3  ;;  %4332 = vmatprep.mubr.f32.mxu1 %v18267_v46  ;;  %v7712_v19 = vand.u32 4294901760, %v7711_v50 }
 0x744   : > { %18296 = vst [vmem:[#allocation72_spill] sm:$0xff] %v16302_v53  ;;  %v16311_v42 = vpack.c.bf16 %v7581_v25, %v7577_v17  ;;  %v16313_v10 = vsub.f32 %v7568_v34, %v7581_v25  ;;  %v16315_v37 = vpack.c.bf16 %v7583_v1, %v7579_v36  ;;  %v16317_v55 = vsub.f32 %v7567_v30, %v7583_v1 }
 0x745   : > { %18297 = vst [vmem:[#allocation71_spill] sm:$0xff] %v16305_v16  ;;  %13445 = vpow2.f32 %v9648_v43  ;;  %v7718_v61 = vand.u32 4294901760, %v7717_v52  ;;  %v7722_v5 = vand.u32 4294901760, %v16281_v26  ;;  %v7728_v63 = vand.u32 4294901760, %v16302_v53 }
 0x746   : > { %18298 = vst [vmem:[#allocation64_spill] sm:$0xff] %v16311_v42  ;;  %18299 = vst [vmem:[#allocation66_spill] sm:$0xff] %v16313_v10  ;;  %13447 = vpow2.f32 %v9650_v31  ;;  %v7740_v17 = vand.u32 4294901760, %v16313_v10  ;;  %v7734_v34 = vand.u32 4294901760, %v16305_v16  ;;  %v16327_v36 = vpop.eup %13437  ;;  %4334 = vmatmul.mubr.f32.gmra.mrb[58].mxu1 %v16231_v41  ;;  %v7746_v50 = vand.u32 4294901760, %v16317_v55 }
 0x747   : > { %18300 = vst [vmem:[#allocation74_spill] sm:$0xff] %v16315_v37  ;;  %18301 = vst [vmem:[#allocation42_spill] sm:$0xff] %v16317_v55  ;;  %v16330_v30 = vpack.c.bf16 %v7718_v61, %v7706_v29  ;;  %v7723_v27 = vsub.f32 %v16281_v26, %v7722_v5  ;;  %v16336_v1 = vpop.eup %13439  ;;  %4420 = vmatprep.mubr.f32.mxu1 %v18267_v46  ;;  %v7729_v43 = vsub.f32 %v16302_v53, %v7728_v63 }
 0x748   : > { %18304 = vst [vmem:[#allocation68_spill] sm:$0xff] %v16327_v36  ;;  %18306 = vst [vmem:[#allocation83_spill] sm:$0xff] %v16336_v1  ;;  %v7741_v31 = vsub.f32 %v16313_v10, %v7740_v17  ;;  %v7735_v52 = vsub.f32 %v16305_v16, %v7734_v34  ;;  %v9652_v61 = vadd.f32 %v16336_v1, %v16327_v36  ;;  %v18309_v1 = vand.u32 4294901760, %v16272_v57 }
 0x749   : > { %18305 = vst [vmem:[#allocation73_spill] sm:$0xff] %v16330_v30  ;;  %v7724_v3 = vand.u32 4294901760, %v7723_v27  ;;  %v7747_v48 = vsub.f32 %v16317_v55, %v7746_v50  ;;  %v7730_v30 = vand.u32 4294901760, %v7729_v43  ;;  %v18308_v27 = vand.u32 4294901760, %v16256_v49 }
 0x74a   : > { %v7742_v37 = vand.u32 4294901760, %v7741_v31  ;;  %v7736_v42 = vand.u32 4294901760, %v7735_v52  ;;  %v16351_v62 = vpop.eup %13441  ;;  %9653 = vadd.xlane.f32.xlu1 %v9652_v61  ;;  %4423 = vmatmul.mubr.f32.vlgmr.msra.gmra.mrb[52].mxu1 %v16203_v28  ;;  %v18311_v43 = vand.u32 4294901760, %v16259_v59  ;;  %v16489_v25 = vand.u32 4294901760, %v18333_v8 }
 0x74b   : > { %18307 = vst [vmem:[#allocation80_spill] sm:$0xff] %v16351_v62  ;;  %v16354_v29 = vpack.c.bf16 %v7724_v3, %v7712_v19  ;;  %v7748_v36 = vand.u32 4294901760, %v7747_v48  ;;  %v16360_v26 = vpack.c.bf16 %v18309_v1, %v18308_v27  ;;  %v16366_v52 = vpop.eup %13443  ;;  %11879 = vmatpush1.bf16.msra.mxu1 %v18263_v4  ;;  %4428 = vmatprep.mubr.f32.mxu1 %v18267_v46 }
 0x74c   : > { %v16364_v31 = vpack.c.bf16 %v7722_v5, %v18311_v43  ;;  %18313 = vst [vmem:[#allocation75_spill] sm:$0xff] %v16366_v52  ;;  %v16370_v61 = vpack.c.bf16 %v7742_v37, %v7730_v30  ;;  %v16372_v3 = vpack.c.bf16 %v7740_v17, %v7728_v63  ;;  %v16374_v48 = vpack.c.bf16 %v7746_v50, %v7734_v34  ;;  %v18318_v37 = vld [vmem:[#allocation77_spill] sm:$0xff]  ;;  %v18320_v34 = vld [vmem:[#allocation78_spill] sm:$0xff] }
 0x74d   : > { %18310 = vst [vmem:[#allocation91_spill] sm:$0xff] %v16360_v26  ;;  %11881 = vmatprep.subr.bf16.mxu1 %v18264_v6  ;;  %v9655_v19 = vadd.f32 %v16366_v52, %v16351_v62  ;;  %v16379_v1 = vpack.c.bf16 %v7748_v36, %v7736_v42  ;;  %v9658_v63 = vadd.f32 %v16322_v44, %v16319_v22  ;;  %v18319_v17 = vand.u32 4294901760, %v16203_v28  ;;  %v18321_v36 = vld [vmem:[#allocation79_spill] sm:$0xff]  ;;  %v18323_v50 = vld [vmem:[#allocation82_spill] sm:$0xff] }
 0x74e   : > { %18312 = vst [vmem:[#allocation87_spill] sm:$0xff] %v16364_v31  ;;  %18314 = vst [vmem:[#allocation76_spill] sm:$0xff] %v16372_v3  ;;  %4431 = vmatmul.mubr.f32.gmra.mrb[54].mxu1 %v16213_v47  ;;  %v18322_v30 = vand.u32 4294901760, %v16213_v47  ;;  %v18324_v43 = vand.u32 4294901760, %v16222_v11  ;;  %v18325_v28 = vand.u32 4294901760, %v16235_v21  ;;  %v18328_v47 = vld [vmem:[#allocation55_spill] sm:$0xff] }
 0x74f   : > { %18315 = vst [vmem:[#allocation81_spill] sm:$0xff] %v16374_v48  ;;  %v16381_v5 = vpop.eup %13445  ;;  %9656 = vadd.xlane.f32.xlu0 %v9655_v19  ;;  %11883 = vmatpush1.bf16.msra.mxu1 %v18265_v2 }
 0x750   : > { %18316 = vst [vmem:[#allocation58_spill] sm:$0xff] %v16381_v5  ;;  %v16384_v27 = vpop.eup %13447  ;;  %4436 = vmatprep.mubr.f32.mxu1 %v18267_v46  ;;  %11885 = vmatprep.subr.bf16.mxu1 %v18318_v37  ;;  %v18329_v37 = vld [vmem:[#allocation53_spill] sm:$0xff] }
 0x751   : > { %18317 = vst [vmem:[#allocation44_spill] sm:$0xff] %v16384_v27  ;;  %v9661_v42 = vadd.f32 %v16384_v27, %v16381_v5 }
 0x752   : > { %4439 = vmatmul.mubr.f32.gmra.mrb[56].mxu1 %v16222_v11  ;;  %v16436_v11 = vand.u32 4294901760, %v18328_v47 }
 0x753   : > { %9659 = vadd.xlane.f32.xlu0 %v9658_v63  ;;  %4444 = vmatprep.mubr.f32.mxu1 %v18267_v46  ;;  %v16446_v63 = vand.u32 4294901760, %v18329_v37 }
 0x756   : > { %4447 = vmatmul.mubr.f32.gmra.mrb[58].mxu1 %v16235_v21 }
 0x757   : > { %9662 = vadd.xlane.f32.xlu0 %v9661_v42  ;;  %4525 = vmatprep.mubr.f32.mxu1 %v18267_v46  ;;  %v16451_v42 = vsub.f32 %v18328_v47, %v16436_v11 }
 0x759   : > { %v18334_v22 = vand.u32 4294901760, %v16451_v42 }
 0x75a   : > { %4529 = vmatmul.mubr.f32.vlgmr.msra.gmra.mrb[52].mxu1 %v18319_v17  ;;  %v18330_v17 = vld [vmem:[#allocation9_spill] sm:$0xff] }
 0x75b   : > { %11887 = vmatpush1.bf16.msra.mxu1 %v18320_v34  ;;  %4534 = vmatprep.mubr.f32.mxu1 %v18267_v46  ;;  %v16454_v34 = vand.u32 4294901760, %v18330_v17 }
 0x75c   : > { %11889 = vmatprep.subr.bf16.mxu1 %v18321_v36 }
 0x75e   : > { %4538 = vmatmul.mubr.f32.gmra.mrb[54].mxu1 %v18322_v30  ;;  %v16462_v30 = vsub.f32 %v18329_v37, %v16446_v63 }
 0x75f   : > { %11891 = vmatpush1.bf16.msra.mxu1 %v18323_v50  ;;  %4543 = vmatprep.mubr.f32.mxu1 %v18267_v46  ;;  %v18331_v50 = vld [vmem:[#allocation35_spill] sm:$0xff] }
 0x760   : > { %11893 = vmatprep.subr.bf16.mxu1 %v18262_v35  ;;  %v18326_v35 = vld [vmem:[#allocation51_spill] sm:$0xff] }
 0x761   : > { %v16424_v21 = vand.u32 4294901760, %v18326_v35 }
 0x762   : > { %4547 = vmatmul.mubr.f32.gmra.mrb[56].mxu1 %v18324_v43  ;;  %v16465_v43 = vand.u32 4294901760, %v18331_v50 }
 0x763   : > { %4552 = vmatprep.mubr.f32.mxu1 %v18267_v46 }
 0x766   : > { %4556 = vmatmul.mubr.f32.gmra.mrb[58].mxu1 %v18325_v28  ;;  %v16469_v28 = vsub.f32 %v18330_v17, %v16454_v34  ;;  %v16486_v17 = vsub.f32 %v18331_v50, %v16465_v43 }
 0x767   : > { %4650 = vmatprep.mubr.f32.mxu1 %v18267_v46 }
 0x768   : > { %v5022_v5 = vand.u32 4294901760, %v16469_v28  ;;  %v5028_v27 = vand.u32 4294901760, %v16486_v17 }
 0x76a   : > { %4652 = vmatmul.mubr.f32.vlgmr.msra.gmra.mrb[52].mxu1 %v16200_v58 }
 0x76b   : > { %11895 = vmatpush1.bf16.msra.mxu1 %v18263_v4  ;;  %4657 = vmatprep.mubr.f32.mxu1 %v18267_v46  ;;  %v18327_v4 = vld [vmem:[#allocation52_spill] sm:$0xff] }
 0x76c   : > { %11897 = vmatprep.subr.bf16.mxu1 %v18264_v6  ;;  %v16429_v6 = vand.u32 4294901760, %v18327_v4 }
 0x76e   : > { %4659 = vmatmul.mubr.f32.gmra.mrb[54].mxu1 %v16207_v38  ;;  %v16443_v19 = vsub.f32 %v18327_v4, %v16429_v6 }
 0x76f   : > { %11899 = vmatpush1.bf16.msra.mxu1 %v18265_v2  ;;  %4664 = vmatprep.mubr.f32.mxu1 %v18267_v46  ;;  %v16433_v2 = vsub.f32 %v18326_v35, %v16424_v21  ;;  %v18332_v35 = vld [vmem:[#allocation39_spill] sm:$0xff] }
 0x770   : > { %11901 = vmatprep.subr.bf16.mxu1 %v16104_v18  ;;  %v17819_v36 = vand.u32 4294901760, %v16443_v19  ;;  %v16472_v4 = vand.u32 4294901760, %v18332_v35 }
 0x772   : > { %4666 = vmatmul.mubr.f32.gmra.mrb[56].mxu1 %v16217_v13  ;;  %v4999_v37 = vsub.f32 %v16443_v19, %v17819_v36  ;;  %v5008_v36 = vsub.f32 %v16451_v42, %v18334_v22  ;;  %v5029_v22 = vsub.f32 %v16486_v17, %v5028_v27 }
 0x773   : > { %4671 = vmatprep.mubr.f32.mxu1 %v18267_v46 }
 0x774   : > { %v5000_v50 = vand.u32 4294901760, %v4999_v37 }
 0x776   : > { %4673 = vmatmul.mubr.f32.gmra.mrb[58].mxu1 %v16231_v41 }
 0x777   : > { %4751 = vmatprep.mubr.f32.mxu1 %v18267_v46 }
 0x77a   : > { %4753 = vmatmul.mubr.f32.vlgmr.msra.gmra.mrb[52].mxu1 %v16200_v58  ;;  %v17817_v58 = vand.u32 4294901760, %v16433_v2 }
 0x77b   : > { %11903 = vmatpush1.bf16.xpose.msra.mxu1 %v16108_v60  ;;  %4758 = vmatprep.mubr.f32.mxu1 %v18267_v46 }
 0x77c   : > { %11905 = vmatprep.subr.bf16.mxu1 %v16129_v12 }
 0x77e   : > { %4760 = vmatmul.mubr.f32.gmra.mrb[54].mxu1 %v16207_v38  ;;  %v4993_v38 = vsub.f32 %v16433_v2, %v17817_v58  ;;  %v5013_v58 = vand.u32 4294901760, %v16462_v30 }
 0x77f   : > { %4765 = vmatprep.mubr.f32.mxu1 %v18267_v46 }
 0x780   : > { %v4994_v47 = vand.u32 4294901760, %v4993_v38  ;;  %v5014_v44 = vsub.f32 %v16462_v30, %v5013_v58  ;;  %v5023_v38 = vsub.f32 %v16469_v28, %v5022_v5 }
 0x782   : > { %4767 = vmatmul.mubr.f32.gmra.mrb[56].mxu1 %v16217_v13  ;;  %v16495_v13 = vsub.f32 %v18332_v35, %v16472_v4  ;;  %v5009_v35 = vand.u32 4294901760, %v5008_v36  ;;  %v5030_v36 = vand.u32 4294901760, %v5029_v22 }
 0x783   : > { %11907 = vmatpush1.bf16.xpose.msra.mxu1 %v16133_v7  ;;  %4772 = vmatprep.mubr.f32.mxu1 %v18267_v46 }
 0x784   : > { %11909 = vmatprep.subr.bf16.mxu1 %v16155_v9  ;;  %v5042_v9 = vsub.f32 %v18333_v8, %v16489_v25  ;;  %v5037_v62 = vand.u32 4294901760, %v16495_v13  ;;  %v5024_v8 = vand.u32 4294901760, %v5023_v38 }
 0x786   : > { %4774 = vmatmul.mubr.f32.gmra.mrb[58].mxu1 %v16231_v41  ;;  %v5015_v41 = vand.u32 4294901760, %v5014_v44  ;;  %v5038_v37 = vsub.f32 %v16495_v13, %v5037_v62  ;;  %v18336_v44 = vpack.c.bf16 %v16114_v56, %v16102_v15  ;;  %v18339_v15 = vand.u32 4294901760, %v16433_v2 }
 0x787   : > { %4995 = vmatprep.mubr.f32.mxu1 %v4994_v47  ;;  %v5043_v47 = vand.u32 4294901760, %v5042_v9  ;;  %v18341_v56 = vand.u32 4294901760, %v16451_v42 }
 0x788   : > { %v5039_v48 = vand.u32 4294901760, %v5038_v37 }
 0x789   : > { %v5044_v52 = vsub.f32 %v5042_v9, %v5043_v47 }
 0x78a   : > { %5001 = vmatmul.mubr.f32.vlgmr.msra.gmra.mrb[60].mxu1 %v5000_v50 }
 0x78b   : > { %11911 = vmatpush1.bf16.xpose.msra.mxu1 %v16170_v45  ;;  %5010 = vmatprep.mubr.f32.mxu1 %v5009_v35  ;;  %v18335_v45 = vpack.c.bf16 %v16106_v23, %v16100_v54  ;;  %v18338_v54 = vpack.c.bf16 %v16139_v20, %v16137_v24  ;;  %v18340_v23 = vand.u32 4294901760, %v16443_v19 }
 0x78c   : > { %11913 = vmatprep.subr.bf16.mxu1 %v16180_v0  ;;  %v5045_v0 = vand.u32 4294901760, %v5044_v52 }
 0x78e   : > { %5016 = vmatmul.mubr.f32.gmra.mrb[62].mxu1 %v5015_v41 }
 0x78f   : > { %5025 = vmatprep.mubr.f32.mxu1 %v5024_v8 }
 0x792   : > { %5031 = vmatmul.mubr.f32.gmra.mrb[64].mxu1 %v5030_v36 }
 0x793   : > { %11915 = vmatpush1.bf16.xpose.msra.mxu1 %v16182_v39  ;;  %5040 = vmatprep.mubr.f32.mxu1 %v5039_v48  ;;  %v18337_v39 = vpack.c.bf16 %v16131_v33, %v16123_v32  ;;  %v18342_v32 = vld [vmem:[#allocation54_spill] sm:$0xff] }
 0x794   : > { %11917 = vmatprep.subr.bf16.mxu1 %v18335_v45  ;;  %v18346_v33 = vld [vmem:[#allocation30_spill] sm:$0xff] }
 0x796   : > { %5046 = vmatmul.mubr.f32.gmra.mrb[66].mxu1 %v5045_v0 }
 0x797   : > { %5156 = vmatprep.mubr.f32.mxu1 %v16424_v21 }
 0x79a   : > { %5158 = vmatmul.mubr.f32.vlgmr.msra.gmra.mrb[60].mxu1 %v16429_v6 }
 0x79b   : > { %11919 = vmatpush1.bf16.xpose.msra.mxu1 %v18336_v44  ;;  %5163 = vmatprep.mubr.f32.mxu1 %v16436_v11 }
 0x79c   : > { %11921 = vmatprep.subr.bf16.mxu1 %v18337_v39 }
 0x79e   : > { %5165 = vmatmul.mubr.f32.gmra.mrb[62].mxu1 %v16446_v63 }
 0x79f   : > { %5170 = vmatprep.mubr.f32.mxu1 %v16454_v34 }
 0x7a2   : > { %5172 = vmatmul.mubr.f32.gmra.mrb[64].mxu1 %v16465_v43 }
 0x7a3   : > { %11923 = vmatpush1.bf16.xpose.msra.mxu1 %v18338_v54  ;;  %5177 = vmatprep.mubr.f32.mxu1 %v16472_v4 }
 0x7a4   : > { %11925 = vmatprep.subr.bf16.mxu1 %v16104_v18 }
 0x7a6   : > { %5179 = vmatmul.mubr.f32.gmra.mrb[66].mxu1 %v16489_v25 }
 0x7a7   : > { %5266 = vmatprep.mubr.f32.mxu1 %v16433_v2 }
 0x7aa   : > { %5269 = vmatmul.mubr.f32.vlgmr.msra.gmra.mrb[60].mxu1 %v16443_v19 }
 0x7ab   : > { %11927 = vmatpush1.bf16.xpose.msra.mxu1 %v16108_v60  ;;  %5275 = vmatprep.mubr.f32.mxu1 %v16451_v42 }
 0x7ac   : > { %11929 = vmatprep.subr.bf16.mxu1 %v16129_v12 }
 0x7ae   : > { %5278 = vmatmul.mubr.f32.gmra.mrb[62].mxu1 %v16462_v30 }
 0x7af   : > { %5284 = vmatprep.mubr.f32.mxu1 %v16469_v28 }
 0x7b2   : > { %5287 = vmatmul.mubr.f32.gmra.mrb[64].mxu1 %v16486_v17 }
 0x7b3   : > { %11931 = vmatpush1.bf16.xpose.msra.mxu1 %v16133_v7  ;;  %5293 = vmatprep.mubr.f32.mxu1 %v16495_v13 }
 0x7b4   : > { %11933 = vmatprep.subr.bf16.mxu1 %v16176_v40 }
 0x7b6   : > { %5296 = vmatmul.mubr.f32.gmra.mrb[66].mxu1 %v5042_v9 }
 0x7b7   : > { %5376 = vmatprep.mubr.f32.mxu1 %v18339_v15 }
 0x7ba   : > { %5380 = vmatmul.mubr.f32.vlgmr.msra.gmra.mrb[60].mxu1 %v18340_v23 }
 0x7bb   : > { %11935 = vmatpush1.bf16.xpose.msra.mxu1 %v16184_v14  ;;  %5387 = vmatprep.mubr.f32.mxu1 %v18341_v56 }
 0x7bc   : > { %11937 = vmatprep.subr.bf16.mxu1 %v16186_v51 }
 0x7be   : > { %5391 = vmatmul.mubr.f32.gmra.mrb[62].mxu1 %v5013_v58 }
 0x7bf   : > { %5398 = vmatprep.mubr.f32.mxu1 %v5022_v5 }
 0x7c2   : > { %5402 = vmatmul.mubr.f32.gmra.mrb[64].mxu1 %v5028_v27 }
 0x7c3   : > { %11939 = vmatpush1.bf16.xpose.msra.mxu1 %v18342_v32  ;;  %5409 = vmatprep.mubr.f32.mxu1 %v5037_v62 }
 0x7c4   : > { %11941 = vmatprep.subr.bf16.mxu1 %v16104_v18  ;;  %v18343_v18 = vld [vmem:[#allocation85_spill] sm:$0xff] }
 0x7c6   : > { %5413 = vmatmul.mubr.f32.gmra.mrb[66].mxu1 %v5043_v47 }
 0x7c7   : > { %5507 = vmatprep.mubr.f32.mxu1 %v16424_v21 }
 0x7ca   : > { %5509 = vmatmul.mubr.f32.vlgmr.msra.gmra.mrb[60].mxu1 %v16429_v6 }
 0x7cb   : > { %11943 = vmatpush1.bf16.xpose.msra.mxu1 %v16108_v60  ;;  %5514 = vmatprep.mubr.f32.mxu1 %v16436_v11  ;;  %v18344_v60 = vld [vmem:[#allocation88_spill] sm:$0xff] }
 0x7cc   : > { %11945 = vmatprep.subr.bf16.mxu1 %v16129_v12  ;;  %v18345_v12 = vld [vmem:[#allocation93_spill] sm:$0xff] }
 0x7ce   : > { %5516 = vmatmul.mubr.f32.gmra.mrb[62].mxu1 %v16446_v63 }
 0x7cf   : > { %5521 = vmatprep.mubr.f32.mxu1 %v16454_v34 }
 0x7d2   : > { %5523 = vmatmul.mubr.f32.gmra.mrb[64].mxu1 %v16465_v43 }
 0x7d3   : > { %11947 = vmatpush1.bf16.xpose.msra.mxu1 %v16133_v7  ;;  %5528 = vmatprep.mubr.f32.mxu1 %v16472_v4  ;;  %v18347_v7 = vld [vmem:[#allocation47_spill] sm:$0xff] }
 0x7d4   : > { %11949 = vmatprep.subr.bf16.mxu1 %v18343_v18 }
 0x7d6   : > { %5530 = vmatmul.mubr.f32.gmra.mrb[66].mxu1 %v16489_v25 }
 0x7d7   : > { %5608 = vmatprep.mubr.f32.mxu1 %v16424_v21 }
 0x7da   : > { %5610 = vmatmul.mubr.f32.vlgmr.msra.gmra.mrb[60].mxu1 %v16429_v6 }
 0x7db   : > { %11951 = vmatpush1.bf16.msra.mxu1 %v18344_v60  ;;  %5615 = vmatprep.mubr.f32.mxu1 %v16436_v11 }
 0x7dc   : > { %11953 = vmatprep.subr.bf16.mxu1 %v18345_v12 }
 0x7de   : > { %5617 = vmatmul.mubr.f32.gmra.mrb[62].mxu1 %v16446_v63 }
 0x7df   : > { %11955 = vmatpush1.bf16.msra.mxu1 %v18346_v33  ;;  %5622 = vmatprep.mubr.f32.mxu1 %v16454_v34 }
 0x7e0   : > { %11957 = vmatprep.subr.bf16.mxu1 %v18347_v7 }
 0x7e2   : > { %5624 = vmatmul.mubr.f32.gmra.mrb[64].mxu1 %v16465_v43 }
 0x7e3   : > { %5629 = vmatprep.mubr.f32.mxu1 %v16472_v4 }
 0x7e6   : > { %5631 = vmatmul.mubr.f32.gmra.mrb[66].mxu1 %v16489_v25 }
 0x7e7   : > { %5720 = vmatprep.mubr.f32.mxu1 %v18267_v46 }
 0x84d   : > { %v4754_v24 = vpop.f32.mrb[52].mxu1 }
 0x84e   : > { %v6890_v20 = vand.u32 4294901760, %v4754_v24  ;;  %v4756_v40 = vpop.f32.mrb[53].mxu1 }
 0x84f   : > { %v6888_v14 = vand.u32 4294901760, %v4756_v40 }
 0x850   : > { %v16580_v51 = vsub.f32 %v4754_v24, %v6890_v20 }
 0x851   : > { %v16582_v62 = vsub.f32 %v4756_v40, %v6888_v14  ;;  %v4761_v52 = vpop.f32.mrb[54].mxu1 }
 0x852   : > { %v6980_v48 = vand.u32 4294901760, %v16580_v51  ;;  %v6894_v5 = vand.u32 4294901760, %v4761_v52  ;;  %v4763_v27 = vpop.f32.mrb[55].mxu1 }
 0x853   : > { %v6974_v21 = vand.u32 4294901760, %v16582_v62  ;;  %v6892_v6 = vand.u32 4294901760, %v4763_v27 }
 0x854   : > { %v16586_v2 = vpack.c.bf16 %v6894_v5, %v6890_v20  ;;  %v16588_v25 = vsub.f32 %v4761_v52, %v6894_v5  ;;  %v6981_v42 = vsub.f32 %v16580_v51, %v6980_v48 }
 0x855   : > { %v16590_v11 = vpack.c.bf16 %v6892_v6, %v6888_v14  ;;  %v16592_v19 = vsub.f32 %v4763_v27, %v6892_v6  ;;  %v4768_v63 = vpop.f32.mrb[56].mxu1  ;;  %v6975_v28 = vsub.f32 %v16582_v62, %v6974_v21 }
 0x856   : > { %v6992_v34 = vand.u32 4294901760, %v16588_v25  ;;  %v6898_v30 = vand.u32 4294901760, %v4768_v63  ;;  %v4770_v43 = vpop.f32.mrb[57].mxu1  ;;  %v6982_v8 = vand.u32 4294901760, %v6981_v42 }
 0x857   : > { %v6986_v4 = vand.u32 4294901760, %v16592_v19  ;;  %v6896_v17 = vand.u32 4294901760, %v4770_v43  ;;  %v6976_v54 = vand.u32 4294901760, %v6975_v28 }
 0x858   : > { %v6993_v50 = vsub.f32 %v16588_v25, %v6992_v34  ;;  %v16603_v9 = vsub.f32 %v4768_v63, %v6898_v30  ;;  %v16605_v35 = vpack.c.bf16 %v6992_v34, %v6980_v48 }
 0x859   : > { %v6987_v38 = vsub.f32 %v16592_v19, %v6986_v4  ;;  %v16608_v41 = vsub.f32 %v4770_v43, %v6896_v17  ;;  %v4775_v22 = vpop.f32.mrb[58].mxu1  ;;  %v16610_v47 = vpack.c.bf16 %v6986_v4, %v6974_v21 }
 0x85a   : > { %v6994_v37 = vand.u32 4294901760, %v6993_v50  ;;  %v7004_v36 = vand.u32 4294901760, %v16603_v9  ;;  %v6902_v45 = vand.u32 4294901760, %v4775_v22  ;;  %v4777_v0 = vpop.f32.mrb[59].mxu1 }
 0x85b   : > { %v6998_v44 = vand.u32 4294901760, %v16608_v41  ;;  %v6900_v39 = vand.u32 4294901760, %v4777_v0  ;;  %v6988_v15 = vand.u32 4294901760, %v6987_v38 }
 0x85c   : > { %v16614_v23 = vpack.c.bf16 %v6902_v45, %v6898_v30  ;;  %v16616_v56 = vsub.f32 %v4775_v22, %v6902_v45  ;;  %v16618_v32 = vpack.c.bf16 %v6994_v37, %v6982_v8  ;;  %v7005_v40 = vsub.f32 %v16603_v9, %v7004_v36 }
 0x85d   : > { %v16620_v7 = vpack.c.bf16 %v6900_v39, %v6896_v17  ;;  %v16622_v24 = vsub.f32 %v4777_v0, %v6900_v39  ;;  %v16624_v20 = vpack.c.bf16 %v6988_v15, %v6976_v54  ;;  %v6999_v48 = vsub.f32 %v16608_v41, %v6998_v44 }
 0x85e   : > { %v7016_v14 = vand.u32 4294901760, %v16616_v56  ;;  %v7006_v34 = vand.u32 4294901760, %v7005_v40 }
 0x85f   : > { %v7010_v5 = vand.u32 4294901760, %v16622_v24  ;;  %v7000_v43 = vand.u32 4294901760, %v6999_v48 }
 0x860   : > { %v7017_v21 = vsub.f32 %v16616_v56, %v7016_v14  ;;  %v16635_v6 = vpack.c.bf16 %v7016_v14, %v7004_v36 }
 0x861   : > { %v7011_v63 = vsub.f32 %v16622_v24, %v7010_v5  ;;  %v16638_v42 = vpack.c.bf16 %v7010_v5, %v6998_v44 }
 0x862   : > { %v7018_v30 = vand.u32 4294901760, %v7017_v21 }
 0x863   : > { %v7012_v28 = vand.u32 4294901760, %v7011_v63 }
 0x864   : > { %v16640_v4 = vpack.c.bf16 %v7018_v30, %v7006_v34 }
 0x865   : > { %v16642_v17 = vpack.c.bf16 %v7012_v28, %v7000_v43 }
 0x8ad   : > { %v5611_v50 = vpop.f32.mrb[60].mxu1 }
 0x8ae   : > { %v5637_v38 = vsel %vm4077_vm2, %v5611_v50, 0  ;;  %v5613_v22 = vpop.f32.mrb[61].mxu1  ;;  %v18348_v50 = vld [vmem:[#allocation96_spill] sm:$0xff] }
 0x8af   : > { %v16645_v8 = vand.u32 4294901760, %v5637_v38 }
 0x8b1   : > { %v16648_v37 = vsub.f32 %v5637_v38, %v16645_v8  ;;  %v5618_v36 = vpop.f32.mrb[62].mxu1 }
 0x8b2   : > { %v5640_v45 = vsel %vm4077_vm2, %v5618_v36, 0  ;;  %v5620_v0 = vpop.f32.mrb[63].mxu1 }
 0x8b3   : > { %v5723_v44 = vand.u32 4294901760, %v16648_v37  ;;  %v16652_v39 = vand.u32 4294901760, %v5640_v45 }
 0x8b5   : > { %v5724_v54 = vsub.f32 %v16648_v37, %v5723_v44  ;;  %v5733_v15 = vsub.f32 %v5640_v45, %v16652_v39  ;;  %v5625_v40 = vpop.f32.mrb[64].mxu1  ;;  %v18349_v45 = vld [vmem:[#allocation49_spill] sm:$0xff] }
 0x8b6   : > { %v5643_v14 = vsel %vm4077_vm2, %v5625_v40, 0  ;;  %v5627_v48 = vpop.f32.mrb[65].mxu1 }
 0x8b7   : > { %v5725_v5 = vand.u32 4294901760, %v5724_v54  ;;  %v5734_v21 = vand.u32 4294901760, %v5733_v15  ;;  %v16657_v63 = vand.u32 4294901760, %v5643_v14 }
 0x8b9   : > { %v5744_v34 = vsub.f32 %v5643_v14, %v16657_v63  ;;  %v5632_v30 = vpop.f32.mrb[66].mxu1  ;;  %5726 = vmatmul.mubr.f32.vlgmr.msra.gmra.mrb[68].mxu1 %v5725_v5  ;;  %v5735_v43 = vsub.f32 %v5733_v15, %v5734_v21  ;;  %v18350_v14 = vld [vmem:[#allocation16_spill] sm:$0xff]  ;;  %v18351_v5 = vld [vmem:[#allocation86_spill] sm:$0xff] }
 0x8ba   : > { %v5646_v28 = vsel %vm4077_vm2, %v5632_v30, 0  ;;  %11959 = vmatpush1.bf16.msra.mxu1 %v18348_v50  ;;  %v5634_v38 = vpop.f32.mrb[67].mxu1  ;;  %5731 = vmatprep.mubr.f32.mxu1 %v18267_v46  ;;  %v18352_v30 = vld [vmem:[#allocation84_spill] sm:$0xff] }
 0x8bb   : > { %v5745_v22 = vand.u32 4294901760, %v5744_v34  ;;  %v16663_v36 = vand.u32 4294901760, %v5646_v28  ;;  %11961 = vmatprep.subr.bf16.mxu1 %v18349_v45  ;;  %v5736_v0 = vand.u32 4294901760, %v5735_v43  ;;  %v18353_v50 = vpack.c.bf16 %v18351_v5, %v18352_v30  ;;  %v18354_v43 = vld [vmem:[#allocation90_spill] sm:$0xff]  ;;  %v18358_v5 = vld [vmem:[#allocation92_spill] sm:$0xff] }
 0x8bd   : > { %v5755_v54 = vsub.f32 %v5646_v28, %v16663_v36  ;;  %5737 = vmatmul.mubr.f32.gmra.mrb[70].mxu1 %v5736_v0  ;;  %v5746_v40 = vsub.f32 %v5744_v34, %v5745_v22  ;;  %v18355_v28 = vld [vmem:[#allocation89_spill] sm:$0xff] }
 0x8be   : > { %11963 = vmatpush1.bf16.msra.mxu1 %v18350_v14  ;;  %5742 = vmatprep.mubr.f32.mxu1 %v18267_v46  ;;  %v18356_v0 = vpack.c.bf16 %v18354_v43, %v18355_v28  ;;  %v18357_v14 = vld [vmem:[#allocation94_spill] sm:$0xff] }
 0x8bf   : > { %v5756_v48 = vand.u32 4294901760, %v5755_v54  ;;  %11965 = vmatprep.subr.bf16.mxu1 %v18353_v50  ;;  %v5747_v38 = vand.u32 4294901760, %v5746_v40  ;;  %v18359_v30 = vpack.c.bf16 %v18357_v14, %v18358_v5  ;;  %v18360_v40 = vld [vmem:[#allocation95_spill] sm:$0xff]  ;;  %v18361_v50 = vld [vmem:[#allocation28_spill] sm:$0xff] }
 0x8c1   : > { %5748 = vmatmul.mubr.f32.gmra.mrb[72].mxu1 %v5747_v38  ;;  %v5757_v52 = vsub.f32 %v5755_v54, %v5756_v48  ;;  %v18363_v38 = vld [vmem:[#allocation11_spill] sm:$0xff] }
 0x8c2   : > { %5753 = vmatprep.mubr.f32.mxu1 %v18267_v46 }
 0x8c3   : > { %v5758_v45 = vand.u32 4294901760, %v5757_v52  ;;  %v18362_v52 = vpack.c.bf16 %v18360_v40, %v18361_v50 }
 0x8c5   : > { %5759 = vmatmul.mubr.f32.gmra.mrb[74].mxu1 %v5758_v45  ;;  %v18365_v45 = vld [vmem:[#allocation97_spill] sm:$0xff] }
 0x8c6   : > { %5869 = vmatprep.mubr.f32.mxu1 %v18267_v46 }
 0x8c9   : > { %5871 = vmatmul.mubr.f32.vlgmr.msra.gmra.mrb[68].mxu1 %v16645_v8 }
 0x8ca   : > { %11967 = vmatpush1.bf16.msra.mxu1 %v18356_v0  ;;  %5876 = vmatprep.mubr.f32.mxu1 %v18267_v46 }
 0x8cb   : > { %11969 = vmatprep.subr.bf16.mxu1 %v18359_v30 }
 0x8cd   : > { %5878 = vmatmul.mubr.f32.gmra.mrb[70].mxu1 %v16652_v39 }
 0x8ce   : > { %11971 = vmatpush1.bf16.msra.mxu1 %v18362_v52  ;;  %5883 = vmatprep.mubr.f32.mxu1 %v18267_v46 }
 0x8cf   : > { %11973 = vmatprep.subr.bf16.mxu1 %v18343_v18 }
 0x8d1   : > { %5885 = vmatmul.mubr.f32.gmra.mrb[72].mxu1 %v16657_v63 }
 0x8d2   : > { %5890 = vmatprep.mubr.f32.mxu1 %v18267_v46 }
 0x8d5   : > { %5892 = vmatmul.mubr.f32.gmra.mrb[74].mxu1 %v16663_v36 }
 0x8d6   : > { %5978 = vmatprep.mubr.f32.mxu1 %v18267_v46 }
 0x8d9   : > { %5981 = vmatmul.mubr.f32.vlgmr.msra.gmra.mrb[68].mxu1 %v16648_v37  ;;  %v18364_v37 = vld [vmem:[#allocation5_spill] sm:$0xff] }
 0x8da   : > { %11975 = vmatpush1.bf16.msra.mxu1 %v18344_v60  ;;  %5986 = vmatprep.mubr.f32.mxu1 %v18267_v46 }
 0x8db   : > { %11977 = vmatprep.subr.bf16.mxu1 %v18345_v12 }
 0x8dd   : > { %5989 = vmatmul.mubr.f32.gmra.mrb[70].mxu1 %v5733_v15  ;;  %v18366_v15 = vld [vmem:[#allocation98_spill] sm:$0xff] }
 0x8de   : > { %11979 = vmatpush1.bf16.msra.mxu1 %v18346_v33  ;;  %5994 = vmatprep.mubr.f32.mxu1 %v18267_v46 }
 0x8df   : > { %11981 = vmatprep.subr.bf16.mxu1 %v18363_v38 }
 0x8e1   : > { %5997 = vmatmul.mubr.f32.gmra.mrb[72].mxu1 %v5744_v34 }
 0x8e2   : > { %6002 = vmatprep.mubr.f32.mxu1 %v18267_v46 }
 0x8e5   : > { %6005 = vmatmul.mubr.f32.gmra.mrb[74].mxu1 %v5755_v54 }
 0x8e6   : > { %6083 = vmatprep.mubr.f32.mxu1 %v18267_v46 }
 0x8e9   : > { %6087 = vmatmul.mubr.f32.vlgmr.msra.gmra.mrb[68].mxu1 %v5723_v44 }
 0x8ea   : > { %11983 = vmatpush1.bf16.msra.mxu1 %v18364_v37  ;;  %6092 = vmatprep.mubr.f32.mxu1 %v18267_v46 }
 0x8eb   : > { %11985 = vmatprep.subr.bf16.mxu1 %v18365_v45 }
 0x8ed   : > { %6096 = vmatmul.mubr.f32.gmra.mrb[70].mxu1 %v5734_v21 }
 0x8ee   : > { %11987 = vmatpush1.bf16.msra.mxu1 %v18366_v15  ;;  %6101 = vmatprep.mubr.f32.mxu1 %v18267_v46 }
 0x8ef   : > { %11989 = vmatprep.subr.bf16.mxu1 %v18343_v18 }
 0x8f1   : > { %6105 = vmatmul.mubr.f32.gmra.mrb[72].mxu1 %v5745_v22 }
 0x8f2   : > { %6110 = vmatprep.mubr.f32.mxu1 %v18267_v46 }
 0x8f5   : > { %6114 = vmatmul.mubr.f32.gmra.mrb[74].mxu1 %v5756_v48 }
 0x8f6   : > { %6208 = vmatprep.mubr.f32.mxu1 %v18267_v46 }
 0x8f9   : > { %6210 = vmatmul.mubr.f32.vlgmr.msra.gmra.mrb[68].mxu1 %v16645_v8 }
 0x8fa   : > { %11991 = vmatpush1.bf16.msra.mxu1 %v18344_v60  ;;  %6215 = vmatprep.mubr.f32.mxu1 %v18267_v46  ;;  %v18367_v60 = vld [vmem:[#allocation57_spill] sm:$0xff] }
 0x8fb   : > { %11993 = vmatprep.subr.bf16.mxu1 %v18345_v12  ;;  %v6341_v12 = vsel %vm4077_vm2, %v18367_v60, 0 }
 0x8fd   : > { %6217 = vmatmul.mubr.f32.gmra.mrb[70].mxu1 %v16652_v39 }
 0x8fe   : > { %11995 = vmatpush1.bf16.msra.mxu1 %v18346_v33  ;;  %6222 = vmatprep.mubr.f32.mxu1 %v18267_v46 }
 0x901   : > { %6224 = vmatmul.mubr.f32.gmra.mrb[72].mxu1 %v16657_v63 }
 0x902   : > { %6229 = vmatprep.mubr.f32.mxu1 %v18267_v46 }
 0x905   : > { %6231 = vmatmul.mubr.f32.gmra.mrb[74].mxu1 %v16663_v36 }
 0x906   : > { %6309 = vmatprep.mubr.f32.mxu1 %v18267_v46 }
 0x909   : > { %6311 = vmatmul.mubr.f32.vlgmr.msra.gmra.mrb[68].mxu1 %v16645_v8 }
 0x90a   : > { %6316 = vmatprep.mubr.f32.mxu1 %v18267_v46 }
 0x90d   : > { %6318 = vmatmul.mubr.f32.gmra.mrb[70].mxu1 %v16652_v39  ;;  %v16732_v39 = vand.u32 4294901760, %v6341_v12 }
 0x90e   : > { %6323 = vmatprep.mubr.f32.mxu1 %v18267_v46 }
 0x90f   : > { %v16743_v14 = vsub.f32 %v6341_v12, %v16732_v39 }
 0x911   : > { %6325 = vmatmul.mubr.f32.gmra.mrb[72].mxu1 %v16657_v63 }
 0x912   : > { %6330 = vmatprep.mubr.f32.mxu1 %v18267_v46 }
 0x915   : > { %6332 = vmatmul.mubr.f32.gmra.mrb[74].mxu1 %v16663_v36 }
 0x916   : > { %6415 = vmatprep.mubr.f32.mxu1 %v18267_v46 }
 0x9dc   : > { %v6312_v18 = vpop.f32.mrb[68].mxu1 }
 0x9dd   : > { %v6345_v33 = vand.u32 4294901760, %v6312_v18  ;;  %v6314_v8 = vpop.f32.mrb[69].mxu1 }
 0x9de   : > { %v6343_v44 = vand.u32 4294901760, %v6314_v8 }
 0x9df   : > { %v16730_v21 = vsub.f32 %v6312_v18, %v6345_v33 }
 0x9e0   : > { %v16734_v34 = vsub.f32 %v6314_v8, %v6343_v44  ;;  %v6319_v63 = vpop.f32.mrb[70].mxu1 }
 0x9e1   : > { %v6435_v22 = vand.u32 4294901760, %v16730_v21  ;;  %v6349_v54 = vand.u32 4294901760, %v6319_v63  ;;  %v6321_v36 = vpop.f32.mrb[71].mxu1 }
 0x9e2   : > { %v6429_v48 = vand.u32 4294901760, %v16734_v34  ;;  %v6347_v43 = vand.u32 4294901760, %v6321_v36 }
 0x9e3   : > { %v16738_v28 = vpack.c.bf16 %v6349_v54, %v6345_v33  ;;  %v16740_v0 = vsub.f32 %v6319_v63, %v6349_v54  ;;  %v6436_v50 = vsub.f32 %v16730_v21, %v6435_v22  ;;  %v6418_v63 = vand.u32 4294901760, %v16743_v14 }
 0x9e4   : > { %v16745_v5 = vpack.c.bf16 %v6347_v43, %v6343_v44  ;;  %v6440_v30 = vsub.f32 %v6321_v36, %v6347_v43  ;;  %v6326_v40 = vpop.f32.mrb[72].mxu1  ;;  %v6430_v15 = vsub.f32 %v16734_v34, %v6429_v48 }
 0x9e5   : > { %v6447_v52 = vand.u32 4294901760, %v16740_v0  ;;  %v12014_v38 = vpack.c.bf16 %v16740_v0, %v16730_v21  ;;  %v6353_v37 = vand.u32 4294901760, %v6326_v40  ;;  %v6328_v45 = vpop.f32.mrb[73].mxu1  ;;  %v6437_v27 = vand.u32 4294901760, %v6436_v50 }
 0x9e6   : > { %v6441_v18 = vand.u32 4294901760, %v6440_v30  ;;  %v6351_v60 = vand.u32 4294901760, %v6328_v45  ;;  %11997 = vmatprep.subr.bf16.mxu1 %v16745_v5  ;;  %v12012_v12 = vpack.c.bf16 %v6440_v30, %v16734_v34  ;;  %v6431_v16 = vand.u32 4294901760, %v6430_v15 }
 0x9e7   : > { %v6448_v33 = vsub.f32 %v16740_v0, %v6447_v52  ;;  %v6458_v8 = vsub.f32 %v6326_v40, %v6353_v37  ;;  %11999 = vmatpush1.bf16.msra.mxu1 %v16738_v28  ;;  %v16756_v44 = vpack.c.bf16 %v6447_v52, %v6435_v22  ;;  %v6419_v22 = vsub.f32 %v16743_v14, %v6418_v63 }
 0x9e8   : > { %v6442_v21 = vsub.f32 %v6440_v30, %v6441_v18  ;;  %v6452_v54 = vsub.f32 %v6328_v45, %v6351_v60  ;;  %v6333_v36 = vpop.f32.mrb[74].mxu1  ;;  %v12028_v43 = vpack.c.bf16 %v6441_v18, %v6429_v48 }
 0x9e9   : > { %v6449_v58 = vand.u32 4294901760, %v6448_v33  ;;  %v6459_v13 = vand.u32 4294901760, %v6458_v8  ;;  %v6357_v3 = vand.u32 4294901760, %v6333_v36  ;;  %v6335_v31 = vpop.f32.mrb[75].mxu1  ;;  %v6420_v15 = vand.u32 4294901760, %v6419_v22  ;;  %v18384_v22 = vld [vmem:[#allocation73_spill] sm:$0xff] }
 0x9ea   : > { %v6453_v26 = vand.u32 4294901760, %v6452_v54  ;;  %v6355_v34 = vand.u32 4294901760, %v6335_v31  ;;  %v6443_v0 = vand.u32 4294901760, %v6442_v21 }
 0x9eb   : > { %v12002_v40 = vpack.c.bf16 %v6357_v3, %v6353_v37  ;;  %v6470_v55 = vsub.f32 %v6333_v36, %v6357_v3  ;;  %v12006_v53 = vpack.c.bf16 %v6449_v58, %v6437_v27  ;;  %v6460_v45 = vsub.f32 %v6458_v8, %v6459_v13  ;;  %v18382_v36 = vld [vmem:[#allocation74_spill] sm:$0xff] }
 0x9ec   : > { %v12000_v52 = vpack.c.bf16 %v6355_v34, %v6351_v60  ;;  %v6464_v10 = vsub.f32 %v6335_v31, %v6355_v34  ;;  %v12004_v30 = vpack.c.bf16 %v6443_v0, %v6431_v16  ;;  %v6454_v50 = vsub.f32 %v6452_v54, %v6453_v26  ;;  %v18383_v0 = vld [vmem:[#allocation17_spill] sm:$0xff] }
 0x9ed   : > { %v6471_v59 = vand.u32 4294901760, %v6470_v55  ;;  %v12018_v48 = vpack.c.bf16 %v6470_v55, %v6458_v8  ;;  %v6461_v58 = vand.u32 4294901760, %v6460_v45 }
 0x9ee   : > { %v6465_v18 = vand.u32 4294901760, %v6464_v10  ;;  %12001 = vmatprep.subr.bf16.mxu1 %v12000_v52  ;;  %v12016_v33 = vpack.c.bf16 %v6464_v10, %v6452_v54  ;;  %v6455_v37 = vand.u32 4294901760, %v6454_v50 }
 0x9ef   : > { %v6472_v49 = vsub.f32 %v6470_v55, %v6471_v59  ;;  %12003 = vmatpush1.bf16.msra.mxu1 %v12002_v40  ;;  %v12034_v57 = vpack.c.bf16 %v6471_v59, %v6459_v13  ;;  %v18368_v13 = vpack.c.bf16 %v16592_v19, %v16582_v62 }
 0x9f0   : > { %v6466_v21 = vsub.f32 %v6464_v10, %v6465_v18  ;;  %12005 = vmatprep.subr.bf16.mxu1 %v12004_v30  ;;  %v12032_v3 = vpack.c.bf16 %v6465_v18, %v6453_v26 }
 0x9f1   : > { %v6473_v27 = vand.u32 4294901760, %v6472_v49  ;;  %v13459_v49 = vld [vmem:[%s17533_s2] sm:$0xf] }
 0x9f2   : > { %6421 = vmatmul.mubr.f32.vlgmr.msra.gmra.mrb[76].mxu1 %v6420_v15  ;;  %v6467_v31 = vand.u32 4294901760, %v6466_v21  ;;  %v6886_v59 = vsel %vm4077_vm2, %v13459_v49, 0 }
 0x9f3   : > { %12007 = vmatpush1.bf16.msra.mxu1 %v12006_v53  ;;  %v12010_v16 = vpack.c.bf16 %v6473_v27, %v6461_v58  ;;  %6531 = vmatprep.mubr.f32.mxu1 %v18267_v46  ;;  %v6961_v26 = vand.u32 4294901760, %v6886_v59 }
 0x9f4   : > { %v12008_v60 = vpack.c.bf16 %v6467_v31, %v6455_v37 }
 0x9f5   : > { %v6962_v53 = vsub.f32 %v6886_v59, %v6961_v26 }
 0x9f6   : > { %12009 = vmatprep.subr.bf16.mxu1 %v12008_v60 }
 0x9f7   : > { %12011 = vmatpush1.bf16.msra.mxu1 %v12010_v16  ;;  %v6963_v10 = vand.u32 4294901760, %v6962_v53 }
 0x9f8   : > { %12013 = vmatprep.subr.bf16.mxu1 %v12012_v12 }
 0x9f9   : > { %v6964_v55 = vsub.f32 %v6962_v53, %v6963_v10 }
 0x9fa   : > { %6533 = vmatmul.mubr.f32.vlgmr.msra.gmra.mrb[76].mxu1 %v16732_v39 }
 0x9fb   : > { %12015 = vmatpush1.bf16.msra.mxu1 %v12014_v38  ;;  %6619 = vmatprep.mubr.f32.mxu1 %v18267_v46  ;;  %v18380_v38 = vld [vmem:[#allocation13_spill] sm:$0xff] }
 0x9fc   : > { %12017 = vmatprep.subr.bf16.mxu1 %v12016_v33  ;;  %v16856_v12 = vand.u32 4294901760, %v18380_v38 }
 0x9fe   : > { %v16872_v34 = vsub.f32 %v18380_v38, %v16856_v12 }
 0x9ff   : > { %12019 = vmatpush1.bf16.msra.mxu1 %v12018_v48 }
 0xa00   : > { %12021 = vmatprep.subr.bf16.mxu1 %v16745_v5  ;;  %v7679_v15 = vand.u32 4294901760, %v16872_v34 }
 0xa02   : > { %6622 = vmatmul.mubr.f32.vlgmr.msra.gmra.mrb[76].mxu1 %v16743_v14  ;;  %v7680_v37 = vsub.f32 %v16872_v34, %v7679_v15 }
 0xa03   : > { %12023 = vmatpush1.bf16.msra.mxu1 %v16738_v28  ;;  %6700 = vmatprep.mubr.f32.mxu1 %v18267_v46 }
 0xa04   : > { %12025 = vmatprep.subr.bf16.mxu1 %v12000_v52  ;;  %v7681_v49 = vand.u32 4294901760, %v7680_v37 }
 0xa07   : > { %12027 = vmatpush1.bf16.msra.mxu1 %v12002_v40 }
 0xa08   : > { %12029 = vmatprep.subr.bf16.mxu1 %v12028_v43 }
 0xa0a   : > { %6704 = vmatmul.mubr.f32.vlgmr.msra.gmra.mrb[76].mxu1 %v6418_v63 }
 0xa0b   : > { %12031 = vmatpush1.bf16.msra.mxu1 %v16756_v44  ;;  %6798 = vmatprep.mubr.f32.mxu1 %v18267_v46  ;;  %v18381_v44 = vld [vmem:[#allocation18_spill] sm:$0xff] }
 0xa0c   : > { %12033 = vmatprep.subr.bf16.mxu1 %v12032_v3  ;;  %v16863_v63 = vand.u32 4294901760, %v18381_v44 }
 0xa0e   : > { %v7687_v30 = vsub.f32 %v18381_v44, %v16863_v63 }
 0xa0f   : > { %12035 = vmatpush1.bf16.msra.mxu1 %v12034_v57  ;;  %v6965_v57 = vand.u32 4294901760, %v6964_v55  ;;  %v18388_v55 = vld [vmem:[#allocation62_spill] sm:$0xff] }
 0xa10   : > { %12037 = vmatprep.subr.bf16.mxu1 %v16745_v5  ;;  %v7688_v58 = vand.u32 4294901760, %v7687_v30 }
 0xa12   : > { %6800 = vmatmul.mubr.f32.vlgmr.msra.gmra.mrb[76].mxu1 %v16732_v39  ;;  %v7689_v60 = vsub.f32 %v7687_v30, %v7688_v58 }
 0xa13   : > { %12039 = vmatpush1.bf16.msra.mxu1 %v16738_v28  ;;  %6878 = vmatprep.mubr.f32.mxu1 %v18267_v46 }
 0xa14   : > { %12041 = vmatprep.subr.bf16.mxu1 %v12000_v52 }
 0xa17   : > { %12043 = vmatpush1.bf16.msra.mxu1 %v12002_v40  ;;  %v16875_v40 = vand.u32 4294901760, %v18383_v0 }
 0xa18   : > { %12045 = vmatprep.subr.bf16.mxu1 %v16590_v11 }
 0xa19   : > { %v7693_v50 = vsub.f32 %v18383_v0, %v16875_v40 }
 0xa1a   : > { %6880 = vmatmul.mubr.f32.vlgmr.msra.gmra.mrb[76].mxu1 %v16732_v39  ;;  %v18369_v39 = vpack.c.bf16 %v16588_v25, %v16580_v51  ;;  %v18372_v51 = vld [vmem:[#allocation8_spill] sm:$0xff] }
 0xa1b   : > { %12047 = vmatpush1.bf16.msra.mxu1 %v16586_v2  ;;  %6960 = vmatprep.mubr.f32.mxu1 %v18267_v46  ;;  %v16808_v62 = vand.u32 4294901760, %v18372_v51  ;;  %v7694_v31 = vand.u32 4294901760, %v7693_v50 }
 0xa1c   : > { %12049 = vmatprep.subr.bf16.mxu1 %v16620_v7 }
 0xa1d   : > { %v16815_v25 = vsub.f32 %v18372_v51, %v16808_v62  ;;  %v7695_v59 = vsub.f32 %v7693_v50, %v7694_v31  ;;  %v18395_v51 = vld [vmem:[#allocation71_spill] sm:$0xff] }
 0xa1f   : > { %12051 = vmatpush1.bf16.msra.mxu1 %v16614_v23  ;;  %v7643_v19 = vand.u32 4294901760, %v16815_v25 }
 0xa20   : > { %12053 = vmatprep.subr.bf16.mxu1 %v16624_v20  ;;  %v18371_v20 = vpack.c.bf16 %v16616_v56, %v16603_v9  ;;  %v18375_v56 = vld [vmem:[#allocation50_spill] sm:$0xff] }
 0xa21   : > { %v7644_v9 = vsub.f32 %v16815_v25, %v7643_v19 }
 0xa22   : > { %6966 = vmatmul.mubr.f32.vlgmr.msra.gmra.mrb[76].mxu1 %v6965_v57  ;;  %v18389_v57 = vld [vmem:[#allocation41_spill] sm:$0xff] }
 0xa23   : > { %12055 = vmatpush1.bf16.msra.mxu1 %v16618_v32  ;;  %7076 = vmatprep.mubr.f32.mxu1 %v18267_v46  ;;  %v18370_v32 = vpack.c.bf16 %v16622_v24, %v16608_v41  ;;  %v7645_v41 = vand.u32 4294901760, %v7644_v9  ;;  %v18376_v24 = vld [vmem:[#allocation61_spill] sm:$0xff] }
 0xa24   : > { %12057 = vmatprep.subr.bf16.mxu1 %v16642_v17  ;;  %v18379_v17 = vld [vmem:[#allocation56_spill] sm:$0xff] }
 0xa25   : > { %v16848_v28 = vand.u32 4294901760, %v18379_v17 }
 0xa27   : > { %12059 = vmatpush1.bf16.msra.mxu1 %v16640_v4  ;;  %v16860_v8 = vsub.f32 %v18379_v17, %v16848_v28 }
 0xa28   : > { %12061 = vmatprep.subr.bf16.mxu1 %v18368_v13  ;;  %v18390_v13 = vpack.c.bf16 %v18388_v55, %v18389_v57  ;;  %v18419_v55 = vld [vmem:[#allocation24_spill] sm:$0xff] }
 0xa29   : > { %v7673_v48 = vand.u32 4294901760, %v16860_v8 }
 0xa2a   : > { %7078 = vmatmul.mubr.f32.vlgmr.msra.gmra.mrb[76].mxu1 %v6961_v26 }
 0xa2b   : > { %12063 = vmatpush1.bf16.msra.mxu1 %v18369_v39  ;;  %7164 = vmatprep.mubr.f32.mxu1 %v18267_v46  ;;  %v7674_v3 = vsub.f32 %v16860_v8, %v7673_v48  ;;  %v18391_v39 = vld [vmem:[#allocation66_spill] sm:$0xff] }
 0xa2c   : > { %12065 = vmatprep.subr.bf16.mxu1 %v18370_v32  ;;  %v18392_v32 = vld [vmem:[#allocation72_spill] sm:$0xff] }
 0xa2d   : > { %v7675_v16 = vand.u32 4294901760, %v7674_v3 }
 0xa2f   : > { %12067 = vmatpush1.bf16.msra.mxu1 %v18371_v20  ;;  %v18393_v20 = vpack.c.bf16 %v18391_v39, %v18392_v32  ;;  %v18422_v39 = vld [vmem:[#allocation109_spill] sm:$0xff]  ;;  %v18423_v32 = vld [vmem:[#allocation111_spill] sm:$0xff] }
 0xa30   : > { %12069 = vmatprep.subr.bf16.mxu1 %v16590_v11 }
 0xa32   : > { %7167 = vmatmul.mubr.f32.vlgmr.msra.gmra.mrb[76].mxu1 %v6962_v53  ;;  %v18385_v53 = vld [vmem:[#allocation45_spill] sm:$0xff] }
 0xa33   : > { %12071 = vmatpush1.bf16.msra.mxu1 %v16586_v2  ;;  %7245 = vmatprep.mubr.f32.mxu1 %v18267_v46 }
 0xa34   : > { %12073 = vmatprep.subr.bf16.mxu1 %v16620_v7 }
 0xa37   : > { %12075 = vmatpush1.bf16.msra.mxu1 %v16614_v23 }
 0xa38   : > { %12077 = vmatprep.subr.bf16.mxu1 %v16610_v47 }
 0xa3a   : > { %7249 = vmatmul.mubr.f32.vlgmr.msra.gmra.mrb[76].mxu1 %v6963_v10  ;;  %v18386_v10 = vld [vmem:[#allocation40_spill] sm:$0xff] }
 0xa3b   : > { %12079 = vmatpush1.bf16.msra.mxu1 %v16605_v35  ;;  %7343 = vmatprep.mubr.f32.mxu1 %v18267_v46  ;;  %v18373_v35 = vld [vmem:[#allocation43_spill] sm:$0xff] }
 0xa3c   : > { %12081 = vmatprep.subr.bf16.mxu1 %v16638_v42 }
 0xa3f   : > { %12083 = vmatpush1.bf16.msra.mxu1 %v16635_v6  ;;  %v18377_v6 = vld [vmem:[#allocation12_spill] sm:$0xff] }
 0xa40   : > { %12085 = vmatprep.subr.bf16.mxu1 %v16590_v11  ;;  %v18374_v11 = vld [vmem:[#allocation7_spill] sm:$0xff]  ;;  %v16840_v42 = vand.u32 4294901760, %v18377_v6 }
 0xa41   : > { %v16829_v47 = vand.u32 4294901760, %v18374_v11 }
 0xa42   : > { %7345 = vmatmul.mubr.f32.vlgmr.msra.gmra.mrb[76].mxu1 %v6961_v26  ;;  %v16853_v5 = vsub.f32 %v18377_v6, %v16840_v42  ;;  %v18400_v6 = vld [vmem:[#allocation81_spill] sm:$0xff] }
 0xa43   : > { %12087 = vmatpush1.bf16.msra.mxu1 %v16586_v2  ;;  %7423 = vmatprep.mubr.f32.mxu1 %v18267_v46  ;;  %v16832_v2 = vand.u32 4294901760, %v18375_v56 }
 0xa44   : > { %12089 = vmatprep.subr.bf16.mxu1 %v16620_v7  ;;  %v16837_v7 = vsub.f32 %v18374_v11, %v16829_v47  ;;  %v7664_v52 = vand.u32 4294901760, %v16853_v5  ;;  %v18398_v11 = vld [vmem:[#allocation87_spill] sm:$0xff] }
 0xa45   : > { %v16845_v4 = vsub.f32 %v18375_v56, %v16832_v2  ;;  %v18399_v56 = vld [vmem:[#allocation76_spill] sm:$0xff] }
 0xa46   : > { %v7649_v14 = vand.u32 4294901760, %v16837_v7  ;;  %v7665_v33 = vsub.f32 %v16853_v5, %v7664_v52 }
 0xa47   : > { %12091 = vmatpush1.bf16.msra.mxu1 %v16614_v23  ;;  %v18378_v23 = vld [vmem:[#allocation64_spill] sm:$0xff]  ;;  %v7658_v54 = vand.u32 4294901760, %v16845_v4 }
 0xa48   : > { %12093 = vmatprep.subr.bf16.mxu1 %v18373_v35  ;;  %v7650_v43 = vsub.f32 %v16837_v7, %v7649_v14  ;;  %v7666_v27 = vand.u32 4294901760, %v7665_v33 }
 0xa49   : > { %v7659_v45 = vsub.f32 %v16845_v4, %v7658_v54 }
 0xa4a   : > { %7425 = vmatmul.mubr.f32.vlgmr.msra.gmra.mrb[76].mxu1 %v6961_v26  ;;  %v7651_v18 = vand.u32 4294901760, %v7650_v43  ;;  %v7690_v26 = vand.u32 4294901760, %v7689_v60 }
 0xa4b   : > { %7646 = vmatprep.mubr.f32.mxu1 %v7645_v41  ;;  %v7660_v21 = vand.u32 4294901760, %v7659_v45  ;;  %v18397_v41 = vld [vmem:[#allocation91_spill] sm:$0xff] }
 0xa50   : > { %12095 = vmatpush1.bf16.xpose.msra.mxu1 %v18376_v24 }
 0xa51   : > { %12097 = vmatprep.subr.bf16.mxu1 %v18378_v23 }
 0xa58   : > { %12099 = vmatpush1.bf16.xpose.msra.mxu1 %v18382_v36 }
 0xa59   : > { %12101 = vmatprep.subr.bf16.mxu1 %v18384_v22 }
 0xa5f   : > { %7652 = vmatmul.mubr.f32.vlgmr.msra.gmra.mrb[78].mxu1 %v7651_v18 }
 0xa60   : > { %7661 = vmatprep.mubr.f32.mxu1 %v7660_v21  ;;  %12103 = vmatpush1.bf16.xpose.msra.mxu1 %v16354_v29  ;;  %v18387_v29 = vpack.c.bf16 %v18385_v53, %v18386_v10  ;;  %v18408_v21 = vld [vmem:[#allocation113_spill] sm:$0xff]  ;;  %v18415_v53 = vld [vmem:[#allocation103_spill] sm:$0xff] }
 0xa61   : > { %12105 = vmatprep.subr.bf16.mxu1 %v16370_v61  ;;  %v7696_v61 = vand.u32 4294901760, %v7695_v59  ;;  %v18413_v59 = vld [vmem:[#allocation14_spill] sm:$0xff]  ;;  %v18416_v10 = vld [vmem:[#allocation101_spill] sm:$0xff] }
 0xa63   : > { %7667 = vmatmul.mubr.f32.gmra.mrb[80].mxu1 %v7666_v27  ;;  %v18410_v27 = vld [vmem:[#allocation100_spill] sm:$0xff] }
 0xa64   : > { %7676 = vmatprep.mubr.f32.mxu1 %v7675_v16 }
 0xa67   : > { %7682 = vmatmul.mubr.f32.gmra.mrb[82].mxu1 %v7681_v49  ;;  %v18412_v49 = vld [vmem:[#allocation99_spill] sm:$0xff] }
 0xa68   : > { %7691 = vmatprep.mubr.f32.mxu1 %v7690_v26  ;;  %12107 = vmatpush1.bf16.xpose.msra.mxu1 %v16379_v1  ;;  %v18394_v1 = vld [vmem:[#allocation42_spill] sm:$0xff]  ;;  %v18414_v26 = vpack.c.bf16 %v18412_v49, %v18413_v59 }
 0xa69   : > { %12109 = vmatprep.subr.bf16.mxu1 %v18387_v29  ;;  %v18396_v9 = vpack.c.bf16 %v18394_v1, %v18395_v51  ;;  %v18417_v29 = vpack.c.bf16 %v18415_v53, %v18416_v10  ;;  %v8990_v1 = vpop.permute.xlu1 %8989 }
 0xa6b   : > { %7697 = vmatmul.mubr.f32.gmra.mrb[84].mxu1 %v7696_v61  ;;  %v18418_v61 = vld [vmem:[#allocation105_spill] sm:$0xff] }
 0xa6c   : > { %7807 = vmatprep.mubr.f32.mxu1 %v16808_v62  ;;  %v18420_v57 = vpack.c.bf16 %v18418_v61, %v18419_v55 }
 0xa6f   : > { %7809 = vmatmul.mubr.f32.vlgmr.msra.gmra.mrb[78].mxu1 %v16829_v47 }
 0xa70   : > { %7814 = vmatprep.mubr.f32.mxu1 %v16832_v2  ;;  %12111 = vmatpush1.bf16.xpose.msra.mxu1 %v18390_v13  ;;  %v18421_v13 = vld [vmem:[#allocation108_spill] sm:$0xff] }
 0xa71   : > { %12113 = vmatprep.subr.bf16.mxu1 %v18393_v20  ;;  %v18424_v20 = vld [vmem:[#allocation112_spill] sm:$0xff] }
 0xa73   : > { %7816 = vmatmul.mubr.f32.gmra.mrb[80].mxu1 %v16840_v42 }
 0xa74   : > { %7821 = vmatprep.mubr.f32.mxu1 %v16848_v28 }
 0xa77   : > { %7823 = vmatmul.mubr.f32.gmra.mrb[82].mxu1 %v16856_v12 }
 0xa78   : > { %7828 = vmatprep.mubr.f32.mxu1 %v16863_v63  ;;  %12115 = vmatpush1.bf16.xpose.msra.mxu1 %v18396_v9  ;;  %v8991_v9 = vsel %vm4077_vm2, %v8990_v1, 0 }
 0xa79   : > { %12117 = vmatprep.subr.bf16.mxu1 %v18373_v35 }
 0xa7b   : > { %7830 = vmatmul.mubr.f32.gmra.mrb[84].mxu1 %v16875_v40 }
 0xa7c   : > { %7917 = vmatprep.mubr.f32.mxu1 %v16815_v25  ;;  %v18401_v25 = vld [vmem:[#allocation10_spill] sm:$0xff] }
 0xa7f   : > { %7920 = vmatmul.mubr.f32.vlgmr.msra.gmra.mrb[78].mxu1 %v16837_v7  ;;  %v18405_v7 = vld [vmem:[#allocation106_spill] sm:$0xff] }
 0xa80   : > { %7926 = vmatprep.mubr.f32.mxu1 %v16845_v4  ;;  %12119 = vmatpush1.bf16.xpose.msra.mxu1 %v18376_v24 }
 0xa81   : > { %12121 = vmatprep.subr.bf16.mxu1 %v18378_v23 }
 0xa83   : > { %7929 = vmatmul.mubr.f32.gmra.mrb[80].mxu1 %v16853_v5 }
 0xa84   : > { %7935 = vmatprep.mubr.f32.mxu1 %v16860_v8 }
 0xa87   : > { %7938 = vmatmul.mubr.f32.gmra.mrb[82].mxu1 %v16872_v34 }
 0xa88   : > { %7944 = vmatprep.mubr.f32.mxu1 %v7687_v30  ;;  %12123 = vmatpush1.bf16.xpose.msra.mxu1 %v18382_v36 }
 0xa89   : > { %12125 = vmatprep.subr.bf16.mxu1 %v18397_v41 }
 0xa8b   : > { %7947 = vmatmul.mubr.f32.gmra.mrb[84].mxu1 %v7693_v50  ;;  %v18407_v50 = vld [vmem:[#allocation110_spill] sm:$0xff] }
 0xa8c   : > { %8027 = vmatprep.mubr.f32.mxu1 %v7643_v19  ;;  %v18402_v19 = vld [vmem:[#allocation15_spill] sm:$0xff] }
 0xa8f   : > { %8031 = vmatmul.mubr.f32.vlgmr.msra.gmra.mrb[78].mxu1 %v7649_v14 }
 0xa90   : > { %8038 = vmatprep.mubr.f32.mxu1 %v7658_v54  ;;  %12127 = vmatpush1.bf16.xpose.msra.mxu1 %v18398_v11 }
 0xa91   : > { %12129 = vmatprep.subr.bf16.mxu1 %v18399_v56 }
 0xa93   : > { %8042 = vmatmul.mubr.f32.gmra.mrb[80].mxu1 %v7664_v52  ;;  %v18406_v52 = vld [vmem:[#allocation107_spill] sm:$0xff] }
 0xa94   : > { %8049 = vmatprep.mubr.f32.mxu1 %v7673_v48 }
 0xa97   : > { %8053 = vmatmul.mubr.f32.gmra.mrb[82].mxu1 %v7679_v15 }
 0xa98   : > { %8060 = vmatprep.mubr.f32.mxu1 %v7688_v58  ;;  %12131 = vmatpush1.bf16.xpose.msra.mxu1 %v18400_v6  ;;  %v18409_v58 = vld [vmem:[#allocation104_spill] sm:$0xff] }
 0xa99   : > { %12133 = vmatprep.subr.bf16.mxu1 %v18373_v35  ;;  %v18403_v35 = vld [vmem:[#allocation102_spill] sm:$0xff]  ;;  %v18411_v37 = vpack.c.bf16 %v18409_v58, %v18410_v27 }
 0xa9b   : > { %8064 = vmatmul.mubr.f32.gmra.mrb[84].mxu1 %v7694_v31 }
 0xa9c   : > { %8158 = vmatprep.mubr.f32.mxu1 %v16808_v62 }
 0xa9f   : > { %8160 = vmatmul.mubr.f32.vlgmr.msra.gmra.mrb[78].mxu1 %v16829_v47 }
 0xaa0   : > { %8165 = vmatprep.mubr.f32.mxu1 %v16832_v2  ;;  %12135 = vmatpush1.bf16.xpose.msra.mxu1 %v18376_v24  ;;  %v18404_v24 = vld [vmem:[#allocation29_spill] sm:$0xff] }
 0xaa1   : > { %12137 = vmatprep.subr.bf16.mxu1 %v18378_v23 }
 0xaa3   : > { %8167 = vmatmul.mubr.f32.gmra.mrb[80].mxu1 %v16840_v42 }
 0xaa4   : > { %8172 = vmatprep.mubr.f32.mxu1 %v16848_v28 }
 0xaa7   : > { %8174 = vmatmul.mubr.f32.gmra.mrb[82].mxu1 %v16856_v12 }
 0xaa8   : > { %8179 = vmatprep.mubr.f32.mxu1 %v16863_v63  ;;  %12139 = vmatpush1.bf16.xpose.msra.mxu1 %v18382_v36 }
 0xaa9   : > { %12141 = vmatprep.subr.bf16.mxu1 %v18401_v25 }
 0xaab   : > { %8181 = vmatmul.mubr.f32.gmra.mrb[84].mxu1 %v16875_v40 }
 0xaac   : > { %8259 = vmatprep.mubr.f32.mxu1 %v16808_v62 }
 0xaaf   : > { %8261 = vmatmul.mubr.f32.vlgmr.msra.gmra.mrb[78].mxu1 %v16829_v47 }
 0xab0   : > { %8266 = vmatprep.mubr.f32.mxu1 %v16832_v2  ;;  %12143 = vmatpush1.bf16.msra.mxu1 %v18402_v19 }
 0xab1   : > { %12145 = vmatprep.subr.bf16.mxu1 %v18403_v35 }
 0xab3   : > { %8268 = vmatmul.mubr.f32.gmra.mrb[80].mxu1 %v16840_v42 }
 0xab4   : > { %8273 = vmatprep.mubr.f32.mxu1 %v16848_v28  ;;  %12147 = vmatpush1.bf16.msra.mxu1 %v18404_v24 }
 0xab5   : > { %12149 = vmatprep.subr.bf16.mxu1 %v18405_v7 }
 0xab7   : > { %8275 = vmatmul.mubr.f32.gmra.mrb[82].mxu1 %v16856_v12 }
 0xab8   : > { %8280 = vmatprep.mubr.f32.mxu1 %v16863_v63 }
 0xabb   : > { %8282 = vmatmul.mubr.f32.gmra.mrb[84].mxu1 %v16875_v40 }
 0xabc   : > { %8371 = vmatprep.mubr.f32.mxu1 %v18267_v46 }
 0xb82   : > { %v8262_v62 = vpop.f32.mrb[78].mxu1 }
 0xb83   : > { %v8288_v47 = vsel %vm4077_vm2, %v8262_v62, 0  ;;  %v8264_v2 = vpop.f32.mrb[79].mxu1 }
 0xb84   : > { %v16957_v23 = vand.u32 4294901760, %v8288_v47 }
 0xb86   : > { %v16960_v42 = vsub.f32 %v8288_v47, %v16957_v23  ;;  %v8269_v4 = vpop.f32.mrb[80].mxu1 }
 0xb87   : > { %v8291_v17 = vsel %vm4077_vm2, %v8269_v4, 0  ;;  %v8271_v28 = vpop.f32.mrb[81].mxu1 }
 0xb88   : > { %v8374_v14 = vand.u32 4294901760, %v16960_v42  ;;  %v16964_v5 = vand.u32 4294901760, %v8291_v17 }
 0xb8a   : > { %v8375_v38 = vsub.f32 %v16960_v42, %v8374_v14  ;;  %v8384_v12 = vsub.f32 %v8291_v17, %v16964_v5  ;;  %v8276_v8 = vpop.f32.mrb[82].mxu1 }
 0xb8b   : > { %v8294_v44 = vsel %vm4077_vm2, %v8276_v8, 0  ;;  %v8278_v63 = vpop.f32.mrb[83].mxu1 }
 0xb8c   : > { %v8376_v54 = vand.u32 4294901760, %v8375_v38  ;;  %v8385_v36 = vand.u32 4294901760, %v8384_v12  ;;  %v16969_v43 = vand.u32 4294901760, %v8294_v44 }
 0xb8e   : > { %v8395_v34 = vsub.f32 %v8294_v44, %v16969_v43  ;;  %v8283_v0 = vpop.f32.mrb[84].mxu1  ;;  %8377 = vmatmul.mubr.f32.vlgmr.msra.gmra.mrb[86].mxu1 %v8376_v54  ;;  %v8386_v40 = vsub.f32 %v8384_v12, %v8385_v36 }
 0xb8f   : > { %v8297_v22 = vsel %vm4077_vm2, %v8283_v0, 0  ;;  %12151 = vmatpush1.bf16.msra.mxu1 %v18406_v52  ;;  %v8285_v30 = vpop.f32.mrb[85].mxu1  ;;  %8382 = vmatprep.mubr.f32.mxu1 %v18267_v46 }
 0xb90   : > { %v8396_v45 = vand.u32 4294901760, %v8395_v34  ;;  %v16975_v48 = vand.u32 4294901760, %v8297_v22  ;;  %12153 = vmatprep.subr.bf16.mxu1 %v18407_v50  ;;  %v8387_v18 = vand.u32 4294901760, %v8386_v40 }
 0xb92   : > { %v8406_v33 = vsub.f32 %v8297_v22, %v16975_v48  ;;  %8388 = vmatmul.mubr.f32.gmra.mrb[88].mxu1 %v8387_v18  ;;  %v8397_v15 = vsub.f32 %v8395_v34, %v8396_v45 }
 0xb93   : > { %12155 = vmatpush1.bf16.msra.mxu1 %v18408_v21  ;;  %8393 = vmatprep.mubr.f32.mxu1 %v18267_v46 }
 0xb94   : > { %v8407_v3 = vand.u32 4294901760, %v8406_v33  ;;  %12157 = vmatprep.subr.bf16.mxu1 %v18411_v37  ;;  %v8398_v31 = vand.u32 4294901760, %v8397_v15 }
 0xb96   : > { %8399 = vmatmul.mubr.f32.gmra.mrb[90].mxu1 %v8398_v31  ;;  %v8408_v16 = vsub.f32 %v8406_v33, %v8407_v3 }
 0xb97   : > { %8404 = vmatprep.mubr.f32.mxu1 %v18267_v46 }
 0xb98   : > { %v8409_v60 = vand.u32 4294901760, %v8408_v16 }
 0xb9a   : > { %8410 = vmatmul.mubr.f32.gmra.mrb[92].mxu1 %v8409_v60 }
 0xb9b   : > { %8520 = vmatprep.mubr.f32.mxu1 %v18267_v46 }
 0xb9e   : > { %8522 = vmatmul.mubr.f32.vlgmr.msra.gmra.mrb[86].mxu1 %v16957_v23 }
 0xb9f   : > { %12159 = vmatpush1.bf16.msra.mxu1 %v18414_v26  ;;  %8527 = vmatprep.mubr.f32.mxu1 %v18267_v46 }
 0xba0   : > { %12161 = vmatprep.subr.bf16.mxu1 %v18417_v29 }
 0xba2   : > { %8529 = vmatmul.mubr.f32.gmra.mrb[88].mxu1 %v16964_v5 }
 0xba3   : > { %12163 = vmatpush1.bf16.msra.mxu1 %v18420_v57  ;;  %8534 = vmatprep.mubr.f32.mxu1 %v18267_v46 }
 0xba4   : > { %12165 = vmatprep.subr.bf16.mxu1 %v18401_v25 }
 0xba6   : > { %8536 = vmatmul.mubr.f32.gmra.mrb[90].mxu1 %v16969_v43 }
 0xba7   : > { %8541 = vmatprep.mubr.f32.mxu1 %v18267_v46 }
 0xbaa   : > { %8543 = vmatmul.mubr.f32.gmra.mrb[92].mxu1 %v16975_v48 }
 0xbab   : > { %8629 = vmatprep.mubr.f32.mxu1 %v18267_v46 }
 0xbae   : > { %8632 = vmatmul.mubr.f32.vlgmr.msra.gmra.mrb[86].mxu1 %v16960_v42 }
 0xbaf   : > { %12167 = vmatpush1.bf16.msra.mxu1 %v18402_v19  ;;  %8637 = vmatprep.mubr.f32.mxu1 %v18267_v46 }
 0xbb0   : > { %12169 = vmatprep.subr.bf16.mxu1 %v18403_v35 }
 0xbb2   : > { %8640 = vmatmul.mubr.f32.gmra.mrb[88].mxu1 %v8384_v12 }
 0xbb3   : > { %12171 = vmatpush1.bf16.msra.mxu1 %v18404_v24  ;;  %8645 = vmatprep.mubr.f32.mxu1 %v18267_v46 }
 0xbb4   : > { %12173 = vmatprep.subr.bf16.mxu1 %v18421_v13 }
 0xbb6   : > { %8648 = vmatmul.mubr.f32.gmra.mrb[90].mxu1 %v8395_v34 }
 0xbb7   : > { %8653 = vmatprep.mubr.f32.mxu1 %v18267_v46 }
 0xbba   : > { %8656 = vmatmul.mubr.f32.gmra.mrb[92].mxu1 %v8406_v33 }
 0xbbb   : > { %8734 = vmatprep.mubr.f32.mxu1 %v18267_v46 }
 0xbbe   : > { %8738 = vmatmul.mubr.f32.vlgmr.msra.gmra.mrb[86].mxu1 %v8374_v14 }
 0xbbf   : > { %12175 = vmatpush1.bf16.msra.mxu1 %v18422_v39  ;;  %8743 = vmatprep.mubr.f32.mxu1 %v18267_v46 }
 0xbc0   : > { %12177 = vmatprep.subr.bf16.mxu1 %v18423_v32 }
 0xbc2   : > { %8747 = vmatmul.mubr.f32.gmra.mrb[88].mxu1 %v8385_v36 }
 0xbc3   : > { %12179 = vmatpush1.bf16.msra.mxu1 %v18424_v20  ;;  %8752 = vmatprep.mubr.f32.mxu1 %v18267_v46 }
 0xbc4   : > { %12181 = vmatprep.subr.bf16.mxu1 %v18401_v25  ;;  %v17043_v25 = vand.u32 4294901760, %v8991_v9 }
 0xbc6   : > { %8756 = vmatmul.mubr.f32.gmra.mrb[90].mxu1 %v8396_v45  ;;  %v17054_v4 = vsub.f32 %v8991_v9, %v17043_v25 }
 0xbc7   : > { %8761 = vmatprep.mubr.f32.mxu1 %v18267_v46 }
 0xbc8   : > { %v9068_v22 = vand.u32 4294901760, %v17054_v4 }
 0xbca   : > { %8765 = vmatmul.mubr.f32.gmra.mrb[92].mxu1 %v8407_v3  ;;  %v9069_v49 = vsub.f32 %v17054_v4, %v9068_v22 }
 0xbcb   : > { %8859 = vmatprep.mubr.f32.mxu1 %v18267_v46 }
 0xbcc   : > { %v9070_v20 = vand.u32 4294901760, %v9069_v49 }
 0xbce   : > { %8861 = vmatmul.mubr.f32.vlgmr.msra.gmra.mrb[86].mxu1 %v16957_v23 }
 0xbcf   : > { %12183 = vmatpush1.bf16.msra.mxu1 %v18402_v19  ;;  %8866 = vmatprep.mubr.f32.mxu1 %v18267_v46 }
 0xbd0   : > { %12185 = vmatprep.subr.bf16.mxu1 %v18403_v35 }
 0xbd2   : > { %8868 = vmatmul.mubr.f32.gmra.mrb[88].mxu1 %v16964_v5 }
 0xbd3   : > { %12187 = vmatpush1.bf16.msra.mxu1 %v18404_v24  ;;  %8873 = vmatprep.mubr.f32.mxu1 %v18267_v46 }
 0xbd6   : > { %8875 = vmatmul.mubr.f32.gmra.mrb[90].mxu1 %v16969_v43 }
 0xbd7   : > { %8880 = vmatprep.mubr.f32.mxu1 %v18267_v46 }
 0xbda   : > { %8882 = vmatmul.mubr.f32.gmra.mrb[92].mxu1 %v16975_v48 }
 0xbdb   : > { %8960 = vmatprep.mubr.f32.mxu1 %v18267_v46 }
 0xbde   : > { %8962 = vmatmul.mubr.f32.vlgmr.msra.gmra.mrb[86].mxu1 %v16957_v23 }
 0xbdf   : > { %8967 = vmatprep.mubr.f32.mxu1 %v18267_v46 }
 0xbe2   : > { %8969 = vmatmul.mubr.f32.gmra.mrb[88].mxu1 %v16964_v5 }
 0xbe3   : > { %8974 = vmatprep.mubr.f32.mxu1 %v18267_v46 }
 0xbe6   : > { %8976 = vmatmul.mubr.f32.gmra.mrb[90].mxu1 %v16969_v43 }
 0xbe7   : > { %8981 = vmatprep.mubr.f32.mxu1 %v18267_v46 }
 0xbea   : > { %8983 = vmatmul.mubr.f32.gmra.mrb[92].mxu1 %v16975_v48 }
 0xbeb   : > { %9065 = vmatprep.mubr.f32.mxu1 %v18267_v46 }
 0xcb1   : > { %v8963_v51 = vpop.f32.mrb[86].mxu1 }
 0xcb2   : > { %v8995_v41 = vand.u32 4294901760, %v8963_v51  ;;  %v8965_v11 = vpop.f32.mrb[87].mxu1 }
 0xcb3   : > { %v8993_v56 = vand.u32 4294901760, %v8965_v11 }
 0xcb4   : > { %v17041_v6 = vsub.f32 %v8963_v51, %v8995_v41 }
 0xcb5   : > { %v17045_v19 = vsub.f32 %v8965_v11, %v8993_v56  ;;  %v8970_v35 = vpop.f32.mrb[88].mxu1 }
 0xcb6   : > { %v9085_v24 = vand.u32 4294901760, %v17041_v6  ;;  %v8999_v7 = vand.u32 4294901760, %v8970_v35  ;;  %v8972_v62 = vpop.f32.mrb[89].mxu1 }
 0xcb7   : > { %v9079_v47 = vand.u32 4294901760, %v17045_v19  ;;  %v8997_v2 = vand.u32 4294901760, %v8972_v62 }
 0xcb8   : > { %v17049_v23 = vpack.c.bf16 %v8999_v7, %v8995_v41  ;;  %v17051_v42 = vsub.f32 %v8970_v35, %v8999_v7  ;;  %v9086_v5 = vsub.f32 %v17041_v6, %v9085_v24  ;;  %v9657_v35 = vpop.xlane.xlu0 %9656 }
 0xcb9   : > { %v17056_v17 = vpack.c.bf16 %v8997_v2, %v8993_v56  ;;  %v9090_v28 = vsub.f32 %v8972_v62, %v8997_v2  ;;  %v8977_v14 = vpop.f32.mrb[90].mxu1  ;;  %v9080_v63 = vsub.f32 %v17045_v19, %v9079_v47  ;;  %13449 = vrcp.f32 %v9657_v35 }
 0xcba   : > { %v9097_v38 = vand.u32 4294901760, %v17051_v42  ;;  %v12206_v12 = vpack.c.bf16 %v17051_v42, %v17041_v6  ;;  %v9003_v8 = vand.u32 4294901760, %v8977_v14  ;;  %v8979_v44 = vpop.f32.mrb[91].mxu1  ;;  %v9087_v50 = vand.u32 4294901760, %v9086_v5  ;;  %v18426_v5 = vld [vmem:[#allocation75_spill] sm:$0xff] }
 0xcbb   : > { %v9091_v54 = vand.u32 4294901760, %v9090_v28  ;;  %v9001_v36 = vand.u32 4294901760, %v8979_v44  ;;  %12189 = vmatprep.subr.bf16.mxu1 %v17056_v17  ;;  %v12204_v43 = vpack.c.bf16 %v9090_v28, %v17045_v19  ;;  %v9081_v27 = vand.u32 4294901760, %v9080_v63 }
 0xcbc   : > { %v9098_v34 = vsub.f32 %v17051_v42, %v9097_v38  ;;  %v9108_v0 = vsub.f32 %v8977_v14, %v9003_v8  ;;  %12191 = vmatpush1.bf16.msra.mxu1 %v17049_v23  ;;  %v17067_v40 = vpack.c.bf16 %v9097_v38, %v9085_v24  ;;  %v9654_v24 = vpop.xlane.xlu1 %9653  ;;  %v9660_v7 = vpop.xlane.xlu0 %9659 }
 0xcbd   : > { %v9092_v52 = vsub.f32 %v9090_v28, %v9091_v54  ;;  %v9102_v30 = vsub.f32 %v8979_v44, %v9001_v36  ;;  %v8984_v45 = vpop.f32.mrb[92].mxu1  ;;  %v12220_v48 = vpack.c.bf16 %v9091_v54, %v9079_v47  ;;  %13451 = vrcp.f32 %v9654_v24  ;;  %v18425_v47 = vld [vmem:[#allocation20_spill] sm:$0xff] }
 0xcbe   : > { %v9099_v18 = vand.u32 4294901760, %v9098_v34  ;;  %v9109_v33 = vand.u32 4294901760, %v9108_v0  ;;  %v9007_v15 = vand.u32 4294901760, %v8984_v45  ;;  %v8986_v21 = vpop.f32.mrb[93].mxu1  ;;  %v17089_v2 = vand.u32 4294901760, %v18425_v47  ;;  %v18428_v34 = vld [vmem:[#allocation80_spill] sm:$0xff] }
 0xcbf   : > { %v9103_v3 = vand.u32 4294901760, %v9102_v30  ;;  %v9005_v58 = vand.u32 4294901760, %v8986_v21  ;;  %v9093_v37 = vand.u32 4294901760, %v9092_v52  ;;  %v18430_v52 = vld [vmem:[#allocation68_spill] sm:$0xff] }
 0xcc0   : > { %v17070_v31 = vpack.c.bf16 %v9007_v15, %v9003_v8  ;;  %v9120_v16 = vsub.f32 %v8984_v45, %v9007_v15  ;;  %v12198_v60 = vpack.c.bf16 %v9099_v18, %v9087_v50  ;;  %v9110_v10 = vsub.f32 %v9108_v0, %v9109_v33  ;;  %v9663_v62 = vpop.xlane.xlu0 %9662  ;;  %v18431_v50 = vld [vmem:[#allocation65_spill] sm:$0xff]  ;;  %v18432_v15 = vld [vmem:[#allocation19_spill] sm:$0xff] }
 0xcc1   : > { %v17075_v59 = vpack.c.bf16 %v9005_v58, %v9001_v36  ;;  %v9114_v26 = vsub.f32 %v8986_v21, %v9005_v58  ;;  %v12196_v53 = vpack.c.bf16 %v9093_v37, %v9081_v27  ;;  %v9104_v55 = vsub.f32 %v9102_v30, %v9103_v3 }
 0xcc2   : > { %v9121_v29 = vand.u32 4294901760, %v9120_v16  ;;  %v12210_v61 = vpack.c.bf16 %v9120_v16, %v9108_v0  ;;  %v9111_v9 = vand.u32 4294901760, %v9110_v10  ;;  %13453 = vrcp.f32 %v9663_v62 }
 0xcc3   : > { %v9115_v57 = vand.u32 4294901760, %v9114_v26  ;;  %12193 = vmatprep.subr.bf16.mxu1 %v17075_v59  ;;  %v12208_v13 = vpack.c.bf16 %v9114_v26, %v9102_v30  ;;  %v9105_v11 = vand.u32 4294901760, %v9104_v55  ;;  %v13450_v42 = vpop.eup %13449  ;;  %13455 = vrcp.f32 %v9660_v7  ;;  %v18435_v55 = vld [vmem:[#allocation21_spill] sm:$0xff] }
 0xcc4   : > { %v9122_v39 = vsub.f32 %v9120_v16, %v9121_v29  ;;  %12195 = vmatpush1.bf16.msra.mxu1 %v17070_v31  ;;  %v12226_v32 = vpack.c.bf16 %v9121_v29, %v9109_v33  ;;  %v17097_v14 = vsub.f32 %v18425_v47, %v17089_v2  ;;  %v9669_v38 = vmul.f32 %v13450_v42, %v18426_v5  ;;  %v18433_v16 = vld [vmem:[#allocation22_spill] sm:$0xff]  ;;  %v18438_v7 = vld [vmem:[#allocation37_spill] sm:$0xff] }
 0xcc5   : > { %v9116_v1 = vsub.f32 %v9114_v26, %v9115_v57  ;;  %12197 = vmatprep.subr.bf16.mxu1 %v12196_v53  ;;  %v12224_v51 = vpack.c.bf16 %v9115_v57, %v9103_v3  ;;  %v9668_v0 = vmul.f32 %v13450_v42, %v18428_v34  ;;  %v17124_v21 = vand.u32 4294901760, %v18432_v15  ;;  %v18439_v5 = vld [vmem:[#allocation25_spill] sm:$0xff] }
 0xcc6   : > { %v9123_v41 = vand.u32 4294901760, %v9122_v39  ;;  %v9750_v8 = vand.u32 4294901760, %v17097_v14  ;;  %v9680_v44 = vand.u32 4294901760, %v9669_v38  ;;  %v17148_v57 = vand.u32 4294901760, %v18435_v55  ;;  %v18436_v39 = vld [vmem:[#allocation59_spill] sm:$0xff] }
 0xcc7   : > { %9071 = vmatmul.mubr.f32.vlgmr.msra.gmra.mrb[76].mxu1 %v9070_v20  ;;  %v9117_v56 = vand.u32 4294901760, %v9116_v1  ;;  %v13452_v28 = vpop.eup %13451  ;;  %v9682_v33 = vand.u32 4294901760, %v9668_v0  ;;  %v17138_v53 = vsub.f32 %v18432_v15, %v17124_v21  ;;  %v18437_v20 = vld [vmem:[#allocation38_spill] sm:$0xff]  ;;  %v17175_v62 = vand.u32 4294901760, %v18438_v7 }
 0xcc8   : > { %12199 = vmatpush1.bf16.msra.mxu1 %v12198_v60  ;;  %v12202_v6 = vpack.c.bf16 %v9123_v41, %v9111_v9  ;;  %9181 = vmatprep.mubr.f32.mxu1 %v18267_v46  ;;  %v9751_v36 = vsub.f32 %v17097_v14, %v9750_v8  ;;  %v9665_v30 = vmul.f32 %v13452_v28, %v18430_v52  ;;  %v17129_v60 = vand.u32 4294901760, %v18433_v16 }
 0xcc9   : > { %v12200_v19 = vpack.c.bf16 %v9117_v56, %v9105_v11  ;;  %v17155_v1 = vand.u32 4294901760, %v18437_v20  ;;  %v17172_v24 = vsub.f32 %v18435_v55, %v17148_v57 }
 0xcca   : > { %v9678_v27 = vand.u32 4294901760, %v9665_v30  ;;  %v17165_v41 = vsub.f32 %v18433_v16, %v17129_v60 }
 0xccb   : > { %12201 = vmatprep.subr.bf16.mxu1 %v12200_v19 }
 0xccc   : > { %12203 = vmatpush1.bf16.msra.mxu1 %v12202_v6  ;;  %v13454_v63 = vpop.eup %13453  ;;  %v17131_v49 = vpack.c.bf16 %v9682_v33, %v9678_v27  ;;  %v9756_v6 = vand.u32 4294901760, %v17138_v53 }
 0xccd   : > { %12205 = vmatprep.subr.bf16.mxu1 %v12204_v43 }
 0xccf   : > { %9183 = vmatmul.mubr.f32.vlgmr.msra.gmra.mrb[76].mxu1 %v17043_v25 }
 0xcd0   : > { %12207 = vmatpush1.bf16.msra.mxu1 %v12206_v12  ;;  %9269 = vmatprep.mubr.f32.mxu1 %v18267_v46  ;;  %v18427_v12 = vld [vmem:[#allocation83_spill] sm:$0xff] }
 0xcd1   : > { %12209 = vmatprep.subr.bf16.mxu1 %v12208_v13  ;;  %v17151_v13 = vsub.f32 %v9665_v30, %v9678_v27 }
 0xcd3   : > { %v9817_v42 = vand.u32 4294901760, %v17151_v13 }
 0xcd4   : > { %12211 = vmatpush1.bf16.msra.mxu1 %v12210_v61 }
 0xcd5   : > { %12213 = vmatprep.subr.bf16.mxu1 %v17056_v17  ;;  %v9818_v30 = vsub.f32 %v17151_v13, %v9817_v42 }
 0xcd7   : > { %9272 = vmatmul.mubr.f32.vlgmr.msra.gmra.mrb[76].mxu1 %v17054_v4  ;;  %v9666_v4 = vmul.f32 %v13452_v28, %v18427_v12  ;;  %v17180_v28 = vsub.f32 %v18437_v20, %v17155_v1 }
 0xcd8   : > { %12215 = vmatpush1.bf16.msra.mxu1 %v17049_v23  ;;  %9350 = vmatprep.mubr.f32.mxu1 %v18267_v46 }
 0xcd9   : > { %12217 = vmatprep.subr.bf16.mxu1 %v17075_v59  ;;  %v9676_v54 = vand.u32 4294901760, %v9666_v4  ;;  %v9780_v27 = vand.u32 4294901760, %v17180_v28 }
 0xcdb   : > { %v17110_v43 = vpack.c.bf16 %v9680_v44, %v9676_v54  ;;  %v17119_v45 = vsub.f32 %v9666_v4, %v9676_v54  ;;  %v9765_v54 = vand.u32 4294901760, %v17165_v41 }
 0xcdc   : > { %12219 = vmatpush1.bf16.msra.mxu1 %v17070_v31 }
 0xcdd   : > { %12221 = vmatprep.subr.bf16.mxu1 %v12220_v48  ;;  %v9752_v48 = vand.u32 4294901760, %v9751_v36  ;;  %v9766_v15 = vsub.f32 %v17165_v41, %v9765_v54 }
 0xcdf   : > { %9354 = vmatmul.mubr.f32.vlgmr.msra.gmra.mrb[76].mxu1 %v9068_v22 }
 0xce0   : > { %12223 = vmatpush1.bf16.msra.mxu1 %v17067_v40  ;;  %9448 = vmatprep.mubr.f32.mxu1 %v18267_v46  ;;  %v17114_v40 = vsub.f32 %v9669_v38, %v9680_v44  ;;  %v17183_v38 = vand.u32 4294901760, %v18439_v5 }
 0xce1   : > { %12225 = vmatprep.subr.bf16.mxu1 %v12224_v51 }
 0xce2   : > { %v9823_v58 = vand.u32 4294901760, %v17114_v40 }
 0xce4   : > { %12227 = vmatpush1.bf16.msra.mxu1 %v12226_v32  ;;  %v9824_v61 = vsub.f32 %v17114_v40, %v9823_v58 }
 0xce5   : > { %12229 = vmatprep.subr.bf16.mxu1 %v17056_v17  ;;  %v13456_v17 = vpop.eup %13455 }
 0xce6   : > { %v9672_v18 = vmul.f32 %v13456_v17, %v18431_v50  ;;  %v9671_v32 = vmul.f32 %v13456_v17, %v18436_v39  ;;  %v9825_v19 = vand.u32 4294901760, %v9824_v61  ;;  %v17215_v50 = vsub.f32 %v18439_v5, %v17183_v38 }
 0xce7   : > { %9450 = vmatmul.mubr.f32.vlgmr.msra.gmra.mrb[76].mxu1 %v17043_v25  ;;  %v9819_v61 = vand.u32 4294901760, %v9818_v30 }
 0xce8   : > { %12231 = vmatpush1.bf16.msra.mxu1 %v17049_v23  ;;  %9528 = vmatprep.mubr.f32.mxu1 %v18267_v46  ;;  %v18429_v23 = vld [vmem:[#allocation44_spill] sm:$0xff]  ;;  %v9684_v37 = vand.u32 4294901760, %v9672_v18  ;;  %v9686_v47 = vand.u32 4294901760, %v9671_v32 }
 0xce9   : > { %12233 = vmatprep.subr.bf16.mxu1 %v17075_v59  ;;  %v9675_v22 = vmul.f32 %v13454_v63, %v18429_v23  ;;  %v17133_v59 = vsub.f32 %v9668_v0, %v9682_v33  ;;  %v9757_v0 = vsub.f32 %v17138_v53, %v9756_v6  ;;  %v18440_v23 = vld [vmem:[#allocation23_spill] sm:$0xff]  ;;  %v9771_v33 = vand.u32 4294901760, %v17172_v24 }
 0xcea   : > { %v17158_v51 = vsub.f32 %v9672_v18, %v9684_v37  ;;  %v17204_v52 = vsub.f32 %v9671_v32, %v9686_v47 }
 0xceb   : > { %v9688_v3 = vand.u32 4294901760, %v9675_v22  ;;  %v9829_v56 = vand.u32 4294901760, %v17133_v59  ;;  %v9772_v32 = vsub.f32 %v17172_v24, %v9771_v33 }
 0xcec   : > { %12235 = vmatpush1.bf16.msra.mxu1 %v17070_v31  ;;  %v9811_v31 = vand.u32 4294901760, %v17119_v45  ;;  %v9835_v4 = vand.u32 4294901760, %v17158_v51  ;;  %v9841_v55 = vand.u32 4294901760, %v17204_v52 }
 0xced   : > { %12237 = vmatprep.subr.bf16.mxu1 %v17110_v43  ;;  %v17140_v10 = vpack.c.bf16 %v9688_v3, %v9684_v37  ;;  %v17142_v29 = vsub.f32 %v9675_v22, %v9688_v3  ;;  %v9830_v36 = vsub.f32 %v17133_v59, %v9829_v56  ;;  %v17201_v22 = vand.u32 4294901760, %v18440_v23 }
 0xcee   : > { %v9812_v9 = vsub.f32 %v17119_v45, %v9811_v31  ;;  %v9836_v18 = vsub.f32 %v17158_v51, %v9835_v4 }
 0xcef   : > { %9530 = vmatmul.mubr.f32.vlgmr.msra.gmra.mrb[76].mxu1 %v17043_v25  ;;  %v18434_v25 = vld [vmem:[#allocation58_spill] sm:$0xff]  ;;  %v9847_v35 = vand.u32 4294901760, %v17142_v29  ;;  %v9831_v3 = vand.u32 4294901760, %v9830_v36  ;;  %v9773_v36 = vand.u32 4294901760, %v9772_v32  ;;  %v12254_v32 = vpack.c.bf16 %v17133_v59, %v17151_v13 }
 0xcf0   : > { %9753 = vmatprep.mubr.f32.mxu1 %v9752_v48  ;;  %v9674_v26 = vmul.f32 %v13454_v63, %v18434_v25  ;;  %v9813_v12 = vand.u32 4294901760, %v9812_v9  ;;  %v17211_v48 = vsub.f32 %v18438_v7, %v17175_v62  ;;  %v17228_v25 = vsub.f32 %v18440_v23, %v17201_v22 }
 0xcf1   : > { %v9848_v34 = vsub.f32 %v17142_v29, %v9847_v35  ;;  %v9837_v39 = vand.u32 4294901760, %v9836_v18  ;;  %v9795_v9 = vand.u32 4294901760, %v17215_v50  ;;  %v9781_v7 = vsub.f32 %v17180_v28, %v9780_v27 }
 0xcf2   : > { %v9690_v11 = vand.u32 4294901760, %v9674_v26  ;;  %v12244_v17 = vpack.c.bf16 %v9825_v19, %v9813_v12  ;;  %v9786_v20 = vand.u32 4294901760, %v17211_v48  ;;  %v12246_v19 = vpack.c.bf16 %v9831_v3, %v9819_v61 }
 0xcf3   : > { %v9849_v16 = vand.u32 4294901760, %v9848_v34  ;;  %v9842_v12 = vsub.f32 %v17204_v52, %v9841_v55  ;;  %v9801_v34 = vand.u32 4294901760, %v17228_v25  ;;  %v9796_v23 = vsub.f32 %v17215_v50, %v9795_v9 }
 0xcf4   : > { %v17186_v44 = vpack.c.bf16 %v9690_v11, %v9686_v47  ;;  %v17188_v63 = vsub.f32 %v9674_v26, %v9690_v11  ;;  %v9758_v26 = vand.u32 4294901760, %v9757_v0  ;;  %v9767_v11 = vand.u32 4294901760, %v9766_v15 }
 0xcf5   : > { %12239 = vmatpush1.bf16.xpose.msra.mxu1 %v17131_v49  ;;  %v12248_v5 = vpack.c.bf16 %v9849_v16, %v9837_v39  ;;  %v9782_v0 = vand.u32 4294901760, %v9781_v7  ;;  %v9843_v18 = vand.u32 4294901760, %v9842_v12  ;;  %v9802_v3 = vsub.f32 %v17228_v25, %v9801_v34 }
 0xcf6   : > { %12241 = vmatprep.subr.bf16.mxu1 %v17140_v10  ;;  %v9853_v37 = vand.u32 4294901760, %v17188_v63  ;;  %v9797_v16 = vand.u32 4294901760, %v9796_v23  ;;  %v12252_v61 = vpack.c.bf16 %v17114_v40, %v17119_v45  ;;  %v12268_v7 = vpack.c.bf16 %v9823_v58, %v9811_v31  ;;  %v18443_v45 = vld [vmem:[#allocation120_spill] sm:$0xff]  ;;  %v18445_v31 = vld [vmem:[#allocation26_spill] sm:$0xff] }
 0xcf7   : > { %v9803_v39 = vand.u32 4294901760, %v9802_v3  ;;  %v12272_v40 = vpack.c.bf16 %v9847_v35, %v9835_v4  ;;  %v18444_v58 = vld [vmem:[#allocation124_spill] sm:$0xff]  ;;  %v18455_v23 = vld [vmem:[#allocation122_spill] sm:$0xff]  ;;  %v18459_v3 = vld [vmem:[#allocation123_spill] sm:$0xff] }
 0xcf8   : > { %v9854_v47 = vsub.f32 %v17188_v63, %v9853_v37 }
 0xcfa   : > { %v9855_v30 = vand.u32 4294901760, %v9854_v47  ;;  %v12270_v47 = vpack.c.bf16 %v9829_v56, %v9817_v42 }
 0xcfd   : > { %12243 = vmatpush1.bf16.xpose.msra.mxu1 %v17186_v44 }
 0xcfe   : > { %12245 = vmatprep.subr.bf16.mxu1 %v12244_v17  ;;  %v9787_v17 = vsub.f32 %v17211_v48, %v9786_v20 }
 0xd00   : > { %v9788_v15 = vand.u32 4294901760, %v9787_v17  ;;  %v18452_v17 = vld [vmem:[#allocation119_spill] sm:$0xff] }
 0xd04   : > { %9759 = vmatmul.mubr.f32.vlgmr.msra.gmra.mrb[94].mxu1 %v9758_v26  ;;  %v12250_v26 = vpack.c.bf16 %v9855_v30, %v9843_v18  ;;  %v18456_v30 = vld [vmem:[#allocation121_spill] sm:$0xff] }
 0xd05   : > { %9768 = vmatprep.mubr.f32.mxu1 %v9767_v11  ;;  %12247 = vmatpush1.bf16.xpose.msra.mxu1 %v12246_v19  ;;  %v12256_v11 = vpack.c.bf16 %v17142_v29, %v17158_v51  ;;  %v12258_v19 = vpack.c.bf16 %v17188_v63, %v17204_v52  ;;  %v18446_v63 = vld [vmem:[#allocation27_spill] sm:$0xff]  ;;  %v18457_v18 = vpack.c.bf16 %v18455_v23, %v18456_v30 }
 0xd06   : > { %12249 = vmatprep.subr.bf16.mxu1 %v12248_v5 }
 0xd08   : > { %9774 = vmatmul.mubr.f32.gmra.mrb[96].mxu1 %v9773_v36 }
 0xd09   : > { %9783 = vmatprep.mubr.f32.mxu1 %v9782_v0 }
 0xd0c   : > { %9789 = vmatmul.mubr.f32.gmra.mrb[98].mxu1 %v9788_v15  ;;  %v18458_v15 = vld [vmem:[#allocation125_spill] sm:$0xff] }
 0xd0d   : > { %9798 = vmatprep.mubr.f32.mxu1 %v9797_v16  ;;  %12251 = vmatpush1.bf16.xpose.msra.mxu1 %v12250_v26  ;;  %v18460_v16 = vpack.c.bf16 %v18458_v15, %v18459_v3  ;;  %v18461_v26 = vld [vmem:[#allocation34_spill] sm:$0xff] }
 0xd0e   : > { %12253 = vmatprep.subr.bf16.mxu1 %v12252_v61  ;;  %v18462_v61 = vld [vmem:[#allocation31_spill] sm:$0xff] }
 0xd10   : > { %9804 = vmatmul.mubr.f32.gmra.mrb[100].mxu1 %v9803_v39  ;;  %v18463_v39 = vld [vmem:[#allocation36_spill] sm:$0xff] }
 0xd11   : > { %9914 = vmatprep.mubr.f32.mxu1 %v17089_v2 }
 0xd14   : > { %9916 = vmatmul.mubr.f32.vlgmr.msra.gmra.mrb[94].mxu1 %v17124_v21 }
 0xd15   : > { %9921 = vmatprep.mubr.f32.mxu1 %v17129_v60  ;;  %12255 = vmatpush1.bf16.xpose.msra.mxu1 %v12254_v32  ;;  %v18464_v32 = vld [vmem:[#allocation48_spill] sm:$0xff] }
 0xd16   : > { %12257 = vmatprep.subr.bf16.mxu1 %v12256_v11  ;;  %v3220_v11 = vld [vmem:[%s17534_s3] sm:$0xf] }
 0xd18   : > { %9923 = vmatmul.mubr.f32.gmra.mrb[96].mxu1 %v17148_v57 }
 0xd19   : > { %9928 = vmatprep.mubr.f32.mxu1 %v17155_v1 }
 0xd1c   : > { %9930 = vmatmul.mubr.f32.gmra.mrb[98].mxu1 %v17175_v62 }
 0xd1d   : > { %9935 = vmatprep.mubr.f32.mxu1 %v17183_v38  ;;  %12259 = vmatpush1.bf16.xpose.msra.mxu1 %v12258_v19  ;;  %v13529_v19 = vmov 0  }
 0xd1e   : > { %12261 = vmatprep.subr.bf16.mxu1 %v17110_v43  ;;  %13278 = vset.pattern.permute.xlu1 %v13529_v19 }
 0xd1f   : > { %13279 = vset.pattern.permute.xlu0 %v13529_v19  ;;  %11647 = vperm.xlu1 %13278, %v3220_v11  }
 0xd20   : > { %9937 = vmatmul.mubr.f32.gmra.mrb[100].mxu1 %v17201_v22 }
 0xd21   : > { %10024 = vmatprep.mubr.f32.mxu1 %v17097_v14  ;;  %v12274_v14 = vpack.c.bf16 %v9853_v37, %v9841_v55  ;;  %v18448_v37 = vld [vmem:[#allocation32_spill] sm:$0xff] }
 0xd22   : > { %v18449_v55 = vld [vmem:[#allocation116_spill] sm:$0xff] }
 0xd24   : > { %10027 = vmatmul.mubr.f32.vlgmr.msra.gmra.mrb[94].mxu1 %v17138_v53 }
 0xd25   : > { %10033 = vmatprep.mubr.f32.mxu1 %v17165_v41  ;;  %12263 = vmatpush1.bf16.xpose.msra.mxu1 %v17131_v49 }
 0xd26   : > { %12265 = vmatprep.subr.bf16.mxu1 %v17140_v10 }
 0xd28   : > { %10036 = vmatmul.mubr.f32.gmra.mrb[96].mxu1 %v17172_v24 }
 0xd29   : > { %10042 = vmatprep.mubr.f32.mxu1 %v17180_v28 }
 0xd2c   : > { %10045 = vmatmul.mubr.f32.gmra.mrb[98].mxu1 %v17211_v48  ;;  %v18447_v48 = vld [vmem:[#allocation33_spill] sm:$0xff] }
 0xd2d   : > { %10051 = vmatprep.mubr.f32.mxu1 %v17215_v50  ;;  %12267 = vmatpush1.bf16.xpose.msra.mxu1 %v17186_v44 }
 0xd2e   : > { %12269 = vmatprep.subr.bf16.mxu1 %v12268_v7 }
 0xd30   : > { %10054 = vmatmul.mubr.f32.gmra.mrb[100].mxu1 %v17228_v25 }
 0xd31   : > { %10134 = vmatprep.mubr.f32.mxu1 %v9750_v8  ;;  %v18441_v8 = vld [vmem:[#allocation115_spill] sm:$0xff] }
 0xd34   : > { %10138 = vmatmul.mubr.f32.vlgmr.msra.gmra.mrb[94].mxu1 %v9756_v6 }
 0xd35   : > { %10145 = vmatprep.mubr.f32.mxu1 %v9765_v54  ;;  %12271 = vmatpush1.bf16.xpose.msra.mxu1 %v12270_v47 }
 0xd36   : > { %12273 = vmatprep.subr.bf16.mxu1 %v12272_v40 }
 0xd38   : > { %10149 = vmatmul.mubr.f32.gmra.mrb[96].mxu1 %v9771_v33 }
 0xd39   : > { %10156 = vmatprep.mubr.f32.mxu1 %v9780_v27 }
 0xd3c   : > { %10160 = vmatmul.mubr.f32.gmra.mrb[98].mxu1 %v9786_v20  ;;  %v18450_v20 = vld [vmem:[#allocation114_spill] sm:$0xff] }
 0xd3d   : > { %10167 = vmatprep.mubr.f32.mxu1 %v9795_v9  ;;  %12275 = vmatpush1.bf16.xpose.msra.mxu1 %v12274_v14  ;;  %v18451_v9 = vpack.c.bf16 %v18449_v55, %v18450_v20 }
 0xd3e   : > { %12277 = vmatprep.subr.bf16.mxu1 %v17110_v43  ;;  %v18442_v43 = vld [vmem:[#allocation117_spill] sm:$0xff] }
 0xd40   : > { %10171 = vmatmul.mubr.f32.gmra.mrb[100].mxu1 %v9801_v34  ;;  %v18453_v34 = vld [vmem:[#allocation118_spill] sm:$0xff] }
 0xd41   : > { %10265 = vmatprep.mubr.f32.mxu1 %v17089_v2  ;;  %v18454_v0 = vpack.c.bf16 %v18452_v17, %v18453_v34 }
 0xd44   : > { %10267 = vmatmul.mubr.f32.vlgmr.msra.gmra.mrb[94].mxu1 %v17124_v21 }
 0xd45   : > { %10272 = vmatprep.mubr.f32.mxu1 %v17129_v60  ;;  %12279 = vmatpush1.bf16.xpose.msra.mxu1 %v17131_v49 }
 0xd46   : > { %12281 = vmatprep.subr.bf16.mxu1 %v17140_v10 }
 0xd48   : > { %10274 = vmatmul.mubr.f32.gmra.mrb[96].mxu1 %v17148_v57 }
 0xd49   : > { %10279 = vmatprep.mubr.f32.mxu1 %v17155_v1 }
 0xd4c   : > { %10281 = vmatmul.mubr.f32.gmra.mrb[98].mxu1 %v17175_v62 }
 0xd4d   : > { %10286 = vmatprep.mubr.f32.mxu1 %v17183_v38  ;;  %12283 = vmatpush1.bf16.xpose.msra.mxu1 %v17186_v44 }
 0xd4e   : > { %12285 = vmatprep.subr.bf16.mxu1 %v18441_v8 }
 0xd50   : > { %10288 = vmatmul.mubr.f32.gmra.mrb[100].mxu1 %v17201_v22 }
 0xd51   : > { %10366 = vmatprep.mubr.f32.mxu1 %v17089_v2  ;;  %v13460_v2 = vld [vmem:[%s17533_s2] sm:$0xf] }
 0xd52   : > { %11096 = vrot.lane.b32.xlu0 %v13460_v2, %s13528_s13  ;;  %s11803_s13 = sshll.u32 %s13587_s25, 7  ;;  %s13530_s25 = smov [#allocation2]  }
 0xd53   : > { %s13465_s26 = sshll.u32 %s13530_s25, 4  ;;  %s13466_s26 = int_to_ptr.vmem [resolvable:$false] %s13465_s26 }
 0xd54   : > { %10368 = vmatmul.mubr.f32.vlgmr.msra.gmra.mrb[94].mxu1 %v17124_v21  ;;  %s13467_s28 = scalar_lea.vmem %s13466_s26, 256  ;;  %p13468_p0 = scmp.lt.s32.totalorder %s17491_s15, %s13466_s26 }
 0xd55   : > { %10373 = vmatprep.mubr.f32.mxu1 %v17129_v60  ;;  %12287 = vmatpush1.bf16.msra.mxu1 %v18442_v43 }
 0xd56   : > { %12289 = vmatprep.subr.bf16.mxu1 %v18443_v45 }
 0xd58   : > { %10375 = vmatmul.mubr.f32.gmra.mrb[96].mxu1 %v17148_v57 }
 0xd59   : > { %10380 = vmatprep.mubr.f32.mxu1 %v17155_v1  ;;  %12291 = vmatpush1.bf16.msra.mxu1 %v18444_v58 }
 0xd5a   : > { %12293 = vmatprep.subr.bf16.mxu1 %v18445_v31 }
 0xd5c   : > { %10382 = vmatmul.mubr.f32.gmra.mrb[98].mxu1 %v17175_v62 }
 0xd5d   : > { %10387 = vmatprep.mubr.f32.mxu1 %v17183_v38 }
 0xd60   : > { %10389 = vmatmul.mubr.f32.gmra.mrb[100].mxu1 %v17201_v22 }
 0xd61   : > { %10478 = vmatprep.mubr.f32.mxu1 %v18267_v46 }
 0xdc4   : > { %v11097_v7 = vpop.permute.xlu0 %11096 }
 0xe27   : > { %v10369_v21 = vpop.f32.mrb[94].mxu1 }
 0xe28   : > { %v10395_v60 = vsel %vm4077_vm2, %v10369_v21, 0  ;;  %v10371_v49 = vpop.f32.mrb[95].mxu1 }
 0xe29   : > { %v17341_v59 = vand.u32 4294901760, %v10395_v60 }
 0xe2b   : > { %v17344_v53 = vsub.f32 %v10395_v60, %v17341_v59  ;;  %v10376_v10 = vpop.f32.mrb[96].mxu1 }
 0xe2c   : > { %v10398_v29 = vsel %vm4077_vm2, %v10376_v10, 0  ;;  %v10378_v57 = vpop.f32.mrb[97].mxu1 }
 0xe2d   : > { %v10481_v13 = vand.u32 4294901760, %v17344_v53  ;;  %v17348_v1 = vand.u32 4294901760, %v10398_v29 }
 0xe2f   : > { %v10482_v51 = vsub.f32 %v17344_v53, %v10481_v13  ;;  %v10491_v41 = vsub.f32 %v10398_v29, %v17348_v1  ;;  %v10383_v56 = vpop.f32.mrb[98].mxu1 }
 0xe30   : > { %v10401_v6 = vsel %vm4077_vm2, %v10383_v56, 0  ;;  %v10385_v35 = vpop.f32.mrb[99].mxu1 }
 0xe31   : > { %v10483_v24 = vand.u32 4294901760, %v10482_v51  ;;  %v10492_v62 = vand.u32 4294901760, %v10491_v41  ;;  %v17353_v42 = vand.u32 4294901760, %v10401_v6 }
 0xe33   : > { %v10502_v28 = vsub.f32 %v10401_v6, %v17353_v42  ;;  %v10390_v38 = vpop.f32.mrb[100].mxu1  ;;  %10484 = vmatmul.mubr.f32.vlgmr.msra.gmra.mrb[102].mxu1 %v10483_v24  ;;  %v10493_v4 = vsub.f32 %v10491_v41, %v10492_v62 }
 0xe34   : > { %v10404_v44 = vsel %vm4077_vm2, %v10390_v38, 0  ;;  %12295 = vmatpush1.bf16.msra.mxu1 %v18446_v63  ;;  %v10392_v54 = vpop.f32.mrb[101].mxu1  ;;  %10489 = vmatprep.mubr.f32.mxu1 %v18267_v46 }
 0xe35   : > { %v10503_v22 = vand.u32 4294901760, %v10502_v28  ;;  %v17359_v52 = vand.u32 4294901760, %v10404_v44  ;;  %12297 = vmatprep.subr.bf16.mxu1 %v18447_v48  ;;  %v10494_v50 = vand.u32 4294901760, %v10493_v4 }
 0xe37   : > { %v10513_v33 = vsub.f32 %v10404_v44, %v17359_v52  ;;  %10495 = vmatmul.mubr.f32.gmra.mrb[104].mxu1 %v10494_v50  ;;  %v10504_v27 = vsub.f32 %v10502_v28, %v10503_v22 }
 0xe38   : > { %12299 = vmatpush1.bf16.msra.mxu1 %v18448_v37  ;;  %10500 = vmatprep.mubr.f32.mxu1 %v18267_v46 }
 0xe39   : > { %v10514_v25 = vand.u32 4294901760, %v10513_v33  ;;  %12301 = vmatprep.subr.bf16.mxu1 %v18451_v9  ;;  %v10505_v5 = vand.u32 4294901760, %v10504_v27 }
 0xe3b   : > { %10506 = vmatmul.mubr.f32.gmra.mrb[106].mxu1 %v10505_v5  ;;  %v10515_v12 = vsub.f32 %v10513_v33, %v10514_v25 }
 0xe3c   : > { %10511 = vmatprep.mubr.f32.mxu1 %v18267_v46 }
 0xe3d   : > { %v10516_v36 = vand.u32 4294901760, %v10515_v12 }
 0xe3f   : > { %10517 = vmatmul.mubr.f32.gmra.mrb[108].mxu1 %v10516_v36 }
 0xe40   : > { %10627 = vmatprep.mubr.f32.mxu1 %v18267_v46 }
 0xe43   : > { %10629 = vmatmul.mubr.f32.vlgmr.msra.gmra.mrb[102].mxu1 %v17341_v59 }
 0xe44   : > { %12303 = vmatpush1.bf16.msra.mxu1 %v18454_v0  ;;  %10634 = vmatprep.mubr.f32.mxu1 %v18267_v46 }
 0xe45   : > { %12305 = vmatprep.subr.bf16.mxu1 %v18457_v18 }
 0xe47   : > { %10636 = vmatmul.mubr.f32.gmra.mrb[104].mxu1 %v17348_v1 }
 0xe48   : > { %12307 = vmatpush1.bf16.msra.mxu1 %v18460_v16  ;;  %10641 = vmatprep.mubr.f32.mxu1 %v18267_v46 }
 0xe49   : > { %12309 = vmatprep.subr.bf16.mxu1 %v18441_v8 }
 0xe4b   : > { %10643 = vmatmul.mubr.f32.gmra.mrb[106].mxu1 %v17353_v42 }
 0xe4c   : > { %10648 = vmatprep.mubr.f32.mxu1 %v18267_v46 }
 0xe4f   : > { %10650 = vmatmul.mubr.f32.gmra.mrb[108].mxu1 %v17359_v52 }
 0xe50   : > { %10736 = vmatprep.mubr.f32.mxu1 %v18267_v46 }
 0xe53   : > { %10739 = vmatmul.mubr.f32.vlgmr.msra.gmra.mrb[102].mxu1 %v17344_v53 }
 0xe54   : > { %12311 = vmatpush1.bf16.msra.mxu1 %v18442_v43  ;;  %10744 = vmatprep.mubr.f32.mxu1 %v18267_v46 }
 0xe55   : > { %12313 = vmatprep.subr.bf16.mxu1 %v18443_v45 }
 0xe57   : > { %10747 = vmatmul.mubr.f32.gmra.mrb[104].mxu1 %v10491_v41 }
 0xe58   : > { %12315 = vmatpush1.bf16.msra.mxu1 %v18444_v58  ;;  %10752 = vmatprep.mubr.f32.mxu1 %v18267_v46 }
 0xe59   : > { %12317 = vmatprep.subr.bf16.mxu1 %v18461_v26 }
 0xe5b   : > { %10755 = vmatmul.mubr.f32.gmra.mrb[106].mxu1 %v10502_v28 }
 0xe5c   : > { %10760 = vmatprep.mubr.f32.mxu1 %v18267_v46 }
 0xe5f   : > { %10763 = vmatmul.mubr.f32.gmra.mrb[108].mxu1 %v10513_v33 }
 0xe60   : > { %10841 = vmatprep.mubr.f32.mxu1 %v18267_v46 }
 0xe63   : > { %10845 = vmatmul.mubr.f32.vlgmr.msra.gmra.mrb[102].mxu1 %v10481_v13 }
 0xe64   : > { %12319 = vmatpush1.bf16.msra.mxu1 %v18462_v61  ;;  %10850 = vmatprep.mubr.f32.mxu1 %v18267_v46 }
 0xe65   : > { %12321 = vmatprep.subr.bf16.mxu1 %v18463_v39 }
 0xe67   : > { %10854 = vmatmul.mubr.f32.gmra.mrb[104].mxu1 %v10492_v62 }
 0xe68   : > { %12323 = vmatpush1.bf16.msra.mxu1 %v18464_v32  ;;  %10859 = vmatprep.mubr.f32.mxu1 %v18267_v46 }
 0xe69   : > { %12325 = vmatprep.subr.bf16.mxu1 %v18441_v8  ;;  %v11098_v8 = vsel %vm4077_vm2, %v11097_v7, 0 }
 0xe6a   : > { %v17432_v2 = vand.u32 4294901760, %v11098_v8 }
 0xe6b   : > { %10863 = vmatmul.mubr.f32.gmra.mrb[106].mxu1 %v10503_v22 }
 0xe6c   : > { %10868 = vmatprep.mubr.f32.mxu1 %v18267_v46  ;;  %v17445_v51 = vsub.f32 %v11098_v8, %v17432_v2 }
 0xe6f   : > { %10872 = vmatmul.mubr.f32.gmra.mrb[108].mxu1 %v10514_v25 }
 0xe70   : > { %10966 = vmatprep.mubr.f32.mxu1 %v18267_v46 }
 0xe73   : > { %10968 = vmatmul.mubr.f32.vlgmr.msra.gmra.mrb[102].mxu1 %v17341_v59 }
 0xe74   : > { %12327 = vmatpush1.bf16.msra.mxu1 %v18442_v43  ;;  %10973 = vmatprep.mubr.f32.mxu1 %v18267_v46 }
 0xe75   : > { %12329 = vmatprep.subr.bf16.mxu1 %v18443_v45 }
 0xe77   : > { %10975 = vmatmul.mubr.f32.gmra.mrb[104].mxu1 %v17348_v1 }
 0xe78   : > { %12331 = vmatpush1.bf16.msra.mxu1 %v18444_v58  ;;  %10980 = vmatprep.mubr.f32.mxu1 %v18267_v46 }
 0xe7b   : > { %10982 = vmatmul.mubr.f32.gmra.mrb[106].mxu1 %v17353_v42 }
 0xe7c   : > { %10987 = vmatprep.mubr.f32.mxu1 %v18267_v46 }
 0xe7f   : > { %10989 = vmatmul.mubr.f32.gmra.mrb[108].mxu1 %v17359_v52 }
 0xe80   : > { %11067 = vmatprep.mubr.f32.mxu1 %v18267_v46 }
 0xe83   : > { %11069 = vmatmul.mubr.f32.vlgmr.msra.gmra.mrb[102].mxu1 %v17341_v59 }
 0xe84   : > { %11074 = vmatprep.mubr.f32.mxu1 %v18267_v46 }
 0xe87   : > { %11076 = vmatmul.mubr.f32.gmra.mrb[104].mxu1 %v17348_v1 }
 0xe88   : > { %11081 = vmatprep.mubr.f32.mxu1 %v18267_v46 }
 0xe8b   : > { %11083 = vmatmul.mubr.f32.gmra.mrb[106].mxu1 %v17353_v42 }
 0xe8c   : > { %11088 = vmatprep.mubr.f32.mxu1 %v18267_v46 }
 0xe8f   : > { %11090 = vmatmul.mubr.f32.gmra.mrb[108].mxu1 %v17359_v52  ;;  %v11175_v52 = vand.u32 4294901760, %v17445_v51 }
 0xe90   : > { %11172 = vmatprep.mubr.f32.mxu1 %v18267_v46 }
 0xe91   : > { %v11176_v0 = vsub.f32 %v17445_v51, %v11175_v52 }
 0xe93   : > { %v11177_v19 = vand.u32 4294901760, %v11176_v0 }
 0xf56   : > { %v11070_v47 = vpop.f32.mrb[102].mxu1 }
 0xf57   : > { %v11102_v40 = vand.u32 4294901760, %v11070_v47  ;;  %v11072_v14 = vpop.f32.mrb[103].mxu1 }
 0xf58   : > { %v11100_v43 = vand.u32 4294901760, %v11072_v14 }
 0xf59   : > { %v17428_v45 = vsub.f32 %v11070_v47, %v11102_v40 }
 0xf5a   : > { %v17430_v58 = vsub.f32 %v11072_v14, %v11100_v43  ;;  %v11077_v31 = vpop.f32.mrb[104].mxu1 }
 0xf5b   : > { %v11192_v21 = vand.u32 4294901760, %v17428_v45  ;;  %v11106_v60 = vand.u32 4294901760, %v11077_v31  ;;  %v11079_v49 = vpop.f32.mrb[105].mxu1 }
 0xf5c   : > { %v11186_v59 = vand.u32 4294901760, %v17430_v58  ;;  %v11104_v53 = vand.u32 4294901760, %v11079_v49 }
 0xf5d   : > { %v17436_v10 = vpack.c.bf16 %v11106_v60, %v11102_v40  ;;  %v17438_v29 = vsub.f32 %v11077_v31, %v11106_v60  ;;  %v11193_v41 = vsub.f32 %v17428_v45, %v11192_v21  ;;  %v11648_v31 = vpop.permute.xlu1 %11647 }
 0xf5e   : > { %v17440_v57 = vpack.c.bf16 %v11104_v53, %v11100_v43  ;;  %v17442_v13 = vsub.f32 %v11079_v49, %v11104_v53  ;;  %v11084_v1 = vpop.f32.mrb[106].mxu1  ;;  %v11187_v62 = vsub.f32 %v17430_v58, %v11186_v59 }
 0xf5f   : > { %v11204_v56 = vand.u32 4294901760, %v17438_v29  ;;  %v12350_v6 = vpack.c.bf16 %v17438_v29, %v17428_v45  ;;  %v11110_v35 = vand.u32 4294901760, %v11084_v1  ;;  %v11086_v24 = vpop.f32.mrb[107].mxu1  ;;  %v11194_v33 = vand.u32 4294901760, %v11193_v41 }
 0xf60   : > { %v11198_v42 = vand.u32 4294901760, %v17442_v13  ;;  %v11108_v28 = vand.u32 4294901760, %v11086_v24  ;;  %12333 = vmatprep.subr.bf16.mxu1 %v17440_v57  ;;  %v12348_v38 = vpack.c.bf16 %v17442_v13, %v17430_v58  ;;  %v11188_v5 = vand.u32 4294901760, %v11187_v62 }
 0xf61   : > { %v11205_v4 = vsub.f32 %v17438_v29, %v11204_v56  ;;  %v11215_v44 = vsub.f32 %v11084_v1, %v11110_v35  ;;  %12335 = vmatpush1.bf16.msra.mxu1 %v17436_v10  ;;  %v12366_v63 = vpack.c.bf16 %v11204_v56, %v11192_v21 }
 0xf62   : > { %v11199_v54 = vsub.f32 %v17442_v13, %v11198_v42  ;;  %v11209_v22 = vsub.f32 %v11086_v24, %v11108_v28  ;;  %v11091_v48 = vpop.f32.mrb[108].mxu1  ;;  %v12364_v50 = vpack.c.bf16 %v11198_v42, %v11186_v59 }
 0xf63   : > { %v11206_v27 = vand.u32 4294901760, %v11205_v4  ;;  %v11216_v37 = vand.u32 4294901760, %v11215_v44  ;;  %v11114_v25 = vand.u32 4294901760, %v11091_v48  ;;  %v11093_v55 = vpop.f32.mrb[109].mxu1 }
 0xf64   : > { %v11210_v20 = vand.u32 4294901760, %v11209_v22  ;;  %v11112_v9 = vand.u32 4294901760, %v11093_v55  ;;  %v11200_v12 = vand.u32 4294901760, %v11199_v54 }
 0xf65   : > { %v12338_v36 = vpack.c.bf16 %v11114_v25, %v11110_v35  ;;  %v11227_v17 = vsub.f32 %v11091_v48, %v11114_v25  ;;  %v12342_v34 = vpack.c.bf16 %v11206_v27, %v11194_v33  ;;  %v11217_v15 = vsub.f32 %v11215_v44, %v11216_v37  ;;  %v11691_v27 = vld [vmem:[%s17535_s4] sm:$0xf] }
 0xf66   : > { %v12336_v23 = vpack.c.bf16 %v11112_v9, %v11108_v28  ;;  %v11221_v30 = vsub.f32 %v11093_v55, %v11112_v9  ;;  %v12340_v18 = vpack.c.bf16 %v11200_v12, %v11188_v5  ;;  %v11211_v26 = vsub.f32 %v11209_v22, %v11210_v20  ;;  %v11692_v55 = vld [vmem:[%s17536_s5] sm:$0xf] }
 0xf67   : > { %v11228_v3 = vand.u32 4294901760, %v11227_v17  ;;  %v12354_v16 = vpack.c.bf16 %v11227_v17, %v11215_v44  ;;  %v11218_v40 = vand.u32 4294901760, %v11217_v15 }
 0xf68   : > { %v11222_v61 = vand.u32 4294901760, %v11221_v30  ;;  %12337 = vmatprep.subr.bf16.mxu1 %v12336_v23  ;;  %v12352_v39 = vpack.c.bf16 %v11221_v30, %v11209_v22  ;;  %v11212_v8 = vand.u32 4294901760, %v11211_v26 }
 0xf69   : > { %v11229_v32 = vsub.f32 %v11227_v17, %v11228_v3  ;;  %12339 = vmatpush1.bf16.msra.mxu1 %v12338_v36  ;;  %v12370_v11 = vpack.c.bf16 %v11228_v3, %v11216_v37 }
 0xf6a   : > { %v11223_v7 = vsub.f32 %v11221_v30, %v11222_v61  ;;  %12341 = vmatprep.subr.bf16.mxu1 %v12340_v18  ;;  %v12368_v47 = vpack.c.bf16 %v11222_v61, %v11210_v20 }
 0xf6b   : > { %v11230_v14 = vand.u32 4294901760, %v11229_v32 }
 0xf6c   : > { %11178 = vmatmul.mubr.f32.vlgmr.msra.gmra.mrb[76].mxu1 %v11177_v19  ;;  %v11224_v43 = vand.u32 4294901760, %v11223_v7 }
 0xf6d   : > { %12343 = vmatpush1.bf16.msra.mxu1 %v12342_v34  ;;  %v12346_v45 = vpack.c.bf16 %v11230_v14, %v11218_v40  ;;  %11288 = vmatprep.mubr.f32.mxu1 %v18267_v46 }
 0xf6e   : > { %v12344_v58 = vpack.c.bf16 %v11224_v43, %v11212_v8 }
 0xf70   : > { %12345 = vmatprep.subr.bf16.mxu1 %v12344_v58 }
 0xf71   : > { %12347 = vmatpush1.bf16.msra.mxu1 %v12346_v45 }
 0xf72   : > { %12349 = vmatprep.subr.bf16.mxu1 %v12348_v38 }
 0xf74   : > { %11290 = vmatmul.mubr.f32.vlgmr.msra.gmra.mrb[76].mxu1 %v17432_v2 }
 0xf75   : > { %12351 = vmatpush1.bf16.msra.mxu1 %v12350_v6  ;;  %11376 = vmatprep.mubr.f32.mxu1 %v18267_v46 }
 0xf76   : > { %12353 = vmatprep.subr.bf16.mxu1 %v12352_v39 }
 0xf79   : > { %12355 = vmatpush1.bf16.msra.mxu1 %v12354_v16 }
 0xf7a   : > { %12357 = vmatprep.subr.bf16.mxu1 %v17440_v57 }
 0xf7c   : > { %11379 = vmatmul.mubr.f32.vlgmr.msra.gmra.mrb[76].mxu1 %v17445_v51 }
 0xf7d   : > { %12359 = vmatpush1.bf16.msra.mxu1 %v17436_v10  ;;  %11457 = vmatprep.mubr.f32.mxu1 %v18267_v46 }
 0xf7e   : > { %12361 = vmatprep.subr.bf16.mxu1 %v12336_v23 }
 0xf81   : > { %12363 = vmatpush1.bf16.msra.mxu1 %v12338_v36 }
 0xf82   : > { %12365 = vmatprep.subr.bf16.mxu1 %v12364_v50 }
 0xf84   : > { %11461 = vmatmul.mubr.f32.vlgmr.msra.gmra.mrb[76].mxu1 %v11175_v52 }
 0xf85   : > { %12367 = vmatpush1.bf16.msra.mxu1 %v12366_v63  ;;  %11555 = vmatprep.mubr.f32.mxu1 %v18267_v46 }
 0xf86   : > { %12369 = vmatprep.subr.bf16.mxu1 %v12368_v47 }
 0xf89   : > { %12371 = vmatpush1.bf16.msra.mxu1 %v12370_v11 }
 0xf8a   : > { %12373 = vmatprep.subr.bf16.mxu1 %v17440_v57 }
 0xf8c   : > { %11557 = vmatmul.mubr.f32.vlgmr.msra.gmra.mrb[76].mxu1 %v17432_v2 }
 0xf8d   : > { %12375 = vmatpush1.bf16.msra.mxu1 %v17436_v10  ;;  %11635 = vmatprep.mubr.f32.mxu1 %v18267_v46 }
 0xf8e   : > { %12377 = vmatprep.subr.bf16.mxu1 %v12336_v23 }
 0xf91   : > { %12379 = vmatpush1.bf16.msra.mxu1 %v12338_v36 }
 0xf94   : > { %11637 = vmatmul.mubr.f32.vlgmr.msra.gmra.mrb[76].mxu1 %v17432_v2 }
0x1067   : > { %v11638_v21 = vpop.f32.mrb[76].mxu1 }
0x1068   : > { %v11650_v60 = vadd.f32 %v11648_v31, %v11638_v21  ;;  %v11640_v49 = vpop.f32.mrb[77].mxu1 }
0x1069   : > { %v11651_v59 = vadd.f32 %v11648_v31, %v11640_v49 }
0x106a   : > { %v11652_v53 = vsel %vm446_vm1, %v11650_v60, 0.0 }
0x106b   : > { %v11653_v29 = vsel %vm446_vm1, %v11651_v59, 0.0 }
0x106c   : > { %v11654_v57 = vadd.f32 %v11653_v29, %v11652_v53 }
0x106e   : > { %11655 = vadd.xlane.f32.xlu0 %v11654_v57 }
0x10fb   : > { %v11656_v13 = vpop.xlane.xlu0 %11655 }
0x10fc   : > { %v11657_v1 = vrot.slane %v11656_v13, 4 }
0x10fe   : > { %v11658_v10 = vadd.f32 %v11657_v1, %v11656_v13 }
0x1100   : > { %v11659_v51 = vrot.slane %v11658_v10, 2 }
0x1102   : > { %v11660_v46 = vadd.f32 %v11659_v51, %v11658_v10 }
0x1104   : > { %v11661_v41 = vrot.slane %v11660_v46, 1 }
0x1106   : > { %v11662_v56 = vadd.f32 %v11661_v41, %v11660_v46 }
0x1108   : > { %13228 = vpush %v11662_v56 }
0x1139   : > { %s13229_s16 = spop %13228 }
0x113a   : > { %s11666_s17 = smul.f32 0.0009765625, %s13229_s16 }
0x113c   : > { %v11667_v2 = vstv %s11666_s17 }
0x113d   : > { %v11668_v6 = vsub.f32 %v11650_v60, %v11667_v2  ;;  %v11669_v35 = vsub.f32 %v11651_v59, %v11667_v2 }
0x113f   : > { %v11670_v24 = vmul.f32 %v11668_v6, %v11668_v6  ;;  %v11671_v62 = vmul.f32 %v11669_v35, %v11669_v35 }
0x1141   : > { %v11672_v42 = vsel %vm446_vm1, %v11670_v24, 0.0  ;;  %v11673_v28 = vsel %vm446_vm1, %v11671_v62, 0.0 }
0x1142   : > { %v11674_v38 = vadd.f32 %v11673_v28, %v11672_v42 }
0x1144   : > { %11675 = vadd.xlane.f32.xlu1 %v11674_v38 }
0x11d1   : > { %v11676_v4 = vpop.xlane.xlu1 %11675 }
0x11d2   : > { %v11677_v44 = vrot.slane %v11676_v4, 4 }
0x11d4   : > { %v11678_v63 = vadd.f32 %v11677_v44, %v11676_v4 }
0x11d6   : > { %v11679_v54 = vrot.slane %v11678_v63, 2 }
0x11d8   : > { %v11680_v22 = vadd.f32 %v11679_v54, %v11678_v63 }
0x11da   : > { %v11681_v52 = vrot.slane %v11680_v22, 1 }
0x11dc   : > { %v11682_v48 = vadd.f32 %v11681_v52, %v11680_v22 }
0x11de   : > { %13230 = vpush %v11682_v48 }
0x120f   : > { %s13231_s18 = spop %13230 }
0x1210   : > { %s11686_s19 = smul.f32 0.0009765625, %s13231_s18  ;;  %s17489_s18 = scalar_lea.hbm %s17537_s6, %s11803_s13 }
0x1212   : > { %s11687_s20 = sadd.f32 1e-05, %s11686_s19  ;;  %s11717_s19 = scalar_lea.sflag [#allocation3], %s242_s11 }
0x1214   : > { %v11688_v50 = vstv %s11687_s20  ;;  %s13461_s20 = scalar_lea.vmem %s17491_s15, 128 }
0x1215   : > { %13457 = vrsqrt.f32 %v11688_v50  ;;  %p13462_p11 = scmp.ne.s32.totalorder %s17491_s15, %s13461_s20  ;;  %p13469_p1 = scmp.lt.s32.totalorder %s13467_s28, %s13461_s20 }
0x1217   : > { %p13463_p12 = pnand %p13462_p11, %p13604_p5  ;;  %p13470_p2 = por %p13469_p1, %p13468_p0 }
0x1219   : > { %p13464_p13 = pneg %p13463_p12 }
0x121b   : > { %p13471_p3 = pnand %p13470_p2, %p13464_p13 }
0x121f   : > { %v13458_v33 = vpop.eup %13457 }
0x1220   : > { %13232 = vpush %v13458_v33 }
0x1251   : > { %s13233_s29 = spop %13232 }
0x1252   : > { %v11693_v37 = vstv %s13233_s29 }
0x1253   : > { %v11694_v25 = vmul.f32 %v11693_v37, %v11691_v27 }
0x1255   : > { %v11695_v20 = vmul.f32 %v11694_v25, %v11667_v2  ;;  %11699 = vperm.xlu0 %13279, %v11694_v25  }
0x1257   : > { %v11696_v9 = vsub.f32 %v11692_v55, %v11695_v20 }
0x1259   : > { %11706 = vperm.xlu1 %13278, %v11696_v9  }
0x12d4   : > { %v11700_v5 = vpop.permute.xlu0 %11699 }
0x12d5   : > { %v11702_v12 = vmul.f32 %v11700_v5, %v11650_v60  ;;  %v11703_v36 = vmul.f32 %v11700_v5, %v11651_v59 }
0x12d8   : > { %v11707_v17 = vpop.permute.xlu1 %11706 }
0x12d9   : > { %v11709_v34 = vadd.f32 %v11707_v17, %v11702_v12  ;;  %v11710_v0 = vadd.f32 %v11707_v17, %v11703_v36 }
0x12db   : > { %v11713_v23 = vcombine.low %v11709_v34, %v11710_v0 }
0x12dd   : > { %11715 = vst [vmem:[%s244_s14] sm:$0xff] %v11713_v23 }
0x12de   : > { %13474 = shalt.err (!%p13471_p3)
}
0x12df   : > { %s13475_s29 = scalar_lea.hbm %s17489_s18, 128  ;;  %s13479_s11 = scalar_lea.hbm %s17537_s6, 256 }
0x12e0   : > { %p13476_p4 = scmp.ne.s32.totalorder %s17489_s18, %s13475_s29  ;;  %p13480_p9 = scmp.lt.u32.totalorder %s17489_s18, %s17537_s6 }
0x12e1   : > { %p13481_p10 = scmp.lt.u32.totalorder %s13479_s11, %s13475_s29  ;;  %p13483_p12 = scmp.lt.u32.totalorder %s13475_s29, %s17489_s18 }
0x12e2   : > { %p13477_p7 = pnand %p13476_p4, %p13604_p5 }
0x12e3   : > { %p13482_p11 = por %p13481_p10, %p13480_p9 }
0x12e4   : > { %p13478_p8 = pneg %p13477_p7 }
0x12e5   : > { %p13484_p13 = por %p13483_p12, %p13482_p11 }
0x12e7   : > { %p13485_p0 = pnand %p13484_p13, %p13478_p8 }
0x12e9   : > { %13488 = shalt.err (!%p13485_p0)
}
0x12ea   : > { %13234 = dma.vmem_to_hbm [thread:$0]  (%p13604_p5), %s17491_s15, 128, %s17489_s18, %s11717_s19  }
0x12eb PF: > { %p13240_p1 = scmp.ge.s32.totalorder %s13523_s24, 2  ;;  %s11743_s14 = sand.u32 1, %s13511_s21  }
0x12ec   : > { %s11744_s16 = scalar_lea.sflag [#allocation3], %s11743_s14 }
0x12ed   : > { %p13237_p2 = pnand %p13240_p1, %p13608_p6 }
0x12ef   : > { %13506 = dma.done.wait (!%p13237_p2), %s11744_s16, 128  }
0x12f0   : > { %13508 = vsyncadd (!%p13237_p2), %s11744_s16, 4294967168  ;;  %p16_p3 = scmp.ge.s32.totalorder %s13591_s27, 4   ;;  %s18465_s21 = smov %s13515_s22 }
0x12f1   : > { %s18466_s22 = smov %s13519_s23  ;;  %s18467_s23 = smov %s13602_s30 }
0x12f2   : > { %s18468_s24 = smov %s13591_s27  ;;  %18 = sbr.rel (!%p16_p3) target bundleno = 3 (0x3), region = 79 }
0x12f9   :  { %11749 = vsyncpa [#allocation3], 1 }
0x12fa   :  { %11751 = vsyncpa [#allocation3 + $0x1], 1 }

</bundles_post_ra>
